<compile_context>
chip_gen: v6e
topology: v6e:2x2x1
jax: 0.10.0
libtpu: 0.0.40
codegen_flags: <defaults>
</compile_context>

<pallas_src>
import functools
import math

import jax
import jax.numpy as jnp
from jax.experimental import pallas as pl
from jax.experimental.pallas import tpu as pltpu


def _round_up(x, m):
    return ((x + m - 1) // m) * m


# ---------------------------------------------------------------------------
# Pallas kernel 1: matmul (conv-as-GEMM) with fused per-channel sum / sumsq
# ---------------------------------------------------------------------------
def _conv_mm_stats_kernel(a_ref, b_ref, o_ref, sum_ref, sq_ref,
                          acc_ref, ssum_ref, ssq_ref):
    """grid = (j: Cout tiles [parallel], i: M tiles [arbitrary], k [arbitrary]).

    o = a @ b (bf16 in, f32 accumulate, bf16 out); additionally accumulates
    column sum and sum-of-squares of the f32 result across all M tiles and
    writes them once per j tile (block index constant over i and k).
    """
    i = pl.program_id(1)
    k = pl.program_id(2)
    ni = pl.num_programs(1)
    nk = pl.num_programs(2)

    @pl.when(k == 0)
    def _():
        acc_ref[...] = jnp.zeros_like(acc_ref)

    @pl.when(jnp.logical_and(i == 0, k == 0))
    def _():
        ssum_ref[...] = jnp.zeros_like(ssum_ref)
        ssq_ref[...] = jnp.zeros_like(ssq_ref)

    acc_ref[...] += jnp.dot(a_ref[...], b_ref[...],
                            preferred_element_type=jnp.float32)

    @pl.when(k == nk - 1)
    def _():
        y = acc_ref[...]
        o_ref[...] = y.astype(o_ref.dtype)
        ssum_ref[...] += jnp.sum(y, axis=0, keepdims=True)
        ssq_ref[...] += jnp.sum(y * y, axis=0, keepdims=True)

    @pl.when(jnp.logical_and(i == ni - 1, k == nk - 1))
    def _():
        sum_ref[...] = ssum_ref[...]
        sq_ref[...] = ssq_ref[...]


def conv_matmul_stats(patches, w2):
    """patches: (M, K), w2: (K, Cout).

    Returns (out_padded (Mp, Cout) bf16, col_sum (Cout,) f32,
             col_sumsq (Cout,) f32, Mp).
    Padded rows/columns are zero, so the statistics over the real M rows are
    exact (the conv bias is dropped and cancelled by BatchNorm anyway).
    """
    M, K = patches.shape
    K2, Cout = w2.shape
    assert K == K2
    assert Cout % 128 == 0, "Cout must be a multiple of 128 (module uses 128..1024)"

    # M tile: up to 256 rows (MXU-friendly on v6e/v7x); pad M up to a multiple.
    tm = min(256, _round_up(max(M, 8), 8))
    Mp = _round_up(M, tm)
    # K tile: cap at 1024 (keeps double-buffered blocks small on v5e/v7x).
    Kp = _round_up(K, 128)
    tk = min(1024, Kp)
    while Kp % tk:
        tk //= 2                      # Kp is a multiple of 128 -> terminates >=128
    # N tile: 256 where possible -> >=2 parallel blocks for conv2-4 (v7x megacore).
    tn = min(256, Cout)

    a = patches.astype(jnp.bfloat16)
    if Mp != M or Kp != K:
        a = jnp.pad(a, ((0, Mp - M), (0, Kp - K)))
    b = w2.astype(jnp.bfloat16)
    if Kp != K:
        b = jnp.pad(b, ((0, Kp - K), (0, 0)))

    grid = (Cout // tn, Mp // tm, Kp // tk)

    out, s1, s2 = pl.pallas_call(
        _conv_mm_stats_kernel,
        out_shape=(
            jax.ShapeDtypeStruct((Mp, Cout), jnp.bfloat16),
            jax.ShapeDtypeStruct((1, Cout), jnp.float32),
            jax.ShapeDtypeStruct((1, Cout), jnp.float32),
        ),
        grid_spec=pltpu.PrefetchScalarGridSpec(
            num_scalar_prefetch=0,
            grid=grid,
            in_specs=[
                pl.BlockSpec((tm, tk), lambda j, i, k: (i, k)),
                pl.BlockSpec((tk, tn), lambda j, i, k: (k, j)),
            ],
            out_specs=[
                pl.BlockSpec((tm, tn), lambda j, i, k: (i, j)),
                pl.BlockSpec((1, tn), lambda j, i, k: (0, j)),
                pl.BlockSpec((1, tn), lambda j, i, k: (0, j)),
            ],
            scratch_shapes=[
                pltpu.VMEM((tm, tn), jnp.float32),
                pltpu.VMEM((1, tn), jnp.float32),
                pltpu.VMEM((1, tn), jnp.float32),
            ],
        ),
        compiler_params=pltpu.CompilerParams(
            # stats accumulate over the M axis -> it must be "arbitrary";
            # the Cout axis carries the v7x megacore parallelism.
            dimension_semantics=("parallel", "arbitrary", "arbitrary"),
            vmem_limit_bytes=32 * 1024 * 1024,
        ),
    )(a, b)
    return out, s1.reshape(Cout), s2.reshape(Cout), Mp


# ---------------------------------------------------------------------------
# Pallas kernel 2: fused BatchNorm(batch stats) + LeakyReLU(0.2), tiled over M
# ---------------------------------------------------------------------------
def _bn_lrelu_kernel(x_ref, scale_ref, shift_ref, o_ref):
    y = x_ref[...].astype(jnp.float32) * scale_ref[...] + shift_ref[...]
    o_ref[...] = jnp.where(y >= 0.0, y, 0.2 * y).astype(o_ref.dtype)


def bn_leakyrelu(x_padded, col_sum, col_sumsq, m_real, gamma, beta,
                 eps=1e-5, out_dtype=jnp.bfloat16):
    """x_padded: (Mp, C). Stats are over the m_real valid rows (one-pass)."""
    Mp, C = x_padded.shape
    mean = col_sum / float(m_real)
    var = jnp.maximum(col_sumsq / float(m_real) - mean * mean, 0.0)  # biased var
    inv = jax.lax.rsqrt(var + eps)
    scale = (gamma * inv).reshape(1, C).astype(jnp.float32)
    shift = (beta - mean * gamma * inv).reshape(1, C).astype(jnp.float32)

    rows = math.gcd(Mp, 512)          # divides Mp, multiple of 8, <= 512 rows/tile

    return pl.pallas_call(
        _bn_lrelu_kernel,
        out_shape=jax.ShapeDtypeStruct((Mp, C), out_dtype),
        grid_spec=pltpu.PrefetchScalarGridSpec(
            num_scalar_prefetch=0,
            grid=(Mp // rows,),
            in_specs=[
                pl.BlockSpec((rows, C), lambda i: (i, 0)),
                pl.BlockSpec((1, C), lambda i: (0, 0)),
                pl.BlockSpec((1, C), lambda i: (0, 0)),
            ],
            out_specs=pl.BlockSpec((rows, C), lambda i: (i, 0)),
        ),
        compiler_params=pltpu.CompilerParams(
            dimension_semantics=("parallel",),
            vmem_limit_bytes=32 * 1024 * 1024,
        ),
    )(x_padded, scale, shift)


# ---------------------------------------------------------------------------
# Conv-as-matmul glue
# ---------------------------------------------------------------------------
def conv_im2col(x_nhwc, k=4, s=2, p=1):
    # TODO(synk): patch extraction is materialized in HBM (bf16); a fully lazy
    # in-kernel tap-by-tap DMA would cut A-operand traffic a further ~4x.
    N, H, W, C = x_nhwc.shape
    xp = jnp.pad(x_nhwc, ((0, 0), (p, p), (p, p), (0, 0)))
    OH = (H + 2 * p - k) // s + 1
    OW = (W + 2 * p - k) // s + 1
    cols = [xp[:, di:di + s * OH:s, dj:dj + s * OW:s, :]
            for di in range(k) for dj in range(k)]
    patches = jnp.concatenate(cols, axis=-1)              # (N, OH, OW, k*k*C)
    return patches.reshape(N * OH * OW, k * k * C), OH, OW


def conv_block(x_nhwc, w, gamma, beta):
    """Conv2d(k=4,s=2,p=1) + BatchNorm2d (batch stats) + LeakyReLU(0.2).

    The conv bias is intentionally dropped: training-mode BatchNorm subtracts
    the per-channel batch mean, which cancels a constant per-channel bias
    exactly (zero numerical change, one less DMA + add per tile).
    """
    Cout, Cin, kh, kw = w.shape
    N = x_nhwc.shape[0]
    patches, OH, OW = conv_im2col(x_nhwc, k=kh, s=2, p=1)
    # torch weight (Cout, Cin, kh, kw) -> (kh*kw*Cin, Cout) matching patch order
    w2 = jnp.transpose(w, (2, 3, 1, 0)).reshape(kh * kw * Cin, Cout)
    out_p, col_sum, col_sq, _mp = conv_matmul_stats(patches, w2)
    M = N * OH * OW
    act = bn_leakyrelu(out_p, col_sum, col_sq, M, gamma, beta)
    return act[:M].reshape(N, OH, OW, Cout)


# ---------------------------------------------------------------------------
# Full forward pass
# ---------------------------------------------------------------------------
def critic_forward(x_nchw, params, dropout=0.0, intermediate_output=False,
                   rng=None):
    x = jnp.transpose(x_nchw, (0, 2, 3, 1)).astype(jnp.bfloat16)  # NCHW -> NHWC

    if dropout > 0.0:
        if rng is None:
            rng = jax.random.PRNGKey(0)
        drop_keys = list(jax.random.split(rng, 4))

    def _dropout(h, idx):
        if dropout <= 0.0:
            return h
        keep = 1.0 - dropout
        mask = jax.random.bernoulli(drop_keys[idx], keep, h.shape)
        return (jnp.where(mask, h, 0) / keep).astype(h.dtype)

    # block1..block3, each followed by dropout (matches the reference forward)
    for idx, name in enumerate(("conv1", "conv2", "conv3")):
        w, _b, g, bt = params[name]
        x = conv_block(x, w, g, bt)
        x = _dropout(x, idx)

    # block4: conv + BN + LeakyReLU + MaxPool2d(2), then dropout
    w, _b, g, bt = params["conv4"]
    x = conv_block(x, w, g, bt)
    N, H, W, C = x.shape
    x = x.reshape(N, H // 2, 2, W // 2, 2, C).max(axis=(2, 4))
    x = _dropout(x, 3)

    # x.view(N, 1024, -1).mean(dim=2) == per-channel spatial mean
    feat = x.reshape(N, -1, C).mean(axis=1).astype(jnp.float32)      # (N, 1024)

    # Final 1024 -> 1 linear head: tiny GEMV, plain JAX (1-lane-wide output
    # would waste a whole pallas_call + masked stores).
    wl, bl = params["linear"]
    out = feat @ wl.astype(jnp.float32).T + bl.astype(jnp.float32)   # (N, 1)
    if intermediate_output:
        return out, feat
    return out


# ---------------------------------------------------------------------------
# Deterministic parameter initialization (shapes match the PyTorch __init__)
# ---------------------------------------------------------------------------
def init_params(key, in_channels):
    keys = jax.random.split(key, 5)

    def conv_p(k, cin, cout):
        w = jax.random.normal(k, (cout, cin, 4, 4), jnp.float32) * 0.02
        b = jnp.zeros((cout,), jnp.float32)        # kept for parity; cancelled by BN
        gamma = jnp.ones((cout,), jnp.float32)
        beta = jnp.zeros((cout,), jnp.float32)
        return (w, b, gamma, beta)

    return {
        "conv1": conv_p(keys[0], in_channels, 128),
        "conv2": conv_p(keys[1], 128, 256),
        "conv3": conv_p(keys[2], 256, 512),
        "conv4": conv_p(keys[3], 512, 1024),
        "linear": (jax.random.normal(keys[4], (1, 1024), jnp.float32) * 0.02,
                   jnp.zeros((1,), jnp.float32)),
    }


if __name__ == "__main__":
    key = jax.random.PRNGKey(0)
    kx, kp = jax.random.split(key)
    in_channels = 3
    # Architecture needs >=32 spatial: 32 -> 16 -> 8 -> 4 -> 2 (convs) -> 1 (pool)
    x = jax.random.normal(kx, (2, in_channels, 32, 32), jnp.float32)
    params = init_params(kp, in_channels)

    fwd = jax.jit(functools.partial(critic_forward, intermediate_output=True))
    out, feat = fwd(x, params)
    out = jax.block_until_ready(out)

    assert out.shape == (2, 1), out.shape
    assert feat.shape == (2, 1024), feat.shape
    assert bool(jnp.all(jnp.isfinite(out)))
    print("KERNEL_OK")
</pallas_src>

<mosaic_0001>
module attributes {stable_mosaic.version = 11 : i64} {
  func.func @_conv_mm_stats_kernel(%arg0: i32, %arg1: i32, %arg2: i32, %arg3: memref<256x128xbf16, #tpu.memory_space<vmem>>, %arg4: memref<128x128xbf16, #tpu.memory_space<vmem>>, %arg5: memref<256x128xbf16, #tpu.memory_space<vmem>>, %arg6: memref<1x128xf32, #tpu.memory_space<vmem>>, %arg7: memref<1x128xf32, #tpu.memory_space<vmem>>, %arg8: memref<256x128xf32, #tpu.memory_space<vmem>>, %arg9: memref<1x128xf32, #tpu.memory_space<vmem>>, %arg10: memref<1x128xf32, #tpu.memory_space<vmem>>) attributes {dimension_semantics = [#tpu.dimension_semantics<parallel>, #tpu.dimension_semantics<arbitrary>, #tpu.dimension_semantics<arbitrary>], iteration_bounds = array<i64: 1, 2, 1>, scalar_prefetch = 0 : i64, scratch_operands = 3 : i64, tpu.core_type = #tpu.core_type<tc>, window_params = [{transform_indices = @transform_0, window_bounds = array<i64: 256, 128>}, {transform_indices = @transform_1, window_bounds = array<i64: 128, 128>}, {transform_indices = @transform_2, window_bounds = array<i64: 256, 128>}, {transform_indices = @transform_3, window_bounds = array<i64: 1, 128>}, {transform_indices = @transform_4, window_bounds = array<i64: 1, 128>}]} {
    %c0_i32 = arith.constant 0 : i32
    %0 = arith.cmpi eq, %arg2, %c0_i32 : i32
    %1 = arith.extui %0 : i1 to i32
    %c0_i32_0 = arith.constant 0 : i32
    %2 = arith.cmpi ne, %1, %c0_i32_0 : i32
    scf.if %2 {
      %cst_15 = arith.constant 0.000000e+00 : f32
      %22 = vector.broadcast %cst_15 : f32 to vector<256x128xf32>
      %c0_16 = arith.constant 0 : index
      %c0_17 = arith.constant 0 : index
      %23 = vector.load %arg8[%c0_16, %c0_17] : memref<256x128xf32, #tpu.memory_space<vmem>>, vector<256x128xf32>
      tpu.vector_store %arg8[%c0_16, %c0_17], %22 {strides = array<i32>} : memref<256x128xf32, #tpu.memory_space<vmem>>, vector<256x128xf32>,
    } else {
    }
    %c0_i32_1 = arith.constant 0 : i32
    %3 = arith.cmpi eq, %arg1, %c0_i32_1 : i32
    %c0_i32_2 = arith.constant 0 : i32
    %4 = arith.cmpi eq, %arg2, %c0_i32_2 : i32
    %5 = arith.andi %3, %4 : i1
    %6 = arith.extui %5 : i1 to i32
    %c0_i32_3 = arith.constant 0 : i32
    %7 = arith.cmpi ne, %6, %c0_i32_3 : i32
    scf.if %7 {
      %cst_15 = arith.constant 0.000000e+00 : f32
      %22 = vector.broadcast %cst_15 : f32 to vector<1x128xf32>
      %c0_16 = arith.constant 0 : index
      %c0_17 = arith.constant 0 : index
      %23 = vector.load %arg9[%c0_16, %c0_17] : memref<1x128xf32, #tpu.memory_space<vmem>>, vector<1x128xf32>
      tpu.vector_store %arg9[%c0_16, %c0_17], %22 {strides = array<i32>} : memref<1x128xf32, #tpu.memory_space<vmem>>, vector<1x128xf32>,
      %cst_18 = arith.constant 0.000000e+00 : f32
      %24 = vector.broadcast %cst_18 : f32 to vector<1x128xf32>
      %c0_19 = arith.constant 0 : index
      %c0_20 = arith.constant 0 : index
      %25 = vector.load %arg10[%c0_19, %c0_20] : memref<1x128xf32, #tpu.memory_space<vmem>>, vector<1x128xf32>
      tpu.vector_store %arg10[%c0_19, %c0_20], %24 {strides = array<i32>} : memref<1x128xf32, #tpu.memory_space<vmem>>, vector<1x128xf32>,
    } else {
    }
    %c0 = arith.constant 0 : index
    %c0_4 = arith.constant 0 : index
    %8 = vector.load %arg8[%c0, %c0_4] : memref<256x128xf32, #tpu.memory_space<vmem>>, vector<256x128xf32>
    %c0_5 = arith.constant 0 : index
    %c0_6 = arith.constant 0 : index
    %9 = vector.load %arg3[%c0_5, %c0_6] : memref<256x128xbf16, #tpu.memory_space<vmem>>, vector<256x128xbf16>
    %c0_7 = arith.constant 0 : index
    %c0_8 = arith.constant 0 : index
    %10 = vector.load %arg4[%c0_7, %c0_8] : memref<128x128xbf16, #tpu.memory_space<vmem>>, vector<128x128xbf16>
    %cst = arith.constant dense<0.000000e+00> : vector<256x128xf32>
    %11 = tpu.matmul %9, %10, %cst {dimension_numbers = #tpu.dot_dimension_numbers<[1], [0], [0], [1], [0, 0, 1, 1], [], []>} : vector<256x128xbf16>, vector<128x128xbf16>, vector<256x128xf32> -> vector<256x128xf32>
    %12 = arith.addf %8, %11 : vector<256x128xf32>
    %c0_9 = arith.constant 0 : index
    %c0_10 = arith.constant 0 : index
    %13 = vector.load %arg8[%c0_9, %c0_10] : memref<256x128xf32, #tpu.memory_space<vmem>>, vector<256x128xf32>
    tpu.vector_store %arg8[%c0_9, %c0_10], %12 {strides = array<i32>} : memref<256x128xf32, #tpu.memory_space<vmem>>, vector<256x128xf32>,
    %c0_i32_11 = arith.constant 0 : i32
    %14 = arith.cmpi eq, %arg2, %c0_i32_11 : i32
    %15 = arith.extui %14 : i1 to i32
    %c0_i32_12 = arith.constant 0 : i32
    %16 = arith.cmpi ne, %15, %c0_i32_12 : i32
    scf.if %16 {
      %c0_15 = arith.constant 0 : index
      %c0_16 = arith.constant 0 : index
      %22 = vector.load %arg8[%c0_15, %c0_16] : memref<256x128xf32, #tpu.memory_space<vmem>>, vector<256x128xf32>
      %23 = arith.truncf %22 : vector<256x128xf32> to vector<256x128xbf16>
      %c0_17 = arith.constant 0 : index
      %c0_18 = arith.constant 0 : index
      %24 = vector.load %arg5[%c0_17, %c0_18] : memref<256x128xbf16, #tpu.memory_space<vmem>>, vector<256x128xbf16>
      tpu.vector_store %arg5[%c0_17, %c0_18], %23 {strides = array<i32>} : memref<256x128xbf16, #tpu.memory_space<vmem>>, vector<256x128xbf16>,
      %c0_19 = arith.constant 0 : index
      %c0_20 = arith.constant 0 : index
      %25 = vector.load %arg9[%c0_19, %c0_20] : memref<1x128xf32, #tpu.memory_space<vmem>>, vector<1x128xf32>
      %cst_21 = arith.constant dense<0.000000e+00> : vector<128xf32>
      %26 = vector.multi_reduction <add>, %22, %cst_21 [0] : vector<256x128xf32> to vector<128xf32>
      %27 = vector.shape_cast %26 : vector<128xf32> to vector<1x128xf32>
      %28 = arith.addf %25, %27 : vector<1x128xf32>
      %c0_22 = arith.constant 0 : index
      %c0_23 = arith.constant 0 : index
      %29 = vector.load %arg9[%c0_22, %c0_23] : memref<1x128xf32, #tpu.memory_space<vmem>>, vector<1x128xf32>
      tpu.vector_store %arg9[%c0_22, %c0_23], %28 {strides = array<i32>} : memref<1x128xf32, #tpu.memory_space<vmem>>, vector<1x128xf32>,
      %c0_24 = arith.constant 0 : index
      %c0_25 = arith.constant 0 : index
      %30 = vector.load %arg10[%c0_24, %c0_25] : memref<1x128xf32, #tpu.memory_space<vmem>>, vector<1x128xf32>
      %31 = arith.mulf %22, %22 : vector<256x128xf32>
      %cst_26 = arith.constant dense<0.000000e+00> : vector<128xf32>
      %32 = vector.multi_reduction <add>, %31, %cst_26 [0] : vector<256x128xf32> to vector<128xf32>
      %33 = vector.shape_cast %32 : vector<128xf32> to vector<1x128xf32>
      %34 = arith.addf %30, %33 : vector<1x128xf32>
      %c0_27 = arith.constant 0 : index
      %c0_28 = arith.constant 0 : index
      %35 = vector.load %arg10[%c0_27, %c0_28] : memref<1x128xf32, #tpu.memory_space<vmem>>, vector<1x128xf32>
      tpu.vector_store %arg10[%c0_27, %c0_28], %34 {strides = array<i32>} : memref<1x128xf32, #tpu.memory_space<vmem>>, vector<1x128xf32>,
    } else {
    }
    %c1_i32 = arith.constant 1 : i32
    %17 = arith.cmpi eq, %arg1, %c1_i32 : i32
    %c0_i32_13 = arith.constant 0 : i32
    %18 = arith.cmpi eq, %arg2, %c0_i32_13 : i32
    %19 = arith.andi %17, %18 : i1
    %20 = arith.extui %19 : i1 to i32
    %c0_i32_14 = arith.constant 0 : i32
    %21 = arith.cmpi ne, %20, %c0_i32_14 : i32
    scf.if %21 {
      %c0_15 = arith.constant 0 : index
      %c0_16 = arith.constant 0 : index
      %22 = vector.load %arg9[%c0_15, %c0_16] : memref<1x128xf32, #tpu.memory_space<vmem>>, vector<1x128xf32>
      %c0_17 = arith.constant 0 : index
      %c0_18 = arith.constant 0 : index
      %23 = vector.load %arg6[%c0_17, %c0_18] : memref<1x128xf32, #tpu.memory_space<vmem>>, vector<1x128xf32>
      tpu.vector_store %arg6[%c0_17, %c0_18], %22 {strides = array<i32>} : memref<1x128xf32, #tpu.memory_space<vmem>>, vector<1x128xf32>,
      %c0_19 = arith.constant 0 : index
      %c0_20 = arith.constant 0 : index
      %24 = vector.load %arg10[%c0_19, %c0_20] : memref<1x128xf32, #tpu.memory_space<vmem>>, vector<1x128xf32>
      %c0_21 = arith.constant 0 : index
      %c0_22 = arith.constant 0 : index
      %25 = vector.load %arg7[%c0_21, %c0_22] : memref<1x128xf32, #tpu.memory_space<vmem>>, vector<1x128xf32>
      tpu.vector_store %arg7[%c0_21, %c0_22], %24 {strides = array<i32>} : memref<1x128xf32, #tpu.memory_space<vmem>>, vector<1x128xf32>,
    } else {
    }
    return
  }
  func.func @transform_0(%arg0: i32, %arg1: i32, %arg2: i32) -> (i32, i32) {
    %c0_i32 = arith.constant 0 : i32
    return %arg1, %arg2 : i32, i32
  }
  func.func @transform_1(%arg0: i32, %arg1: i32, %arg2: i32) -> (i32, i32) {
    %c0_i32 = arith.constant 0 : i32
    return %arg2, %arg0 : i32, i32
  }
  func.func @transform_2(%arg0: i32, %arg1: i32, %arg2: i32) -> (i32, i32) {
    %c0_i32 = arith.constant 0 : i32
    return %arg1, %arg0 : i32, i32
  }
  func.func @transform_3(%arg0: i32, %arg1: i32, %arg2: i32) -> (i32, i32) {
    %c0_i32 = arith.constant 0 : i32
    %c0_i32_0 = arith.constant 0 : i32
    return %c0_i32, %arg0 : i32, i32
  }
  func.func @transform_4(%arg0: i32, %arg1: i32, %arg2: i32) -> (i32, i32) {
    %c0_i32 = arith.constant 0 : i32
    %c0_i32_0 = arith.constant 0 : i32
    return %c0_i32, %arg0 : i32, i32
  }
}

module attributes {stable_mosaic.version = 11 : i64} {
  func.func @_bn_lrelu_kernel(%arg0: i32, %arg1: memref<512x128xbf16, #tpu.memory_space<vmem>>, %arg2: memref<1x128xf32, #tpu.memory_space<vmem>>, %arg3: memref<1x128xf32, #tpu.memory_space<vmem>>, %arg4: memref<512x128xbf16, #tpu.memory_space<vmem>>) attributes {dimension_semantics = [#tpu.dimension_semantics<parallel>], iteration_bounds = array<i64: 1>, scalar_prefetch = 0 : i64, scratch_operands = 0 : i64, tpu.core_type = #tpu.core_type<tc>, window_params = [{transform_indices = @transform_0, window_bounds = array<i64: 512, 128>}, {pipeline_mode = #tpu.pipeline_mode<synchronous>, transform_indices = @transform_1, window_bounds = array<i64: 1, 128>}, {pipeline_mode = #tpu.pipeline_mode<synchronous>, transform_indices = @transform_2, window_bounds = array<i64: 1, 128>}, {transform_indices = @transform_3, window_bounds = array<i64: 512, 128>}]} {
    %c0 = arith.constant 0 : index
    %c0_0 = arith.constant 0 : index
    %0 = vector.load %arg1[%c0, %c0_0] : memref<512x128xbf16, #tpu.memory_space<vmem>>, vector<512x128xbf16>
    %1 = arith.extf %0 : vector<512x128xbf16> to vector<512x128xf32>
    %c0_1 = arith.constant 0 : index
    %c0_2 = arith.constant 0 : index
    %2 = vector.load %arg2[%c0_1, %c0_2] : memref<1x128xf32, #tpu.memory_space<vmem>>, vector<1x128xf32>
    %3 = vector.broadcast %2 : vector<1x128xf32> to vector<512x128xf32>
    %4 = arith.mulf %1, %3 : vector<512x128xf32>
    %c0_3 = arith.constant 0 : index
    %c0_4 = arith.constant 0 : index
    %5 = vector.load %arg3[%c0_3, %c0_4] : memref<1x128xf32, #tpu.memory_space<vmem>>, vector<1x128xf32>
    %6 = vector.broadcast %5 : vector<1x128xf32> to vector<512x128xf32>
    %7 = arith.addf %4, %6 : vector<512x128xf32>
    %cst = arith.constant 0.000000e+00 : f32
    %8 = vector.broadcast %cst : f32 to vector<512x128xf32>
    %9 = arith.cmpf oge, %7, %8 : vector<512x128xf32>
    %cst_5 = arith.constant 2.000000e-01 : f32
    %10 = vector.broadcast %cst_5 : f32 to vector<512x128xf32>
    %11 = arith.mulf %10, %7 : vector<512x128xf32>
    %12 = arith.select %9, %7, %11 : vector<512x128xi1>, vector<512x128xf32>
    %13 = arith.truncf %12 : vector<512x128xf32> to vector<512x128xbf16>
    %c0_6 = arith.constant 0 : index
    %c0_7 = arith.constant 0 : index
    %14 = vector.load %arg4[%c0_6, %c0_7] : memref<512x128xbf16, #tpu.memory_space<vmem>>, vector<512x128xbf16>
    tpu.vector_store %arg4[%c0_6, %c0_7], %13 {strides = array<i32>} : memref<512x128xbf16, #tpu.memory_space<vmem>>, vector<512x128xbf16>,
    return
  }
  func.func @transform_0(%arg0: i32) -> (i32, i32) {
    %c0_i32 = arith.constant 0 : i32
    %c0_i32_0 = arith.constant 0 : i32
    return %arg0, %c0_i32 : i32, i32
  }
  func.func @transform_1(%arg0: i32) -> (i32, i32) {
    %c0_i32 = arith.constant 0 : i32
    %c0_i32_0 = arith.constant 0 : i32
    %c0_i32_1 = arith.constant 0 : i32
    return %c0_i32, %c0_i32_0 : i32, i32
  }
  func.func @transform_2(%arg0: i32) -> (i32, i32) {
    %c0_i32 = arith.constant 0 : i32
    %c0_i32_0 = arith.constant 0 : i32
    %c0_i32_1 = arith.constant 0 : i32
    return %c0_i32, %c0_i32_0 : i32, i32
  }
  func.func @transform_3(%arg0: i32) -> (i32, i32) {
    %c0_i32 = arith.constant 0 : i32
    %c0_i32_0 = arith.constant 0 : i32
    return %arg0, %c0_i32 : i32, i32
  }
}

module attributes {stable_mosaic.version = 11 : i64} {
  func.func @_conv_mm_stats_kernel(%arg0: i32, %arg1: i32, %arg2: i32, %arg3: memref<128x1024xbf16, #tpu.memory_space<vmem>>, %arg4: memref<1024x256xbf16, #tpu.memory_space<vmem>>, %arg5: memref<128x256xbf16, #tpu.memory_space<vmem>>, %arg6: memref<1x256xf32, #tpu.memory_space<vmem>>, %arg7: memref<1x256xf32, #tpu.memory_space<vmem>>, %arg8: memref<128x256xf32, #tpu.memory_space<vmem>>, %arg9: memref<1x256xf32, #tpu.memory_space<vmem>>, %arg10: memref<1x256xf32, #tpu.memory_space<vmem>>) attributes {dimension_semantics = [#tpu.dimension_semantics<parallel>, #tpu.dimension_semantics<arbitrary>, #tpu.dimension_semantics<arbitrary>], iteration_bounds = array<i64: 1, 1, 2>, scalar_prefetch = 0 : i64, scratch_operands = 3 : i64, tpu.core_type = #tpu.core_type<tc>, window_params = [{transform_indices = @transform_0, window_bounds = array<i64: 128, 1024>}, {transform_indices = @transform_1, window_bounds = array<i64: 1024, 256>}, {transform_indices = @transform_2, window_bounds = array<i64: 128, 256>}, {transform_indices = @transform_3, window_bounds = array<i64: 1, 256>}, {transform_indices = @transform_4, window_bounds = array<i64: 1, 256>}]} {
    %c0_i32 = arith.constant 0 : i32
    %0 = arith.cmpi eq, %arg2, %c0_i32 : i32
    %1 = arith.extui %0 : i1 to i32
    %c0_i32_0 = arith.constant 0 : i32
    %2 = arith.cmpi ne, %1, %c0_i32_0 : i32
    scf.if %2 {
      %cst_15 = arith.constant 0.000000e+00 : f32
      %22 = vector.broadcast %cst_15 : f32 to vector<128x256xf32>
      %c0_16 = arith.constant 0 : index
      %c0_17 = arith.constant 0 : index
      %23 = vector.load %arg8[%c0_16, %c0_17] : memref<128x256xf32, #tpu.memory_space<vmem>>, vector<128x256xf32>
      tpu.vector_store %arg8[%c0_16, %c0_17], %22 {strides = array<i32>} : memref<128x256xf32, #tpu.memory_space<vmem>>, vector<128x256xf32>,
    } else {
    }
    %c0_i32_1 = arith.constant 0 : i32
    %3 = arith.cmpi eq, %arg1, %c0_i32_1 : i32
    %c0_i32_2 = arith.constant 0 : i32
    %4 = arith.cmpi eq, %arg2, %c0_i32_2 : i32
    %5 = arith.andi %3, %4 : i1
    %6 = arith.extui %5 : i1 to i32
    %c0_i32_3 = arith.constant 0 : i32
    %7 = arith.cmpi ne, %6, %c0_i32_3 : i32
    scf.if %7 {
      %cst_15 = arith.constant 0.000000e+00 : f32
      %22 = vector.broadcast %cst_15 : f32 to vector<1x256xf32>
      %c0_16 = arith.constant 0 : index
      %c0_17 = arith.constant 0 : index
      %23 = vector.load %arg9[%c0_16, %c0_17] : memref<1x256xf32, #tpu.memory_space<vmem>>, vector<1x256xf32>
      tpu.vector_store %arg9[%c0_16, %c0_17], %22 {strides = array<i32>} : memref<1x256xf32, #tpu.memory_space<vmem>>, vector<1x256xf32>,
      %cst_18 = arith.constant 0.000000e+00 : f32
      %24 = vector.broadcast %cst_18 : f32 to vector<1x256xf32>
      %c0_19 = arith.constant 0 : index
      %c0_20 = arith.constant 0 : index
      %25 = vector.load %arg10[%c0_19, %c0_20] : memref<1x256xf32, #tpu.memory_space<vmem>>, vector<1x256xf32>
      tpu.vector_store %arg10[%c0_19, %c0_20], %24 {strides = array<i32>} : memref<1x256xf32, #tpu.memory_space<vmem>>, vector<1x256xf32>,
    } else {
    }
    %c0 = arith.constant 0 : index
    %c0_4 = arith.constant 0 : index
    %8 = vector.load %arg8[%c0, %c0_4] : memref<128x256xf32, #tpu.memory_space<vmem>>, vector<128x256xf32>
    %c0_5 = arith.constant 0 : index
    %c0_6 = arith.constant 0 : index
    %9 = vector.load %arg3[%c0_5, %c0_6] : memref<128x1024xbf16, #tpu.memory_space<vmem>>, vector<128x1024xbf16>
    %c0_7 = arith.constant 0 : index
    %c0_8 = arith.constant 0 : index
    %10 = vector.load %arg4[%c0_7, %c0_8] : memref<1024x256xbf16, #tpu.memory_space<vmem>>, vector<1024x256xbf16>
    %cst = arith.constant dense<0.000000e+00> : vector<128x256xf32>
    %11 = tpu.matmul %9, %10, %cst {dimension_numbers = #tpu.dot_dimension_numbers<[1], [0], [0], [1], [0, 0, 1, 1], [], []>} : vector<128x1024xbf16>, vector<1024x256xbf16>, vector<128x256xf32> -> vector<128x256xf32>
    %12 = arith.addf %8, %11 : vector<128x256xf32>
    %c0_9 = arith.constant 0 : index
    %c0_10 = arith.constant 0 : index
    %13 = vector.load %arg8[%c0_9, %c0_10] : memref<128x256xf32, #tpu.memory_space<vmem>>, vector<128x256xf32>
    tpu.vector_store %arg8[%c0_9, %c0_10], %12 {strides = array<i32>} : memref<128x256xf32, #tpu.memory_space<vmem>>, vector<128x256xf32>,
    %c1_i32 = arith.constant 1 : i32
    %14 = arith.cmpi eq, %arg2, %c1_i32 : i32
    %15 = arith.extui %14 : i1 to i32
    %c0_i32_11 = arith.constant 0 : i32
    %16 = arith.cmpi ne, %15, %c0_i32_11 : i32
    scf.if %16 {
      %c0_15 = arith.constant 0 : index
      %c0_16 = arith.constant 0 : index
      %22 = vector.load %arg8[%c0_15, %c0_16] : memref<128x256xf32, #tpu.memory_space<vmem>>, vector<128x256xf32>
      %23 = arith.truncf %22 : vector<128x256xf32> to vector<128x256xbf16>
      %c0_17 = arith.constant 0 : index
      %c0_18 = arith.constant 0 : index
      %24 = vector.load %arg5[%c0_17, %c0_18] : memref<128x256xbf16, #tpu.memory_space<vmem>>, vector<128x256xbf16>
      tpu.vector_store %arg5[%c0_17, %c0_18], %23 {strides = array<i32>} : memref<128x256xbf16, #tpu.memory_space<vmem>>, vector<128x256xbf16>,
      %c0_19 = arith.constant 0 : index
      %c0_20 = arith.constant 0 : index
      %25 = vector.load %arg9[%c0_19, %c0_20] : memref<1x256xf32, #tpu.memory_space<vmem>>, vector<1x256xf32>
      %cst_21 = arith.constant dense<0.000000e+00> : vector<256xf32>
      %26 = vector.multi_reduction <add>, %22, %cst_21 [0] : vector<128x256xf32> to vector<256xf32>
      %27 = vector.shape_cast %26 : vector<256xf32> to vector<1x256xf32>
      %28 = arith.addf %25, %27 : vector<1x256xf32>
      %c0_22 = arith.constant 0 : index
      %c0_23 = arith.constant 0 : index
      %29 = vector.load %arg9[%c0_22, %c0_23] : memref<1x256xf32, #tpu.memory_space<vmem>>, vector<1x256xf32>
      tpu.vector_store %arg9[%c0_22, %c0_23], %28 {strides = array<i32>} : memref<1x256xf32, #tpu.memory_space<vmem>>, vector<1x256xf32>,
      %c0_24 = arith.constant 0 : index
      %c0_25 = arith.constant 0 : index
      %30 = vector.load %arg10[%c0_24, %c0_25] : memref<1x256xf32, #tpu.memory_space<vmem>>, vector<1x256xf32>
      %31 = arith.mulf %22, %22 : vector<128x256xf32>
      %cst_26 = arith.constant dense<0.000000e+00> : vector<256xf32>
      %32 = vector.multi_reduction <add>, %31, %cst_26 [0] : vector<128x256xf32> to vector<256xf32>
      %33 = vector.shape_cast %32 : vector<256xf32> to vector<1x256xf32>
      %34 = arith.addf %30, %33 : vector<1x256xf32>
      %c0_27 = arith.constant 0 : index
      %c0_28 = arith.constant 0 : index
      %35 = vector.load %arg10[%c0_27, %c0_28] : memref<1x256xf32, #tpu.memory_space<vmem>>, vector<1x256xf32>
      tpu.vector_store %arg10[%c0_27, %c0_28], %34 {strides = array<i32>} : memref<1x256xf32, #tpu.memory_space<vmem>>, vector<1x256xf32>,
    } else {
    }
    %c0_i32_12 = arith.constant 0 : i32
    %17 = arith.cmpi eq, %arg1, %c0_i32_12 : i32
    %c1_i32_13 = arith.constant 1 : i32
    %18 = arith.cmpi eq, %arg2, %c1_i32_13 : i32
    %19 = arith.andi %17, %18 : i1
    %20 = arith.extui %19 : i1 to i32
    %c0_i32_14 = arith.constant 0 : i32
    %21 = arith.cmpi ne, %20, %c0_i32_14 : i32
    scf.if %21 {
      %c0_15 = arith.constant 0 : index
      %c0_16 = arith.constant 0 : index
      %22 = vector.load %arg9[%c0_15, %c0_16] : memref<1x256xf32, #tpu.memory_space<vmem>>, vector<1x256xf32>
      %c0_17 = arith.constant 0 : index
      %c0_18 = arith.constant 0 : index
      %23 = vector.load %arg6[%c0_17, %c0_18] : memref<1x256xf32, #tpu.memory_space<vmem>>, vector<1x256xf32>
      tpu.vector_store %arg6[%c0_17, %c0_18], %22 {strides = array<i32>} : memref<1x256xf32, #tpu.memory_space<vmem>>, vector<1x256xf32>,
      %c0_19 = arith.constant 0 : index
      %c0_20 = arith.constant 0 : index
      %24 = vector.load %arg10[%c0_19, %c0_20] : memref<1x256xf32, #tpu.memory_space<vmem>>, vector<1x256xf32>
      %c0_21 = arith.constant 0 : index
      %c0_22 = arith.constant 0 : index
      %25 = vector.load %arg7[%c0_21, %c0_22] : memref<1x256xf32, #tpu.memory_space<vmem>>, vector<1x256xf32>
      tpu.vector_store %arg7[%c0_21, %c0_22], %24 {strides = array<i32>} : memref<1x256xf32, #tpu.memory_space<vmem>>, vector<1x256xf32>,
    } else {
    }
    return
  }
  func.func @transform_0(%arg0: i32, %arg1: i32, %arg2: i32) -> (i32, i32) {
    %c0_i32 = arith.constant 0 : i32
    return %arg1, %arg2 : i32, i32
  }
  func.func @transform_1(%arg0: i32, %arg1: i32, %arg2: i32) -> (i32, i32) {
    %c0_i32 = arith.constant 0 : i32
    return %arg2, %arg0 : i32, i32
  }
  func.func @transform_2(%arg0: i32, %arg1: i32, %arg2: i32) -> (i32, i32) {
    %c0_i32 = arith.constant 0 : i32
    return %arg1, %arg0 : i32, i32
  }
  func.func @transform_3(%arg0: i32, %arg1: i32, %arg2: i32) -> (i32, i32) {
    %c0_i32 = arith.constant 0 : i32
    %c0_i32_0 = arith.constant 0 : i32
    return %c0_i32, %arg0 : i32, i32
  }
  func.func @transform_4(%arg0: i32, %arg1: i32, %arg2: i32) -> (i32, i32) {
    %c0_i32 = arith.constant 0 : i32
    %c0_i32_0 = arith.constant 0 : i32
    return %c0_i32, %arg0 : i32, i32
  }
}

module attributes {stable_mosaic.version = 11 : i64} {
  func.func @_bn_lrelu_kernel(%arg0: i32, %arg1: memref<128x256xbf16, #tpu.memory_space<vmem>>, %arg2: memref<1x256xf32, #tpu.memory_space<vmem>>, %arg3: memref<1x256xf32, #tpu.memory_space<vmem>>, %arg4: memref<128x256xbf16, #tpu.memory_space<vmem>>) attributes {dimension_semantics = [#tpu.dimension_semantics<parallel>], iteration_bounds = array<i64: 1>, scalar_prefetch = 0 : i64, scratch_operands = 0 : i64, tpu.core_type = #tpu.core_type<tc>, window_params = [{transform_indices = @transform_0, window_bounds = array<i64: 128, 256>}, {pipeline_mode = #tpu.pipeline_mode<synchronous>, transform_indices = @transform_1, window_bounds = array<i64: 1, 256>}, {pipeline_mode = #tpu.pipeline_mode<synchronous>, transform_indices = @transform_2, window_bounds = array<i64: 1, 256>}, {transform_indices = @transform_3, window_bounds = array<i64: 128, 256>}]} {
    %c0 = arith.constant 0 : index
    %c0_0 = arith.constant 0 : index
    %0 = vector.load %arg1[%c0, %c0_0] : memref<128x256xbf16, #tpu.memory_space<vmem>>, vector<128x256xbf16>
    %1 = arith.extf %0 : vector<128x256xbf16> to vector<128x256xf32>
    %c0_1 = arith.constant 0 : index
    %c0_2 = arith.constant 0 : index
    %2 = vector.load %arg2[%c0_1, %c0_2] : memref<1x256xf32, #tpu.memory_space<vmem>>, vector<1x256xf32>
    %3 = vector.broadcast %2 : vector<1x256xf32> to vector<128x256xf32>
    %4 = arith.mulf %1, %3 : vector<128x256xf32>
    %c0_3 = arith.constant 0 : index
    %c0_4 = arith.constant 0 : index
    %5 = vector.load %arg3[%c0_3, %c0_4] : memref<1x256xf32, #tpu.memory_space<vmem>>, vector<1x256xf32>
    %6 = vector.broadcast %5 : vector<1x256xf32> to vector<128x256xf32>
    %7 = arith.addf %4, %6 : vector<128x256xf32>
    %cst = arith.constant 0.000000e+00 : f32
    %8 = vector.broadcast %cst : f32 to vector<128x256xf32>
    %9 = arith.cmpf oge, %7, %8 : vector<128x256xf32>
    %cst_5 = arith.constant 2.000000e-01 : f32
    %10 = vector.broadcast %cst_5 : f32 to vector<128x256xf32>
    %11 = arith.mulf %10, %7 : vector<128x256xf32>
    %12 = arith.select %9, %7, %11 : vector<128x256xi1>, vector<128x256xf32>
    %13 = arith.truncf %12 : vector<128x256xf32> to vector<128x256xbf16>
    %c0_6 = arith.constant 0 : index
    %c0_7 = arith.constant 0 : index
    %14 = vector.load %arg4[%c0_6, %c0_7] : memref<128x256xbf16, #tpu.memory_space<vmem>>, vector<128x256xbf16>
    tpu.vector_store %arg4[%c0_6, %c0_7], %13 {strides = array<i32>} : memref<128x256xbf16, #tpu.memory_space<vmem>>, vector<128x256xbf16>,
    return
  }
  func.func @transform_0(%arg0: i32) -> (i32, i32) {
    %c0_i32 = arith.constant 0 : i32
    %c0_i32_0 = arith.constant 0 : i32
    return %arg0, %c0_i32 : i32, i32
  }
  func.func @transform_1(%arg0: i32) -> (i32, i32) {
    %c0_i32 = arith.constant 0 : i32
    %c0_i32_0 = arith.constant 0 : i32
    %c0_i32_1 = arith.constant 0 : i32
    return %c0_i32, %c0_i32_0 : i32, i32
  }
  func.func @transform_2(%arg0: i32) -> (i32, i32) {
    %c0_i32 = arith.constant 0 : i32
    %c0_i32_0 = arith.constant 0 : i32
    %c0_i32_1 = arith.constant 0 : i32
    return %c0_i32, %c0_i32_0 : i32, i32
  }
  func.func @transform_3(%arg0: i32) -> (i32, i32) {
    %c0_i32 = arith.constant 0 : i32
    %c0_i32_0 = arith.constant 0 : i32
    return %arg0, %c0_i32 : i32, i32
  }
}

module attributes {stable_mosaic.version = 11 : i64} {
  func.func @_conv_mm_stats_kernel(%arg0: i32, %arg1: i32, %arg2: i32, %arg3: memref<32x1024xbf16, #tpu.memory_space<vmem>>, %arg4: memref<1024x256xbf16, #tpu.memory_space<vmem>>, %arg5: memref<32x256xbf16, #tpu.memory_space<vmem>>, %arg6: memref<1x256xf32, #tpu.memory_space<vmem>>, %arg7: memref<1x256xf32, #tpu.memory_space<vmem>>, %arg8: memref<32x256xf32, #tpu.memory_space<vmem>>, %arg9: memref<1x256xf32, #tpu.memory_space<vmem>>, %arg10: memref<1x256xf32, #tpu.memory_space<vmem>>) attributes {dimension_semantics = [#tpu.dimension_semantics<parallel>, #tpu.dimension_semantics<arbitrary>, #tpu.dimension_semantics<arbitrary>], iteration_bounds = array<i64: 2, 1, 4>, scalar_prefetch = 0 : i64, scratch_operands = 3 : i64, tpu.core_type = #tpu.core_type<tc>, window_params = [{transform_indices = @transform_0, window_bounds = array<i64: 32, 1024>}, {transform_indices = @transform_1, window_bounds = array<i64: 1024, 256>}, {transform_indices = @transform_2, window_bounds = array<i64: 32, 256>}, {transform_indices = @transform_3, window_bounds = array<i64: 1, 256>}, {transform_indices = @transform_4, window_bounds = array<i64: 1, 256>}]} {
    %c0_i32 = arith.constant 0 : i32
    %0 = arith.cmpi eq, %arg2, %c0_i32 : i32
    %1 = arith.extui %0 : i1 to i32
    %c0_i32_0 = arith.constant 0 : i32
    %2 = arith.cmpi ne, %1, %c0_i32_0 : i32
    scf.if %2 {
      %cst_15 = arith.constant 0.000000e+00 : f32
      %22 = vector.broadcast %cst_15 : f32 to vector<32x256xf32>
      %c0_16 = arith.constant 0 : index
      %c0_17 = arith.constant 0 : index
      %23 = vector.load %arg8[%c0_16, %c0_17] : memref<32x256xf32, #tpu.memory_space<vmem>>, vector<32x256xf32>
      tpu.vector_store %arg8[%c0_16, %c0_17], %22 {strides = array<i32>} : memref<32x256xf32, #tpu.memory_space<vmem>>, vector<32x256xf32>,
    } else {
    }
    %c0_i32_1 = arith.constant 0 : i32
    %3 = arith.cmpi eq, %arg1, %c0_i32_1 : i32
    %c0_i32_2 = arith.constant 0 : i32
    %4 = arith.cmpi eq, %arg2, %c0_i32_2 : i32
    %5 = arith.andi %3, %4 : i1
    %6 = arith.extui %5 : i1 to i32
    %c0_i32_3 = arith.constant 0 : i32
    %7 = arith.cmpi ne, %6, %c0_i32_3 : i32
    scf.if %7 {
      %cst_15 = arith.constant 0.000000e+00 : f32
      %22 = vector.broadcast %cst_15 : f32 to vector<1x256xf32>
      %c0_16 = arith.constant 0 : index
      %c0_17 = arith.constant 0 : index
      %23 = vector.load %arg9[%c0_16, %c0_17] : memref<1x256xf32, #tpu.memory_space<vmem>>, vector<1x256xf32>
      tpu.vector_store %arg9[%c0_16, %c0_17], %22 {strides = array<i32>} : memref<1x256xf32, #tpu.memory_space<vmem>>, vector<1x256xf32>,
      %cst_18 = arith.constant 0.000000e+00 : f32
      %24 = vector.broadcast %cst_18 : f32 to vector<1x256xf32>
      %c0_19 = arith.constant 0 : index
      %c0_20 = arith.constant 0 : index
      %25 = vector.load %arg10[%c0_19, %c0_20] : memref<1x256xf32, #tpu.memory_space<vmem>>, vector<1x256xf32>
      tpu.vector_store %arg10[%c0_19, %c0_20], %24 {strides = array<i32>} : memref<1x256xf32, #tpu.memory_space<vmem>>, vector<1x256xf32>,
    } else {
    }
    %c0 = arith.constant 0 : index
    %c0_4 = arith.constant 0 : index
    %8 = vector.load %arg8[%c0, %c0_4] : memref<32x256xf32, #tpu.memory_space<vmem>>, vector<32x256xf32>
    %c0_5 = arith.constant 0 : index
    %c0_6 = arith.constant 0 : index
    %9 = vector.load %arg3[%c0_5, %c0_6] : memref<32x1024xbf16, #tpu.memory_space<vmem>>, vector<32x1024xbf16>
    %c0_7 = arith.constant 0 : index
    %c0_8 = arith.constant 0 : index
    %10 = vector.load %arg4[%c0_7, %c0_8] : memref<1024x256xbf16, #tpu.memory_space<vmem>>, vector<1024x256xbf16>
    %cst = arith.constant dense<0.000000e+00> : vector<32x256xf32>
    %11 = tpu.matmul %9, %10, %cst {dimension_numbers = #tpu.dot_dimension_numbers<[1], [0], [0], [1], [0, 0, 1, 1], [], []>} : vector<32x1024xbf16>, vector<1024x256xbf16>, vector<32x256xf32> -> vector<32x256xf32>
    %12 = arith.addf %8, %11 : vector<32x256xf32>
    %c0_9 = arith.constant 0 : index
    %c0_10 = arith.constant 0 : index
    %13 = vector.load %arg8[%c0_9, %c0_10] : memref<32x256xf32, #tpu.memory_space<vmem>>, vector<32x256xf32>
    tpu.vector_store %arg8[%c0_9, %c0_10], %12 {strides = array<i32>} : memref<32x256xf32, #tpu.memory_space<vmem>>, vector<32x256xf32>,
    %c3_i32 = arith.constant 3 : i32
    %14 = arith.cmpi eq, %arg2, %c3_i32 : i32
    %15 = arith.extui %14 : i1 to i32
    %c0_i32_11 = arith.constant 0 : i32
    %16 = arith.cmpi ne, %15, %c0_i32_11 : i32
    scf.if %16 {
      %c0_15 = arith.constant 0 : index
      %c0_16 = arith.constant 0 : index
      %22 = vector.load %arg8[%c0_15, %c0_16] : memref<32x256xf32, #tpu.memory_space<vmem>>, vector<32x256xf32>
      %23 = arith.truncf %22 : vector<32x256xf32> to vector<32x256xbf16>
      %c0_17 = arith.constant 0 : index
      %c0_18 = arith.constant 0 : index
      %24 = vector.load %arg5[%c0_17, %c0_18] : memref<32x256xbf16, #tpu.memory_space<vmem>>, vector<32x256xbf16>
      tpu.vector_store %arg5[%c0_17, %c0_18], %23 {strides = array<i32>} : memref<32x256xbf16, #tpu.memory_space<vmem>>, vector<32x256xbf16>,
      %c0_19 = arith.constant 0 : index
      %c0_20 = arith.constant 0 : index
      %25 = vector.load %arg9[%c0_19, %c0_20] : memref<1x256xf32, #tpu.memory_space<vmem>>, vector<1x256xf32>
      %cst_21 = arith.constant dense<0.000000e+00> : vector<256xf32>
      %26 = vector.multi_reduction <add>, %22, %cst_21 [0] : vector<32x256xf32> to vector<256xf32>
      %27 = vector.shape_cast %26 : vector<256xf32> to vector<1x256xf32>
      %28 = arith.addf %25, %27 : vector<1x256xf32>
      %c0_22 = arith.constant 0 : index
      %c0_23 = arith.constant 0 : index
      %29 = vector.load %arg9[%c0_22, %c0_23] : memref<1x256xf32, #tpu.memory_space<vmem>>, vector<1x256xf32>
      tpu.vector_store %arg9[%c0_22, %c0_23], %28 {strides = array<i32>} : memref<1x256xf32, #tpu.memory_space<vmem>>, vector<1x256xf32>,
      %c0_24 = arith.constant 0 : index
      %c0_25 = arith.constant 0 : index
      %30 = vector.load %arg10[%c0_24, %c0_25] : memref<1x256xf32, #tpu.memory_space<vmem>>, vector<1x256xf32>
      %31 = arith.mulf %22, %22 : vector<32x256xf32>
      %cst_26 = arith.constant dense<0.000000e+00> : vector<256xf32>
      %32 = vector.multi_reduction <add>, %31, %cst_26 [0] : vector<32x256xf32> to vector<256xf32>
      %33 = vector.shape_cast %32 : vector<256xf32> to vector<1x256xf32>
      %34 = arith.addf %30, %33 : vector<1x256xf32>
      %c0_27 = arith.constant 0 : index
      %c0_28 = arith.constant 0 : index
      %35 = vector.load %arg10[%c0_27, %c0_28] : memref<1x256xf32, #tpu.memory_space<vmem>>, vector<1x256xf32>
      tpu.vector_store %arg10[%c0_27, %c0_28], %34 {strides = array<i32>} : memref<1x256xf32, #tpu.memory_space<vmem>>, vector<1x256xf32>,
    } else {
    }
    %c0_i32_12 = arith.constant 0 : i32
    %17 = arith.cmpi eq, %arg1, %c0_i32_12 : i32
    %c3_i32_13 = arith.constant 3 : i32
    %18 = arith.cmpi eq, %arg2, %c3_i32_13 : i32
    %19 = arith.andi %17, %18 : i1
    %20 = arith.extui %19 : i1 to i32
    %c0_i32_14 = arith.constant 0 : i32
    %21 = arith.cmpi ne, %20, %c0_i32_14 : i32
    scf.if %21 {
      %c0_15 = arith.constant 0 : index
      %c0_16 = arith.constant 0 : index
      %22 = vector.load %arg9[%c0_15, %c0_16] : memref<1x256xf32, #tpu.memory_space<vmem>>, vector<1x256xf32>
      %c0_17 = arith.constant 0 : index
      %c0_18 = arith.constant 0 : index
      %23 = vector.load %arg6[%c0_17, %c0_18] : memref<1x256xf32, #tpu.memory_space<vmem>>, vector<1x256xf32>
      tpu.vector_store %arg6[%c0_17, %c0_18], %22 {strides = array<i32>} : memref<1x256xf32, #tpu.memory_space<vmem>>, vector<1x256xf32>,
      %c0_19 = arith.constant 0 : index
      %c0_20 = arith.constant 0 : index
      %24 = vector.load %arg10[%c0_19, %c0_20] : memref<1x256xf32, #tpu.memory_space<vmem>>, vector<1x256xf32>
      %c0_21 = arith.constant 0 : index
      %c0_22 = arith.constant 0 : index
      %25 = vector.load %arg7[%c0_21, %c0_22] : memref<1x256xf32, #tpu.memory_space<vmem>>, vector<1x256xf32>
      tpu.vector_store %arg7[%c0_21, %c0_22], %24 {strides = array<i32>} : memref<1x256xf32, #tpu.memory_space<vmem>>, vector<1x256xf32>,
    } else {
    }
    return
  }
  func.func @transform_0(%arg0: i32, %arg1: i32, %arg2: i32) -> (i32, i32) {
    %c0_i32 = arith.constant 0 : i32
    return %arg1, %arg2 : i32, i32
  }
  func.func @transform_1(%arg0: i32, %arg1: i32, %arg2: i32) -> (i32, i32) {
    %c0_i32 = arith.constant 0 : i32
    return %arg2, %arg0 : i32, i32
  }
  func.func @transform_2(%arg0: i32, %arg1: i32, %arg2: i32) -> (i32, i32) {
    %c0_i32 = arith.constant 0 : i32
    return %arg1, %arg0 : i32, i32
  }
  func.func @transform_3(%arg0: i32, %arg1: i32, %arg2: i32) -> (i32, i32) {
    %c0_i32 = arith.constant 0 : i32
    %c0_i32_0 = arith.constant 0 : i32
    return %c0_i32, %arg0 : i32, i32
  }
  func.func @transform_4(%arg0: i32, %arg1: i32, %arg2: i32) -> (i32, i32) {
    %c0_i32 = arith.constant 0 : i32
    %c0_i32_0 = arith.constant 0 : i32
    return %c0_i32, %arg0 : i32, i32
  }
}

module attributes {stable_mosaic.version = 11 : i64} {
  func.func @_bn_lrelu_kernel(%arg0: i32, %arg1: memref<32x512xbf16, #tpu.memory_space<vmem>>, %arg2: memref<1x512xf32, #tpu.memory_space<vmem>>, %arg3: memref<1x512xf32, #tpu.memory_space<vmem>>, %arg4: memref<32x512xbf16, #tpu.memory_space<vmem>>) attributes {dimension_semantics = [#tpu.dimension_semantics<parallel>], iteration_bounds = array<i64: 1>, scalar_prefetch = 0 : i64, scratch_operands = 0 : i64, tpu.core_type = #tpu.core_type<tc>, window_params = [{transform_indices = @transform_0, window_bounds = array<i64: 32, 512>}, {pipeline_mode = #tpu.pipeline_mode<synchronous>, transform_indices = @transform_1, window_bounds = array<i64: 1, 512>}, {pipeline_mode = #tpu.pipeline_mode<synchronous>, transform_indices = @transform_2, window_bounds = array<i64: 1, 512>}, {transform_indices = @transform_3, window_bounds = array<i64: 32, 512>}]} {
    %c0 = arith.constant 0 : index
    %c0_0 = arith.constant 0 : index
    %0 = vector.load %arg1[%c0, %c0_0] : memref<32x512xbf16, #tpu.memory_space<vmem>>, vector<32x512xbf16>
    %1 = arith.extf %0 : vector<32x512xbf16> to vector<32x512xf32>
    %c0_1 = arith.constant 0 : index
    %c0_2 = arith.constant 0 : index
    %2 = vector.load %arg2[%c0_1, %c0_2] : memref<1x512xf32, #tpu.memory_space<vmem>>, vector<1x512xf32>
    %3 = vector.broadcast %2 : vector<1x512xf32> to vector<32x512xf32>
    %4 = arith.mulf %1, %3 : vector<32x512xf32>
    %c0_3 = arith.constant 0 : index
    %c0_4 = arith.constant 0 : index
    %5 = vector.load %arg3[%c0_3, %c0_4] : memref<1x512xf32, #tpu.memory_space<vmem>>, vector<1x512xf32>
    %6 = vector.broadcast %5 : vector<1x512xf32> to vector<32x512xf32>
    %7 = arith.addf %4, %6 : vector<32x512xf32>
    %cst = arith.constant 0.000000e+00 : f32
    %8 = vector.broadcast %cst : f32 to vector<32x512xf32>
    %9 = arith.cmpf oge, %7, %8 : vector<32x512xf32>
    %cst_5 = arith.constant 2.000000e-01 : f32
    %10 = vector.broadcast %cst_5 : f32 to vector<32x512xf32>
    %11 = arith.mulf %10, %7 : vector<32x512xf32>
    %12 = arith.select %9, %7, %11 : vector<32x512xi1>, vector<32x512xf32>
    %13 = arith.truncf %12 : vector<32x512xf32> to vector<32x512xbf16>
    %c0_6 = arith.constant 0 : index
    %c0_7 = arith.constant 0 : index
    %14 = vector.load %arg4[%c0_6, %c0_7] : memref<32x512xbf16, #tpu.memory_space<vmem>>, vector<32x512xbf16>
    tpu.vector_store %arg4[%c0_6, %c0_7], %13 {strides = array<i32>} : memref<32x512xbf16, #tpu.memory_space<vmem>>, vector<32x512xbf16>,
    return
  }
  func.func @transform_0(%arg0: i32) -> (i32, i32) {
    %c0_i32 = arith.constant 0 : i32
    %c0_i32_0 = arith.constant 0 : i32
    return %arg0, %c0_i32 : i32, i32
  }
  func.func @transform_1(%arg0: i32) -> (i32, i32) {
    %c0_i32 = arith.constant 0 : i32
    %c0_i32_0 = arith.constant 0 : i32
    %c0_i32_1 = arith.constant 0 : i32
    return %c0_i32, %c0_i32_0 : i32, i32
  }
  func.func @transform_2(%arg0: i32) -> (i32, i32) {
    %c0_i32 = arith.constant 0 : i32
    %c0_i32_0 = arith.constant 0 : i32
    %c0_i32_1 = arith.constant 0 : i32
    return %c0_i32, %c0_i32_0 : i32, i32
  }
  func.func @transform_3(%arg0: i32) -> (i32, i32) {
    %c0_i32 = arith.constant 0 : i32
    %c0_i32_0 = arith.constant 0 : i32
    return %arg0, %c0_i32 : i32, i32
  }
}

module attributes {stable_mosaic.version = 11 : i64} {
  func.func @_conv_mm_stats_kernel(%arg0: i32, %arg1: i32, %arg2: i32, %arg3: memref<8x1024xbf16, #tpu.memory_space<vmem>>, %arg4: memref<1024x256xbf16, #tpu.memory_space<vmem>>, %arg5: memref<8x256xbf16, #tpu.memory_space<vmem>>, %arg6: memref<1x256xf32, #tpu.memory_space<vmem>>, %arg7: memref<1x256xf32, #tpu.memory_space<vmem>>, %arg8: memref<8x256xf32, #tpu.memory_space<vmem>>, %arg9: memref<1x256xf32, #tpu.memory_space<vmem>>, %arg10: memref<1x256xf32, #tpu.memory_space<vmem>>) attributes {dimension_semantics = [#tpu.dimension_semantics<parallel>, #tpu.dimension_semantics<arbitrary>, #tpu.dimension_semantics<arbitrary>], iteration_bounds = array<i64: 4, 1, 8>, scalar_prefetch = 0 : i64, scratch_operands = 3 : i64, tpu.core_type = #tpu.core_type<tc>, window_params = [{transform_indices = @transform_0, window_bounds = array<i64: 8, 1024>}, {transform_indices = @transform_1, window_bounds = array<i64: 1024, 256>}, {transform_indices = @transform_2, window_bounds = array<i64: 8, 256>}, {transform_indices = @transform_3, window_bounds = array<i64: 1, 256>}, {transform_indices = @transform_4, window_bounds = array<i64: 1, 256>}]} {
    %c0_i32 = arith.constant 0 : i32
    %0 = arith.cmpi eq, %arg2, %c0_i32 : i32
    %1 = arith.extui %0 : i1 to i32
    %c0_i32_0 = arith.constant 0 : i32
    %2 = arith.cmpi ne, %1, %c0_i32_0 : i32
    scf.if %2 {
      %cst_15 = arith.constant 0.000000e+00 : f32
      %22 = vector.broadcast %cst_15 : f32 to vector<8x256xf32>
      %c0_16 = arith.constant 0 : index
      %c0_17 = arith.constant 0 : index
      %23 = vector.load %arg8[%c0_16, %c0_17] : memref<8x256xf32, #tpu.memory_space<vmem>>, vector<8x256xf32>
      tpu.vector_store %arg8[%c0_16, %c0_17], %22 {strides = array<i32>} : memref<8x256xf32, #tpu.memory_space<vmem>>, vector<8x256xf32>,
    } else {
    }
    %c0_i32_1 = arith.constant 0 : i32
    %3 = arith.cmpi eq, %arg1, %c0_i32_1 : i32
    %c0_i32_2 = arith.constant 0 : i32
    %4 = arith.cmpi eq, %arg2, %c0_i32_2 : i32
    %5 = arith.andi %3, %4 : i1
    %6 = arith.extui %5 : i1 to i32
    %c0_i32_3 = arith.constant 0 : i32
    %7 = arith.cmpi ne, %6, %c0_i32_3 : i32
    scf.if %7 {
      %cst_15 = arith.constant 0.000000e+00 : f32
      %22 = vector.broadcast %cst_15 : f32 to vector<1x256xf32>
      %c0_16 = arith.constant 0 : index
      %c0_17 = arith.constant 0 : index
      %23 = vector.load %arg9[%c0_16, %c0_17] : memref<1x256xf32, #tpu.memory_space<vmem>>, vector<1x256xf32>
      tpu.vector_store %arg9[%c0_16, %c0_17], %22 {strides = array<i32>} : memref<1x256xf32, #tpu.memory_space<vmem>>, vector<1x256xf32>,
      %cst_18 = arith.constant 0.000000e+00 : f32
      %24 = vector.broadcast %cst_18 : f32 to vector<1x256xf32>
      %c0_19 = arith.constant 0 : index
      %c0_20 = arith.constant 0 : index
      %25 = vector.load %arg10[%c0_19, %c0_20] : memref<1x256xf32, #tpu.memory_space<vmem>>, vector<1x256xf32>
      tpu.vector_store %arg10[%c0_19, %c0_20], %24 {strides = array<i32>} : memref<1x256xf32, #tpu.memory_space<vmem>>, vector<1x256xf32>,
    } else {
    }
    %c0 = arith.constant 0 : index
    %c0_4 = arith.constant 0 : index
    %8 = vector.load %arg8[%c0, %c0_4] : memref<8x256xf32, #tpu.memory_space<vmem>>, vector<8x256xf32>
    %c0_5 = arith.constant 0 : index
    %c0_6 = arith.constant 0 : index
    %9 = vector.load %arg3[%c0_5, %c0_6] : memref<8x1024xbf16, #tpu.memory_space<vmem>>, vector<8x1024xbf16>
    %c0_7 = arith.constant 0 : index
    %c0_8 = arith.constant 0 : index
    %10 = vector.load %arg4[%c0_7, %c0_8] : memref<1024x256xbf16, #tpu.memory_space<vmem>>, vector<1024x256xbf16>
    %cst = arith.constant dense<0.000000e+00> : vector<8x256xf32>
    %11 = tpu.matmul %9, %10, %cst {dimension_numbers = #tpu.dot_dimension_numbers<[1], [0], [0], [1], [0, 0, 1, 1], [], []>} : vector<8x1024xbf16>, vector<1024x256xbf16>, vector<8x256xf32> -> vector<8x256xf32>
    %12 = arith.addf %8, %11 : vector<8x256xf32>
    %c0_9 = arith.constant 0 : index
    %c0_10 = arith.constant 0 : index
    %13 = vector.load %arg8[%c0_9, %c0_10] : memref<8x256xf32, #tpu.memory_space<vmem>>, vector<8x256xf32>
    tpu.vector_store %arg8[%c0_9, %c0_10], %12 {strides = array<i32>} : memref<8x256xf32, #tpu.memory_space<vmem>>, vector<8x256xf32>,
    %c7_i32 = arith.constant 7 : i32
    %14 = arith.cmpi eq, %arg2, %c7_i32 : i32
    %15 = arith.extui %14 : i1 to i32
    %c0_i32_11 = arith.constant 0 : i32
    %16 = arith.cmpi ne, %15, %c0_i32_11 : i32
    scf.if %16 {
      %c0_15 = arith.constant 0 : index
      %c0_16 = arith.constant 0 : index
      %22 = vector.load %arg8[%c0_15, %c0_16] : memref<8x256xf32, #tpu.memory_space<vmem>>, vector<8x256xf32>
      %23 = arith.truncf %22 : vector<8x256xf32> to vector<8x256xbf16>
      %c0_17 = arith.constant 0 : index
      %c0_18 = arith.constant 0 : index
      %24 = vector.load %arg5[%c0_17, %c0_18] : memref<8x256xbf16, #tpu.memory_space<vmem>>, vector<8x256xbf16>
      tpu.vector_store %arg5[%c0_17, %c0_18], %23 {strides = array<i32>} : memref<8x256xbf16, #tpu.memory_space<vmem>>, vector<8x256xbf16>,
      %c0_19 = arith.constant 0 : index
      %c0_20 = arith.constant 0 : index
      %25 = vector.load %arg9[%c0_19, %c0_20] : memref<1x256xf32, #tpu.memory_space<vmem>>, vector<1x256xf32>
      %cst_21 = arith.constant dense<0.000000e+00> : vector<256xf32>
      %26 = vector.multi_reduction <add>, %22, %cst_21 [0] : vector<8x256xf32> to vector<256xf32>
      %27 = vector.shape_cast %26 : vector<256xf32> to vector<1x256xf32>
      %28 = arith.addf %25, %27 : vector<1x256xf32>
      %c0_22 = arith.constant 0 : index
      %c0_23 = arith.constant 0 : index
      %29 = vector.load %arg9[%c0_22, %c0_23] : memref<1x256xf32, #tpu.memory_space<vmem>>, vector<1x256xf32>
      tpu.vector_store %arg9[%c0_22, %c0_23], %28 {strides = array<i32>} : memref<1x256xf32, #tpu.memory_space<vmem>>, vector<1x256xf32>,
      %c0_24 = arith.constant 0 : index
      %c0_25 = arith.constant 0 : index
      %30 = vector.load %arg10[%c0_24, %c0_25] : memref<1x256xf32, #tpu.memory_space<vmem>>, vector<1x256xf32>
      %31 = arith.mulf %22, %22 : vector<8x256xf32>
      %cst_26 = arith.constant dense<0.000000e+00> : vector<256xf32>
      %32 = vector.multi_reduction <add>, %31, %cst_26 [0] : vector<8x256xf32> to vector<256xf32>
      %33 = vector.shape_cast %32 : vector<256xf32> to vector<1x256xf32>
      %34 = arith.addf %30, %33 : vector<1x256xf32>
      %c0_27 = arith.constant 0 : index
      %c0_28 = arith.constant 0 : index
      %35 = vector.load %arg10[%c0_27, %c0_28] : memref<1x256xf32, #tpu.memory_space<vmem>>, vector<1x256xf32>
      tpu.vector_store %arg10[%c0_27, %c0_28], %34 {strides = array<i32>} : memref<1x256xf32, #tpu.memory_space<vmem>>, vector<1x256xf32>,
    } else {
    }
    %c0_i32_12 = arith.constant 0 : i32
    %17 = arith.cmpi eq, %arg1, %c0_i32_12 : i32
    %c7_i32_13 = arith.constant 7 : i32
    %18 = arith.cmpi eq, %arg2, %c7_i32_13 : i32
    %19 = arith.andi %17, %18 : i1
    %20 = arith.extui %19 : i1 to i32
    %c0_i32_14 = arith.constant 0 : i32
    %21 = arith.cmpi ne, %20, %c0_i32_14 : i32
    scf.if %21 {
      %c0_15 = arith.constant 0 : index
      %c0_16 = arith.constant 0 : index
      %22 = vector.load %arg9[%c0_15, %c0_16] : memref<1x256xf32, #tpu.memory_space<vmem>>, vector<1x256xf32>
      %c0_17 = arith.constant 0 : index
      %c0_18 = arith.constant 0 : index
      %23 = vector.load %arg6[%c0_17, %c0_18] : memref<1x256xf32, #tpu.memory_space<vmem>>, vector<1x256xf32>
      tpu.vector_store %arg6[%c0_17, %c0_18], %22 {strides = array<i32>} : memref<1x256xf32, #tpu.memory_space<vmem>>, vector<1x256xf32>,
      %c0_19 = arith.constant 0 : index
      %c0_20 = arith.constant 0 : index
      %24 = vector.load %arg10[%c0_19, %c0_20] : memref<1x256xf32, #tpu.memory_space<vmem>>, vector<1x256xf32>
      %c0_21 = arith.constant 0 : index
      %c0_22 = arith.constant 0 : index
      %25 = vector.load %arg7[%c0_21, %c0_22] : memref<1x256xf32, #tpu.memory_space<vmem>>, vector<1x256xf32>
      tpu.vector_store %arg7[%c0_21, %c0_22], %24 {strides = array<i32>} : memref<1x256xf32, #tpu.memory_space<vmem>>, vector<1x256xf32>,
    } else {
    }
    return
  }
  func.func @transform_0(%arg0: i32, %arg1: i32, %arg2: i32) -> (i32, i32) {
    %c0_i32 = arith.constant 0 : i32
    return %arg1, %arg2 : i32, i32
  }
  func.func @transform_1(%arg0: i32, %arg1: i32, %arg2: i32) -> (i32, i32) {
    %c0_i32 = arith.constant 0 : i32
    return %arg2, %arg0 : i32, i32
  }
  func.func @transform_2(%arg0: i32, %arg1: i32, %arg2: i32) -> (i32, i32) {
    %c0_i32 = arith.constant 0 : i32
    return %arg1, %arg0 : i32, i32
  }
  func.func @transform_3(%arg0: i32, %arg1: i32, %arg2: i32) -> (i32, i32) {
    %c0_i32 = arith.constant 0 : i32
    %c0_i32_0 = arith.constant 0 : i32
    return %c0_i32, %arg0 : i32, i32
  }
  func.func @transform_4(%arg0: i32, %arg1: i32, %arg2: i32) -> (i32, i32) {
    %c0_i32 = arith.constant 0 : i32
    %c0_i32_0 = arith.constant 0 : i32
    return %c0_i32, %arg0 : i32, i32
  }
}

module attributes {stable_mosaic.version = 11 : i64} {
  func.func @_bn_lrelu_kernel(%arg0: i32, %arg1: memref<8x1024xbf16, #tpu.memory_space<vmem>>, %arg2: memref<1x1024xf32, #tpu.memory_space<vmem>>, %arg3: memref<1x1024xf32, #tpu.memory_space<vmem>>, %arg4: memref<8x1024xbf16, #tpu.memory_space<vmem>>) attributes {dimension_semantics = [#tpu.dimension_semantics<parallel>], iteration_bounds = array<i64: 1>, scalar_prefetch = 0 : i64, scratch_operands = 0 : i64, tpu.core_type = #tpu.core_type<tc>, window_params = [{transform_indices = @transform_0, window_bounds = array<i64: 8, 1024>}, {pipeline_mode = #tpu.pipeline_mode<synchronous>, transform_indices = @transform_1, window_bounds = array<i64: 1, 1024>}, {pipeline_mode = #tpu.pipeline_mode<synchronous>, transform_indices = @transform_2, window_bounds = array<i64: 1, 1024>}, {transform_indices = @transform_3, window_bounds = array<i64: 8, 1024>}]} {
    %c0 = arith.constant 0 : index
    %c0_0 = arith.constant 0 : index
    %0 = vector.load %arg1[%c0, %c0_0] : memref<8x1024xbf16, #tpu.memory_space<vmem>>, vector<8x1024xbf16>
    %1 = arith.extf %0 : vector<8x1024xbf16> to vector<8x1024xf32>
    %c0_1 = arith.constant 0 : index
    %c0_2 = arith.constant 0 : index
    %2 = vector.load %arg2[%c0_1, %c0_2] : memref<1x1024xf32, #tpu.memory_space<vmem>>, vector<1x1024xf32>
    %3 = vector.broadcast %2 : vector<1x1024xf32> to vector<8x1024xf32>
    %4 = arith.mulf %1, %3 : vector<8x1024xf32>
    %c0_3 = arith.constant 0 : index
    %c0_4 = arith.constant 0 : index
    %5 = vector.load %arg3[%c0_3, %c0_4] : memref<1x1024xf32, #tpu.memory_space<vmem>>, vector<1x1024xf32>
    %6 = vector.broadcast %5 : vector<1x1024xf32> to vector<8x1024xf32>
    %7 = arith.addf %4, %6 : vector<8x1024xf32>
    %cst = arith.constant 0.000000e+00 : f32
    %8 = vector.broadcast %cst : f32 to vector<8x1024xf32>
    %9 = arith.cmpf oge, %7, %8 : vector<8x1024xf32>
    %cst_5 = arith.constant 2.000000e-01 : f32
    %10 = vector.broadcast %cst_5 : f32 to vector<8x1024xf32>
    %11 = arith.mulf %10, %7 : vector<8x1024xf32>
    %12 = arith.select %9, %7, %11 : vector<8x1024xi1>, vector<8x1024xf32>
    %13 = arith.truncf %12 : vector<8x1024xf32> to vector<8x1024xbf16>
    %c0_6 = arith.constant 0 : index
    %c0_7 = arith.constant 0 : index
    %14 = vector.load %arg4[%c0_6, %c0_7] : memref<8x1024xbf16, #tpu.memory_space<vmem>>, vector<8x1024xbf16>
    tpu.vector_store %arg4[%c0_6, %c0_7], %13 {strides = array<i32>} : memref<8x1024xbf16, #tpu.memory_space<vmem>>, vector<8x1024xbf16>,
    return
  }
  func.func @transform_0(%arg0: i32) -> (i32, i32) {
    %c0_i32 = arith.constant 0 : i32
    %c0_i32_0 = arith.constant 0 : i32
    return %arg0, %c0_i32 : i32, i32
  }
  func.func @transform_1(%arg0: i32) -> (i32, i32) {
    %c0_i32 = arith.constant 0 : i32
    %c0_i32_0 = arith.constant 0 : i32
    %c0_i32_1 = arith.constant 0 : i32
    return %c0_i32, %c0_i32_0 : i32, i32
  }
  func.func @transform_2(%arg0: i32) -> (i32, i32) {
    %c0_i32 = arith.constant 0 : i32
    %c0_i32_0 = arith.constant 0 : i32
    %c0_i32_1 = arith.constant 0 : i32
    return %c0_i32, %c0_i32_0 : i32, i32
  }
  func.func @transform_3(%arg0: i32) -> (i32, i32) {
    %c0_i32 = arith.constant 0 : i32
    %c0_i32_0 = arith.constant 0 : i32
    return %arg0, %c0_i32 : i32, i32
  }
}

</mosaic_0001>

<bundles_post_ra>
// kernel: critic_forward.8
= control target key start
LH: loop header
LB: loop body
LE: loop exit
PB: predicated region body
PF: predicated region fallthrough
CT: control target
= control target key end

     0   :  { %s1631_s15 = smov 0   ;;  %s1633_s16 = smov 0   ;;  %s1868_s0 = inlined_call_operand.vmem [shape: bf16[512,128], index: 0, kind: input, shape index: {}]   ;;  %s1869_s1 = inlined_call_operand.vmem [shape: bf16[128,128], index: 1, kind: input, shape index: {}]   ;;  %s1870_s2 = inlined_call_operand.vmem [shape: bf16[512,128], index: 2, kind: output, shape index: {0}]   ;;  %s1871_s3 = inlined_call_operand.vmem [shape: f32[1,128], index: 3, kind: output, shape index: {1}]   ;;  %s1872_s4 = inlined_call_operand.vmem [shape: f32[1,128], index: 4, kind: output, shape index: {2}]  }
   0x1   :  { %s1635_s17 = smov 0  }
   0x2 LB: > { %s30_s18 = sadd.s32 1, %s1598_s16  ;;  %p1246_p0 = scmp.ge.s32.totalorder %s1602_s17, 1  ;;  %s1602_s17 = sphi %s1635_s17, %s15_s17   ;;  %s1598_s16 = sphi %s1633_s16, %s1875_s16   ;;  %s1594_s15 = sphi %s1631_s15, %s1874_s15  }
   0x3   : > { %p32_p1 = scmp.ge.s32.totalorder %s30_s18, 2  ;;  %p210_p2 = scmp.lt.s32.totalorder %s1602_s17, 3 }
   0x5   : > { %s1877_s18 = smov (%p32_p1, %s30_s18), 0  ;;  %p211_p3 = pnand %p1246_p0, %p210_p2 }
   0x6   : > { %s1247_s19 = sshll.u32 (!%p211_p3), %s1594_s15, 5  ;;  %p326_p4 = scmp.eq.s32.totalorder (!%p211_p3), %s1594_s15, 0 }
   0x7   : > { %214 = sbr.rel (%p211_p3) target bundleno = 352 (0x160), region = 28  ;;  %p1655_p5 = scmp.lt.s32.totalorder (!%p211_p3), %s1247_s19, 63 }
   0xc   : > { %v1604_v0 = vmov 0.0   ;;  %s1879_s19 = smov (!%p1655_p5, %s1247_s19), 63  ;;  %v1605_v1 = vmov (%p326_p4), 0.0  }
   0xd   : > { %294 = vst [vmem:[#allocation2 + $0xb0] sm:$0xff] %v1604_v0  ;;  %295 = vst [vmem:[#allocation2] sm:$0xff] %v1604_v0  ;;  %s1248_s21 = sshll.u32 %s1879_s19, 2 }
   0xe   : > { %296 = vst [vmem:[#allocation2 + $0xd8] sm:$0xff] %v1604_v0  ;;  %297 = vst [vmem:[#allocation2 + $0x18] sm:$0xff] %v1604_v0  ;;  %s1666_s24 = scalar_lea.vmem %s1868_s0, %s1248_s21  ;;  %s1671_s27 = scalar_lea.vmem %s1870_s2, %s1248_s21 }
   0xf   : > { %298 = vst [vmem:[#allocation2 + $0x50] sm:$0xff] %v1604_v0  ;;  %299 = vst [vmem:[#allocation2 + $0x68] sm:$0xff] %v1604_v0 }
  0x10   : > { %300 = vst [vmem:[#allocation2 + $0x30] sm:$0xff] %v1604_v0  ;;  %301 = vst [vmem:[#allocation2 + $0x48] sm:$0xff] %v1604_v0 }
  0x11   : > { %302 = vst [vmem:[#allocation2 + $0x80] sm:$0xff] %v1604_v0  ;;  %303 = vst [vmem:[#allocation2 + $0x88] sm:$0xff] %v1604_v0 }
  0x12   : > { %304 = vst [vmem:[#allocation2 + $0xe8] sm:$0xff] %v1604_v0  ;;  %305 = vst [vmem:[#allocation2 + $0xb8] sm:$0xff] %v1604_v0 }
  0x13   : > { %306 = vst [vmem:[#allocation2 + $0x60] sm:$0xff] %v1604_v0  ;;  %307 = vst [vmem:[#allocation2 + $0xf0] sm:$0xff] %v1604_v0 }
  0x14   : > { %308 = vst [vmem:[#allocation2 + $0x8] sm:$0xff] %v1604_v0  ;;  %309 = vst [vmem:[#allocation2 + $0x78] sm:$0xff] %v1604_v0 }
  0x15   : > { %310 = vst [vmem:[#allocation2 + $0x38] sm:$0xff] %v1604_v0  ;;  %311 = vst [vmem:[#allocation2 + $0x58] sm:$0xff] %v1604_v0 }
  0x16   : > { %312 = vst [vmem:[#allocation2 + $0x40] sm:$0xff] %v1604_v0  ;;  %313 = vst [vmem:[#allocation2 + $0xc8] sm:$0xff] %v1604_v0 }
  0x17   : > { %314 = vst [vmem:[#allocation2 + $0xe0] sm:$0xff] %v1604_v0  ;;  %315 = vst [vmem:[#allocation2 + $0x90] sm:$0xff] %v1604_v0 }
  0x18   : > { %316 = vst [vmem:[#allocation2 + $0x70] sm:$0xff] %v1604_v0  ;;  %317 = vst [vmem:[#allocation2 + $0xc0] sm:$0xff] %v1604_v0  ;;  %330 = sbr.rel (!%p326_p4) target bundleno = 30 (0x1e), region = 36 }
  0x19   : > { %318 = vst [vmem:[#allocation2 + $0xa8] sm:$0xff] %v1604_v0  ;;  %319 = vst [vmem:[#allocation2 + $0xd0] sm:$0xff] %v1604_v0 }
  0x1a   : > { %320 = vst [vmem:[#allocation2 + $0x10] sm:$0xff] %v1604_v0  ;;  %321 = vst [vmem:[#allocation2 + $0x28] sm:$0xff] %v1604_v0 }
  0x1b   : > { %322 = vst [vmem:[#allocation2 + $0xa0] sm:$0xff] %v1604_v0  ;;  %323 = vst [vmem:[#allocation2 + $0xf8] sm:$0xff] %v1604_v0 }
  0x1c   : > { %324 = vst [vmem:[#allocation2 + $0x20] sm:$0xff] %v1604_v0  ;;  %325 = vst [vmem:[#allocation2 + $0x98] sm:$0xff] %v1604_v0 }
  0x1d   : > { %331 = vst [vmem:[#allocation3] sm:$0x1] %v1605_v1  ;;  %332 = vst [vmem:[#allocation4] sm:$0x1] %v1605_v1 }
  0x1e PF: > { %v1556_v2 = vld [vmem:[%s1869_s1 + $0x38] sm:$0xff]   ;;  %v1557_v3 = vld [vmem:[%s1869_s1 + $0x30] sm:$0xff]   ;;  %v1558_v4 = vld [vmem:[%s1869_s1 + $0x28] sm:$0xff]   ;;  %p1089_p6 = scmp.eq.s32.totalorder %s1594_s15, 1 }
  0x1f   : > { %1466 = vmatprep.subr.bf16.mxu0 %v1556_v2  ;;  %1514 = vmatprep.subr.bf16.mxu1 %v1556_v2  ;;  %v1559_v5 = vld [vmem:[%s1869_s1 + $0x20] sm:$0xff]   ;;  %v1560_v7 = vld [vmem:[%s1869_s1 + $0x18] sm:$0xff]   ;;  %v1561_v8 = vld [vmem:[%s1869_s1 + $0x10] sm:$0xff]  }
  0x20   : > { %1467 = vmatpush3.bf16.msra.mxu0 %v1556_v2  ;;  %1522 = vmatpush3.bf16.msra.mxu1 %v1556_v2  ;;  %v1564_v6 = vld [vmem:[%s1666_s24] sm:$0xff]   ;;  %v1562_v10 = vld [vmem:[%s1869_s1 + $0x8] sm:$0xff]   ;;  %v1566_v14 = vld [vmem:[%s1666_s24 + $0x10] sm:$0xff]  }
  0x21   : > { %1468 = vmatprep.subr.bf16.mxu0 %v1557_v3  ;;  %1515 = vmatprep.subr.bf16.mxu1 %v1557_v3  ;;  %v1572_v9 = vld [vmem:[%s1666_s24 + $0x40] sm:$0xff]   ;;  %v1565_v12 = vld [vmem:[%s1666_s24 + $0x8] sm:$0xff]   ;;  %v1574_v15 = vld [vmem:[%s1666_s24 + $0x50] sm:$0xff]  }
  0x22   : > { %1482 = vmatprep.mubr.bf16.mxu0 %v1564_v6  ;;  %1498 = vmatprep.mubr.bf16.mxu1 %v1572_v9  ;;  %v1563_v11 = vld [vmem:[%s1869_s1] sm:$0xff]   ;;  %v1573_v13 = vld [vmem:[%s1666_s24 + $0x48] sm:$0xff]   ;;  %v1567_v16 = vld [vmem:[%s1666_s24 + $0x18] sm:$0xff]  }
  0x23   : > { %v1575_v17 = vld [vmem:[%s1666_s24 + $0x58] sm:$0xff]   ;;  %v1568_v18 = vld [vmem:[%s1666_s24 + $0x20] sm:$0xff]   ;;  %v1569_v20 = vld [vmem:[%s1666_s24 + $0x28] sm:$0xff]  }
  0x24   : > { %1469 = vmatpush3.bf16.msra.mxu0 %v1557_v3  ;;  %1523 = vmatpush3.bf16.msra.mxu1 %v1557_v3  ;;  %v1576_v19 = vld [vmem:[%s1666_s24 + $0x60] sm:$0xff]   ;;  %v1577_v21 = vld [vmem:[%s1666_s24 + $0x68] sm:$0xff]   ;;  %v1570_v22 = vld [vmem:[%s1666_s24 + $0x30] sm:$0xff]  }
  0x25   : > { %1470 = vmatprep.subr.bf16.mxu0 %v1558_v4  ;;  %1516 = vmatprep.subr.bf16.mxu1 %v1558_v4  ;;  %v1578_v23 = vld [vmem:[%s1666_s24 + $0x70] sm:$0xff]   ;;  %v1571_v24 = vld [vmem:[%s1666_s24 + $0x38] sm:$0xff]   ;;  %v351_v27 = vld [vmem:[#allocation2 + $0x40] sm:$0xff] }
  0x26   : > { %v1579_v25 = vld [vmem:[%s1666_s24 + $0x78] sm:$0xff]   ;;  %v333_v29 = vld [vmem:[#allocation2 + $0xb0] sm:$0xff]  ;;  %v352_v37 = vld [vmem:[#allocation2 + $0xc8] sm:$0xff] }
  0x27   : > { %v335_v26 = vld [vmem:[#allocation2 + $0xd8] sm:$0xff]  ;;  %v334_v41 = vld [vmem:[#allocation2] sm:$0xff]  ;;  %v339_v47 = vld [vmem:[#allocation2 + $0x30] sm:$0xff] }
  0x28   : > { %1471 = vmatpush3.bf16.msra.mxu0 %v1558_v4  ;;  %1524 = vmatpush3.bf16.msra.mxu1 %v1558_v4  ;;  %v349_v31 = vld [vmem:[#allocation2 + $0x38] sm:$0xff]  ;;  %v355_v52 = vld [vmem:[#allocation2 + $0x70] sm:$0xff]  ;;  %v353_v62 = vld [vmem:[#allocation2 + $0xe0] sm:$0xff] }
  0x29   : > { %1472 = vmatprep.subr.bf16.mxu0 %v1559_v5  ;;  %1517 = vmatprep.subr.bf16.mxu1 %v1559_v5  ;;  %v336_v35 = vld [vmem:[#allocation2 + $0x18] sm:$0xff]  ;;  %v337_v55 = vld [vmem:[#allocation2 + $0x50] sm:$0xff]  ;;  %v340_v0 = vld [vmem:[#allocation2 + $0x48] sm:$0xff] }
  0x2a   : > { %v350_v45 = vld [vmem:[#allocation2 + $0x58] sm:$0xff] }
  0x2c   : > { %1473 = vmatpush3.bf16.msra.mxu0 %v1559_v5  ;;  %1525 = vmatpush3.bf16.msra.mxu1 %v1559_v5 }
  0x2d   : > { %1474 = vmatprep.subr.bf16.mxu0 %v1560_v7  ;;  %1518 = vmatprep.subr.bf16.mxu1 %v1560_v7 }
  0x30   : > { %1475 = vmatpush3.bf16.msra.mxu0 %v1560_v7  ;;  %1526 = vmatpush3.bf16.msra.mxu1 %v1560_v7 }
  0x31   : > { %1476 = vmatprep.subr.bf16.mxu0 %v1561_v8  ;;  %1519 = vmatprep.subr.bf16.mxu1 %v1561_v8 }
  0x34   : > { %1477 = vmatpush3.bf16.msra.mxu0 %v1561_v8  ;;  %1527 = vmatpush3.bf16.msra.mxu1 %v1561_v8  ;;  %v356_v8 = vld [vmem:[#allocation2 + $0xc0] sm:$0xff] }
  0x35   : > { %1478 = vmatprep.subr.bf16.mxu0 %v1562_v10  ;;  %1520 = vmatprep.subr.bf16.mxu1 %v1562_v10 }
  0x38   : > { %1479 = vmatpush3.bf16.msra.mxu0 %v1562_v10  ;;  %1528 = vmatpush3.bf16.msra.mxu1 %v1562_v10 }
  0x39   : > { %1480 = vmatprep.subr.bf16.mxu0 %v1563_v11  ;;  %1521 = vmatprep.subr.bf16.mxu1 %v1563_v11 }
  0x3c   : > { %1481 = vmatpush3.bf16.msra.mxu0 %v1563_v11  ;;  %1529 = vmatpush3.bf16.msra.mxu1 %v1563_v11 }
  0x3f   : > { %1483 = vmatmul.mubr.bf16.vlgmr.msra.gmra.mxu0 %v1565_v12  ;;  %1499 = vmatmul.mubr.bf16.vlgmr.msra.gmra.mxu1 %v1573_v13 }
  0x40   : > { %1486 = vmatprep.mubr.bf16.mxu0 %v1566_v14  ;;  %1502 = vmatprep.mubr.bf16.mxu1 %v1574_v15 }
  0x47   : > { %1487 = vmatmul.mubr.bf16.gmra.mxu0 %v1567_v16  ;;  %1503 = vmatmul.mubr.bf16.gmra.mxu1 %v1575_v17  ;;  %v338_v16 = vld [vmem:[#allocation2 + $0x68] sm:$0xff]  ;;  %v354_v17 = vld [vmem:[#allocation2 + $0x90] sm:$0xff] }
  0x48   : > { %1490 = vmatprep.mubr.bf16.mxu0 %v1568_v18  ;;  %1506 = vmatprep.mubr.bf16.mxu1 %v1576_v19  ;;  %v343_v19 = vld [vmem:[#allocation2 + $0xe8] sm:$0xff] }
  0x4f   : > { %1491 = vmatmul.mubr.bf16.gmra.mxu0 %v1569_v20  ;;  %1507 = vmatmul.mubr.bf16.gmra.mxu1 %v1577_v21 }
  0x50   : > { %1494 = vmatprep.mubr.bf16.mxu0 %v1570_v22  ;;  %1510 = vmatprep.mubr.bf16.mxu1 %v1578_v23  ;;  %v359_v22 = vld [vmem:[#allocation2 + $0x10] sm:$0xff] }
  0x57   : > { %1495 = vmatmul.mubr.bf16.gmra.mxu0 %v1571_v24  ;;  %1511 = vmatmul.mubr.bf16.gmra.mxu1 %v1579_v25 }
  0xff   : > { %v1484_v28 = vpop.f32.mrf.mxu0  ;;  %v1500_v30 = vpop.f32.mrf.mxu1 }
 0x100   : > { %v720_v32 = vadd.f32 %v1484_v28, %v335_v26  ;;  %v1716_v33 = vadd.f32 %v1500_v30, %v351_v27 }
 0x101   : > { %v591_v34 = vpop.f32.mrf.mxu0  ;;  %v655_v36 = vpop.f32.mrf.mxu1 }
 0x102   : > { %752 = vst [vmem:[#allocation2 + $0xd8] sm:$0xff] %v720_v32  ;;  %v718_v38 = vadd.f32 %v591_v34, %v333_v29  ;;  %768 = vst [vmem:[#allocation2 + $0x40] sm:$0xff] %v1716_v33  ;;  %v1719_v39 = vadd.f32 %v655_v36, %v349_v31  ;;  %v1020_v4 = vmul.f32 %v720_v32, %v720_v32  ;;  %v341_v29 = vld [vmem:[#allocation2 + $0x80] sm:$0xff] }
 0x103   : > { %v1485_v40 = vpop.f32.mrf.mxu0  ;;  %v1501_v42 = vpop.f32.mrf.mxu1 }
 0x104   : > { %750 = vst [vmem:[#allocation2 + $0xb0] sm:$0xff] %v718_v38  ;;  %v721_v43 = vadd.f32 %v1485_v40, %v336_v35  ;;  %766 = vst [vmem:[#allocation2 + $0x38] sm:$0xff] %v1719_v39  ;;  %v1722_v44 = vadd.f32 %v1501_v42, %v352_v37  ;;  %v1018_v53 = vmul.f32 %v718_v38, %v718_v38  ;;  %v357_v37 = vld [vmem:[#allocation2 + $0xa8] sm:$0xff] }
 0x105   : > { %v594_v46 = vpop.f32.mrf.mxu0  ;;  %v658_v48 = vpop.f32.mrf.mxu1 }
 0x106   : > { %753 = vst [vmem:[#allocation2 + $0x18] sm:$0xff] %v721_v43  ;;  %v1355_v49 = vpack.c.bf16 %v721_v43, %v720_v32  ;;  %v719_v50 = vadd.f32 %v594_v46, %v334_v41  ;;  %769 = vst [vmem:[#allocation2 + $0xc8] sm:$0xff] %v1722_v44  ;;  %v1395_v51 = vpack.c.bf16 %v1722_v44, %v1716_v33 }
 0x107   : > { %v1488_v54 = vpop.f32.mrf.mxu0  ;;  %v1727_v56 = vadd.f32 %v658_v48, %v350_v45  ;;  %v1504_v57 = vpop.f32.mrf.mxu1  ;;  %v1021_v12 = vmul.f32 %v721_v43, %v721_v43 }
 0x108   : > { %1427 = vst [vmem:[%s1671_s27 + $0x8] sm:$0xff] %v1355_v49   ;;  %751 = vst [vmem:[#allocation2] sm:$0xff] %v719_v50  ;;  %v1350_v58 = vpack.c.bf16 %v719_v50, %v718_v38  ;;  %v978_v59 = vadd.f32 %v719_v50, %v718_v38  ;;  %v1019_v60 = vmul.f32 %v719_v50, %v719_v50 }
 0x109   : > { %v1730_v61 = vadd.f32 %v1488_v54, %v339_v47  ;;  %1435 = vst [vmem:[%s1671_s27 + $0x48] sm:$0xff] %v1395_v51   ;;  %v607_v63 = vpop.f32.mrf.mxu0  ;;  %767 = vst [vmem:[#allocation2 + $0x58] sm:$0xff] %v1727_v56  ;;  %v1390_v1 = vpack.c.bf16 %v1727_v56, %v1719_v39  ;;  %v1736_v2 = vadd.f32 %v1504_v57, %v355_v52  ;;  %v671_v3 = vpop.f32.mrf.mxu1  ;;  %v360_v47 = vld [vmem:[#allocation2 + $0x28] sm:$0xff] }
 0x10a   : > { %1351 = vst [vmem:[%s1671_s27] sm:$0xff] %v1350_v58   ;;  %v979_v5 = vadd.f32 %v978_v59, %v720_v32  ;;  %v1050_v6 = vadd.f32 %v1019_v60, %v1018_v53  ;;  %v722_v7 = vadd.f32 %v607_v63, %v337_v55  ;;  %v1742_v10 = vadd.f32 %v671_v3, %v353_v62  ;;  %v342_v53 = vld [vmem:[#allocation2 + $0x88] sm:$0xff]  ;;  %v358_v59 = vld [vmem:[#allocation2 + $0xd0] sm:$0xff]  ;;  %v363_v3 = vld [vmem:[#allocation2 + $0x20] sm:$0xff] }
 0x10b   : > { %756 = vst [vmem:[#allocation2 + $0x30] sm:$0xff] %v1730_v61  ;;  %v1489_v9 = vpop.f32.mrf.mxu0  ;;  %1434 = vst [vmem:[%s1671_s27 + $0x40] sm:$0xff] %v1390_v1   ;;  %v1505_v11 = vpop.f32.mrf.mxu1  ;;  %v1024_v49 = vmul.f32 %v1730_v61, %v1730_v61  ;;  %v347_v1 = vld [vmem:[#allocation2 + $0x8] sm:$0xff] }
 0x10c   : > { %772 = vst [vmem:[#allocation2 + $0x70] sm:$0xff] %v1736_v2  ;;  %v1051_v13 = vadd.f32 %v1050_v6, %v1020_v4  ;;  %754 = vst [vmem:[#allocation2 + $0x50] sm:$0xff] %v722_v7  ;;  %v980_v14 = vadd.f32 %v979_v5, %v721_v43  ;;  %v725_v15 = vadd.f32 %v1489_v9, %v340_v0  ;;  %v344_v43 = vld [vmem:[#allocation2 + $0xb8] sm:$0xff] }
 0x10d   : > { %v610_v18 = vpop.f32.mrf.mxu0  ;;  %770 = vst [vmem:[#allocation2 + $0xe0] sm:$0xff] %v1742_v10  ;;  %v1745_v20 = vadd.f32 %v1505_v11, %v356_v8  ;;  %v674_v21 = vpop.f32.mrf.mxu1  ;;  %v1022_v24 = vmul.f32 %v722_v7, %v722_v7 }
 0x10e   : > { %v981_v23 = vadd.f32 %v980_v14, %v722_v7  ;;  %v1052_v25 = vadd.f32 %v1051_v13, %v1021_v12  ;;  %757 = vst [vmem:[#allocation2 + $0x48] sm:$0xff] %v725_v15  ;;  %v1365_v26 = vpack.c.bf16 %v725_v15, %v1730_v61  ;;  %v723_v27 = vadd.f32 %v610_v18, %v338_v16  ;;  %v345_v12 = vld [vmem:[#allocation2 + $0x60] sm:$0xff] }
 0x10f   : > { %v1492_v28 = vpop.f32.mrf.mxu0  ;;  %773 = vst [vmem:[#allocation2 + $0xc0] sm:$0xff] %v1745_v20  ;;  %v1405_v30 = vpack.c.bf16 %v1745_v20, %v1736_v2  ;;  %v1751_v31 = vadd.f32 %v674_v21, %v354_v17  ;;  %v1508_v32 = vpop.f32.mrf.mxu1  ;;  %v1025_v60 = vmul.f32 %v725_v15, %v725_v15 }
 0x110   : > { %v1053_v34 = vadd.f32 %v1052_v25, %v1022_v24  ;;  %1429 = vst [vmem:[%s1671_s27 + $0x18] sm:$0xff] %v1365_v26   ;;  %v1754_v35 = vadd.f32 %v1492_v28, %v343_v19  ;;  %v1756_v36 = vadd.f32 %v1508_v32, %v359_v22  ;;  %755 = vst [vmem:[#allocation2 + $0x68] sm:$0xff] %v723_v27  ;;  %v348_v24 = vld [vmem:[#allocation2 + $0x78] sm:$0xff] }
 0x111   : > { %v1360_v38 = vpack.c.bf16 %v723_v27, %v722_v7  ;;  %v982_v40 = vadd.f32 %v981_v23, %v723_v27  ;;  %v1023_v41 = vmul.f32 %v723_v27, %v723_v27  ;;  %v623_v42 = vpop.f32.mrf.mxu0  ;;  %1437 = vst [vmem:[%s1671_s27 + $0x58] sm:$0xff] %v1405_v30   ;;  %771 = vst [vmem:[#allocation2 + $0x90] sm:$0xff] %v1751_v31  ;;  %v687_v46 = vpop.f32.mrf.mxu1  ;;  %v364_v27 = vld [vmem:[#allocation2 + $0x98] sm:$0xff] }
 0x112   : > { %v1400_v45 = vpack.c.bf16 %v1751_v31, %v1742_v10  ;;  %760 = vst [vmem:[#allocation2 + $0xe8] sm:$0xff] %v1754_v35  ;;  %v726_v48 = vadd.f32 %v623_v42, %v341_v29  ;;  %776 = vst [vmem:[#allocation2 + $0x10] sm:$0xff] %v1756_v36  ;;  %v1769_v54 = vadd.f32 %v687_v46, %v357_v37 }
 0x113   : > { %1428 = vst [vmem:[%s1671_s27 + $0x10] sm:$0xff] %v1360_v38   ;;  %v983_v50 = vadd.f32 %v982_v40, %v1730_v61  ;;  %v1054_v51 = vadd.f32 %v1053_v34, %v1023_v41  ;;  %v1493_v52 = vpop.f32.mrf.mxu0  ;;  %v1509_v55 = vpop.f32.mrf.mxu1  ;;  %v1028_v30 = vmul.f32 %v1754_v35, %v1754_v35  ;;  %v346_v38 = vld [vmem:[#allocation2 + $0xf0] sm:$0xff] }
 0x114   : > { %1436 = vst [vmem:[%s1671_s27 + $0x50] sm:$0xff] %v1400_v45   ;;  %758 = vst [vmem:[#allocation2 + $0x80] sm:$0xff] %v726_v48  ;;  %v729_v57 = vadd.f32 %v1493_v52, %v344_v43  ;;  %v1771_v58 = vadd.f32 %v1509_v55, %v360_v47  ;;  %v1026_v8 = vmul.f32 %v726_v48, %v726_v48  ;;  %v362_v43 = vld [vmem:[#allocation2 + $0xf8] sm:$0xff] }
 0x115   : > { %v1055_v62 = vadd.f32 %v1054_v51, %v1024_v49  ;;  %v984_v63 = vadd.f32 %v983_v50, %v725_v15  ;;  %v626_v0 = vpop.f32.mrf.mxu0  ;;  %774 = vst [vmem:[#allocation2 + $0xa8] sm:$0xff] %v1769_v54  ;;  %v690_v61 = vpop.f32.mrf.mxu1  ;;  %v361_v15 = vld [vmem:[#allocation2 + $0xa0] sm:$0xff] }
 0x116   : > { %761 = vst [vmem:[#allocation2 + $0xb8] sm:$0xff] %v729_v57  ;;  %v1375_v4 = vpack.c.bf16 %v729_v57, %v1754_v35  ;;  %v727_v5 = vadd.f32 %v626_v0, %v342_v53  ;;  %777 = vst [vmem:[#allocation2 + $0x28] sm:$0xff] %v1771_v58  ;;  %v1415_v6 = vpack.c.bf16 %v1771_v58, %v1756_v36 }
 0x117   : > { %v985_v7 = vadd.f32 %v984_v63, %v726_v48  ;;  %v1056_v9 = vadd.f32 %v1055_v62, %v1025_v60  ;;  %v1496_v11 = vpop.f32.mrf.mxu0  ;;  %v1778_v13 = vadd.f32 %v690_v61, %v358_v59  ;;  %v1512_v14 = vpop.f32.mrf.mxu1  ;;  %v1029_v45 = vmul.f32 %v729_v57, %v729_v57 }
 0x118   : > { %1431 = vst [vmem:[%s1671_s27 + $0x28] sm:$0xff] %v1375_v4   ;;  %759 = vst [vmem:[#allocation2 + $0x88] sm:$0xff] %v727_v5  ;;  %v1370_v16 = vpack.c.bf16 %v727_v5, %v726_v48  ;;  %v1027_v17 = vmul.f32 %v727_v5, %v727_v5  ;;  %v732_v18 = vadd.f32 %v1496_v11, %v347_v1 }
 0x119   : > { %1439 = vst [vmem:[%s1671_s27 + $0x68] sm:$0xff] %v1415_v6   ;;  %v1782_v19 = vadd.f32 %v1512_v14, %v363_v3  ;;  %v1057_v21 = vadd.f32 %v1056_v9, %v1026_v8  ;;  %v986_v22 = vadd.f32 %v985_v7, %v727_v5  ;;  %v639_v23 = vpop.f32.mrf.mxu0  ;;  %775 = vst [vmem:[#allocation2 + $0xd0] sm:$0xff] %v1778_v13  ;;  %v703_v26 = vpop.f32.mrf.mxu1 }
 0x11a   : > { %v1410_v25 = vpack.c.bf16 %v1778_v13, %v1769_v54  ;;  %1430 = vst [vmem:[%s1671_s27 + $0x20] sm:$0xff] %v1370_v16   ;;  %764 = vst [vmem:[#allocation2 + $0x8] sm:$0xff] %v732_v18  ;;  %v730_v28 = vadd.f32 %v639_v23, %v345_v12  ;;  %v1789_v29 = vadd.f32 %v703_v26, %v361_v15 }
 0x11b   : > { %780 = vst [vmem:[#allocation2 + $0x20] sm:$0xff] %v1782_v19  ;;  %v987_v32 = vadd.f32 %v986_v22, %v1754_v35  ;;  %v1058_v34 = vadd.f32 %v1057_v21, %v1027_v17  ;;  %v1497_v37 = vpop.f32.mrf.mxu0  ;;  %v1513_v40 = vpop.f32.mrf.mxu1  ;;  %v1032_v1 = vmul.f32 %v732_v18, %v732_v18  ;;  %v1034_v7 = vmul.f32 %v1719_v39, %v1719_v39 }
 0x11c   : > { %1438 = vst [vmem:[%s1671_s27 + $0x60] sm:$0xff] %v1410_v25   ;;  %762 = vst [vmem:[#allocation2 + $0x60] sm:$0xff] %v730_v28  ;;  %v733_v41 = vadd.f32 %v1497_v37, %v348_v24  ;;  %v1796_v42 = vadd.f32 %v1513_v40, %v364_v27  ;;  %v1030_v53 = vmul.f32 %v730_v28, %v730_v28 }
 0x11d   : > { %778 = vst [vmem:[#allocation2 + $0xa0] sm:$0xff] %v1789_v29  ;;  %v1059_v46 = vadd.f32 %v1058_v34, %v1028_v30  ;;  %v988_v47 = vadd.f32 %v987_v32, %v729_v57  ;;  %v642_v48 = vpop.f32.mrf.mxu0  ;;  %v706_v49 = vpop.f32.mrf.mxu1  ;;  %v1035_v12 = vmul.f32 %v1727_v56, %v1727_v56  ;;  %v1036_v15 = vmul.f32 %v1716_v33, %v1716_v33 }
 0x11e   : > { %765 = vst [vmem:[#allocation2 + $0x78] sm:$0xff] %v733_v41  ;;  %v1385_v35 = vpack.c.bf16 %v733_v41, %v732_v18  ;;  %v731_v50 = vadd.f32 %v642_v48, %v346_v38  ;;  %781 = vst [vmem:[#allocation2 + $0x98] sm:$0xff] %v1796_v42  ;;  %v1425_v51 = vpack.c.bf16 %v1796_v42, %v1782_v19 }
 0x11f   : > { %v989_v52 = vadd.f32 %v988_v47, %v730_v28  ;;  %v1060_v55 = vadd.f32 %v1059_v46, %v1029_v45  ;;  %v747_v59 = vadd.f32 %v706_v49, %v362_v43  ;;  %v1033_v4 = vmul.f32 %v733_v41, %v733_v41 }
 0x120   : > { %1433 = vst [vmem:[%s1671_s27 + $0x38] sm:$0xff] %v1385_v35   ;;  %763 = vst [vmem:[#allocation2 + $0xf0] sm:$0xff] %v731_v50  ;;  %v1380_v57 = vpack.c.bf16 %v731_v50, %v730_v28  ;;  %v1031_v60 = vmul.f32 %v731_v50, %v731_v50  ;;  %v1038_v23 = vmul.f32 %v1742_v10, %v1742_v10 }
 0x121   : > { %1441 = vst [vmem:[%s1671_s27 + $0x78] sm:$0xff] %v1425_v51   ;;  %v1061_v62 = vadd.f32 %v1060_v55, %v1030_v53  ;;  %v990_v63 = vadd.f32 %v989_v52, %v731_v50  ;;  %779 = vst [vmem:[#allocation2 + $0xf8] sm:$0xff] %v747_v59  ;;  %v1420_v0 = vpack.c.bf16 %v747_v59, %v1789_v29 }
 0x122   : > { %1432 = vst [vmem:[%s1671_s27 + $0x30] sm:$0xff] %v1380_v57   ;;  %v1039_v26 = vmul.f32 %v1751_v31, %v1751_v31  ;;  %v1042_v34 = vmul.f32 %v1769_v54, %v1769_v54  ;;  %v1043_v40 = vmul.f32 %v1778_v13, %v1778_v13  ;;  %v1046_v47 = vmul.f32 %v1789_v29, %v1789_v29 }
 0x123   : > { %v991_v61 = vadd.f32 %v990_v63, %v732_v18  ;;  %v1062_v3 = vadd.f32 %v1061_v62, %v1031_v60  ;;  %1440 = vst [vmem:[%s1671_s27 + $0x70] sm:$0xff] %v1420_v0   ;;  %v1037_v18 = vmul.f32 %v1722_v44, %v1722_v44  ;;  %v1047_v35 = vmul.f32 %v747_v59, %v747_v59 }
 0x124   : > { %v1048_v50 = vmul.f32 %v1782_v19, %v1782_v19  ;;  %v1049_v52 = vmul.f32 %v1796_v42, %v1796_v42 }
 0x125   : > { %v1063_v5 = vadd.f32 %v1062_v3, %v1032_v1  ;;  %v992_v6 = vadd.f32 %v991_v61, %v733_v41  ;;  %v977_v3 = vld [vmem:[#allocation3] sm:$0x1] }
 0x127   : > { %v993_v8 = vadd.f32 %v992_v6, %v1719_v39  ;;  %v1064_v9 = vadd.f32 %v1063_v5, %v1033_v4  ;;  %v1017_v5 = vld [vmem:[#allocation4] sm:$0x1] }
 0x129   : > { %v994_v11 = vadd.f32 %v993_v8, %v1727_v56  ;;  %v1065_v14 = vadd.f32 %v1064_v9, %v1034_v7 }
 0x12b   : > { %v995_v16 = vadd.f32 %v994_v11, %v1716_v33  ;;  %v1066_v17 = vadd.f32 %v1065_v14, %v1035_v12  ;;  %v1040_v33 = vmul.f32 %v1736_v2, %v1736_v2 }
 0x12d   : > { %v1067_v21 = vadd.f32 %v1066_v17, %v1036_v15  ;;  %v996_v22 = vadd.f32 %v995_v16, %v1722_v44  ;;  %v1041_v44 = vmul.f32 %v1745_v20, %v1745_v20 }
 0x12f   : > { %v997_v39 = vadd.f32 %v996_v22, %v1742_v10  ;;  %v1068_v24 = vadd.f32 %v1067_v21, %v1037_v18 }
 0x131   : > { %v1069_v56 = vadd.f32 %v1068_v24, %v1038_v23  ;;  %v998_v25 = vadd.f32 %v997_v39, %v1751_v31 }
 0x133   : > { %v999_v27 = vadd.f32 %v998_v25, %v1736_v2  ;;  %v1070_v28 = vadd.f32 %v1069_v56, %v1039_v26  ;;  %v1044_v2 = vmul.f32 %v1756_v36, %v1756_v36 }
 0x135   : > { %v1071_v30 = vadd.f32 %v1070_v28, %v1040_v33  ;;  %v1000_v32 = vadd.f32 %v999_v27, %v1745_v20  ;;  %v1045_v20 = vmul.f32 %v1771_v58, %v1771_v58 }
 0x137   : > { %v1001_v10 = vadd.f32 %v1000_v32, %v1769_v54  ;;  %v1072_v37 = vadd.f32 %v1071_v30, %v1041_v44 }
 0x139   : > { %v1073_v38 = vadd.f32 %v1072_v37, %v1042_v34  ;;  %v1002_v31 = vadd.f32 %v1001_v10, %v1778_v13 }
 0x13b   : > { %v1003_v41 = vadd.f32 %v1002_v31, %v1756_v36  ;;  %v1074_v43 = vadd.f32 %v1073_v38, %v1043_v40 }
 0x13d   : > { %v1075_v45 = vadd.f32 %v1074_v43, %v1044_v2  ;;  %v1004_v46 = vadd.f32 %v1003_v41, %v1771_v58 }
 0x13f   : > { %v1005_v54 = vadd.f32 %v1004_v46, %v1789_v29  ;;  %v1076_v48 = vadd.f32 %v1075_v45, %v1045_v20 }
 0x141   : > { %v1077_v49 = vadd.f32 %v1076_v48, %v1046_v47  ;;  %v1006_v13 = vadd.f32 %v1005_v54, %v747_v59 }
 0x143   : > { %v1007_v36 = vadd.f32 %v1006_v13, %v1782_v19  ;;  %v1078_v51 = vadd.f32 %v1077_v49, %v1047_v35 }
 0x145   : > { %v1008_v58 = vadd.f32 %v1007_v36, %v1796_v42  ;;  %v1079_v53 = vadd.f32 %v1078_v51, %v1048_v50 }
 0x147   : > { %v1009_v55 = vrot.slane %v1008_v58, 4  ;;  %v1080_v57 = vadd.f32 %v1079_v53, %v1049_v52 }
 0x149   : > { %v1010_v60 = vadd.f32 %v1009_v55, %v1008_v58  ;;  %v1081_v29 = vrot.slane %v1080_v57, 4 }
 0x14b   : > { %v1011_v62 = vrot.slane %v1010_v60, 2  ;;  %v1082_v63 = vadd.f32 %v1081_v29, %v1080_v57 }
 0x14d   : > { %v1012_v0 = vadd.f32 %v1011_v62, %v1010_v60  ;;  %v1083_v59 = vrot.slane %v1082_v63, 2 }
 0x14f   : > { %v1013_v1 = vrot.slane %v1012_v0, 1  ;;  %v1084_v61 = vadd.f32 %v1083_v59, %v1082_v63 }
 0x151   : > { %v1014_v4 = vadd.f32 %v1013_v1, %v1012_v0  ;;  %v1085_v19 = vrot.slane %v1084_v61, 1 }
 0x153   : > { %v1015_v6 = vadd.f32 %v1014_v4, %v977_v3  ;;  %v1086_v7 = vadd.f32 %v1085_v19, %v1084_v61  ;;  %1093 = sbr.rel (!%p1089_p6) target bundleno = 352 (0x160), region = 44 }
 0x155   : > { %1016 = vst [vmem:[#allocation3] sm:$0x1] %v1015_v6  ;;  %v1087_v8 = vadd.f32 %v1086_v7, %v1017_v5 }
 0x157   : > { %1088 = vst [vmem:[#allocation4] sm:$0x1] %v1087_v8 }
 0x15c   : > { %v1094_v42 = vld [vmem:[#allocation3] sm:$0x1] }
 0x15d   : > { %1095 = vst [vmem:[%s1871_s3] sm:$0x1] %v1094_v42 }
 0x15e   : > { %v1096_v9 = vld [vmem:[#allocation4] sm:$0x1] }
 0x15f   : > { %1097 = vst [vmem:[%s1872_s4] sm:$0x1] %v1096_v9 }
 0x160 PF: > { %s15_s17 = sadd.s32 1, %s1602_s17   ;;  %s1874_s15 = smov %s1598_s16 }
 0x161   : > { %p12_p7 = scmp.ge.s32.totalorder %s15_s17, 4   ;;  %s1875_s16 = smov %s1877_s18 }
 0x163   :  { %14 = sbr.rel (!%p12_p7) target bundleno = 2 (0x2), region = 101 }

// kernel: critic_forward.9
= control target key start
LH: loop header
LB: loop body
LE: loop exit
PB: predicated region body
PF: predicated region fallthrough
CT: control target
= control target key end

     0   :  { %s1631_s0 = inlined_call_operand.vmem [shape: bf16[512,128], index: 0, kind: input, shape index: {}]   ;;  %s1632_s1 = inlined_call_operand.vmem [shape: f32[1,128], index: 1, kind: input, shape index: {}]   ;;  %s1633_s2 = inlined_call_operand.vmem [shape: f32[1,128], index: 2, kind: input, shape index: {}]   ;;  %s1634_s3 = inlined_call_operand.vmem [shape: bf16[512,128], index: 3, kind: output, shape index: {}]  }
   0x1   :  { %v931_v0 = vld [vmem:[%s1631_s0] sm:$0xff]   ;;  %v1218_v4 = vld [vmem:[%s1631_s0 + $0x8] sm:$0xff]   ;;  %v1219_v5 = vld [vmem:[%s1631_s0 + $0x10] sm:$0xff]  }
   0x2   :  { %v1306_v1 = vld [vmem:[%s1632_s1] ss:$0 sm:$0xff]  ;;  %v932_v2 = vunpack.c.l.bf16 %v931_v0  ;;  %v933_v3 = vunpack.c.h.bf16 %v931_v0  ;;  %v1220_v6 = vld [vmem:[%s1631_s0 + $0x18] sm:$0xff]   ;;  %v936_v8 = vunpack.c.l.bf16 %v1218_v4  ;;  %v937_v9 = vunpack.c.h.bf16 %v1218_v4  ;;  %v1222_v35 = vld [vmem:[%s1631_s0 + $0x28] sm:$0xff]  }
   0x3   :  { %v1320_v7 = vld [vmem:[%s1633_s2] ss:$0 sm:$0xff]  ;;  %v940_v10 = vunpack.c.l.bf16 %v1219_v5  ;;  %v941_v11 = vunpack.c.h.bf16 %v1219_v5  ;;  %v944_v14 = vunpack.c.l.bf16 %v1220_v6  ;;  %v945_v15 = vunpack.c.h.bf16 %v1220_v6  ;;  %v1223_v48 = vld [vmem:[%s1631_s0 + $0x30] sm:$0xff]   ;;  %v1224_v4 = vld [vmem:[%s1631_s0 + $0x38] sm:$0xff]  }
   0x4   :  { %v149_v12 = vmul.f32 %v932_v2, %v1306_v1  ;;  %v150_v13 = vmul.f32 %v933_v3, %v1306_v1  ;;  %v151_v16 = vmul.f32 %v936_v8, %v1306_v1  ;;  %v152_v17 = vmul.f32 %v937_v9, %v1306_v1  ;;  %v1221_v34 = vld [vmem:[%s1631_s0 + $0x20] sm:$0xff]  }
   0x5   :  { %v153_v18 = vmul.f32 %v940_v10, %v1306_v1  ;;  %v154_v19 = vmul.f32 %v941_v11, %v1306_v1  ;;  %v155_v22 = vmul.f32 %v944_v14, %v1306_v1  ;;  %v156_v23 = vmul.f32 %v945_v15, %v1306_v1  ;;  %v1225_v15 = vld [vmem:[%s1631_s0 + $0x40] sm:$0xff]  }
   0x6   :  { %v220_v20 = vadd.f32 %v1320_v7, %v149_v12  ;;  %v221_v21 = vadd.f32 %v1320_v7, %v150_v13  ;;  %v222_v24 = vadd.f32 %v1320_v7, %v151_v16  ;;  %v223_v25 = vadd.f32 %v1320_v7, %v152_v17 }
   0x7   :  { %v224_v26 = vadd.f32 %v1320_v7, %v153_v18  ;;  %v225_v27 = vadd.f32 %v1320_v7, %v154_v19  ;;  %v226_v42 = vadd.f32 %v1320_v7, %v155_v22  ;;  %v227_v43 = vadd.f32 %v1320_v7, %v156_v23 }
   0x8   :  { %vm284_vm0 = vcmp.ge.f32.partialorder %v220_v20, 0.0  ;;  %vm285_vm1 = vcmp.ge.f32.partialorder %v221_v21, 0.0  ;;  %v348_v28 = vmul.f32 0.2, %v220_v20  ;;  %v349_v29 = vmul.f32 0.2, %v221_v21 }
   0x9   :  { %vm286_vm2 = vcmp.ge.f32.partialorder %v222_v24, 0.0  ;;  %vm287_vm3 = vcmp.ge.f32.partialorder %v223_v25, 0.0  ;;  %v350_v30 = vmul.f32 0.2, %v222_v24  ;;  %v351_v31 = vmul.f32 0.2, %v223_v25 }
   0xa   :  { %v412_v32 = vsel %vm284_vm0, %v220_v20, %v348_v28  ;;  %v413_v33 = vsel %vm285_vm1, %v221_v21, %v349_v29  ;;  %vm288_vm4 = vcmp.ge.f32.partialorder %v224_v26, 0.0  ;;  %vm289_vm5 = vcmp.ge.f32.partialorder %v225_v27, 0.0 }
   0xb   :  { %v1061_v36 = vpack.c.bf16 %v413_v33, %v412_v32  ;;  %v414_v37 = vsel %vm286_vm2, %v222_v24, %v350_v30  ;;  %v415_v38 = vsel %vm287_vm3, %v223_v25, %v351_v31  ;;  %v352_v39 = vmul.f32 0.2, %v224_v26 }
   0xc   :  { %v1066_v40 = vpack.c.bf16 %v415_v38, %v414_v37  ;;  %v353_v41 = vmul.f32 0.2, %v225_v27  ;;  %v948_v45 = vunpack.c.l.bf16 %v1221_v34  ;;  %v949_v46 = vunpack.c.h.bf16 %v1221_v34 }
   0xd   :  { %1062 = vst [vmem:[%s1634_s3] sm:$0xff] %v1061_v36   ;;  %v416_v44 = vsel %vm288_vm4, %v224_v26, %v352_v39  ;;  %v952_v47 = vunpack.c.l.bf16 %v1222_v35  ;;  %vm290_vm6 = vcmp.ge.f32.partialorder %v226_v42, 0.0  ;;  %vm291_vm7 = vcmp.ge.f32.partialorder %v227_v43, 0.0  ;;  %v1226_v26 = vld [vmem:[%s1631_s0 + $0x48] sm:$0xff]  }
   0xe   :  { %1249 = vst [vmem:[%s1634_s3 + $0x8] sm:$0xff] %v1066_v40   ;;  %v417_v49 = vsel %vm289_vm5, %v225_v27, %v353_v41  ;;  %v354_v50 = vmul.f32 0.2, %v226_v42  ;;  %v355_v52 = vmul.f32 0.2, %v227_v43  ;;  %v157_v53 = vmul.f32 %v948_v45, %v1306_v1  ;;  %v1227_v27 = vld [vmem:[%s1631_s0 + $0x50] sm:$0xff]  }
   0xf   :  { %v1071_v51 = vpack.c.bf16 %v417_v49, %v416_v44  ;;  %v158_v54 = vmul.f32 %v949_v46, %v1306_v1  ;;  %v953_v56 = vunpack.c.h.bf16 %v1222_v35  ;;  %v159_v57 = vmul.f32 %v952_v47, %v1306_v1 }
  0x10   :  { %v418_v55 = vsel %vm290_vm6, %v226_v42, %v354_v50  ;;  %v956_v58 = vunpack.c.l.bf16 %v1223_v48  ;;  %v419_v59 = vsel %vm291_vm7, %v227_v43, %v355_v52  ;;  %v228_v60 = vadd.f32 %v1320_v7, %v157_v53 }
  0x11   :  { %1250 = vst [vmem:[%s1634_s3 + $0x10] sm:$0xff] %v1071_v51   ;;  %v229_v61 = vadd.f32 %v1320_v7, %v158_v54  ;;  %v957_v62 = vunpack.c.h.bf16 %v1223_v48  ;;  %v1076_v63 = vpack.c.bf16 %v419_v59, %v418_v55  ;;  %v160_v0 = vmul.f32 %v953_v56, %v1306_v1  ;;  %v1228_v55 = vld [vmem:[%s1631_s0 + $0x58] sm:$0xff]  }
  0x12   :  { %v230_v2 = vadd.f32 %v1320_v7, %v159_v57  ;;  %v161_v3 = vmul.f32 %v956_v58, %v1306_v1  ;;  %vm292_vm8 = vcmp.ge.f32.partialorder %v228_v60, 0.0  ;;  %v356_v5 = vmul.f32 0.2, %v228_v60 }
  0x13   :  { %vm293_vm9 = vcmp.ge.f32.partialorder %v229_v61, 0.0  ;;  %v357_v6 = vmul.f32 0.2, %v229_v61  ;;  %1251 = vst [vmem:[%s1634_s3 + $0x18] sm:$0xff] %v1076_v63   ;;  %v231_v8 = vadd.f32 %v1320_v7, %v160_v0  ;;  %v162_v10 = vmul.f32 %v957_v62, %v1306_v1 }
  0x14   :  { %vm294_vm10 = vcmp.ge.f32.partialorder %v230_v2, 0.0  ;;  %v358_v9 = vmul.f32 0.2, %v230_v2  ;;  %v420_v11 = vsel %vm292_vm8, %v228_v60, %v356_v5  ;;  %v232_v13 = vadd.f32 %v1320_v7, %v161_v3  ;;  %v1229_v60 = vld [vmem:[%s1631_s0 + $0x60] sm:$0xff]  }
  0x15   :  { %v421_v12 = vsel %vm293_vm9, %v229_v61, %v357_v6  ;;  %v960_v14 = vunpack.c.l.bf16 %v1224_v4  ;;  %vm295_vm11 = vcmp.ge.f32.partialorder %v231_v8, 0.0  ;;  %v359_v17 = vmul.f32 0.2, %v231_v8 }
  0x16   :  { %v1081_v16 = vpack.c.bf16 %v421_v12, %v420_v11  ;;  %v422_v18 = vsel %vm294_vm10, %v230_v2, %v358_v9  ;;  %v233_v19 = vadd.f32 %v1320_v7, %v162_v10  ;;  %vm296_vm12 = vcmp.ge.f32.partialorder %v232_v13, 0.0  ;;  %v1230_v9 = vld [vmem:[%s1631_s0 + $0x68] sm:$0xff]  }
  0x17   :  { %v360_v20 = vmul.f32 0.2, %v232_v13  ;;  %v961_v21 = vunpack.c.h.bf16 %v1224_v4  ;;  %v423_v22 = vsel %vm295_vm11, %v231_v8, %v359_v17  ;;  %v163_v23 = vmul.f32 %v960_v14, %v1306_v1 }
  0x18   :  { %1252 = vst [vmem:[%s1634_s3 + $0x20] sm:$0xff] %v1081_v16   ;;  %v964_v24 = vunpack.c.l.bf16 %v1225_v15  ;;  %v965_v25 = vunpack.c.h.bf16 %v1225_v15  ;;  %v1086_v28 = vpack.c.bf16 %v423_v22, %v422_v18  ;;  %vm297_vm13 = vcmp.ge.f32.partialorder %v233_v19, 0.0 }
  0x19   :  { %v361_v29 = vmul.f32 0.2, %v233_v19  ;;  %v424_v30 = vsel %vm296_vm12, %v232_v13, %v360_v20  ;;  %v164_v31 = vmul.f32 %v961_v21, %v1306_v1  ;;  %v234_v32 = vadd.f32 %v1320_v7, %v163_v23 }
  0x1a   :  { %v165_v33 = vmul.f32 %v964_v24, %v1306_v1  ;;  %v166_v34 = vmul.f32 %v965_v25, %v1306_v1  ;;  %1253 = vst [vmem:[%s1634_s3 + $0x28] sm:$0xff] %v1086_v28   ;;  %v968_v36 = vunpack.c.l.bf16 %v1226_v26  ;;  %v969_v37 = vunpack.c.h.bf16 %v1226_v26  ;;  %v1231_v28 = vld [vmem:[%s1631_s0 + $0x70] sm:$0xff]  }
  0x1b   :  { %v425_v35 = vsel %vm297_vm13, %v233_v19, %v361_v29  ;;  %v972_v38 = vunpack.c.l.bf16 %v1227_v27  ;;  %v235_v40 = vadd.f32 %v1320_v7, %v164_v31  ;;  %vm298_vm14 = vcmp.ge.f32.partialorder %v234_v32, 0.0 }
  0x1c   :  { %v1091_v39 = vpack.c.bf16 %v425_v35, %v424_v30  ;;  %v362_v41 = vmul.f32 0.2, %v234_v32  ;;  %v236_v42 = vadd.f32 %v1320_v7, %v165_v33  ;;  %v237_v43 = vadd.f32 %v1320_v7, %v166_v34 }
  0x1d   :  { %v167_v44 = vmul.f32 %v968_v36, %v1306_v1  ;;  %v168_v45 = vmul.f32 %v969_v37, %v1306_v1  ;;  %vm299_vm15 = vcmp.ge.f32.partialorder %v235_v40, 0.0  ;;  %v363_v46 = vmul.f32 0.2, %v235_v40  ;;  %v1232_v37 = vld [vmem:[%s1631_s0 + $0x78] sm:$0xff]  }
  0x1e   :  { %1254 = vst [vmem:[%s1634_s3 + $0x30] sm:$0xff] %v1091_v39   ;;  %v426_v47 = vsel %vm298_vm14, %v234_v32, %v362_v41  ;;  %v973_v48 = vunpack.c.h.bf16 %v1227_v27  ;;  %vm300_vm0 = vcmp.ge.f32.partialorder %v236_v42, 0.0  ;;  %vm301_vm1 = vcmp.ge.f32.partialorder %v237_v43, 0.0 }
  0x1f   :  { %v364_v49 = vmul.f32 0.2, %v236_v42  ;;  %v365_v50 = vmul.f32 0.2, %v237_v43  ;;  %v427_v51 = vsel %vm299_vm15, %v235_v40, %v363_v46  ;;  %v238_v52 = vadd.f32 %v1320_v7, %v167_v44 }
  0x20   :  { %v239_v53 = vadd.f32 %v1320_v7, %v168_v45  ;;  %v169_v54 = vmul.f32 %v972_v38, %v1306_v1  ;;  %v1096_v56 = vpack.c.bf16 %v427_v51, %v426_v47  ;;  %v170_v59 = vmul.f32 %v973_v48, %v1306_v1 }
  0x21   :  { %v428_v57 = vsel %vm300_vm0, %v236_v42, %v364_v49  ;;  %v429_v58 = vsel %vm301_vm1, %v237_v43, %v365_v50  ;;  %vm302_vm2 = vcmp.ge.f32.partialorder %v238_v52, 0.0  ;;  %v366_v62 = vmul.f32 0.2, %v238_v52  ;;  %v1233_v42 = vld [vmem:[%s1631_s0 + $0x80] sm:$0xff]   ;;  %v1234_v50 = vld [vmem:[%s1631_s0 + $0x88] sm:$0xff]  }
  0x22   :  { %v1101_v61 = vpack.c.bf16 %v429_v58, %v428_v57  ;;  %vm303_vm3 = vcmp.ge.f32.partialorder %v239_v53, 0.0  ;;  %1255 = vst [vmem:[%s1634_s3 + $0x38] sm:$0xff] %v1096_v56   ;;  %v367_v63 = vmul.f32 0.2, %v239_v53  ;;  %v240_v0 = vadd.f32 %v1320_v7, %v169_v54 }
  0x23   :  { %v241_v2 = vadd.f32 %v1320_v7, %v170_v59  ;;  %v976_v3 = vunpack.c.l.bf16 %v1228_v55  ;;  %v430_v4 = vsel %vm302_vm2, %v238_v52, %v366_v62  ;;  %v977_v5 = vunpack.c.h.bf16 %v1228_v55 }
  0x24   :  { %1256 = vst [vmem:[%s1634_s3 + $0x40] sm:$0xff] %v1101_v61   ;;  %v980_v6 = vunpack.c.l.bf16 %v1229_v60  ;;  %v981_v8 = vunpack.c.h.bf16 %v1229_v60  ;;  %v431_v10 = vsel %vm303_vm3, %v239_v53, %v367_v63  ;;  %vm304_vm4 = vcmp.ge.f32.partialorder %v240_v0, 0.0 }
  0x25   :  { %vm305_vm5 = vcmp.ge.f32.partialorder %v241_v2, 0.0  ;;  %v368_v11 = vmul.f32 0.2, %v240_v0  ;;  %v1106_v12 = vpack.c.bf16 %v431_v10, %v430_v4  ;;  %v369_v13 = vmul.f32 0.2, %v241_v2 }
  0x26   :  { %v171_v14 = vmul.f32 %v976_v3, %v1306_v1  ;;  %v172_v15 = vmul.f32 %v977_v5, %v1306_v1  ;;  %v173_v17 = vmul.f32 %v980_v6, %v1306_v1  ;;  %v174_v18 = vmul.f32 %v981_v8, %v1306_v1 }
  0x27   :  { %v432_v16 = vsel %vm304_vm4, %v240_v0, %v368_v11  ;;  %v984_v19 = vunpack.c.l.bf16 %v1230_v9  ;;  %1257 = vst [vmem:[%s1634_s3 + $0x48] sm:$0xff] %v1106_v12   ;;  %v433_v20 = vsel %vm305_vm5, %v241_v2, %v369_v13  ;;  %v985_v23 = vunpack.c.h.bf16 %v1230_v9 }
  0x28   :  { %v242_v21 = vadd.f32 %v1320_v7, %v171_v14  ;;  %v243_v22 = vadd.f32 %v1320_v7, %v172_v15  ;;  %v1111_v24 = vpack.c.bf16 %v433_v20, %v432_v16  ;;  %v244_v25 = vadd.f32 %v1320_v7, %v173_v17  ;;  %v1235_v15 = vld [vmem:[%s1631_s0 + $0x90] sm:$0xff]   ;;  %v1236_v20 = vld [vmem:[%s1631_s0 + $0x98] sm:$0xff]  }
  0x29   :  { %v245_v26 = vadd.f32 %v1320_v7, %v174_v18  ;;  %v175_v27 = vmul.f32 %v984_v19, %v1306_v1  ;;  %v176_v35 = vmul.f32 %v985_v23, %v1306_v1  ;;  %v988_v41 = vunpack.c.l.bf16 %v1231_v28 }
  0x2a   :  { %vm306_vm6 = vcmp.ge.f32.partialorder %v242_v21, 0.0  ;;  %vm307_vm7 = vcmp.ge.f32.partialorder %v243_v22, 0.0  ;;  %v370_v29 = vmul.f32 0.2, %v242_v21  ;;  %v371_v30 = vmul.f32 0.2, %v243_v22 }
  0x2b   :  { %1258 = vst [vmem:[%s1634_s3 + $0x50] sm:$0xff] %v1111_v24   ;;  %vm308_vm8 = vcmp.ge.f32.partialorder %v244_v25, 0.0  ;;  %vm309_vm9 = vcmp.ge.f32.partialorder %v245_v26, 0.0  ;;  %v372_v31 = vmul.f32 0.2, %v244_v25  ;;  %v246_v36 = vadd.f32 %v1320_v7, %v175_v27 }
  0x2c   :  { %v373_v32 = vmul.f32 0.2, %v245_v26  ;;  %v434_v33 = vsel %vm306_vm6, %v242_v21, %v370_v29  ;;  %v435_v34 = vsel %vm307_vm7, %v243_v22, %v371_v30  ;;  %v247_v44 = vadd.f32 %v1320_v7, %v176_v35  ;;  %v1237_v21 = vld [vmem:[%s1631_s0 + $0xa0] sm:$0xff]  }
  0x2d   :  { %v1116_v38 = vpack.c.bf16 %v435_v34, %v434_v33  ;;  %v436_v39 = vsel %vm308_vm8, %v244_v25, %v372_v31  ;;  %vm310_vm10 = vcmp.ge.f32.partialorder %v246_v36, 0.0  ;;  %v374_v45 = vmul.f32 0.2, %v246_v36 }
  0x2e   :  { %v437_v40 = vsel %vm309_vm9, %v245_v26, %v373_v32  ;;  %v989_v46 = vunpack.c.h.bf16 %v1231_v28  ;;  %v177_v47 = vmul.f32 %v988_v41, %v1306_v1  ;;  %v992_v48 = vunpack.c.l.bf16 %v1232_v37 }
  0x2f   :  { %v1121_v43 = vpack.c.bf16 %v437_v40, %v436_v39  ;;  %1259 = vst [vmem:[%s1634_s3 + $0x58] sm:$0xff] %v1116_v38   ;;  %v993_v49 = vunpack.c.h.bf16 %v1232_v37  ;;  %vm311_vm11 = vcmp.ge.f32.partialorder %v247_v44, 0.0  ;;  %v375_v51 = vmul.f32 0.2, %v247_v44  ;;  %v1238_v40 = vld [vmem:[%s1631_s0 + $0xa8] sm:$0xff]  }
  0x30   :  { %v438_v52 = vsel %vm310_vm10, %v246_v36, %v374_v45  ;;  %v996_v53 = vunpack.c.l.bf16 %v1233_v42  ;;  %v178_v54 = vmul.f32 %v989_v46, %v1306_v1  ;;  %v248_v55 = vadd.f32 %v1320_v7, %v177_v47 }
  0x31   :  { %1260 = vst [vmem:[%s1634_s3 + $0x60] sm:$0xff] %v1121_v43   ;;  %v179_v56 = vmul.f32 %v992_v48, %v1306_v1  ;;  %v180_v57 = vmul.f32 %v993_v49, %v1306_v1  ;;  %v439_v58 = vsel %vm311_vm11, %v247_v44, %v375_v51  ;;  %v997_v59 = vunpack.c.h.bf16 %v1233_v42 }
  0x32   :  { %v181_v60 = vmul.f32 %v996_v53, %v1306_v1  ;;  %v1000_v61 = vunpack.c.l.bf16 %v1234_v50  ;;  %v1126_v62 = vpack.c.bf16 %v439_v58, %v438_v52  ;;  %v249_v63 = vadd.f32 %v1320_v7, %v178_v54 }
  0x33   :  { %vm312_vm12 = vcmp.ge.f32.partialorder %v248_v55, 0.0  ;;  %v376_v0 = vmul.f32 0.2, %v248_v55  ;;  %v250_v2 = vadd.f32 %v1320_v7, %v179_v56  ;;  %v251_v3 = vadd.f32 %v1320_v7, %v180_v57 }
  0x34   :  { %v182_v4 = vmul.f32 %v997_v59, %v1306_v1  ;;  %v252_v5 = vadd.f32 %v1320_v7, %v181_v60  ;;  %1261 = vst [vmem:[%s1634_s3 + $0x68] sm:$0xff] %v1126_v62   ;;  %vm313_vm13 = vcmp.ge.f32.partialorder %v249_v63, 0.0  ;;  %v377_v6 = vmul.f32 0.2, %v249_v63 }
  0x35   :  { %v440_v8 = vsel %vm312_vm12, %v248_v55, %v376_v0  ;;  %v1001_v9 = vunpack.c.h.bf16 %v1234_v50  ;;  %vm314_vm14 = vcmp.ge.f32.partialorder %v250_v2, 0.0  ;;  %vm315_vm15 = vcmp.ge.f32.partialorder %v251_v3, 0.0  ;;  %v1239_v0 = vld [vmem:[%s1631_s0 + $0xb0] sm:$0xff]  }
  0x36   :  { %v378_v10 = vmul.f32 0.2, %v250_v2  ;;  %v379_v11 = vmul.f32 0.2, %v251_v3  ;;  %v441_v12 = vsel %vm313_vm13, %v249_v63, %v377_v6  ;;  %v253_v13 = vadd.f32 %v1320_v7, %v182_v4 }
  0x37   :  { %vm316_vm0 = vcmp.ge.f32.partialorder %v252_v5, 0.0  ;;  %v380_v14 = vmul.f32 0.2, %v252_v5  ;;  %v1131_v16 = vpack.c.bf16 %v441_v12, %v440_v8  ;;  %v183_v19 = vmul.f32 %v1000_v61, %v1306_v1 }
  0x38   :  { %v442_v17 = vsel %vm314_vm14, %v250_v2, %v378_v10  ;;  %v443_v18 = vsel %vm315_vm15, %v251_v3, %v379_v11  ;;  %vm317_vm1 = vcmp.ge.f32.partialorder %v253_v13, 0.0  ;;  %v381_v23 = vmul.f32 0.2, %v253_v13  ;;  %v1240_v2 = vld [vmem:[%s1631_s0 + $0xb8] sm:$0xff]  }
  0x39   :  { %v1136_v22 = vpack.c.bf16 %v443_v18, %v442_v17  ;;  %v444_v24 = vsel %vm316_vm0, %v252_v5, %v380_v14  ;;  %1262 = vst [vmem:[%s1634_s3 + $0x70] sm:$0xff] %v1131_v16   ;;  %v184_v25 = vmul.f32 %v1001_v9, %v1306_v1  ;;  %v254_v26 = vadd.f32 %v1320_v7, %v183_v19  ;;  %v1241_v18 = vld [vmem:[%s1631_s0 + $0xc0] sm:$0xff]  }
  0x3a   :  { %v1004_v27 = vunpack.c.l.bf16 %v1235_v15  ;;  %v1005_v28 = vunpack.c.h.bf16 %v1235_v15  ;;  %v445_v29 = vsel %vm317_vm1, %v253_v13, %v381_v23  ;;  %v1008_v30 = vunpack.c.l.bf16 %v1236_v20 }
  0x3b   :  { %1263 = vst [vmem:[%s1634_s3 + $0x78] sm:$0xff] %v1136_v22   ;;  %v1009_v31 = vunpack.c.h.bf16 %v1236_v20  ;;  %v1012_v32 = vunpack.c.l.bf16 %v1237_v21  ;;  %v1141_v33 = vpack.c.bf16 %v445_v29, %v444_v24  ;;  %v255_v34 = vadd.f32 %v1320_v7, %v184_v25 }
  0x3c   :  { %vm318_vm2 = vcmp.ge.f32.partialorder %v254_v26, 0.0  ;;  %v382_v35 = vmul.f32 0.2, %v254_v26  ;;  %v185_v36 = vmul.f32 %v1004_v27, %v1306_v1  ;;  %v186_v37 = vmul.f32 %v1005_v28, %v1306_v1 }
  0x3d   :  { %v187_v38 = vmul.f32 %v1008_v30, %v1306_v1  ;;  %v188_v39 = vmul.f32 %v1009_v31, %v1306_v1  ;;  %1264 = vst [vmem:[%s1634_s3 + $0x80] sm:$0xff] %v1141_v33   ;;  %vm319_vm3 = vcmp.ge.f32.partialorder %v255_v34, 0.0  ;;  %v383_v41 = vmul.f32 0.2, %v255_v34 }
  0x3e   :  { %v446_v42 = vsel %vm318_vm2, %v254_v26, %v382_v35  ;;  %v1013_v43 = vunpack.c.h.bf16 %v1237_v21  ;;  %v256_v44 = vadd.f32 %v1320_v7, %v185_v36  ;;  %v257_v45 = vadd.f32 %v1320_v7, %v186_v37  ;;  %v1242_v36 = vld [vmem:[%s1631_s0 + $0xc8] sm:$0xff]  }
  0x3f   :  { %v258_v46 = vadd.f32 %v1320_v7, %v187_v38  ;;  %v259_v47 = vadd.f32 %v1320_v7, %v188_v39  ;;  %v447_v48 = vsel %vm319_vm3, %v255_v34, %v383_v41  ;;  %v189_v49 = vmul.f32 %v1012_v32, %v1306_v1 }
  0x40   :  { %v190_v50 = vmul.f32 %v1013_v43, %v1306_v1  ;;  %v1016_v51 = vunpack.c.l.bf16 %v1238_v40  ;;  %v1146_v52 = vpack.c.bf16 %v447_v48, %v446_v42  ;;  %vm320_vm4 = vcmp.ge.f32.partialorder %v256_v44, 0.0  ;;  %v1243_v42 = vld [vmem:[%s1631_s0 + $0xd0] sm:$0xff]  }
  0x41   :  { %vm321_vm5 = vcmp.ge.f32.partialorder %v257_v45, 0.0  ;;  %v384_v53 = vmul.f32 0.2, %v256_v44  ;;  %v385_v54 = vmul.f32 0.2, %v257_v45  ;;  %vm322_vm6 = vcmp.ge.f32.partialorder %v258_v46, 0.0 }
  0x42   :  { %vm323_vm7 = vcmp.ge.f32.partialorder %v259_v47, 0.0  ;;  %v386_v55 = vmul.f32 0.2, %v258_v46  ;;  %1265 = vst [vmem:[%s1634_s3 + $0x88] sm:$0xff] %v1146_v52   ;;  %v387_v57 = vmul.f32 0.2, %v259_v47  ;;  %v260_v58 = vadd.f32 %v1320_v7, %v189_v49 }
  0x43   :  { %v448_v56 = vsel %vm320_vm4, %v256_v44, %v384_v53  ;;  %v261_v59 = vadd.f32 %v1320_v7, %v190_v50  ;;  %v449_v60 = vsel %vm321_vm5, %v257_v45, %v385_v54  ;;  %v1017_v62 = vunpack.c.h.bf16 %v1238_v40 }
  0x44   :  { %v450_v61 = vsel %vm322_vm6, %v258_v46, %v386_v55  ;;  %v191_v63 = vmul.f32 %v1016_v51, %v1306_v1  ;;  %v1151_v3 = vpack.c.bf16 %v449_v60, %v448_v56  ;;  %v451_v4 = vsel %vm323_vm7, %v259_v47, %v387_v57  ;;  %v1244_v55 = vld [vmem:[%s1631_s0 + $0xd8] sm:$0xff]  }
  0x45   :  { %vm324_vm8 = vcmp.ge.f32.partialorder %v260_v58, 0.0  ;;  %vm325_vm9 = vcmp.ge.f32.partialorder %v261_v59, 0.0  ;;  %v1156_v5 = vpack.c.bf16 %v451_v4, %v450_v61  ;;  %v388_v6 = vmul.f32 0.2, %v260_v58 }
  0x46   :  { %v389_v8 = vmul.f32 0.2, %v261_v59  ;;  %v192_v9 = vmul.f32 %v1017_v62, %v1306_v1  ;;  %1266 = vst [vmem:[%s1634_s3 + $0x90] sm:$0xff] %v1151_v3   ;;  %v262_v10 = vadd.f32 %v1320_v7, %v191_v63  ;;  %v1020_v11 = vunpack.c.l.bf16 %v1239_v0 }
  0x47   :  { %v1021_v12 = vunpack.c.h.bf16 %v1239_v0  ;;  %v1024_v13 = vunpack.c.l.bf16 %v1240_v2  ;;  %1267 = vst [vmem:[%s1634_s3 + $0x98] sm:$0xff] %v1156_v5   ;;  %v452_v14 = vsel %vm324_vm8, %v260_v58, %v388_v6  ;;  %v1025_v17 = vunpack.c.h.bf16 %v1240_v2 }
  0x48   :  { %v453_v15 = vsel %vm325_vm9, %v261_v59, %v389_v8  ;;  %v263_v16 = vadd.f32 %v1320_v7, %v192_v9  ;;  %vm326_vm10 = vcmp.ge.f32.partialorder %v262_v10, 0.0  ;;  %v390_v20 = vmul.f32 0.2, %v262_v10 }
  0x49   :  { %v1161_v19 = vpack.c.bf16 %v453_v15, %v452_v14  ;;  %v193_v21 = vmul.f32 %v1020_v11, %v1306_v1  ;;  %v194_v23 = vmul.f32 %v1021_v12, %v1306_v1  ;;  %v195_v24 = vmul.f32 %v1024_v13, %v1306_v1  ;;  %v1246_v14 = vld [vmem:[%s1631_s0 + $0xe8] sm:$0xff]  }
  0x4a   :  { %vm327_vm11 = vcmp.ge.f32.partialorder %v263_v16, 0.0  ;;  %v391_v22 = vmul.f32 0.2, %v263_v16  ;;  %v454_v25 = vsel %vm326_vm10, %v262_v10, %v390_v20  ;;  %v196_v27 = vmul.f32 %v1025_v17, %v1306_v1  ;;  %v1245_v10 = vld [vmem:[%s1631_s0 + $0xe0] sm:$0xff]  }
  0x4b   :  { %1268 = vst [vmem:[%s1634_s3 + $0xa0] sm:$0xff] %v1161_v19   ;;  %v264_v26 = vadd.f32 %v1320_v7, %v193_v21  ;;  %v1028_v28 = vunpack.c.l.bf16 %v1241_v18  ;;  %v265_v30 = vadd.f32 %v1320_v7, %v194_v23  ;;  %v266_v31 = vadd.f32 %v1320_v7, %v195_v24 }
  0x4c   :  { %v455_v29 = vsel %vm327_vm11, %v263_v16, %v391_v22  ;;  %v1029_v32 = vunpack.c.h.bf16 %v1241_v18  ;;  %v267_v35 = vadd.f32 %v1320_v7, %v196_v27  ;;  %v1032_v46 = vunpack.c.l.bf16 %v1242_v36 }
  0x4d   :  { %v1166_v33 = vpack.c.bf16 %v455_v29, %v454_v25  ;;  %vm328_vm12 = vcmp.ge.f32.partialorder %v264_v26, 0.0  ;;  %v392_v34 = vmul.f32 0.2, %v264_v26  ;;  %vm329_vm13 = vcmp.ge.f32.partialorder %v265_v30, 0.0 }
  0x4e   :  { %v393_v37 = vmul.f32 0.2, %v265_v30  ;;  %vm330_vm14 = vcmp.ge.f32.partialorder %v266_v31, 0.0  ;;  %v394_v38 = vmul.f32 0.2, %v266_v31  ;;  %vm331_vm15 = vcmp.ge.f32.partialorder %v267_v35, 0.0 }
  0x4f   :  { %1269 = vst [vmem:[%s1634_s3 + $0xa8] sm:$0xff] %v1166_v33   ;;  %v456_v39 = vsel %vm328_vm12, %v264_v26, %v392_v34  ;;  %v395_v40 = vmul.f32 0.2, %v267_v35  ;;  %v197_v41 = vmul.f32 %v1028_v28, %v1306_v1  ;;  %v198_v45 = vmul.f32 %v1029_v32, %v1306_v1 }
  0x50   :  { %v457_v43 = vsel %vm329_vm13, %v265_v30, %v393_v37  ;;  %v458_v44 = vsel %vm330_vm14, %v266_v31, %v394_v38  ;;  %v1033_v50 = vunpack.c.h.bf16 %v1242_v36  ;;  %v199_v53 = vmul.f32 %v1032_v46, %v1306_v1  ;;  %v1247_v30 = vld [vmem:[%s1631_s0 + $0xf0] sm:$0xff]  }
  0x51   :  { %v1171_v47 = vpack.c.bf16 %v457_v43, %v456_v39  ;;  %v459_v48 = vsel %vm331_vm15, %v267_v35, %v395_v40  ;;  %v268_v49 = vadd.f32 %v1320_v7, %v197_v41  ;;  %v269_v52 = vadd.f32 %v1320_v7, %v198_v45 }
  0x52   :  { %v1176_v51 = vpack.c.bf16 %v459_v48, %v458_v44  ;;  %v1036_v54 = vunpack.c.l.bf16 %v1243_v42  ;;  %v200_v57 = vmul.f32 %v1033_v50, %v1306_v1  ;;  %v1037_v58 = vunpack.c.h.bf16 %v1243_v42  ;;  %v1248_v44 = vld [vmem:[%s1631_s0 + $0xf8] sm:$0xff]  }
  0x53   :  { %1270 = vst [vmem:[%s1634_s3 + $0xb0] sm:$0xff] %v1171_v47   ;;  %vm332_vm0 = vcmp.ge.f32.partialorder %v268_v49, 0.0  ;;  %v396_v56 = vmul.f32 0.2, %v268_v49  ;;  %vm333_vm1 = vcmp.ge.f32.partialorder %v269_v52, 0.0  ;;  %v270_v60 = vadd.f32 %v1320_v7, %v199_v53 }
  0x54   :  { %1271 = vst [vmem:[%s1634_s3 + $0xb8] sm:$0xff] %v1176_v51   ;;  %v397_v59 = vmul.f32 0.2, %v269_v52  ;;  %v201_v61 = vmul.f32 %v1036_v54, %v1306_v1  ;;  %v271_v63 = vadd.f32 %v1320_v7, %v200_v57  ;;  %v202_v0 = vmul.f32 %v1037_v58, %v1306_v1 }
  0x55   :  { %v460_v62 = vsel %vm332_vm0, %v268_v49, %v396_v56  ;;  %v1040_v2 = vunpack.c.l.bf16 %v1244_v55  ;;  %vm334_vm2 = vcmp.ge.f32.partialorder %v270_v60, 0.0  ;;  %v398_v4 = vmul.f32 0.2, %v270_v60 }
  0x56   :  { %v461_v3 = vsel %vm333_vm1, %v269_v52, %v397_v59  ;;  %v272_v5 = vadd.f32 %v1320_v7, %v201_v61  ;;  %vm335_vm3 = vcmp.ge.f32.partialorder %v271_v63, 0.0  ;;  %v399_v8 = vmul.f32 0.2, %v271_v63 }
  0x57   :  { %v1181_v6 = vpack.c.bf16 %v461_v3, %v460_v62  ;;  %v273_v9 = vadd.f32 %v1320_v7, %v202_v0  ;;  %v462_v11 = vsel %vm334_vm2, %v270_v60, %v398_v4  ;;  %v1041_v13 = vunpack.c.h.bf16 %v1244_v55 }
  0x58   :  { %vm336_vm4 = vcmp.ge.f32.partialorder %v272_v5, 0.0  ;;  %v400_v12 = vmul.f32 0.2, %v272_v5  ;;  %v463_v15 = vsel %vm335_vm3, %v271_v63, %v399_v8  ;;  %v203_v17 = vmul.f32 %v1040_v2, %v1306_v1 }
  0x59   :  { %1272 = vst [vmem:[%s1634_s3 + $0xc0] sm:$0xff] %v1181_v6   ;;  %vm337_vm5 = vcmp.ge.f32.partialorder %v273_v9, 0.0  ;;  %v401_v16 = vmul.f32 0.2, %v273_v9  ;;  %v1186_v18 = vpack.c.bf16 %v463_v15, %v462_v11  ;;  %v204_v20 = vmul.f32 %v1041_v13, %v1306_v1 }
  0x5a   :  { %v464_v19 = vsel %vm336_vm4, %v272_v5, %v400_v12  ;;  %v1044_v21 = vunpack.c.l.bf16 %v1245_v10  ;;  %v274_v23 = vadd.f32 %v1320_v7, %v203_v17  ;;  %v1045_v24 = vunpack.c.h.bf16 %v1245_v10 }
  0x5b   :  { %v465_v22 = vsel %vm337_vm5, %v273_v9, %v401_v16  ;;  %v1048_v25 = vunpack.c.l.bf16 %v1246_v14  ;;  %1273 = vst [vmem:[%s1634_s3 + $0xc8] sm:$0xff] %v1186_v18   ;;  %v275_v27 = vadd.f32 %v1320_v7, %v204_v20  ;;  %v1049_v29 = vunpack.c.h.bf16 %v1246_v14 }
  0x5c   :  { %v1191_v26 = vpack.c.bf16 %v465_v22, %v464_v19  ;;  %v205_v28 = vmul.f32 %v1044_v21, %v1306_v1  ;;  %vm338_vm6 = vcmp.ge.f32.partialorder %v274_v23, 0.0  ;;  %v402_v31 = vmul.f32 0.2, %v274_v23 }
  0x5d   :  { %v206_v32 = vmul.f32 %v1045_v24, %v1306_v1  ;;  %v207_v33 = vmul.f32 %v1048_v25, %v1306_v1  ;;  %vm339_vm7 = vcmp.ge.f32.partialorder %v275_v27, 0.0  ;;  %v403_v34 = vmul.f32 0.2, %v275_v27 }
  0x5e   :  { %1274 = vst [vmem:[%s1634_s3 + $0xd0] sm:$0xff] %v1191_v26   ;;  %v276_v35 = vadd.f32 %v1320_v7, %v205_v28  ;;  %v208_v36 = vmul.f32 %v1049_v29, %v1306_v1  ;;  %v466_v37 = vsel %vm338_vm6, %v274_v23, %v402_v31  ;;  %v1052_v40 = vunpack.c.l.bf16 %v1247_v30 }
  0x5f   :  { %v277_v38 = vadd.f32 %v1320_v7, %v206_v32  ;;  %v278_v39 = vadd.f32 %v1320_v7, %v207_v33  ;;  %v467_v41 = vsel %vm339_vm7, %v275_v27, %v403_v34  ;;  %v1053_v51 = vunpack.c.h.bf16 %v1247_v30 }
  0x60   :  { %vm340_vm8 = vcmp.ge.f32.partialorder %v276_v35, 0.0  ;;  %v404_v42 = vmul.f32 0.2, %v276_v35  ;;  %v279_v43 = vadd.f32 %v1320_v7, %v208_v36  ;;  %v1196_v45 = vpack.c.bf16 %v467_v41, %v466_v37 }
  0x61   :  { %vm341_vm9 = vcmp.ge.f32.partialorder %v277_v38, 0.0  ;;  %v405_v46 = vmul.f32 0.2, %v277_v38  ;;  %vm342_vm10 = vcmp.ge.f32.partialorder %v278_v39, 0.0  ;;  %v406_v48 = vmul.f32 0.2, %v278_v39 }
  0x62   :  { %v468_v47 = vsel %vm340_vm8, %v276_v35, %v404_v42  ;;  %vm343_vm11 = vcmp.ge.f32.partialorder %v279_v43, 0.0  ;;  %v407_v49 = vmul.f32 0.2, %v279_v43  ;;  %1275 = vst [vmem:[%s1634_s3 + $0xd8] sm:$0xff] %v1196_v45   ;;  %v209_v52 = vmul.f32 %v1052_v40, %v1306_v1 }
  0x63   :  { %v469_v50 = vsel %vm341_vm9, %v277_v38, %v405_v46  ;;  %v1056_v53 = vunpack.c.l.bf16 %v1248_v44  ;;  %v470_v55 = vsel %vm342_vm10, %v278_v39, %v406_v48  ;;  %v1057_v57 = vunpack.c.h.bf16 %v1248_v44 }
  0x64   :  { %v1201_v54 = vpack.c.bf16 %v469_v50, %v468_v47  ;;  %v471_v56 = vsel %vm343_vm11, %v279_v43, %v407_v49  ;;  %v210_v59 = vmul.f32 %v1053_v51, %v1306_v1  ;;  %v280_v60 = vadd.f32 %v1320_v7, %v209_v52 }
  0x65   :  { %v1206_v58 = vpack.c.bf16 %v471_v56, %v470_v55  ;;  %v211_v61 = vmul.f32 %v1056_v53, %v1306_v1  ;;  %v212_v62 = vmul.f32 %v1057_v57, %v1306_v1 }
  0x66   :  { %1276 = vst [vmem:[%s1634_s3 + $0xe0] sm:$0xff] %v1201_v54   ;;  %v281_v63 = vadd.f32 %v1320_v7, %v210_v59  ;;  %vm344_vm12 = vcmp.ge.f32.partialorder %v280_v60, 0.0  ;;  %v408_v0 = vmul.f32 0.2, %v280_v60 }
  0x67   :  { %1277 = vst [vmem:[%s1634_s3 + $0xe8] sm:$0xff] %v1206_v58   ;;  %v282_v2 = vadd.f32 %v1320_v7, %v211_v61  ;;  %v283_v3 = vadd.f32 %v1320_v7, %v212_v62 }
  0x68   :  { %vm345_vm13 = vcmp.ge.f32.partialorder %v281_v63, 0.0  ;;  %v409_v4 = vmul.f32 0.2, %v281_v63  ;;  %v472_v5 = vsel %vm344_vm12, %v280_v60, %v408_v0 }
  0x69   :  { %vm346_vm14 = vcmp.ge.f32.partialorder %v282_v2, 0.0  ;;  %vm347_vm15 = vcmp.ge.f32.partialorder %v283_v3, 0.0  ;;  %v410_v6 = vmul.f32 0.2, %v282_v2  ;;  %v411_v8 = vmul.f32 0.2, %v283_v3 }
  0x6a   :  { %v473_v1 = vsel %vm345_vm13, %v281_v63, %v409_v4 }
  0x6b   :  { %v1211_v9 = vpack.c.bf16 %v473_v1, %v472_v5  ;;  %v474_v10 = vsel %vm346_vm14, %v282_v2, %v410_v6  ;;  %v475_v11 = vsel %vm347_vm15, %v283_v3, %v411_v8 }
  0x6c   :  { %v1216_v12 = vpack.c.bf16 %v475_v11, %v474_v10 }
  0x6d   :  { %1278 = vst [vmem:[%s1634_s3 + $0xf0] sm:$0xff] %v1211_v9  }
  0x6e   :  { %1279 = vst [vmem:[%s1634_s3 + $0xf8] sm:$0xff] %v1216_v12  }

// kernel: critic_forward.10
= control target key start
LH: loop header
LB: loop body
LE: loop exit
PB: predicated region body
PF: predicated region fallthrough
CT: control target
= control target key end

     0   :  { %s3232_s15 = smov 0   ;;  %s3234_s16 = smov 0   ;;  %s3879_s0 = inlined_call_operand.vmem [shape: bf16[128,2048], index: 0, kind: input, shape index: {}]   ;;  %s3880_s1 = inlined_call_operand.vmem [shape: bf16[2048,256], index: 1, kind: input, shape index: {}]   ;;  %s3881_s2 = inlined_call_operand.vmem [shape: bf16[128,256], index: 2, kind: output, shape index: {0}]   ;;  %s3882_s3 = inlined_call_operand.vmem [shape: f32[1,256], index: 3, kind: output, shape index: {1}]   ;;  %s3883_s4 = inlined_call_operand.vmem [shape: f32[1,256], index: 4, kind: output, shape index: {2}]  }
   0x1   :  { %s3236_s17 = smov 0   ;;  %s3238_s18 = smov 0  }
   0x2   :  { %s3240_s19 = smov 0  }
   0x3 LB: > { %s27_s20 = sadd.s32 1, %s3198_s18  ;;  %p50_p1 = scmp.ne.s32.totalorder %s3190_s16, %s3186_s15  ;;  %s3202_s19 = sphi %s3240_s19, %s15_s19   ;;  %s3198_s18 = sphi %s3238_s18, %s3921_s18   ;;  %s3194_s17 = sphi %s3236_s17, %s3920_s17   ;;  %s3190_s16 = sphi %s3234_s16, %s3919_s16   ;;  %s3186_s15 = sphi %s3232_s15, %s3918_s15  }
   0x4   : > { %p28_p0 = scmp.ge.s32.totalorder %s27_s20, 2  ;;  %p51_p2 = scmp.eq.s32.totalorder %s3202_s19, 0 }
   0x5   : > { %s43_s22 = sadd.s32 1, %s3190_s16  ;;  %p2680_p5 = scmp.ge.s32.totalorder %s3202_s19, 2 }
   0x6   : > { %s3923_s20 = smov (%p28_p0, %s27_s20), 0  ;;  %p52_p3 = por %p51_p2, %p50_p1 }
   0x7   : > { %s39_s21 = ssub.s32 %s3198_s18, %s3923_s20  ;;  %184 = sbr.rel (%p2680_p5) target bundleno = 48 (0x30), region = 16 }
   0x8   : > { %p41_p4 = scmp.eq.s32.totalorder %s39_s21, 0 }
   0xa   : > { %s3267_s23 = scalar_select %p41_p4, %s3190_s16, %s43_s22  }
   0xc   : > { %187 = sbr.rel (!%p52_p3) target bundleno = 48 (0x30), region = 20  ;;  %s189_s24 = sand.u32 (%p52_p3), 1, %s3190_s16  }
   0xd   : > { %s2909_s25 = sshll.u32 (%p52_p3), %s3198_s18, 5  ;;  %s2681_s26 = sshll.u32 (%p52_p3), %s189_s24, 9 }
   0xe   : > { %s3275_s29 = scalar_lea.vmem (%p52_p3), %s3879_s0, %s2909_s25  ;;  %s3280_s30 = scalar_lea.vmem (%p52_p3), [#allocation5], %s2681_s26 }
   0xf   : > { %v210_v0 = vld [vmem:[%s3275_s29] sm:$0xff] (%p52_p3)  ;;  %v212_v1 = vld [vmem:[%s3275_s29 + $0x8] sm:$0xff] (%p52_p3)  ;;  %v214_v2 = vld [vmem:[%s3275_s29 + $0x10] sm:$0xff] (%p52_p3) }
  0x10   : > { %211 = vst [vmem:[%s3280_s30] sm:$0xff] (%p52_p3), %v210_v0  ;;  %213 = vst [vmem:[%s3280_s30 + $0x8] sm:$0xff] (%p52_p3), %v212_v1  ;;  %v216_v3 = vld [vmem:[%s3275_s29 + $0x18] sm:$0xff] (%p52_p3)  ;;  %v218_v4 = vld [vmem:[%s3275_s29 + $0x40] sm:$0xff] (%p52_p3) }
  0x11   : > { %215 = vst [vmem:[%s3280_s30 + $0x10] sm:$0xff] %v214_v2  ;;  %v220_v5 = vld [vmem:[%s3275_s29 + $0x48] sm:$0xff]  ;;  %217 = vst [vmem:[%s3280_s30 + $0x18] sm:$0xff] %v216_v3  ;;  %v222_v6 = vld [vmem:[%s3275_s29 + $0x50] sm:$0xff] }
  0x12   : > { %219 = vst [vmem:[%s3280_s30 + $0x20] sm:$0xff] %v218_v4  ;;  %221 = vst [vmem:[%s3280_s30 + $0x28] sm:$0xff] %v220_v5  ;;  %v224_v7 = vld [vmem:[%s3275_s29 + $0x58] sm:$0xff]  ;;  %v226_v8 = vld [vmem:[%s3275_s29 + $0x80] sm:$0xff] }
  0x13   : > { %223 = vst [vmem:[%s3280_s30 + $0x30] sm:$0xff] %v222_v6  ;;  %225 = vst [vmem:[%s3280_s30 + $0x38] sm:$0xff] %v224_v7  ;;  %v228_v9 = vld [vmem:[%s3275_s29 + $0x88] sm:$0xff]  ;;  %v230_v10 = vld [vmem:[%s3275_s29 + $0x90] sm:$0xff] }
  0x14   : > { %227 = vst [vmem:[%s3280_s30 + $0x40] sm:$0xff] %v226_v8  ;;  %v232_v11 = vld [vmem:[%s3275_s29 + $0x98] sm:$0xff]  ;;  %229 = vst [vmem:[%s3280_s30 + $0x48] sm:$0xff] %v228_v9  ;;  %v234_v12 = vld [vmem:[%s3275_s29 + $0xc0] sm:$0xff] }
  0x15   : > { %231 = vst [vmem:[%s3280_s30 + $0x50] sm:$0xff] %v230_v10  ;;  %233 = vst [vmem:[%s3280_s30 + $0x58] sm:$0xff] %v232_v11  ;;  %v236_v13 = vld [vmem:[%s3275_s29 + $0xc8] sm:$0xff]  ;;  %v238_v14 = vld [vmem:[%s3275_s29 + $0xd0] sm:$0xff] }
  0x16   : > { %235 = vst [vmem:[%s3280_s30 + $0x60] sm:$0xff] %v234_v12  ;;  %237 = vst [vmem:[%s3280_s30 + $0x68] sm:$0xff] %v236_v13  ;;  %v240_v15 = vld [vmem:[%s3275_s29 + $0xd8] sm:$0xff]  ;;  %v242_v16 = vld [vmem:[%s3275_s29 + $0x100] sm:$0xff] }
  0x17   : > { %239 = vst [vmem:[%s3280_s30 + $0x70] sm:$0xff] %v238_v14  ;;  %v244_v17 = vld [vmem:[%s3275_s29 + $0x108] sm:$0xff]  ;;  %241 = vst [vmem:[%s3280_s30 + $0x78] sm:$0xff] %v240_v15  ;;  %v246_v18 = vld [vmem:[%s3275_s29 + $0x110] sm:$0xff] }
  0x18   : > { %243 = vst [vmem:[%s3280_s30 + $0x80] sm:$0xff] %v242_v16  ;;  %245 = vst [vmem:[%s3280_s30 + $0x88] sm:$0xff] %v244_v17  ;;  %v248_v19 = vld [vmem:[%s3275_s29 + $0x118] sm:$0xff]  ;;  %v250_v20 = vld [vmem:[%s3275_s29 + $0x140] sm:$0xff] }
  0x19   : > { %247 = vst [vmem:[%s3280_s30 + $0x90] sm:$0xff] %v246_v18  ;;  %249 = vst [vmem:[%s3280_s30 + $0x98] sm:$0xff] %v248_v19  ;;  %v252_v21 = vld [vmem:[%s3275_s29 + $0x148] sm:$0xff]  ;;  %v254_v22 = vld [vmem:[%s3275_s29 + $0x150] sm:$0xff] }
  0x1a   : > { %251 = vst [vmem:[%s3280_s30 + $0xa0] sm:$0xff] %v250_v20  ;;  %v256_v23 = vld [vmem:[%s3275_s29 + $0x158] sm:$0xff]  ;;  %253 = vst [vmem:[%s3280_s30 + $0xa8] sm:$0xff] %v252_v21  ;;  %v258_v24 = vld [vmem:[%s3275_s29 + $0x180] sm:$0xff] }
  0x1b   : > { %255 = vst [vmem:[%s3280_s30 + $0xb0] sm:$0xff] %v254_v22  ;;  %257 = vst [vmem:[%s3280_s30 + $0xb8] sm:$0xff] %v256_v23  ;;  %v260_v25 = vld [vmem:[%s3275_s29 + $0x188] sm:$0xff]  ;;  %v262_v26 = vld [vmem:[%s3275_s29 + $0x190] sm:$0xff] }
  0x1c   : > { %259 = vst [vmem:[%s3280_s30 + $0xc0] sm:$0xff] %v258_v24  ;;  %261 = vst [vmem:[%s3280_s30 + $0xc8] sm:$0xff] %v260_v25  ;;  %v264_v27 = vld [vmem:[%s3275_s29 + $0x198] sm:$0xff]  ;;  %v266_v28 = vld [vmem:[%s3275_s29 + $0x1c0] sm:$0xff] }
  0x1d   : > { %263 = vst [vmem:[%s3280_s30 + $0xd0] sm:$0xff] %v262_v26  ;;  %v268_v29 = vld [vmem:[%s3275_s29 + $0x1c8] sm:$0xff]  ;;  %265 = vst [vmem:[%s3280_s30 + $0xd8] sm:$0xff] %v264_v27  ;;  %v270_v30 = vld [vmem:[%s3275_s29 + $0x1d0] sm:$0xff] }
  0x1e   : > { %267 = vst [vmem:[%s3280_s30 + $0xe0] sm:$0xff] %v266_v28  ;;  %269 = vst [vmem:[%s3280_s30 + $0xe8] sm:$0xff] %v268_v29  ;;  %v272_v31 = vld [vmem:[%s3275_s29 + $0x1d8] sm:$0xff]  ;;  %v274_v32 = vld [vmem:[%s3275_s29 + $0x200] sm:$0xff] }
  0x1f   : > { %271 = vst [vmem:[%s3280_s30 + $0xf0] sm:$0xff] %v270_v30  ;;  %273 = vst [vmem:[%s3280_s30 + $0xf8] sm:$0xff] %v272_v31  ;;  %v276_v33 = vld [vmem:[%s3275_s29 + $0x208] sm:$0xff]  ;;  %v278_v34 = vld [vmem:[%s3275_s29 + $0x210] sm:$0xff] }
  0x20   : > { %275 = vst [vmem:[%s3280_s30 + $0x100] sm:$0xff] %v274_v32  ;;  %v280_v35 = vld [vmem:[%s3275_s29 + $0x218] sm:$0xff]  ;;  %277 = vst [vmem:[%s3280_s30 + $0x108] sm:$0xff] %v276_v33  ;;  %v282_v36 = vld [vmem:[%s3275_s29 + $0x240] sm:$0xff] }
  0x21   : > { %279 = vst [vmem:[%s3280_s30 + $0x110] sm:$0xff] %v278_v34  ;;  %281 = vst [vmem:[%s3280_s30 + $0x118] sm:$0xff] %v280_v35  ;;  %v284_v37 = vld [vmem:[%s3275_s29 + $0x248] sm:$0xff]  ;;  %v286_v38 = vld [vmem:[%s3275_s29 + $0x250] sm:$0xff] }
  0x22   : > { %283 = vst [vmem:[%s3280_s30 + $0x120] sm:$0xff] %v282_v36  ;;  %285 = vst [vmem:[%s3280_s30 + $0x128] sm:$0xff] %v284_v37  ;;  %v288_v39 = vld [vmem:[%s3275_s29 + $0x258] sm:$0xff]  ;;  %v290_v40 = vld [vmem:[%s3275_s29 + $0x280] sm:$0xff] }
  0x23   : > { %287 = vst [vmem:[%s3280_s30 + $0x130] sm:$0xff] %v286_v38  ;;  %v292_v41 = vld [vmem:[%s3275_s29 + $0x288] sm:$0xff]  ;;  %289 = vst [vmem:[%s3280_s30 + $0x138] sm:$0xff] %v288_v39  ;;  %v294_v42 = vld [vmem:[%s3275_s29 + $0x290] sm:$0xff] }
  0x24   : > { %291 = vst [vmem:[%s3280_s30 + $0x140] sm:$0xff] %v290_v40  ;;  %293 = vst [vmem:[%s3280_s30 + $0x148] sm:$0xff] %v292_v41  ;;  %v296_v43 = vld [vmem:[%s3275_s29 + $0x298] sm:$0xff]  ;;  %v298_v44 = vld [vmem:[%s3275_s29 + $0x2c0] sm:$0xff] }
  0x25   : > { %295 = vst [vmem:[%s3280_s30 + $0x150] sm:$0xff] %v294_v42  ;;  %297 = vst [vmem:[%s3280_s30 + $0x158] sm:$0xff] %v296_v43  ;;  %v300_v45 = vld [vmem:[%s3275_s29 + $0x2c8] sm:$0xff]  ;;  %v302_v46 = vld [vmem:[%s3275_s29 + $0x2d0] sm:$0xff] }
  0x26   : > { %299 = vst [vmem:[%s3280_s30 + $0x160] sm:$0xff] %v298_v44  ;;  %v304_v47 = vld [vmem:[%s3275_s29 + $0x2d8] sm:$0xff]  ;;  %301 = vst [vmem:[%s3280_s30 + $0x168] sm:$0xff] %v300_v45  ;;  %v306_v48 = vld [vmem:[%s3275_s29 + $0x300] sm:$0xff] }
  0x27   : > { %303 = vst [vmem:[%s3280_s30 + $0x170] sm:$0xff] %v302_v46  ;;  %305 = vst [vmem:[%s3280_s30 + $0x178] sm:$0xff] %v304_v47  ;;  %v308_v49 = vld [vmem:[%s3275_s29 + $0x308] sm:$0xff]  ;;  %v310_v50 = vld [vmem:[%s3275_s29 + $0x310] sm:$0xff] }
  0x28   : > { %307 = vst [vmem:[%s3280_s30 + $0x180] sm:$0xff] %v306_v48  ;;  %309 = vst [vmem:[%s3280_s30 + $0x188] sm:$0xff] %v308_v49  ;;  %v312_v51 = vld [vmem:[%s3275_s29 + $0x318] sm:$0xff]  ;;  %v314_v52 = vld [vmem:[%s3275_s29 + $0x340] sm:$0xff] }
  0x29   : > { %311 = vst [vmem:[%s3280_s30 + $0x190] sm:$0xff] %v310_v50  ;;  %v316_v53 = vld [vmem:[%s3275_s29 + $0x348] sm:$0xff]  ;;  %313 = vst [vmem:[%s3280_s30 + $0x198] sm:$0xff] %v312_v51  ;;  %v318_v54 = vld [vmem:[%s3275_s29 + $0x350] sm:$0xff] }
  0x2a   : > { %315 = vst [vmem:[%s3280_s30 + $0x1a0] sm:$0xff] %v314_v52  ;;  %317 = vst [vmem:[%s3280_s30 + $0x1a8] sm:$0xff] %v316_v53  ;;  %v320_v55 = vld [vmem:[%s3275_s29 + $0x358] sm:$0xff]  ;;  %v322_v56 = vld [vmem:[%s3275_s29 + $0x380] sm:$0xff] }
  0x2b   : > { %319 = vst [vmem:[%s3280_s30 + $0x1b0] sm:$0xff] %v318_v54  ;;  %321 = vst [vmem:[%s3280_s30 + $0x1b8] sm:$0xff] %v320_v55  ;;  %v324_v57 = vld [vmem:[%s3275_s29 + $0x388] sm:$0xff]  ;;  %v326_v58 = vld [vmem:[%s3275_s29 + $0x390] sm:$0xff] }
  0x2c   : > { %323 = vst [vmem:[%s3280_s30 + $0x1c0] sm:$0xff] %v322_v56  ;;  %v328_v59 = vld [vmem:[%s3275_s29 + $0x398] sm:$0xff]  ;;  %325 = vst [vmem:[%s3280_s30 + $0x1c8] sm:$0xff] %v324_v57  ;;  %v330_v60 = vld [vmem:[%s3275_s29 + $0x3c0] sm:$0xff] }
  0x2d   : > { %327 = vst [vmem:[%s3280_s30 + $0x1d0] sm:$0xff] %v326_v58  ;;  %329 = vst [vmem:[%s3280_s30 + $0x1d8] sm:$0xff] %v328_v59  ;;  %v332_v61 = vld [vmem:[%s3275_s29 + $0x3c8] sm:$0xff]  ;;  %v334_v62 = vld [vmem:[%s3275_s29 + $0x3d0] sm:$0xff] }
  0x2e   : > { %331 = vst [vmem:[%s3280_s30 + $0x1e0] sm:$0xff] %v330_v60  ;;  %333 = vst [vmem:[%s3280_s30 + $0x1e8] sm:$0xff] %v332_v61  ;;  %v336_v63 = vld [vmem:[%s3275_s29 + $0x3d8] sm:$0xff] }
  0x2f   : > { %335 = vst [vmem:[%s3280_s30 + $0x1f0] sm:$0xff] %v334_v62  ;;  %337 = vst [vmem:[%s3280_s30 + $0x1f8] sm:$0xff] %v336_v63 }
  0x30 PF: > { %p2684_p6 = scmp.ge.s32.totalorder %s3202_s19, 1  ;;  %p357_p7 = scmp.lt.s32.totalorder %s3202_s19, 3 }
  0x32   : > { %p358_p8 = pnand %p2684_p6, %p357_p7 }
  0x34   : > { %361 = sbr.rel (%p358_p8) target bundleno = 543 (0x21f), region = 47 }
  0x39   : > { %s364_s5 = sand.u32 1, %s3186_s15   ;;  %s2686_s6 = sshll.u32 %s3194_s17, 7 }
  0x3a   : > { %s2685_s7 = sshll.u32 %s364_s5, 9  ;;  %p416_p9 = scmp.lt.s32.totalorder %s2686_s6, 255 }
  0x3b   : > { %p448_p10 = scmp.eq.s32.totalorder %s3194_s17, 0  ;;  %s3417_s12 = scalar_lea.vmem [#allocation5], %s2685_s7 }
  0x3c   : > { %s3925_s6 = smov (!%p416_p9, %s2686_s6), 255  ;;  %p2689_p11 = scmp.ne.s32.totalorder %s3194_s17, 0 }
  0x3d   : > { %s2910_s8 = sshll.u32 %s3925_s6, 3 }
  0x3e   : > { %s3415_s11 = scalar_lea.vmem %s3880_s1, %s2910_s8  ;;  %451 = sbr.rel (%p2689_p11) target bundleno = 84 (0x54), region = 55 }
  0x43   : > { %v3204_v0 = vmov 0.0  }
  0x44   : > { %452 = vst [vmem:[#allocation2 + $0xb0] sm:$0xff] %v3204_v0  ;;  %453 = vst [vmem:[#allocation2] sm:$0xff] %v3204_v0 }
  0x45   : > { %454 = vst [vmem:[#allocation2 + $0xd8] sm:$0xff] %v3204_v0  ;;  %455 = vst [vmem:[#allocation2 + $0x18] sm:$0xff] %v3204_v0 }
  0x46   : > { %456 = vst [vmem:[#allocation2 + $0x50] sm:$0xff] %v3204_v0  ;;  %457 = vst [vmem:[#allocation2 + $0x68] sm:$0xff] %v3204_v0 }
  0x47   : > { %458 = vst [vmem:[#allocation2 + $0x30] sm:$0xff] %v3204_v0  ;;  %459 = vst [vmem:[#allocation2 + $0x48] sm:$0xff] %v3204_v0 }
  0x48   : > { %460 = vst [vmem:[#allocation2 + $0x80] sm:$0xff] %v3204_v0  ;;  %461 = vst [vmem:[#allocation2 + $0x88] sm:$0xff] %v3204_v0 }
  0x49   : > { %462 = vst [vmem:[#allocation2 + $0xe8] sm:$0xff] %v3204_v0  ;;  %463 = vst [vmem:[#allocation2 + $0xb8] sm:$0xff] %v3204_v0 }
  0x4a   : > { %464 = vst [vmem:[#allocation2 + $0x60] sm:$0xff] %v3204_v0  ;;  %465 = vst [vmem:[#allocation2 + $0xf0] sm:$0xff] %v3204_v0 }
  0x4b   : > { %466 = vst [vmem:[#allocation2 + $0x8] sm:$0xff] %v3204_v0  ;;  %467 = vst [vmem:[#allocation2 + $0x78] sm:$0xff] %v3204_v0 }
  0x4c   : > { %468 = vst [vmem:[#allocation2 + $0x38] sm:$0xff] %v3204_v0  ;;  %469 = vst [vmem:[#allocation2 + $0x58] sm:$0xff] %v3204_v0 }
  0x4d   : > { %470 = vst [vmem:[#allocation2 + $0x40] sm:$0xff] %v3204_v0  ;;  %471 = vst [vmem:[#allocation2 + $0xc8] sm:$0xff] %v3204_v0 }
  0x4e   : > { %472 = vst [vmem:[#allocation2 + $0xe0] sm:$0xff] %v3204_v0  ;;  %473 = vst [vmem:[#allocation2 + $0x90] sm:$0xff] %v3204_v0 }
  0x4f   : > { %474 = vst [vmem:[#allocation2 + $0x70] sm:$0xff] %v3204_v0  ;;  %475 = vst [vmem:[#allocation2 + $0xc0] sm:$0xff] %v3204_v0 }
  0x50   : > { %476 = vst [vmem:[#allocation2 + $0xa8] sm:$0xff] %v3204_v0  ;;  %477 = vst [vmem:[#allocation2 + $0xd0] sm:$0xff] %v3204_v0 }
  0x51   : > { %478 = vst [vmem:[#allocation2 + $0x10] sm:$0xff] %v3204_v0  ;;  %479 = vst [vmem:[#allocation2 + $0x28] sm:$0xff] %v3204_v0 }
  0x52   : > { %480 = vst [vmem:[#allocation2 + $0xa0] sm:$0xff] %v3204_v0  ;;  %481 = vst [vmem:[#allocation2 + $0xf8] sm:$0xff] %v3204_v0 }
  0x53   : > { %482 = vst [vmem:[#allocation2 + $0x20] sm:$0xff] %v3204_v0  ;;  %483 = vst [vmem:[#allocation2 + $0x98] sm:$0xff] %v3204_v0 }
  0x54 PF: > { %488 = sbr.rel (!%p448_p10) target bundleno = 89 (0x59), region = 59  ;;  %v489_v1 = vlaneseq (%p448_p10)  ;;  %v3205_v2 = vmov (%p448_p10), 0.0  }
  0x56   : > { %vm491_vm0 = vcmp.lt.s32.totalorder (%p448_p10), %v489_v1, 256 }
  0x57   : > { %493 = vst.msk [vmem:[#allocation3] sm:$0x3] (%p448_p10), %vm491_vm0, %v3205_v2  ;;  %494 = vst.msk [vmem:[#allocation4] sm:$0x3] (%p448_p10), %vm491_vm0, %v3205_v2 }
  0x59 PF: > { %v2972_v3 = vld [vmem:[%s3415_s11 + $0x74] ss:$8 sps:$4 sm:$0xff]   ;;  %v2976_v5 = vld [vmem:[%s3415_s11 + $0x70] ss:$8 sps:$4 sm:$0xff]   ;;  %v2978_v7 = vld [vmem:[%s3415_s11 + $0x64] ss:$8 sps:$4 sm:$0xff]  }
  0x5a   : > { %v2974_v4 = vld [vmem:[%s3415_s11 + $0x174] ss:$8 sps:$4 sm:$0xff]   ;;  %1679 = vmatprep.subr.bf16.mxu0 %v2972_v3  ;;  %v2977_v6 = vld [vmem:[%s3415_s11 + $0x170] ss:$8 sps:$4 sm:$0xff]   ;;  %v2980_v8 = vld [vmem:[%s3415_s11 + $0x164] ss:$8 sps:$4 sm:$0xff]  }
  0x5b   : > { %1792 = vmatprep.subr.bf16.mxu1 %v2974_v4  ;;  %1680 = vmatpush1.bf16.msra.mxu0 %v2976_v5  ;;  %v2982_v9 = vld [vmem:[%s3415_s11 + $0x60] ss:$8 sps:$4 sm:$0xff]   ;;  %v2984_v11 = vld [vmem:[%s3415_s11 + $0x54] ss:$8 sps:$4 sm:$0xff]   ;;  %v2988_v13 = vld [vmem:[%s3415_s11 + $0x50] ss:$8 sps:$4 sm:$0xff]  }
  0x5c   : > { %1793 = vmatpush1.bf16.msra.mxu1 %v2977_v6  ;;  %1681 = vmatprep.subr.bf16.mxu0 %v2978_v7  ;;  %v2983_v10 = vld [vmem:[%s3415_s11 + $0x160] ss:$8 sps:$4 sm:$0xff]   ;;  %v2986_v12 = vld [vmem:[%s3415_s11 + $0x154] ss:$8 sps:$4 sm:$0xff]   ;;  %v2989_v14 = vld [vmem:[%s3415_s11 + $0x150] ss:$8 sps:$4 sm:$0xff]  }
  0x5d   : > { %1794 = vmatprep.subr.bf16.mxu1 %v2980_v8  ;;  %v2990_v15 = vld [vmem:[%s3415_s11 + $0x44] ss:$8 sps:$4 sm:$0xff]   ;;  %v2994_v17 = vld [vmem:[%s3415_s11 + $0x40] ss:$8 sps:$4 sm:$0xff]   ;;  %v2996_v19 = vld [vmem:[%s3415_s11 + $0x34] ss:$8 sps:$4 sm:$0xff]  }
  0x5e   : > { %v2992_v16 = vld [vmem:[%s3415_s11 + $0x144] ss:$8 sps:$4 sm:$0xff]   ;;  %v2995_v18 = vld [vmem:[%s3415_s11 + $0x140] ss:$8 sps:$4 sm:$0xff]   ;;  %v2998_v20 = vld [vmem:[%s3415_s11 + $0x134] ss:$8 sps:$4 sm:$0xff]  }
  0x5f   : > { %1682 = vmatpush1.bf16.msra.mxu0 %v2982_v9  ;;  %v3000_v21 = vld [vmem:[%s3415_s11 + $0x30] ss:$8 sps:$4 sm:$0xff]   ;;  %v3002_v23 = vld [vmem:[%s3415_s11 + $0x24] ss:$8 sps:$4 sm:$0xff]   ;;  %v3006_v25 = vld [vmem:[%s3415_s11 + $0x20] ss:$8 sps:$4 sm:$0xff]  }
  0x60   : > { %1795 = vmatpush1.bf16.msra.mxu1 %v2983_v10  ;;  %1683 = vmatprep.subr.bf16.mxu0 %v2984_v11  ;;  %v3001_v22 = vld [vmem:[%s3415_s11 + $0x130] ss:$8 sps:$4 sm:$0xff]   ;;  %v3004_v24 = vld [vmem:[%s3415_s11 + $0x124] ss:$8 sps:$4 sm:$0xff]   ;;  %v3007_v26 = vld [vmem:[%s3415_s11 + $0x120] ss:$8 sps:$4 sm:$0xff]  }
  0x61   : > { %1796 = vmatprep.subr.bf16.mxu1 %v2986_v12  ;;  %v3008_v27 = vld [vmem:[%s3415_s11 + $0x14] ss:$8 sps:$4 sm:$0xff]   ;;  %v3012_v29 = vld [vmem:[%s3415_s11 + $0x10] ss:$8 sps:$4 sm:$0xff]   ;;  %v3014_v31 = vld [vmem:[%s3415_s11 + $0x4] ss:$8 sps:$4 sm:$0xff]  }
  0x62   : > { %v3010_v28 = vld [vmem:[%s3415_s11 + $0x114] ss:$8 sps:$4 sm:$0xff]   ;;  %v3013_v30 = vld [vmem:[%s3415_s11 + $0x110] ss:$8 sps:$4 sm:$0xff]   ;;  %v3016_v32 = vld [vmem:[%s3415_s11 + $0x104] ss:$8 sps:$4 sm:$0xff]  }
  0x63   : > { %1684 = vmatpush1.bf16.msra.mxu0 %v2988_v13  ;;  %v3018_v33 = vld [vmem:[%s3415_s11] ss:$8 sps:$4 sm:$0xff]   ;;  %v3020_v35 = vld [vmem:[%s3415_s11 + $0xf4] ss:$8 sps:$4 sm:$0xff]   ;;  %v3024_v37 = vld [vmem:[%s3415_s11 + $0xf0] ss:$8 sps:$4 sm:$0xff]  }
  0x64   : > { %1797 = vmatpush1.bf16.msra.mxu1 %v2989_v14  ;;  %1685 = vmatprep.subr.bf16.mxu0 %v2990_v15  ;;  %v3019_v34 = vld [vmem:[%s3415_s11 + $0x100] ss:$8 sps:$4 sm:$0xff]   ;;  %v3022_v36 = vld [vmem:[%s3415_s11 + $0x1f4] ss:$8 sps:$4 sm:$0xff]   ;;  %v3025_v38 = vld [vmem:[%s3415_s11 + $0x1f0] ss:$8 sps:$4 sm:$0xff]  }
  0x65   : > { %1798 = vmatprep.subr.bf16.mxu1 %v2992_v16  ;;  %v3026_v39 = vld [vmem:[%s3415_s11 + $0xe4] ss:$8 sps:$4 sm:$0xff]   ;;  %v3030_v41 = vld [vmem:[%s3415_s11 + $0xe0] ss:$8 sps:$4 sm:$0xff]   ;;  %v3032_v43 = vld [vmem:[%s3415_s11 + $0xd4] ss:$8 sps:$4 sm:$0xff]  }
  0x66   : > { %v3028_v40 = vld [vmem:[%s3415_s11 + $0x1e4] ss:$8 sps:$4 sm:$0xff]   ;;  %v3031_v42 = vld [vmem:[%s3415_s11 + $0x1e0] ss:$8 sps:$4 sm:$0xff]   ;;  %v3034_v44 = vld [vmem:[%s3415_s11 + $0x1d4] ss:$8 sps:$4 sm:$0xff]  }
  0x67   : > { %1686 = vmatpush1.bf16.msra.mxu0 %v2994_v17  ;;  %v3036_v45 = vld [vmem:[%s3415_s11 + $0xd0] ss:$8 sps:$4 sm:$0xff]   ;;  %v3038_v47 = vld [vmem:[%s3415_s11 + $0xc4] ss:$8 sps:$4 sm:$0xff]   ;;  %v3042_v49 = vld [vmem:[%s3415_s11 + $0xc0] ss:$8 sps:$4 sm:$0xff]  }
  0x68   : > { %1799 = vmatpush1.bf16.msra.mxu1 %v2995_v18  ;;  %1687 = vmatprep.subr.bf16.mxu0 %v2996_v19  ;;  %v3037_v46 = vld [vmem:[%s3415_s11 + $0x1d0] ss:$8 sps:$4 sm:$0xff]   ;;  %v3040_v48 = vld [vmem:[%s3415_s11 + $0x1c4] ss:$8 sps:$4 sm:$0xff]   ;;  %v3043_v50 = vld [vmem:[%s3415_s11 + $0x1c0] ss:$8 sps:$4 sm:$0xff]  }
  0x69   : > { %1800 = vmatprep.subr.bf16.mxu1 %v2998_v20  ;;  %v527_v51 = vld [vmem:[%s3417_s12] sm:$0xff]  ;;  %v528_v53 = vld [vmem:[%s3417_s12 + $0x8] sm:$0xff]  ;;  %v3044_v55 = vld [vmem:[%s3415_s11 + $0xb4] ss:$8 sps:$4 sm:$0xff]   ;;  %p2195_p12 = scmp.eq.s32.totalorder %s3194_s17, 1  ;;  %p2883_p13 = scmp.ne.s32.totalorder %s3194_s17, 1 }
  0x6a   : > { %v531_v52 = vld [vmem:[%s3417_s12 + $0x20] sm:$0xff]  ;;  %v532_v54 = vld [vmem:[%s3417_s12 + $0x28] sm:$0xff]  ;;  %v3046_v57 = vld [vmem:[%s3415_s11 + $0x1b4] ss:$8 sps:$4 sm:$0xff]  }
  0x6b   : > { %1688 = vmatpush1.bf16.msra.mxu0 %v3000_v21  ;;  %v2692_v56 = vcombine.high %v527_v51, %v531_v52  ;;  %v2694_v58 = vcombine.high %v528_v53, %v532_v54  ;;  %v3048_v59 = vld [vmem:[%s3415_s11 + $0xb0] ss:$8 sps:$4 sm:$0xff]   ;;  %v3050_v61 = vld [vmem:[%s3415_s11 + $0xa4] ss:$8 sps:$4 sm:$0xff]   ;;  %v3054_v63 = vld [vmem:[%s3415_s11 + $0xa0] ss:$8 sps:$4 sm:$0xff]   ;;  %v2691_v14 = vcombine.low %v527_v51, %v531_v52  ;;  %v2693_v15 = vcombine.low %v528_v53, %v532_v54 }
  0x6c   : > { %1801 = vmatpush1.bf16.msra.mxu1 %v3001_v22  ;;  %1689 = vmatprep.subr.bf16.mxu0 %v3002_v23  ;;  %v3049_v60 = vld [vmem:[%s3415_s11 + $0x1b0] ss:$8 sps:$4 sm:$0xff]   ;;  %v3052_v62 = vld [vmem:[%s3415_s11 + $0x1a4] ss:$8 sps:$4 sm:$0xff]   ;;  %v3055_v0 = vld [vmem:[%s3415_s11 + $0x1a0] ss:$8 sps:$4 sm:$0xff]  }
  0x6d   : > { %1802 = vmatprep.subr.bf16.mxu1 %v3004_v24  ;;  %1711 = vmatprep.mubr.bf16.mxu0 %v2692_v56  ;;  %v3056_v1 = vld [vmem:[%s3415_s11 + $0x94] ss:$8 sps:$4 sm:$0xff]   ;;  %v3060_v3 = vld [vmem:[%s3415_s11 + $0x90] ss:$8 sps:$4 sm:$0xff]   ;;  %v3062_v5 = vld [vmem:[%s3415_s11 + $0x84] ss:$8 sps:$4 sm:$0xff]  }
  0x6e   : > { %1824 = vmatprep.mubr.bf16.mxu1 %v2694_v58  ;;  %v3058_v2 = vld [vmem:[%s3415_s11 + $0x194] ss:$8 sps:$4 sm:$0xff]   ;;  %v3061_v4 = vld [vmem:[%s3415_s11 + $0x190] ss:$8 sps:$4 sm:$0xff]   ;;  %v3064_v6 = vld [vmem:[%s3415_s11 + $0x184] ss:$8 sps:$4 sm:$0xff]  }
  0x6f   : > { %1690 = vmatpush1.bf16.msra.mxu0 %v3006_v25  ;;  %v3066_v7 = vld [vmem:[%s3415_s11 + $0x80] ss:$8 sps:$4 sm:$0xff]   ;;  %v3070_v9 = vld [vmem:[%s3415_s11 + $0x274] ss:$8 sps:$4 sm:$0xff]   ;;  %v3068_v11 = vld [vmem:[%s3415_s11 + $0x270] ss:$8 sps:$4 sm:$0xff]  }
  0x70   : > { %1803 = vmatpush1.bf16.msra.mxu1 %v3007_v26  ;;  %1691 = vmatprep.subr.bf16.mxu0 %v3008_v27  ;;  %v3067_v8 = vld [vmem:[%s3415_s11 + $0x180] ss:$8 sps:$4 sm:$0xff]   ;;  %v3073_v10 = vld [vmem:[%s3415_s11 + $0x374] ss:$8 sps:$4 sm:$0xff]   ;;  %v3071_v12 = vld [vmem:[%s3415_s11 + $0x370] ss:$8 sps:$4 sm:$0xff]  }
  0x71   : > { %1804 = vmatprep.subr.bf16.mxu1 %v3010_v28  ;;  %v535_v13 = vld [vmem:[%s3417_s12 + $0x40] sm:$0xff]  ;;  %v536_v17 = vld [vmem:[%s3417_s12 + $0x48] sm:$0xff]  ;;  %v3082_v25 = vld [vmem:[%s3415_s11 + $0x254] ss:$8 sps:$4 sm:$0xff]  }
  0x72   : > { %v539_v16 = vld [vmem:[%s3417_s12 + $0x60] sm:$0xff]  ;;  %v540_v18 = vld [vmem:[%s3417_s12 + $0x68] sm:$0xff]  ;;  %v3085_v26 = vld [vmem:[%s3415_s11 + $0x354] ss:$8 sps:$4 sm:$0xff]  }
  0x73   : > { %1692 = vmatpush1.bf16.msra.mxu0 %v3012_v29  ;;  %v3076_v19 = vld [vmem:[%s3415_s11 + $0x264] ss:$8 sps:$4 sm:$0xff]   ;;  %v2700_v21 = vcombine.high %v535_v13, %v539_v16  ;;  %v2702_v22 = vcombine.high %v536_v17, %v540_v18  ;;  %v3074_v23 = vld [vmem:[%s3415_s11 + $0x260] ss:$8 sps:$4 sm:$0xff]   ;;  %v3080_v27 = vld [vmem:[%s3415_s11 + $0x250] ss:$8 sps:$4 sm:$0xff]  }
  0x74   : > { %1805 = vmatpush1.bf16.msra.mxu1 %v3013_v30  ;;  %1693 = vmatprep.subr.bf16.mxu0 %v3014_v31  ;;  %v3079_v20 = vld [vmem:[%s3415_s11 + $0x364] ss:$8 sps:$4 sm:$0xff]   ;;  %v3077_v24 = vld [vmem:[%s3415_s11 + $0x360] ss:$8 sps:$4 sm:$0xff]   ;;  %v3083_v28 = vld [vmem:[%s3415_s11 + $0x350] ss:$8 sps:$4 sm:$0xff]   ;;  %v2699_v31 = vcombine.low %v535_v13, %v539_v16 }
  0x75   : > { %1806 = vmatprep.subr.bf16.mxu1 %v3016_v32  ;;  %v543_v29 = vld [vmem:[%s3417_s12 + $0x80] sm:$0xff]  ;;  %v2701_v32 = vcombine.low %v536_v17, %v540_v18  ;;  %v3109_v58 = vld [vmem:[%s3415_s11 + $0x314] ss:$8 sps:$4 sm:$0xff]   ;;  %v572_v16 = vld [vmem:[%s3417_s12 + $0x168] sm:$0xff] }
  0x76   : > { %v547_v30 = vld [vmem:[%s3417_s12 + $0xa0] sm:$0xff]  ;;  %v3116_v17 = vld [vmem:[%s3415_s11 + $0x2f0] ss:$8 sps:$4 sm:$0xff]  }
  0x77   : > { %1694 = vmatpush1.bf16.msra.mxu0 %v3018_v33  ;;  %v544_v33 = vld [vmem:[%s3417_s12 + $0x88] sm:$0xff]  ;;  %v3101_v56 = vld [vmem:[%s3415_s11 + $0x320] ss:$8 sps:$4 sm:$0xff]  }
  0x78   : > { %1807 = vmatpush1.bf16.msra.mxu1 %v3019_v34  ;;  %1695 = vmatprep.subr.bf16.mxu0 %v3020_v35  ;;  %v548_v34 = vld [vmem:[%s3417_s12 + $0xa8] sm:$0xff] }
  0x79   : > { %1808 = vmatprep.subr.bf16.mxu1 %v3022_v36  ;;  %v3088_v35 = vld [vmem:[%s3415_s11 + $0x244] ss:$8 sps:$4 sm:$0xff]   ;;  %v3119_v18 = vld [vmem:[%s3415_s11 + $0x3f0] ss:$8 sps:$4 sm:$0xff]  }
  0x7a   : > { %v3091_v36 = vld [vmem:[%s3415_s11 + $0x344] ss:$8 sps:$4 sm:$0xff]  }
  0x7b   : > { %1696 = vmatpush2.bf16.msra.mxu0 %v3024_v37  ;;  %v2708_v37 = vcombine.high %v543_v29, %v547_v30  ;;  %v3100_v51 = vld [vmem:[%s3415_s11 + $0x224] ss:$8 sps:$4 sm:$0xff]  }
  0x7c   : > { %1809 = vmatpush2.bf16.msra.mxu1 %v3025_v38  ;;  %1697 = vmatprep.subr.bf16.mxu0 %v3026_v39  ;;  %v2710_v38 = vcombine.high %v544_v33, %v548_v34  ;;  %v3086_v39 = vld [vmem:[%s3415_s11 + $0x240] ss:$8 sps:$4 sm:$0xff]   ;;  %v3103_v52 = vld [vmem:[%s3415_s11 + $0x324] ss:$8 sps:$4 sm:$0xff]  }
  0x7d   : > { %1810 = vmatprep.subr.bf16.mxu1 %v3028_v40  ;;  %v3089_v40 = vld [vmem:[%s3415_s11 + $0x340] ss:$8 sps:$4 sm:$0xff]  }
  0x7f   : > { %1698 = vmatpush2.bf16.msra.mxu0 %v3030_v41  ;;  %v3094_v41 = vld [vmem:[%s3415_s11 + $0x234] ss:$8 sps:$4 sm:$0xff]  }
  0x80   : > { %1811 = vmatpush2.bf16.msra.mxu1 %v3031_v42  ;;  %1699 = vmatprep.subr.bf16.mxu0 %v3032_v43  ;;  %v3097_v42 = vld [vmem:[%s3415_s11 + $0x334] ss:$8 sps:$4 sm:$0xff]   ;;  %v3092_v43 = vld [vmem:[%s3415_s11 + $0x230] ss:$8 sps:$4 sm:$0xff]  }
  0x81   : > { %1812 = vmatprep.subr.bf16.mxu1 %v3034_v44  ;;  %v3095_v44 = vld [vmem:[%s3415_s11 + $0x330] ss:$8 sps:$4 sm:$0xff]  }
  0x83   : > { %1700 = vmatpush2.bf16.msra.mxu0 %v3036_v45  ;;  %v551_v45 = vld [vmem:[%s3417_s12 + $0xc0] sm:$0xff] }
  0x84   : > { %1813 = vmatpush2.bf16.msra.mxu1 %v3037_v46  ;;  %1701 = vmatprep.subr.bf16.mxu0 %v3038_v47  ;;  %v555_v46 = vld [vmem:[%s3417_s12 + $0xe0] sm:$0xff]  ;;  %v2707_v47 = vcombine.low %v543_v29, %v547_v30 }
  0x85   : > { %1814 = vmatprep.subr.bf16.mxu1 %v3040_v48  ;;  %v2709_v48 = vcombine.low %v544_v33, %v548_v34  ;;  %v2716_v53 = vcombine.high %v551_v45, %v555_v46  ;;  %v579_v30 = vld [vmem:[%s3417_s12 + $0x1a0] sm:$0xff]  ;;  %v3128_v33 = vld [vmem:[%s3415_s11 + $0x2d0] ss:$8 sps:$4 sm:$0xff]  }
  0x86   : > { %v3131_v34 = vld [vmem:[%s3415_s11 + $0x3d0] ss:$8 sps:$4 sm:$0xff]  }
  0x87   : > { %1702 = vmatpush2.bf16.msra.mxu0 %v3042_v49  ;;  %v552_v49 = vld [vmem:[%s3417_s12 + $0xc8] sm:$0xff] }
  0x88   : > { %1815 = vmatpush2.bf16.msra.mxu1 %v3043_v50  ;;  %1703 = vmatprep.subr.bf16.mxu0 %v3044_v55  ;;  %v556_v50 = vld [vmem:[%s3417_s12 + $0xe8] sm:$0xff]  ;;  %v3098_v55 = vld [vmem:[%s3415_s11 + $0x220] ss:$8 sps:$4 sm:$0xff]  }
  0x89   : > { %1816 = vmatprep.subr.bf16.mxu1 %v3046_v57  ;;  %v2718_v54 = vcombine.high %v552_v49, %v556_v50  ;;  %v3106_v57 = vld [vmem:[%s3415_s11 + $0x214] ss:$8 sps:$4 sm:$0xff]  }
  0x8b   : > { %1704 = vmatpush2.bf16.msra.mxu0 %v3048_v59  ;;  %v3104_v59 = vld [vmem:[%s3415_s11 + $0x210] ss:$8 sps:$4 sm:$0xff]  }
  0x8c   : > { %1817 = vmatpush2.bf16.msra.mxu1 %v3049_v60  ;;  %1705 = vmatprep.subr.bf16.mxu0 %v3050_v61  ;;  %v559_v60 = vld [vmem:[%s3417_s12 + $0x100] sm:$0xff] }
  0x8d   : > { %1818 = vmatprep.subr.bf16.mxu1 %v3052_v62  ;;  %v563_v61 = vld [vmem:[%s3417_s12 + $0x120] sm:$0xff]  ;;  %v2715_v62 = vcombine.low %v551_v45, %v555_v46 }
  0x8e   : > { %v2723_v13 = vcombine.low %v559_v60, %v563_v61  ;;  %v587_v46 = vld [vmem:[%s3417_s12 + $0x1e0] sm:$0xff] }
  0x8f   : > { %1706 = vmatpush2.bf16.msra.mxu0 %v3054_v63  ;;  %v2717_v63 = vcombine.low %v552_v49, %v556_v50  ;;  %v3140_v49 = vld [vmem:[%s3415_s11 + $0x2b0] ss:$8 sps:$4 sm:$0xff]  }
  0x90   : > { %1819 = vmatpush2.bf16.msra.mxu1 %v3055_v0  ;;  %1707 = vmatprep.subr.bf16.mxu0 %v3056_v1  ;;  %v560_v0 = vld [vmem:[%s3417_s12 + $0x108] sm:$0xff] }
  0x91   : > { %1820 = vmatprep.subr.bf16.mxu1 %v3058_v2  ;;  %v564_v1 = vld [vmem:[%s3417_s12 + $0x128] sm:$0xff] }
  0x92   : > { %v3107_v2 = vld [vmem:[%s3415_s11 + $0x310] ss:$8 sps:$4 sm:$0xff]  }
  0x93   : > { %1708 = vmatpush2.bf16.msra.mxu0 %v3060_v3  ;;  %v3112_v3 = vld [vmem:[%s3415_s11 + $0x204] ss:$8 sps:$4 sm:$0xff]   ;;  %v3143_v50 = vld [vmem:[%s3415_s11 + $0x3b0] ss:$8 sps:$4 sm:$0xff]  }
  0x94   : > { %1821 = vmatpush2.bf16.msra.mxu1 %v3061_v4  ;;  %1709 = vmatprep.subr.bf16.mxu0 %v3062_v5  ;;  %v3115_v4 = vld [vmem:[%s3415_s11 + $0x304] ss:$8 sps:$4 sm:$0xff]   ;;  %v2724_v5 = vcombine.high %v559_v60, %v563_v61 }
  0x95   : > { %1822 = vmatprep.subr.bf16.mxu1 %v3064_v6  ;;  %v2726_v6 = vcombine.high %v560_v0, %v564_v1 }
  0x97   : > { %1710 = vmatpush2.bf16.msra.mxu0 %v3066_v7  ;;  %v3110_v7 = vld [vmem:[%s3415_s11 + $0x200] ss:$8 sps:$4 sm:$0xff]  }
  0x98   : > { %1823 = vmatpush2.bf16.msra.mxu1 %v3067_v8  ;;  %1905 = vmatprep.subr.bf16.mxu0 %v3070_v9  ;;  %v3113_v8 = vld [vmem:[%s3415_s11 + $0x300] ss:$8 sps:$4 sm:$0xff]   ;;  %v3118_v9 = vld [vmem:[%s3415_s11 + $0x2f4] ss:$8 sps:$4 sm:$0xff]  }
  0x99   : > { %2018 = vmatprep.subr.bf16.mxu1 %v3073_v10  ;;  %v3121_v10 = vld [vmem:[%s3415_s11 + $0x3f4] ss:$8 sps:$4 sm:$0xff]  }
  0x9a   : > { %1712 = vmatmul.mubr.bf16.vlgmr.msra.gmra.mxu0 %v2691_v14  ;;  %v2725_v14 = vcombine.low %v560_v0, %v564_v1  ;;  %v534_v0 = vld [vmem:[%s3417_s12 + $0x38] sm:$0xff]  ;;  %v3152_v1 = vld [vmem:[%s3415_s11 + $0x290] ss:$8 sps:$4 sm:$0xff]  }
  0x9b   : > { %1825 = vmatmul.mubr.bf16.vlgmr.msra.gmra.mxu1 %v2693_v15  ;;  %1906 = vmatpush1.bf16.msra.mxu0 %v3068_v11  ;;  %v567_v11 = vld [vmem:[%s3417_s12 + $0x140] sm:$0xff]  ;;  %v568_v15 = vld [vmem:[%s3417_s12 + $0x148] sm:$0xff] }
  0x9c   : > { %2019 = vmatpush1.bf16.msra.mxu1 %v3071_v12  ;;  %1907 = vmatprep.subr.bf16.mxu0 %v3076_v19  ;;  %v571_v12 = vld [vmem:[%s3417_s12 + $0x160] sm:$0xff]  ;;  %v2733_v29 = vcombine.low %v568_v15, %v572_v16 }
  0x9d   : > { %2020 = vmatprep.subr.bf16.mxu1 %v3079_v20  ;;  %1721 = vmatprep.mubr.bf16.mxu0 %v2700_v21  ;;  %v3124_v19 = vld [vmem:[%s3415_s11 + $0x2e4] ss:$8 sps:$4 sm:$0xff]   ;;  %v2732_v21 = vcombine.high %v567_v11, %v571_v12 }
  0x9e   : > { %1834 = vmatprep.mubr.bf16.mxu1 %v2702_v22  ;;  %v3127_v20 = vld [vmem:[%s3415_s11 + $0x3e4] ss:$8 sps:$4 sm:$0xff]   ;;  %v2734_v22 = vcombine.high %v568_v15, %v572_v16 }
  0x9f   : > { %1908 = vmatpush1.bf16.msra.mxu0 %v3074_v23  ;;  %v3122_v23 = vld [vmem:[%s3415_s11 + $0x2e0] ss:$8 sps:$4 sm:$0xff]  }
  0xa0   : > { %2021 = vmatpush1.bf16.msra.mxu1 %v3077_v24  ;;  %1909 = vmatprep.subr.bf16.mxu0 %v3082_v25  ;;  %v3125_v24 = vld [vmem:[%s3415_s11 + $0x3e0] ss:$8 sps:$4 sm:$0xff]   ;;  %v3130_v25 = vld [vmem:[%s3415_s11 + $0x2d4] ss:$8 sps:$4 sm:$0xff]  }
  0xa1   : > { %2022 = vmatprep.subr.bf16.mxu1 %v3085_v26  ;;  %v3133_v26 = vld [vmem:[%s3415_s11 + $0x3d4] ss:$8 sps:$4 sm:$0xff]  }
  0xa2   : > { %1722 = vmatmul.mubr.bf16.gmra.mxu0 %v2699_v31  ;;  %v576_v31 = vld [vmem:[%s3417_s12 + $0x188] sm:$0xff] }
  0xa3   : > { %1835 = vmatmul.mubr.bf16.gmra.mxu1 %v2701_v32  ;;  %1910 = vmatpush1.bf16.msra.mxu0 %v3080_v27  ;;  %v575_v27 = vld [vmem:[%s3417_s12 + $0x180] sm:$0xff]  ;;  %v580_v32 = vld [vmem:[%s3417_s12 + $0x1a8] sm:$0xff] }
  0xa4   : > { %2023 = vmatpush1.bf16.msra.mxu1 %v3083_v28  ;;  %1911 = vmatprep.subr.bf16.mxu0 %v3088_v35  ;;  %v2731_v28 = vcombine.low %v567_v11, %v571_v12  ;;  %v3136_v35 = vld [vmem:[%s3415_s11 + $0x2c4] ss:$8 sps:$4 sm:$0xff]   ;;  %v2741_v45 = vcombine.low %v576_v31, %v580_v32  ;;  %v538_v11 = vld [vmem:[%s3417_s12 + $0x58] sm:$0xff] }
  0xa5   : > { %2024 = vmatprep.subr.bf16.mxu1 %v3091_v36  ;;  %1731 = vmatprep.mubr.bf16.mxu0 %v2708_v37  ;;  %v3139_v36 = vld [vmem:[%s3415_s11 + $0x3c4] ss:$8 sps:$4 sm:$0xff]   ;;  %v2740_v37 = vcombine.high %v575_v27, %v579_v30  ;;  %v542_v12 = vld [vmem:[%s3417_s12 + $0x78] sm:$0xff] }
  0xa6   : > { %1844 = vmatprep.mubr.bf16.mxu1 %v2710_v38  ;;  %v2742_v38 = vcombine.high %v576_v31, %v580_v32  ;;  %v2706_v16 = vcombine.high %v538_v11, %v542_v12 }
  0xa7   : > { %1912 = vmatpush1.bf16.msra.mxu0 %v3086_v39  ;;  %v3134_v39 = vld [vmem:[%s3415_s11 + $0x2c0] ss:$8 sps:$4 sm:$0xff]  }
  0xa8   : > { %2025 = vmatpush1.bf16.msra.mxu1 %v3089_v40  ;;  %1913 = vmatprep.subr.bf16.mxu0 %v3094_v41  ;;  %v3137_v40 = vld [vmem:[%s3415_s11 + $0x3c0] ss:$8 sps:$4 sm:$0xff]   ;;  %v3142_v41 = vld [vmem:[%s3415_s11 + $0x2b4] ss:$8 sps:$4 sm:$0xff]  }
  0xa9   : > { %2026 = vmatprep.subr.bf16.mxu1 %v3097_v42  ;;  %v3145_v42 = vld [vmem:[%s3415_s11 + $0x3b4] ss:$8 sps:$4 sm:$0xff]  }
  0xaa   : > { %1732 = vmatmul.mubr.bf16.gmra.mxu0 %v2707_v47  ;;  %v584_v47 = vld [vmem:[%s3417_s12 + $0x1c8] sm:$0xff] }
  0xab   : > { %1845 = vmatmul.mubr.bf16.gmra.mxu1 %v2709_v48  ;;  %1914 = vmatpush1.bf16.msra.mxu0 %v3092_v43  ;;  %v583_v43 = vld [vmem:[%s3417_s12 + $0x1c0] sm:$0xff]  ;;  %v588_v48 = vld [vmem:[%s3417_s12 + $0x1e8] sm:$0xff] }
  0xac   : > { %2027 = vmatpush1.bf16.msra.mxu1 %v3095_v44  ;;  %1915 = vmatprep.subr.bf16.mxu0 %v3100_v51  ;;  %v2739_v44 = vcombine.low %v575_v27, %v579_v30  ;;  %v3148_v51 = vld [vmem:[%s3415_s11 + $0x2a4] ss:$8 sps:$4 sm:$0xff]   ;;  %v2747_v60 = vcombine.low %v583_v43, %v587_v46  ;;  %v2749_v61 = vcombine.low %v584_v47, %v588_v48  ;;  %v554_v27 = vld [vmem:[%s3417_s12 + $0xd8] sm:$0xff] }
  0xad   : > { %2028 = vmatprep.subr.bf16.mxu1 %v3103_v52  ;;  %1741 = vmatprep.mubr.bf16.mxu0 %v2716_v53  ;;  %v3151_v52 = vld [vmem:[%s3415_s11 + $0x3a4] ss:$8 sps:$4 sm:$0xff]   ;;  %v2748_v53 = vcombine.high %v583_v43, %v587_v46  ;;  %v570_v43 = vld [vmem:[%s3417_s12 + $0x158] sm:$0xff] }
  0xae   : > { %1854 = vmatprep.mubr.bf16.mxu1 %v2718_v54  ;;  %v2750_v54 = vcombine.high %v584_v47, %v588_v48 }
  0xaf   : > { %1916 = vmatpush1.bf16.msra.mxu0 %v3098_v55  ;;  %v3146_v55 = vld [vmem:[%s3415_s11 + $0x2a0] ss:$8 sps:$4 sm:$0xff]  }
  0xb0   : > { %2029 = vmatpush1.bf16.msra.mxu1 %v3101_v56  ;;  %1917 = vmatprep.subr.bf16.mxu0 %v3106_v57  ;;  %v3149_v56 = vld [vmem:[%s3415_s11 + $0x3a0] ss:$8 sps:$4 sm:$0xff]   ;;  %v3154_v57 = vld [vmem:[%s3415_s11 + $0x294] ss:$8 sps:$4 sm:$0xff]  }
  0xb1   : > { %2030 = vmatprep.subr.bf16.mxu1 %v3109_v58  ;;  %v3157_v58 = vld [vmem:[%s3415_s11 + $0x394] ss:$8 sps:$4 sm:$0xff]  }
  0xb2   : > { %1742 = vmatmul.mubr.bf16.gmra.mxu0 %v2715_v62  ;;  %v533_v62 = vld [vmem:[%s3417_s12 + $0x30] sm:$0xff] }
  0xb3   : > { %1855 = vmatmul.mubr.bf16.gmra.mxu1 %v2717_v63  ;;  %1918 = vmatpush1.bf16.msra.mxu0 %v3104_v59  ;;  %v529_v59 = vld [vmem:[%s3417_s12 + $0x10] sm:$0xff]  ;;  %v530_v63 = vld [vmem:[%s3417_s12 + $0x18] sm:$0xff] }
  0xb4   : > { %2031 = vmatpush1.bf16.msra.mxu1 %v3107_v2  ;;  %1919 = vmatprep.subr.bf16.mxu0 %v3112_v3  ;;  %v3155_v2 = vld [vmem:[%s3415_s11 + $0x390] ss:$8 sps:$4 sm:$0xff]   ;;  %v3160_v3 = vld [vmem:[%s3415_s11 + $0x284] ss:$8 sps:$4 sm:$0xff]  }
  0xb5   : > { %2032 = vmatprep.subr.bf16.mxu1 %v3115_v4  ;;  %1751 = vmatprep.mubr.bf16.mxu0 %v2724_v5  ;;  %v3163_v4 = vld [vmem:[%s3415_s11 + $0x384] ss:$8 sps:$4 sm:$0xff]   ;;  %v2696_v5 = vcombine.high %v529_v59, %v533_v62 }
  0xb6   : > { %1864 = vmatprep.mubr.bf16.mxu1 %v2726_v6  ;;  %v2698_v6 = vcombine.high %v530_v63, %v534_v0 }
  0xb7   : > { %1920 = vmatpush1.bf16.msra.mxu0 %v3110_v7  ;;  %v3158_v7 = vld [vmem:[%s3415_s11 + $0x280] ss:$8 sps:$4 sm:$0xff]  }
  0xb8   : > { %2033 = vmatpush1.bf16.msra.mxu1 %v3113_v8  ;;  %1921 = vmatprep.subr.bf16.mxu0 %v3118_v9  ;;  %v3161_v8 = vld [vmem:[%s3415_s11 + $0x380] ss:$8 sps:$4 sm:$0xff]   ;;  %v537_v9 = vld [vmem:[%s3417_s12 + $0x50] sm:$0xff] }
  0xb9   : > { %2034 = vmatprep.subr.bf16.mxu1 %v3121_v10  ;;  %v541_v10 = vld [vmem:[%s3417_s12 + $0x70] sm:$0xff] }
  0xba   : > { %1752 = vmatmul.mubr.bf16.gmra.mxu0 %v2723_v13  ;;  %v2695_v13 = vcombine.low %v529_v59, %v533_v62  ;;  %v2704_v15 = vcombine.high %v537_v9, %v541_v10  ;;  %v586_v59 = vld [vmem:[%s3417_s12 + $0x1d8] sm:$0xff] }
  0xbb   : > { %1865 = vmatmul.mubr.bf16.gmra.mxu1 %v2725_v14  ;;  %1922 = vmatpush2.bf16.msra.mxu0 %v3116_v17  ;;  %v2697_v14 = vcombine.low %v530_v63, %v534_v0  ;;  %v545_v17 = vld [vmem:[%s3417_s12 + $0x90] sm:$0xff] }
  0xbc   : > { %2035 = vmatpush2.bf16.msra.mxu1 %v3119_v18  ;;  %1923 = vmatprep.subr.bf16.mxu0 %v3124_v19  ;;  %v549_v18 = vld [vmem:[%s3417_s12 + $0xb0] sm:$0xff]  ;;  %v546_v19 = vld [vmem:[%s3417_s12 + $0x98] sm:$0xff] }
  0xbd   : > { %2036 = vmatprep.subr.bf16.mxu1 %v3127_v20  ;;  %1761 = vmatprep.mubr.bf16.mxu0 %v2732_v21  ;;  %v550_v20 = vld [vmem:[%s3417_s12 + $0xb8] sm:$0xff]  ;;  %v2703_v21 = vcombine.low %v537_v9, %v541_v10 }
  0xbe   : > { %1874 = vmatprep.mubr.bf16.mxu1 %v2734_v22  ;;  %v2705_v22 = vcombine.low %v538_v11, %v542_v12  ;;  %v2713_v30 = vcombine.low %v546_v19, %v550_v20 }
  0xbf   : > { %1924 = vmatpush2.bf16.msra.mxu0 %v3122_v23  ;;  %v2712_v23 = vcombine.high %v545_v17, %v549_v18 }
  0xc0   : > { %2037 = vmatpush2.bf16.msra.mxu1 %v3125_v24  ;;  %1925 = vmatprep.subr.bf16.mxu0 %v3130_v25  ;;  %v2714_v24 = vcombine.high %v546_v19, %v550_v20  ;;  %v553_v25 = vld [vmem:[%s3417_s12 + $0xd0] sm:$0xff] }
  0xc1   : > { %2038 = vmatprep.subr.bf16.mxu1 %v3133_v26  ;;  %v557_v26 = vld [vmem:[%s3417_s12 + $0xf0] sm:$0xff] }
  0xc2   : > { %1762 = vmatmul.mubr.bf16.gmra.mxu0 %v2731_v28  ;;  %v558_v28 = vld [vmem:[%s3417_s12 + $0xf8] sm:$0xff]  ;;  %v2720_v31 = vcombine.high %v553_v25, %v557_v26 }
  0xc3   : > { %1875 = vmatmul.mubr.bf16.gmra.mxu1 %v2733_v29  ;;  %1926 = vmatpush2.bf16.msra.mxu0 %v3128_v33  ;;  %v2711_v29 = vcombine.low %v545_v17, %v549_v18  ;;  %v2722_v32 = vcombine.high %v554_v27, %v558_v28  ;;  %v561_v33 = vld [vmem:[%s3417_s12 + $0x110] sm:$0xff] }
  0xc4   : > { %2039 = vmatpush2.bf16.msra.mxu1 %v3131_v34  ;;  %1927 = vmatprep.subr.bf16.mxu0 %v3136_v35  ;;  %v565_v34 = vld [vmem:[%s3417_s12 + $0x130] sm:$0xff]  ;;  %v562_v35 = vld [vmem:[%s3417_s12 + $0x118] sm:$0xff] }
  0xc5   : > { %2040 = vmatprep.subr.bf16.mxu1 %v3139_v36  ;;  %1771 = vmatprep.mubr.bf16.mxu0 %v2740_v37  ;;  %v566_v36 = vld [vmem:[%s3417_s12 + $0x138] sm:$0xff]  ;;  %v2719_v37 = vcombine.low %v553_v25, %v557_v26 }
  0xc6   : > { %1884 = vmatprep.mubr.bf16.mxu1 %v2742_v38  ;;  %v2721_v38 = vcombine.low %v554_v27, %v558_v28  ;;  %v2729_v46 = vcombine.low %v562_v35, %v566_v36 }
  0xc7   : > { %1928 = vmatpush2.bf16.msra.mxu0 %v3134_v39  ;;  %v2728_v39 = vcombine.high %v561_v33, %v565_v34 }
  0xc8   : > { %2041 = vmatpush2.bf16.msra.mxu1 %v3137_v40  ;;  %1929 = vmatprep.subr.bf16.mxu0 %v3142_v41  ;;  %v2730_v40 = vcombine.high %v562_v35, %v566_v36  ;;  %v569_v41 = vld [vmem:[%s3417_s12 + $0x150] sm:$0xff] }
  0xc9   : > { %2042 = vmatprep.subr.bf16.mxu1 %v3145_v42  ;;  %v573_v42 = vld [vmem:[%s3417_s12 + $0x170] sm:$0xff] }
  0xca   : > { %1772 = vmatmul.mubr.bf16.gmra.mxu0 %v2739_v44  ;;  %v574_v44 = vld [vmem:[%s3417_s12 + $0x178] sm:$0xff]  ;;  %v2736_v47 = vcombine.high %v569_v41, %v573_v42 }
  0xcb   : > { %1885 = vmatmul.mubr.bf16.gmra.mxu1 %v2741_v45  ;;  %1930 = vmatpush2.bf16.msra.mxu0 %v3140_v49  ;;  %v2727_v45 = vcombine.low %v561_v33, %v565_v34  ;;  %v2738_v48 = vcombine.high %v570_v43, %v574_v44  ;;  %v577_v49 = vld [vmem:[%s3417_s12 + $0x190] sm:$0xff] }
  0xcc   : > { %2043 = vmatpush2.bf16.msra.mxu1 %v3143_v50  ;;  %1931 = vmatprep.subr.bf16.mxu0 %v3148_v51  ;;  %v581_v50 = vld [vmem:[%s3417_s12 + $0x1b0] sm:$0xff]  ;;  %v578_v51 = vld [vmem:[%s3417_s12 + $0x198] sm:$0xff] }
  0xcd   : > { %2044 = vmatprep.subr.bf16.mxu1 %v3151_v52  ;;  %1781 = vmatprep.mubr.bf16.mxu0 %v2748_v53  ;;  %v582_v52 = vld [vmem:[%s3417_s12 + $0x1b8] sm:$0xff]  ;;  %v2735_v53 = vcombine.low %v569_v41, %v573_v42 }
  0xce   : > { %1894 = vmatprep.mubr.bf16.mxu1 %v2750_v54  ;;  %v2737_v54 = vcombine.low %v570_v43, %v574_v44  ;;  %v2745_v62 = vcombine.low %v578_v51, %v582_v52 }
  0xcf   : > { %1932 = vmatpush2.bf16.msra.mxu0 %v3146_v55  ;;  %v2744_v55 = vcombine.high %v577_v49, %v581_v50 }
  0xd0   : > { %2045 = vmatpush2.bf16.msra.mxu1 %v3149_v56  ;;  %1933 = vmatprep.subr.bf16.mxu0 %v3154_v57  ;;  %v2746_v56 = vcombine.high %v578_v51, %v582_v52  ;;  %v585_v57 = vld [vmem:[%s3417_s12 + $0x1d0] sm:$0xff] }
  0xd1   : > { %2046 = vmatprep.subr.bf16.mxu1 %v3157_v58  ;;  %v589_v58 = vld [vmem:[%s3417_s12 + $0x1f0] sm:$0xff] }
  0xd2   : > { %1782 = vmatmul.mubr.bf16.gmra.mxu0 %v2747_v60  ;;  %v590_v60 = vld [vmem:[%s3417_s12 + $0x1f8] sm:$0xff]  ;;  %v2752_v63 = vcombine.high %v585_v57, %v589_v58 }
  0xd3   : > { %1895 = vmatmul.mubr.bf16.gmra.mxu1 %v2749_v61  ;;  %1934 = vmatpush2.bf16.msra.mxu0 %v3152_v1  ;;  %v2743_v61 = vcombine.low %v577_v49, %v581_v50  ;;  %v2754_v0 = vcombine.high %v586_v59, %v590_v60  ;;  %v2751_v1 = vcombine.low %v585_v57, %v589_v58 }
  0xd4   : > { %2047 = vmatpush2.bf16.msra.mxu1 %v3155_v2  ;;  %1935 = vmatprep.subr.bf16.mxu0 %v3160_v3  ;;  %v2753_v2 = vcombine.low %v586_v59, %v590_v60 }
  0xd5   : > { %2048 = vmatprep.subr.bf16.mxu1 %v3163_v4  ;;  %1937 = vmatprep.mubr.bf16.mxu0 %v2696_v5 }
  0xd6   : > { %2050 = vmatprep.mubr.bf16.mxu1 %v2698_v6 }
  0xd7   : > { %1936 = vmatpush2.bf16.msra.mxu0 %v3158_v7 }
  0xd8   : > { %2049 = vmatpush2.bf16.msra.mxu1 %v3161_v8 }
  0xda   : > { %1938 = vmatmul.mubr.bf16.vlgmr.msra.gmra.mxu0 %v2695_v13 }
  0xdb   : > { %2051 = vmatmul.mubr.bf16.vlgmr.msra.gmra.mxu1 %v2697_v14  ;;  %1947 = vmatprep.mubr.bf16.mxu0 %v2704_v15 }
  0xdc   : > { %2060 = vmatprep.mubr.bf16.mxu1 %v2706_v16 }
  0xe2   : > { %1948 = vmatmul.mubr.bf16.gmra.mxu0 %v2703_v21 }
  0xe3   : > { %2061 = vmatmul.mubr.bf16.gmra.mxu1 %v2705_v22  ;;  %1957 = vmatprep.mubr.bf16.mxu0 %v2712_v23 }
  0xe4   : > { %2070 = vmatprep.mubr.bf16.mxu1 %v2714_v24 }
  0xea   : > { %1958 = vmatmul.mubr.bf16.gmra.mxu0 %v2711_v29 }
  0xeb   : > { %2071 = vmatmul.mubr.bf16.gmra.mxu1 %v2713_v30  ;;  %1967 = vmatprep.mubr.bf16.mxu0 %v2720_v31 }
  0xec   : > { %2080 = vmatprep.mubr.bf16.mxu1 %v2722_v32 }
  0xf2   : > { %1968 = vmatmul.mubr.bf16.gmra.mxu0 %v2719_v37 }
  0xf3   : > { %2081 = vmatmul.mubr.bf16.gmra.mxu1 %v2721_v38  ;;  %1977 = vmatprep.mubr.bf16.mxu0 %v2728_v39 }
  0xf4   : > { %2090 = vmatprep.mubr.bf16.mxu1 %v2730_v40 }
  0xfa   : > { %1978 = vmatmul.mubr.bf16.gmra.mxu0 %v2727_v45 }
  0xfb   : > { %2091 = vmatmul.mubr.bf16.gmra.mxu1 %v2729_v46  ;;  %1987 = vmatprep.mubr.bf16.mxu0 %v2736_v47 }
  0xfc   : > { %2100 = vmatprep.mubr.bf16.mxu1 %v2738_v48 }
 0x102   : > { %1988 = vmatmul.mubr.bf16.gmra.mxu0 %v2735_v53 }
 0x103   : > { %2101 = vmatmul.mubr.bf16.gmra.mxu1 %v2737_v54  ;;  %1997 = vmatprep.mubr.bf16.mxu0 %v2744_v55 }
 0x104   : > { %2110 = vmatprep.mubr.bf16.mxu1 %v2746_v56 }
 0x10a   : > { %1998 = vmatmul.mubr.bf16.gmra.mxu0 %v2743_v61 }
 0x10b   : > { %2111 = vmatmul.mubr.bf16.gmra.mxu1 %v2745_v62  ;;  %2007 = vmatprep.mubr.bf16.mxu0 %v2752_v63 }
 0x10c   : > { %2120 = vmatprep.mubr.bf16.mxu1 %v2754_v0 }
 0x112   : > { %2008 = vmatmul.mubr.bf16.gmra.mxu0 %v2751_v1 }
 0x113   : > { %2121 = vmatmul.mubr.bf16.gmra.mxu1 %v2753_v2 }
 0x15a   : > { %v3614_v3 = vpop.f32.mrf.mxu0 }
 0x15b   : > { %v3616_v4 = vpop.f32.mrf.mxu1 }
 0x15c   : > { %v3618_v5 = vpop.f32.mrf.mxu0 }
 0x15d   : > { %v3620_v6 = vpop.f32.mrf.mxu1 }
 0x15e   : > { %v3622_v7 = vpop.f32.mrf.mxu0 }
 0x15f   : > { %v3624_v8 = vpop.f32.mrf.mxu1 }
 0x160   : > { %v3627_v9 = vpop.f32.mrf.mxu0 }
 0x161   : > { %v3629_v10 = vpop.f32.mrf.mxu1 }
 0x162   : > { %v3631_v11 = vpop.f32.mrf.mxu0 }
 0x163   : > { %v3633_v12 = vpop.f32.mrf.mxu1 }
 0x164   : > { %v3635_v13 = vpop.f32.mrf.mxu0 }
 0x165   : > { %v3637_v14 = vpop.f32.mrf.mxu1 }
 0x166   : > { %v3639_v15 = vpop.f32.mrf.mxu0 }
 0x167   : > { %v3641_v16 = vpop.f32.mrf.mxu1 }
 0x168   : > { %v3643_v17 = vpop.f32.mrf.mxu0 }
 0x169   : > { %v3645_v18 = vpop.f32.mrf.mxu1 }
 0x16a   : > { %v3647_v19 = vpop.f32.mrf.mxu0 }
 0x16b   : > { %v3649_v20 = vpop.f32.mrf.mxu1 }
 0x16c   : > { %v3651_v21 = vpop.f32.mrf.mxu0 }
 0x16d   : > { %v3653_v22 = vpop.f32.mrf.mxu1 }
 0x16e   : > { %v3655_v23 = vpop.f32.mrf.mxu0 }
 0x16f   : > { %v3657_v24 = vpop.f32.mrf.mxu1 }
 0x170   : > { %v3659_v25 = vpop.f32.mrf.mxu0 }
 0x171   : > { %v3661_v26 = vpop.f32.mrf.mxu1 }
 0x172   : > { %v3663_v27 = vpop.f32.mrf.mxu0 }
 0x173   : > { %v3665_v28 = vpop.f32.mrf.mxu1 }
 0x174   : > { %v3667_v29 = vpop.f32.mrf.mxu0 }
 0x175   : > { %v3669_v30 = vpop.f32.mrf.mxu1 }
 0x176   : > { %v3671_v31 = vpop.f32.mrf.mxu0 }
 0x177   : > { %v3673_v32 = vpop.f32.mrf.mxu1 }
 0x178   : > { %v3675_v33 = vpop.f32.mrf.mxu0 }
 0x179   : > { %v3677_v34 = vpop.f32.mrf.mxu1 }
 0x17a   : > { %v3679_v35 = vpop.f32.mrf.mxu0 }
 0x17b   : > { %v3681_v36 = vpop.f32.mrf.mxu1 }
 0x17c   : > { %v3683_v37 = vpop.f32.mrf.mxu0 }
 0x17d   : > { %v3685_v38 = vpop.f32.mrf.mxu1 }
 0x17e   : > { %v3687_v39 = vpop.f32.mrf.mxu0 }
 0x17f   : > { %v3689_v40 = vpop.f32.mrf.mxu1 }
 0x180   : > { %v3691_v41 = vpop.f32.mrf.mxu0 }
 0x181   : > { %v3693_v42 = vpop.f32.mrf.mxu1 }
 0x182   : > { %v3695_v43 = vpop.f32.mrf.mxu0 }
 0x183   : > { %v3697_v44 = vpop.f32.mrf.mxu1 }
 0x184   : > { %v3699_v45 = vpop.f32.mrf.mxu0 }
 0x185   : > { %v3701_v46 = vpop.f32.mrf.mxu1 }
 0x186   : > { %v3703_v47 = vpop.f32.mrf.mxu0 }
 0x187   : > { %v3705_v48 = vpop.f32.mrf.mxu1 }
 0x188   : > { %v3707_v49 = vpop.f32.mrf.mxu0 }
 0x189   : > { %v3709_v50 = vpop.f32.mrf.mxu1 }
 0x18a   : > { %3884 = vst [vmem:[#allocation6_spill] sm:$0xff] %v3709_v50  ;;  %v3711_v51 = vpop.f32.mrf.mxu0  ;;  %v497_v50 = vld [vmem:[#allocation2 + $0xd8] sm:$0xff] }
 0x18b   : > { %3885 = vst [vmem:[#allocation7_spill] sm:$0xff] %v3711_v51  ;;  %v3713_v52 = vpop.f32.mrf.mxu1 }
 0x18c   : > { %3886 = vst [vmem:[#allocation8_spill] sm:$0xff] %v3713_v52  ;;  %v3715_v53 = vpop.f32.mrf.mxu0 }
 0x18d   : > { %3887 = vst [vmem:[#allocation9_spill] sm:$0xff] %v3715_v53  ;;  %v3717_v54 = vpop.f32.mrf.mxu1 }
 0x18e   : > { %3888 = vst [vmem:[#allocation10_spill] sm:$0xff] %v3717_v54  ;;  %v3719_v55 = vpop.f32.mrf.mxu0 }
 0x18f   : > { %3889 = vst [vmem:[#allocation11_spill] sm:$0xff] %v3719_v55  ;;  %v3721_v56 = vpop.f32.mrf.mxu1 }
 0x190   : > { %3890 = vst [vmem:[#allocation12_spill] sm:$0xff] %v3721_v56  ;;  %v3723_v57 = vpop.f32.mrf.mxu0 }
 0x191   : > { %3891 = vst [vmem:[#allocation13_spill] sm:$0xff] %v3723_v57  ;;  %v3725_v58 = vpop.f32.mrf.mxu1  ;;  %v1827_v57 = vadd.f32 %v3616_v4, %v3614_v3  ;;  %v1833_v3 = vadd.f32 %v3629_v10, %v3627_v9 }
 0x192   : > { %3892 = vst [vmem:[#allocation14_spill] sm:$0xff] %v3725_v58  ;;  %v3727_v59 = vpop.f32.mrf.mxu0 }
 0x193   : > { %3893 = vst [vmem:[#allocation15_spill] sm:$0xff] %v3727_v59  ;;  %v3729_v60 = vpop.f32.mrf.mxu1 }
 0x194   : > { %3894 = vst [vmem:[#allocation16_spill] sm:$0xff] %v3729_v60  ;;  %v3731_v61 = vpop.f32.mrf.mxu0  ;;  %v1829_v60 = vadd.f32 %v3620_v6, %v3618_v5 }
 0x195   : > { %3895 = vst [vmem:[#allocation17_spill] sm:$0xff] %v3731_v61  ;;  %v3733_v62 = vpop.f32.mrf.mxu1  ;;  %v495_v61 = vld [vmem:[#allocation2 + $0xb0] sm:$0xff] }
 0x196   : > { %3896 = vst [vmem:[#allocation18_spill] sm:$0xff] %v3733_v62  ;;  %v3735_v63 = vpop.f32.mrf.mxu0 }
 0x197   : > { %3897 = vst [vmem:[#allocation19_spill] sm:$0xff] %v3735_v63  ;;  %v3737_v0 = vpop.f32.mrf.mxu1  ;;  %v1831_v63 = vadd.f32 %v3624_v8, %v3622_v7 }
 0x198   : > { %3898 = vst [vmem:[#allocation20_spill] sm:$0xff] %v3737_v0  ;;  %v3739_v1 = vpop.f32.mrf.mxu0 }
 0x199   : > { %3899 = vst [vmem:[#allocation21_spill] sm:$0xff] %v3739_v1  ;;  %v3741_v2 = vpop.f32.mrf.mxu1  ;;  %v496_v1 = vld [vmem:[#allocation2] sm:$0xff] }
 0x19a   : > { %3900 = vst [vmem:[#allocation22_spill] sm:$0xff] %v3741_v2  ;;  %v1939_v58 = vpop.f32.mrf.mxu0 }
 0x19b   : > { %v2052_v56 = vpop.f32.mrf.mxu1  ;;  %v1940_v59 = vadd.f32 %v1939_v58, %v1827_v57  ;;  %v1837_v57 = vadd.f32 %v3633_v12, %v3631_v11  ;;  %v1841_v11 = vadd.f32 %v3641_v16, %v3639_v15  ;;  %v1847_v15 = vadd.f32 %v3649_v20, %v3647_v19 }
 0x19c   : > { %v1941_v55 = vpop.f32.mrf.mxu0  ;;  %v1851_v19 = vadd.f32 %v3657_v24, %v3655_v23  ;;  %v1857_v23 = vadd.f32 %v3665_v28, %v3663_v27  ;;  %v1861_v27 = vadd.f32 %v3673_v32, %v3671_v31  ;;  %v1867_v31 = vadd.f32 %v3681_v36, %v3679_v35 }
 0x19d   : > { %v2054_v62 = vpop.f32.mrf.mxu1  ;;  %v2053_v0 = vadd.f32 %v2052_v56, %v1940_v59  ;;  %v1942_v54 = vadd.f32 %v1941_v55, %v1829_v60  ;;  %v498_v55 = vld [vmem:[#allocation2 + $0x18] sm:$0xff]  ;;  %v1839_v60 = vadd.f32 %v3637_v14, %v3635_v13  ;;  %v1843_v13 = vadd.f32 %v3645_v18, %v3643_v17 }
 0x19e   : > { %v1943_v53 = vpop.f32.mrf.mxu0  ;;  %v1849_v17 = vadd.f32 %v3653_v22, %v3651_v21  ;;  %v1853_v21 = vadd.f32 %v3661_v26, %v3659_v25  ;;  %v1859_v25 = vadd.f32 %v3669_v30, %v3667_v29  ;;  %v1863_v29 = vadd.f32 %v3677_v34, %v3675_v33 }
 0x19f   : > { %v2056_v2 = vpop.f32.mrf.mxu1  ;;  %v2131_v4 = vadd.f32 %v2053_v0, %v495_v61  ;;  %v2055_v52 = vadd.f32 %v2054_v62, %v1942_v54  ;;  %v1944_v51 = vadd.f32 %v1943_v53, %v1831_v63  ;;  %v499_v54 = vld [vmem:[#allocation2 + $0x50] sm:$0xff]  ;;  %v500_v63 = vld [vmem:[#allocation2 + $0x68] sm:$0xff]  ;;  %v1869_v33 = vadd.f32 %v3685_v38, %v3683_v37 }
 0x1a0   : > { %v1945_v5 = vpop.f32.mrf.mxu0  ;;  %v1871_v35 = vadd.f32 %v3689_v40, %v3687_v39  ;;  %v1873_v37 = vadd.f32 %v3693_v42, %v3691_v41  ;;  %v1877_v39 = vadd.f32 %v3697_v44, %v3695_v43  ;;  %v1879_v41 = vadd.f32 %v3701_v46, %v3699_v45 }
 0x1a1   : > { %v2058_v6 = vpop.f32.mrf.mxu1  ;;  %2163 = vst [vmem:[#allocation2 + $0xb0] sm:$0xff] %v2131_v4  ;;  %v2132_v58 = vadd.f32 %v2055_v52, %v496_v1  ;;  %v2057_v7 = vadd.f32 %v2056_v2, %v1944_v51  ;;  %v1946_v8 = vadd.f32 %v1945_v5, %v1833_v3  ;;  %v501_v3 = vld [vmem:[#allocation2 + $0x30] sm:$0xff]  ;;  %v1881_v43 = vadd.f32 %v3705_v48, %v3703_v47 }
 0x1a2   : > { %v1949_v56 = vpop.f32.mrf.mxu0 }
 0x1a3   : > { %v2062_v59 = vpop.f32.mrf.mxu1  ;;  %2164 = vst [vmem:[#allocation2] sm:$0xff] %v2132_v58  ;;  %v2133_v9 = vadd.f32 %v2057_v7, %v497_v50  ;;  %v2059_v10 = vadd.f32 %v2058_v6, %v1946_v8  ;;  %v1950_v53 = vadd.f32 %v1949_v56, %v1837_v57  ;;  %v502_v58 = vld [vmem:[#allocation2 + $0x48] sm:$0xff] }
 0x1a4   : > { %v1951_v61 = vpop.f32.mrf.mxu0 }
 0x1a5   : > { %v2064_v62 = vpop.f32.mrf.mxu1  ;;  %2165 = vst [vmem:[#allocation2 + $0xd8] sm:$0xff] %v2133_v9  ;;  %v2134_v12 = vadd.f32 %v2059_v10, %v498_v55  ;;  %v2063_v51 = vadd.f32 %v2062_v59, %v1950_v53  ;;  %v1952_v52 = vadd.f32 %v1951_v61, %v1839_v60  ;;  %v503_v59 = vld [vmem:[#allocation2 + $0x80] sm:$0xff] }
 0x1a6   : > { %v1953_v0 = vpop.f32.mrf.mxu0 }
 0x1a7   : > { %v2066_v1 = vpop.f32.mrf.mxu1  ;;  %2166 = vst [vmem:[#allocation2 + $0x18] sm:$0xff] %v2134_v12  ;;  %v2135_v14 = vadd.f32 %v2063_v51, %v499_v54  ;;  %v2065_v50 = vadd.f32 %v2064_v62, %v1952_v52  ;;  %v1954_v2 = vadd.f32 %v1953_v0, %v1841_v11  ;;  %v504_v54 = vld [vmem:[#allocation2 + $0x88] sm:$0xff] }
 0x1a8   : > { %v1955_v4 = vpop.f32.mrf.mxu0  ;;  %v505_v51 = vld [vmem:[#allocation2 + $0xe8] sm:$0xff] }
 0x1a9   : > { %v2068_v5 = vpop.f32.mrf.mxu1  ;;  %2167 = vst [vmem:[#allocation2 + $0x50] sm:$0xff] %v2135_v14  ;;  %v2136_v16 = vadd.f32 %v2065_v50, %v500_v63  ;;  %v2067_v6 = vadd.f32 %v2066_v1, %v1954_v2  ;;  %v1956_v57 = vadd.f32 %v1955_v4, %v1843_v13  ;;  %v506_v13 = vld [vmem:[#allocation2 + $0xb8] sm:$0xff]  ;;  %v507_v4 = vld [vmem:[#allocation2 + $0x60] sm:$0xff] }
 0x1aa   : > { %v1959_v7 = vpop.f32.mrf.mxu0 }
 0x1ab   : > { %v2072_v8 = vpop.f32.mrf.mxu1  ;;  %2168 = vst [vmem:[#allocation2 + $0x68] sm:$0xff] %v2136_v16  ;;  %v2137_v18 = vadd.f32 %v2067_v6, %v501_v3  ;;  %v2069_v55 = vadd.f32 %v2068_v5, %v1956_v57  ;;  %v1960_v56 = vadd.f32 %v1959_v7, %v1847_v15  ;;  %v508_v57 = vld [vmem:[#allocation2 + $0xf0] sm:$0xff] }
 0x1ac   : > { %v1961_v60 = vpop.f32.mrf.mxu0 }
 0x1ad   : > { %v2074_v9 = vpop.f32.mrf.mxu1  ;;  %2169 = vst [vmem:[#allocation2 + $0x30] sm:$0xff] %v2137_v18  ;;  %v2138_v20 = vadd.f32 %v2069_v55, %v502_v58  ;;  %v2073_v10 = vadd.f32 %v2072_v8, %v1960_v56  ;;  %v1962_v53 = vadd.f32 %v1961_v60, %v1849_v17  ;;  %v509_v18 = vld [vmem:[#allocation2 + $0x8] sm:$0xff] }
 0x1ae   : > { %v1963_v61 = vpop.f32.mrf.mxu0 }
 0x1af   : > { %v2076_v62 = vpop.f32.mrf.mxu1  ;;  %2170 = vst [vmem:[#allocation2 + $0x48] sm:$0xff] %v2138_v20  ;;  %v2139_v22 = vadd.f32 %v2073_v10, %v503_v59  ;;  %v2075_v11 = vadd.f32 %v2074_v9, %v1962_v53  ;;  %v1964_v12 = vadd.f32 %v1963_v61, %v1851_v19  ;;  %v510_v9 = vld [vmem:[#allocation2 + $0x78] sm:$0xff] }
 0x1b0   : > { %v1965_v52 = vpop.f32.mrf.mxu0 }
 0x1b1   : > { %v2078_v63 = vpop.f32.mrf.mxu1  ;;  %2171 = vst [vmem:[#allocation2 + $0x80] sm:$0xff] %v2139_v22  ;;  %v2140_v24 = vadd.f32 %v2075_v11, %v504_v54  ;;  %v2077_v0 = vadd.f32 %v2076_v62, %v1964_v12  ;;  %v1966_v1 = vadd.f32 %v1965_v52, %v1853_v21  ;;  %v511_v54 = vld [vmem:[#allocation2 + $0x38] sm:$0xff] }
 0x1b2   : > { %v1969_v14 = vpop.f32.mrf.mxu0  ;;  %v512_v11 = vld [vmem:[#allocation2 + $0x58] sm:$0xff] }
 0x1b3   : > { %v2082_v50 = vpop.f32.mrf.mxu1  ;;  %2172 = vst [vmem:[#allocation2 + $0x88] sm:$0xff] %v2140_v24  ;;  %v2141_v26 = vadd.f32 %v2077_v0, %v505_v51  ;;  %v2079_v2 = vadd.f32 %v2078_v63, %v1966_v1  ;;  %v1970_v3 = vadd.f32 %v1969_v14, %v1857_v23  ;;  %v513_v23 = vld [vmem:[#allocation2 + $0x40] sm:$0xff]  ;;  %v514_v14 = vld [vmem:[#allocation2 + $0xc8] sm:$0xff] }
 0x1b4   : > { %v1971_v5 = vpop.f32.mrf.mxu0 }
 0x1b5   : > { %v2084_v15 = vpop.f32.mrf.mxu1  ;;  %2173 = vst [vmem:[#allocation2 + $0xe8] sm:$0xff] %v2141_v26  ;;  %v2142_v28 = vadd.f32 %v2079_v2, %v506_v13  ;;  %v2083_v16 = vadd.f32 %v2082_v50, %v1970_v3  ;;  %v1972_v6 = vadd.f32 %v1971_v5, %v1859_v25  ;;  %v515_v3 = vld [vmem:[#allocation2 + $0xe0] sm:$0xff] }
 0x1b6   : > { %v1973_v58 = vpop.f32.mrf.mxu0 }
 0x1b7   : > { %v2086_v7 = vpop.f32.mrf.mxu1  ;;  %2174 = vst [vmem:[#allocation2 + $0xb8] sm:$0xff] %v2142_v28  ;;  %v2143_v30 = vadd.f32 %v2083_v16, %v507_v4  ;;  %v2085_v8 = vadd.f32 %v2084_v15, %v1972_v6  ;;  %v1974_v17 = vadd.f32 %v1973_v58, %v1861_v27  ;;  %v516_v28 = vld [vmem:[#allocation2 + $0x90] sm:$0xff] }
 0x1b8   : > { %v1975_v55 = vpop.f32.mrf.mxu0 }
 0x1b9   : > { %v2088_v56 = vpop.f32.mrf.mxu1  ;;  %2175 = vst [vmem:[#allocation2 + $0x60] sm:$0xff] %v2143_v30  ;;  %v2144_v32 = vadd.f32 %v2085_v8, %v508_v57  ;;  %v2087_v59 = vadd.f32 %v2086_v7, %v1974_v17  ;;  %v1976_v60 = vadd.f32 %v1975_v55, %v1863_v29  ;;  %v3901_v57 = vld [vmem:[#allocation6_spill] sm:$0xff]  ;;  %v517_v29 = vld [vmem:[#allocation2 + $0x70] sm:$0xff] }
 0x1ba   : > { %v1979_v19 = vpop.f32.mrf.mxu0  ;;  %v1883_v45 = vadd.f32 %v3901_v57, %v3707_v49  ;;  %v3902_v17 = vld [vmem:[#allocation7_spill] sm:$0xff] }
 0x1bb   : > { %v2092_v20 = vpop.f32.mrf.mxu1  ;;  %2176 = vst [vmem:[#allocation2 + $0xf0] sm:$0xff] %v2144_v32  ;;  %v2145_v34 = vadd.f32 %v2087_v59, %v509_v18  ;;  %v2089_v10 = vadd.f32 %v2088_v56, %v1976_v60  ;;  %v1980_v53 = vadd.f32 %v1979_v19, %v1867_v31  ;;  %v3903_v18 = vld [vmem:[#allocation8_spill] sm:$0xff]  ;;  %v518_v31 = vld [vmem:[#allocation2 + $0xc0] sm:$0xff] }
 0x1bc   : > { %v1981_v61 = vpop.f32.mrf.mxu0  ;;  %v1887_v47 = vadd.f32 %v3903_v18, %v3902_v17  ;;  %v3904_v60 = vld [vmem:[#allocation9_spill] sm:$0xff]  ;;  %v3917_v17 = vld [vmem:[#allocation22_spill] sm:$0xff] }
 0x1bd   : > { %v2094_v62 = vpop.f32.mrf.mxu1  ;;  %2177 = vst [vmem:[#allocation2 + $0x8] sm:$0xff] %v2145_v34  ;;  %v2146_v36 = vadd.f32 %v2089_v10, %v510_v9  ;;  %v2093_v21 = vadd.f32 %v2092_v20, %v1980_v53  ;;  %v1982_v22 = vadd.f32 %v1981_v61, %v1869_v33  ;;  %v3905_v9 = vld [vmem:[#allocation10_spill] sm:$0xff]  ;;  %v3907_v61 = vld [vmem:[#allocation12_spill] sm:$0xff] }
 0x1be   : > { %v1983_v12 = vpop.f32.mrf.mxu0  ;;  %v1889_v49 = vadd.f32 %v3905_v9, %v3904_v60  ;;  %v519_v34 = vld [vmem:[#allocation2 + $0xa8] sm:$0xff]  ;;  %v526_v9 = vld [vmem:[#allocation2 + $0x98] sm:$0xff] }
 0x1bf   : > { %v2096_v51 = vpop.f32.mrf.mxu1  ;;  %2178 = vst [vmem:[#allocation2 + $0x78] sm:$0xff] %v2146_v36  ;;  %v2147_v38 = vadd.f32 %v2093_v21, %v511_v54  ;;  %v2095_v52 = vadd.f32 %v2094_v62, %v1982_v22  ;;  %v1984_v63 = vadd.f32 %v1983_v12, %v1871_v35  ;;  %v3906_v54 = vld [vmem:[#allocation11_spill] sm:$0xff] }
 0x1c0   : > { %v1985_v24 = vpop.f32.mrf.mxu0  ;;  %v1891_v62 = vadd.f32 %v3907_v61, %v3906_v54  ;;  %v520_v22 = vld [vmem:[#allocation2 + $0xd0] sm:$0xff] }
 0x1c1   : > { %v2098_v0 = vpop.f32.mrf.mxu1  ;;  %2179 = vst [vmem:[#allocation2 + $0x38] sm:$0xff] %v2147_v38  ;;  %v2148_v40 = vadd.f32 %v2095_v52, %v512_v11  ;;  %v2097_v1 = vadd.f32 %v2096_v51, %v1984_v63  ;;  %v1986_v13 = vadd.f32 %v1985_v24, %v1873_v37  ;;  %v3908_v51 = vld [vmem:[#allocation13_spill] sm:$0xff]  ;;  %v3909_v37 = vld [vmem:[#allocation14_spill] sm:$0xff]  ;;  %v521_v24 = vld [vmem:[#allocation2 + $0x10] sm:$0xff] }
 0x1c2   : > { %v1989_v50 = vpop.f32.mrf.mxu0  ;;  %v1893_v38 = vadd.f32 %v3909_v37, %v3908_v51 }
 0x1c3   : > { %v2102_v25 = vpop.f32.mrf.mxu1  ;;  %2180 = vst [vmem:[#allocation2 + $0x58] sm:$0xff] %v2148_v40  ;;  %v2149_v42 = vadd.f32 %v2097_v1, %v513_v23  ;;  %v2099_v26 = vadd.f32 %v2098_v0, %v1986_v13  ;;  %v1990_v2 = vadd.f32 %v1989_v50, %v1877_v39  ;;  %v3910_v40 = vld [vmem:[#allocation15_spill] sm:$0xff]  ;;  %v3911_v1 = vld [vmem:[#allocation16_spill] sm:$0xff] }
 0x1c4   : > { %v1991_v4 = vpop.f32.mrf.mxu0  ;;  %v1897_v13 = vadd.f32 %v3911_v1, %v3910_v40 }
 0x1c5   : > { %v2104_v5 = vpop.f32.mrf.mxu1  ;;  %2181 = vst [vmem:[#allocation2 + $0x40] sm:$0xff] %v2149_v42  ;;  %v2150_v44 = vadd.f32 %v2099_v26, %v514_v14  ;;  %v2103_v15 = vadd.f32 %v2102_v25, %v1990_v2  ;;  %v1992_v27 = vadd.f32 %v1991_v4, %v1879_v41  ;;  %v522_v41 = vld [vmem:[#allocation2 + $0x28] sm:$0xff]  ;;  %v3912_v2 = vld [vmem:[#allocation17_spill] sm:$0xff] }
 0x1c6   : > { %v1993_v16 = vpop.f32.mrf.mxu0 }
 0x1c7   : > { %v2106_v6 = vpop.f32.mrf.mxu1  ;;  %2182 = vst [vmem:[#allocation2 + $0xc8] sm:$0xff] %v2150_v44  ;;  %v2151_v46 = vadd.f32 %v2103_v15, %v515_v3  ;;  %v2105_v58 = vadd.f32 %v2104_v5, %v1992_v27  ;;  %v1994_v7 = vadd.f32 %v1993_v16, %v1881_v43  ;;  %v3913_v3 = vld [vmem:[#allocation18_spill] sm:$0xff]  ;;  %v3914_v16 = vld [vmem:[#allocation19_spill] sm:$0xff] }
 0x1c8   : > { %v1995_v30 = vpop.f32.mrf.mxu0  ;;  %v1899_v4 = vadd.f32 %v3913_v3, %v3912_v2  ;;  %v523_v15 = vld [vmem:[#allocation2 + $0xa0] sm:$0xff] }
 0x1c9   : > { %v2108_v8 = vpop.f32.mrf.mxu1  ;;  %2183 = vst [vmem:[#allocation2 + $0xe0] sm:$0xff] %v2151_v46  ;;  %v2152_v48 = vadd.f32 %v2105_v58, %v516_v28  ;;  %v2107_v55 = vadd.f32 %v2106_v6, %v1994_v7  ;;  %v1996_v56 = vadd.f32 %v1995_v30, %v1883_v45  ;;  %v3915_v6 = vld [vmem:[#allocation20_spill] sm:$0xff] }
 0x1ca   : > { %v1999_v32 = vpop.f32.mrf.mxu0  ;;  %v1901_v57 = vadd.f32 %v3915_v6, %v3914_v16  ;;  %v524_v7 = vld [vmem:[#allocation2 + $0xf8] sm:$0xff] }
 0x1cb   : > { %v2112_v59 = vpop.f32.mrf.mxu1  ;;  %2184 = vst [vmem:[#allocation2 + $0x90] sm:$0xff] %v2152_v48  ;;  %v2153_v19 = vadd.f32 %v2107_v55, %v517_v29  ;;  %v2109_v20 = vadd.f32 %v2108_v8, %v1996_v56  ;;  %v2000_v33 = vadd.f32 %v1999_v32, %v1887_v47  ;;  %v3916_v8 = vld [vmem:[#allocation21_spill] sm:$0xff] }
 0x1cc   : > { %v2001_v10 = vpop.f32.mrf.mxu0  ;;  %v1903_v18 = vadd.f32 %v3917_v17, %v3916_v8  ;;  %v525_v56 = vld [vmem:[#allocation2 + $0x20] sm:$0xff] }
 0x1cd   : > { %v2114_v53 = vpop.f32.mrf.mxu1  ;;  %2185 = vst [vmem:[#allocation2 + $0x70] sm:$0xff] %v2153_v19  ;;  %v2154_v35 = vadd.f32 %v2109_v20, %v518_v31  ;;  %v2113_v36 = vadd.f32 %v2112_v59, %v2000_v33  ;;  %v2002_v21 = vadd.f32 %v2001_v10, %v1889_v49 }
 0x1ce   : > { %v2003_v11 = vpop.f32.mrf.mxu0 }
 0x1cf   : > { %v2116_v12 = vpop.f32.mrf.mxu1  ;;  %2186 = vst [vmem:[#allocation2 + $0xc0] sm:$0xff] %v2154_v35  ;;  %v2155_v52 = vadd.f32 %v2113_v36, %v519_v34  ;;  %v2115_v63 = vadd.f32 %v2114_v53, %v2002_v21  ;;  %v2004_v23 = vadd.f32 %v2003_v11, %v1891_v62 }
 0x1d0   : > { %v2005_v0 = vpop.f32.mrf.mxu0 }
 0x1d1   : > { %v2118_v39 = vpop.f32.mrf.mxu1  ;;  %2187 = vst [vmem:[#allocation2 + $0xa8] sm:$0xff] %v2155_v52  ;;  %v2156_v14 = vadd.f32 %v2115_v63, %v520_v22  ;;  %v2117_v50 = vadd.f32 %v2116_v12, %v2004_v23  ;;  %v2006_v25 = vadd.f32 %v2005_v0, %v1893_v38 }
 0x1d2   : > { %v2009_v42 = vpop.f32.mrf.mxu0 }
 0x1d3   : > { %v2122_v26 = vpop.f32.mrf.mxu1  ;;  %2188 = vst [vmem:[#allocation2 + $0xd0] sm:$0xff] %v2156_v14  ;;  %v2157_v5 = vadd.f32 %v2117_v50, %v521_v24  ;;  %v2119_v43 = vadd.f32 %v2118_v39, %v2006_v25  ;;  %v2010_v44 = vadd.f32 %v2009_v42, %v1897_v13 }
 0x1d4   : > { %v2011_v27 = vpop.f32.mrf.mxu0 }
 0x1d5   : > { %v2124_v28 = vpop.f32.mrf.mxu1  ;;  %2189 = vst [vmem:[#allocation2 + $0x10] sm:$0xff] %v2157_v5  ;;  %v2158_v45 = vadd.f32 %v2119_v43, %v522_v41  ;;  %v2123_v46 = vadd.f32 %v2122_v26, %v2010_v44  ;;  %v2012_v58 = vadd.f32 %v2011_v27, %v1899_v4 }
 0x1d6   : > { %v2013_v29 = vpop.f32.mrf.mxu0 }
 0x1d7   : > { %v2126_v30 = vpop.f32.mrf.mxu1  ;;  %2190 = vst [vmem:[#allocation2 + $0x28] sm:$0xff] %v2158_v45  ;;  %v2159_v47 = vadd.f32 %v2123_v46, %v523_v15  ;;  %v2125_v48 = vadd.f32 %v2124_v28, %v2012_v58  ;;  %v2014_v55 = vadd.f32 %v2013_v29, %v1901_v57 }
 0x1d8   : > { %v2015_v31 = vpop.f32.mrf.mxu0 }
 0x1d9   : > { %2191 = vst [vmem:[#allocation2 + $0xa0] sm:$0xff] %v2159_v47  ;;  %v2160_v32 = vadd.f32 %v2125_v48, %v524_v7  ;;  %v2127_v59 = vadd.f32 %v2126_v30, %v2014_v55  ;;  %v2016_v60 = vadd.f32 %v2015_v31, %v1903_v18  ;;  %v2128_v49 = vpop.f32.mrf.mxu1 }
 0x1db   : > { %2192 = vst [vmem:[#allocation2 + $0xf8] sm:$0xff] %v2160_v32  ;;  %v2161_v19 = vadd.f32 %v2127_v59, %v525_v56  ;;  %v2129_v20 = vadd.f32 %v2128_v49, %v2016_v60  ;;  %2198 = sbr.rel (%p2883_p13) target bundleno = 535 (0x217), region = 63 }
 0x1dd   : > { %2193 = vst [vmem:[#allocation2 + $0x20] sm:$0xff] %v2161_v19  ;;  %v2162_v33 = vadd.f32 %v2129_v20, %v526_v9 }
 0x1df   : > { %2194 = vst [vmem:[#allocation2 + $0x98] sm:$0xff] %v2162_v33 }
 0x1e0   : > { %v2199_v34 = vld [vmem:[#allocation2 + $0xb0] sm:$0xff]  ;;  %v2200_v10 = vld [vmem:[#allocation2] sm:$0xff]  ;;  %v2201_v53 = vld [vmem:[#allocation2 + $0xd8] sm:$0xff] }
 0x1e1   : > { %v2912_v54 = vpack.c.bf16 %v2200_v10, %v2199_v34  ;;  %v2411_v61 = vmul.f32 %v2199_v34, %v2199_v34  ;;  %v2412_v62 = vmul.f32 %v2200_v10, %v2200_v10  ;;  %v2202_v35 = vld [vmem:[#allocation2 + $0x18] sm:$0xff]  ;;  %v2344_v36 = vadd.f32 %v2201_v53, %v2199_v34  ;;  %v2203_v21 = vld [vmem:[#allocation2 + $0x50] sm:$0xff]  ;;  %v2204_v22 = vld [vmem:[#allocation2 + $0x68] sm:$0xff] }
 0x1e2   : > { %v2913_v11 = vpack.c.bf16 %v2202_v35, %v2201_v53  ;;  %v2365_v12 = vadd.f32 %v2202_v35, %v2200_v10  ;;  %v2413_v51 = vmul.f32 %v2201_v53, %v2201_v53  ;;  %v2414_v37 = vmul.f32 %v2202_v35, %v2202_v35  ;;  %v2205_v38 = vld [vmem:[#allocation2 + $0x30] sm:$0xff]  ;;  %v2206_v52 = vld [vmem:[#allocation2 + $0x48] sm:$0xff]  ;;  %v2207_v39 = vld [vmem:[#allocation2 + $0x80] sm:$0xff] }
 0x1e3   : > { %2327 = vst [vmem:[%s3881_s2] sm:$0xff] %v2912_v54  ;;  %v2914_v63 = vpack.c.bf16 %v2204_v22, %v2203_v21  ;;  %v2345_v23 = vadd.f32 %v2344_v36, %v2203_v21  ;;  %v2415_v24 = vmul.f32 %v2203_v21, %v2203_v21  ;;  %v2416_v0 = vmul.f32 %v2204_v22, %v2204_v22  ;;  %v2208_v50 = vld [vmem:[#allocation2 + $0x88] sm:$0xff]  ;;  %v2210_v3 = vld [vmem:[#allocation2 + $0xb8] sm:$0xff]  ;;  %v2211_v15 = vld [vmem:[#allocation2 + $0x60] sm:$0xff] }
 0x1e4   : > { %2328 = vst [vmem:[%s3881_s2 + $0x8] sm:$0xff] %v2913_v11  ;;  %v2443_v40 = vadd.f32 %v2413_v51, %v2411_v61  ;;  %v2464_v1 = vadd.f32 %v2414_v37, %v2412_v62  ;;  %v2366_v13 = vadd.f32 %v2365_v12, %v2204_v22  ;;  %v2915_v14 = vpack.c.bf16 %v2206_v52, %v2205_v38  ;;  %v2209_v25 = vld [vmem:[#allocation2 + $0xe8] sm:$0xff]  ;;  %v2212_v27 = vld [vmem:[#allocation2 + $0xf0] sm:$0xff]  ;;  %v2214_v47 = vld [vmem:[#allocation2 + $0x78] sm:$0xff] }
 0x1e5   : > { %2329 = vst [vmem:[%s3881_s2 + $0x10] sm:$0xff] %v2914_v63  ;;  %v2346_v41 = vadd.f32 %v2345_v23, %v2205_v38  ;;  %v2417_v42 = vmul.f32 %v2205_v38, %v2205_v38  ;;  %v2418_v26 = vmul.f32 %v2206_v52, %v2206_v52  ;;  %v2916_v2 = vpack.c.bf16 %v2208_v50, %v2207_v39  ;;  %v2213_v29 = vld [vmem:[#allocation2 + $0x8] sm:$0xff]  ;;  %v2215_v32 = vld [vmem:[#allocation2 + $0x38] sm:$0xff]  ;;  %v2217_v10 = vld [vmem:[#allocation2 + $0x40] sm:$0xff] }
 0x1e6   : > { %v2444_v4 = vadd.f32 %v2443_v40, %v2415_v24  ;;  %v2465_v5 = vadd.f32 %v2464_v1, %v2416_v0  ;;  %2330 = vst [vmem:[%s3881_s2 + $0x18] sm:$0xff] %v2915_v14  ;;  %v2367_v43 = vadd.f32 %v2366_v13, %v2206_v52  ;;  %v2419_v44 = vmul.f32 %v2207_v39, %v2207_v39  ;;  %v2216_v59 = vld [vmem:[#allocation2 + $0x58] sm:$0xff]  ;;  %v2218_v53 = vld [vmem:[#allocation2 + $0xc8] sm:$0xff]  ;;  %v2219_v11 = vld [vmem:[#allocation2 + $0xe0] sm:$0xff] }
 0x1e7   : > { %2331 = vst [vmem:[%s3881_s2 + $0x20] sm:$0xff] %v2916_v2  ;;  %v2347_v28 = vadd.f32 %v2346_v41, %v2207_v39  ;;  %v2420_v16 = vmul.f32 %v2208_v50, %v2208_v50  ;;  %v2917_v6 = vpack.c.bf16 %v2210_v3, %v2209_v25  ;;  %v2421_v57 = vmul.f32 %v2209_v25, %v2209_v25  ;;  %v2220_v12 = vld [vmem:[#allocation2 + $0x90] sm:$0xff]  ;;  %v2222_v23 = vld [vmem:[#allocation2 + $0xc0] sm:$0xff]  ;;  %v2223_v1 = vld [vmem:[#allocation2 + $0xa8] sm:$0xff] }
 0x1e8   : > { %v2445_v45 = vadd.f32 %v2444_v4, %v2417_v42  ;;  %v2466_v46 = vadd.f32 %v2465_v5, %v2418_v26  ;;  %v2368_v58 = vadd.f32 %v2367_v43, %v2208_v50  ;;  %v2422_v7 = vmul.f32 %v2210_v3, %v2210_v3  ;;  %v2221_v63 = vld [vmem:[#allocation2 + $0x70] sm:$0xff]  ;;  %v2226_v4 = vld [vmem:[#allocation2 + $0x28] sm:$0xff] }
 0x1e9   : > { %2332 = vst [vmem:[%s3881_s2 + $0x28] sm:$0xff] %v2917_v6  ;;  %v2348_v30 = vadd.f32 %v2347_v28, %v2209_v25  ;;  %v2918_v8 = vpack.c.bf16 %v2212_v27, %v2211_v15  ;;  %v2423_v17 = vmul.f32 %v2211_v15, %v2211_v15  ;;  %v2424_v18 = vmul.f32 %v2212_v27, %v2212_v27  ;;  %v2224_v13 = vld [vmem:[#allocation2 + $0xd0] sm:$0xff]  ;;  %v2227_v6 = vld [vmem:[#allocation2 + $0xa0] sm:$0xff] }
 0x1ea   : > { %v2446_v48 = vadd.f32 %v2445_v45, %v2419_v44  ;;  %v2467_v55 = vadd.f32 %v2466_v46, %v2420_v16  ;;  %v2369_v56 = vadd.f32 %v2368_v58, %v2210_v3  ;;  %v2919_v31 = vpack.c.bf16 %v2214_v47, %v2213_v29  ;;  %v2225_v3 = vld [vmem:[#allocation2 + $0x10] sm:$0xff] }
 0x1eb   : > { %2333 = vst [vmem:[%s3881_s2 + $0x30] sm:$0xff] %v2918_v8  ;;  %v2349_v60 = vadd.f32 %v2348_v30, %v2211_v15  ;;  %v2425_v9 = vmul.f32 %v2213_v29, %v2213_v29  ;;  %v2920_v49 = vpack.c.bf16 %v2216_v59, %v2215_v32  ;;  %v2426_v34 = vmul.f32 %v2214_v47, %v2214_v47  ;;  %v2230_v30 = vld [vmem:[#allocation2 + $0x98] sm:$0xff] }
 0x1ec   : > { %v2447_v19 = vadd.f32 %v2446_v48, %v2421_v57  ;;  %v2468_v20 = vadd.f32 %v2467_v55, %v2422_v7  ;;  %v2370_v33 = vadd.f32 %v2369_v56, %v2212_v27  ;;  %2334 = vst [vmem:[%s3881_s2 + $0x38] sm:$0xff] %v2919_v31  ;;  %v2427_v61 = vmul.f32 %v2215_v32, %v2215_v32  ;;  %v2228_v57 = vld [vmem:[#allocation2 + $0xf8] sm:$0xff] }
 0x1ed   : > { %v2350_v54 = vadd.f32 %v2349_v60, %v2213_v29  ;;  %2335 = vst [vmem:[%s3881_s2 + $0x40] sm:$0xff] %v2920_v49  ;;  %v2921_v62 = vpack.c.bf16 %v2218_v53, %v2217_v10  ;;  %v2428_v22 = vmul.f32 %v2216_v59, %v2216_v59  ;;  %v2429_v37 = vmul.f32 %v2217_v10, %v2217_v10  ;;  %v2229_v29 = vld [vmem:[#allocation2 + $0x20] sm:$0xff] }
 0x1ee   : > { %v2448_v35 = vadd.f32 %v2447_v19, %v2423_v17  ;;  %v2469_v36 = vadd.f32 %v2468_v20, %v2424_v18  ;;  %v2371_v21 = vadd.f32 %v2370_v33, %v2214_v47  ;;  %v2430_v38 = vmul.f32 %v2218_v53, %v2218_v53 }
 0x1ef   : > { %v2351_v51 = vadd.f32 %v2350_v54, %v2215_v32  ;;  %2336 = vst [vmem:[%s3881_s2 + $0x48] sm:$0xff] %v2921_v62  ;;  %v2922_v52 = vpack.c.bf16 %v2220_v12, %v2219_v11  ;;  %v2923_v40 = vpack.c.bf16 %v2222_v23, %v2221_v63  ;;  %v2431_v50 = vmul.f32 %v2219_v11, %v2219_v11 }
 0x1f0   : > { %v2449_v24 = vadd.f32 %v2448_v35, %v2425_v9  ;;  %v2470_v0 = vadd.f32 %v2469_v36, %v2426_v34  ;;  %v2372_v39 = vadd.f32 %v2371_v21, %v2216_v59  ;;  %v2924_v25 = vpack.c.bf16 %v2224_v13, %v2223_v1 }
 0x1f1   : > { %v2352_v14 = vadd.f32 %v2351_v51, %v2217_v10  ;;  %2337 = vst [vmem:[%s3881_s2 + $0x50] sm:$0xff] %v2922_v52  ;;  %v2432_v2 = vmul.f32 %v2220_v12, %v2220_v12  ;;  %2338 = vst [vmem:[%s3881_s2 + $0x58] sm:$0xff] %v2923_v40  ;;  %v2433_v43 = vmul.f32 %v2221_v63, %v2221_v63  ;;  %v2392_v52 = vlaneseq }
 0x1f2   : > { %v2450_v41 = vadd.f32 %v2449_v24, %v2427_v61  ;;  %v2471_v42 = vadd.f32 %v2470_v0, %v2428_v22  ;;  %v2373_v26 = vadd.f32 %v2372_v39, %v2218_v53  ;;  %2339 = vst [vmem:[%s3881_s2 + $0x60] sm:$0xff] %v2924_v25  ;;  %v2925_v44 = vpack.c.bf16 %v2226_v4, %v2225_v3 }
 0x1f3   : > { %v2353_v5 = vadd.f32 %v2352_v14, %v2219_v11  ;;  %v2434_v16 = vmul.f32 %v2222_v23, %v2222_v23  ;;  %v2435_v46 = vmul.f32 %v2223_v1, %v2223_v1  ;;  %v2436_v58 = vmul.f32 %v2224_v13, %v2224_v13 }
 0x1f4   : > { %v2451_v15 = vadd.f32 %v2450_v41, %v2429_v37  ;;  %v2472_v27 = vadd.f32 %v2471_v42, %v2430_v38  ;;  %v2374_v28 = vadd.f32 %v2373_v26, %v2220_v12  ;;  %2340 = vst [vmem:[%s3881_s2 + $0x68] sm:$0xff] %v2925_v44  ;;  %v2926_v7 = vpack.c.bf16 %v2228_v57, %v2227_v6 }
 0x1f5   : > { %v2354_v45 = vadd.f32 %v2353_v5, %v2221_v63  ;;  %v2927_v47 = vpack.c.bf16 %v2230_v30, %v2229_v29  ;;  %v2437_v55 = vmul.f32 %v2225_v3, %v2225_v3  ;;  %v2438_v59 = vmul.f32 %v2226_v4, %v2226_v4 }
 0x1f6   : > { %v2452_v8 = vadd.f32 %v2451_v15, %v2431_v50  ;;  %v2473_v17 = vadd.f32 %v2472_v27, %v2432_v2  ;;  %v2375_v18 = vadd.f32 %v2374_v28, %v2222_v23  ;;  %2341 = vst [vmem:[%s3881_s2 + $0x70] sm:$0xff] %v2926_v7  ;;  %v2439_v9 = vmul.f32 %v2227_v6, %v2227_v6  ;;  %v2343_v7 = vld [vmem:[#allocation3] sm:$0x3] }
 0x1f7   : > { %v2355_v48 = vadd.f32 %v2354_v45, %v2223_v1  ;;  %2342 = vst [vmem:[%s3881_s2 + $0x78] sm:$0xff] %v2927_v47  ;;  %v2440_v33 = vmul.f32 %v2228_v57, %v2228_v57  ;;  %v2441_v10 = vmul.f32 %v2229_v29, %v2229_v29  ;;  %v2442_v62 = vmul.f32 %v2230_v30, %v2230_v30 }
 0x1f8   : > { %v2453_v56 = vadd.f32 %v2452_v8, %v2433_v43  ;;  %v2474_v31 = vadd.f32 %v2473_v17, %v2434_v16  ;;  %v2376_v32 = vadd.f32 %v2375_v18, %v2224_v13  ;;  %v3206_v0 = vmov 1966171168   ;;  %v2410_v8 = vld [vmem:[#allocation4] sm:$0x3] }
 0x1f9   : > { %v2356_v60 = vadd.f32 %v2355_v48, %v2225_v3  ;;  %v2390_v39 = vunpack.c.l.s4 %v3206_v0  ;;  %v2393_v25 = vshrl.u32 %v2392_v52, 7  ;;  %vm2407_vm1 = vcmp.lt.s32.totalorder %v2392_v52, 256 }
 0x1fa   : > { %v2454_v49 = vadd.f32 %v2453_v56, %v2435_v46  ;;  %v2475_v19 = vadd.f32 %v2474_v31, %v2436_v58  ;;  %v2377_v20 = vadd.f32 %v2376_v32, %v2226_v4 }
 0x1fb   : > { %v2357_v34 = vadd.f32 %v2356_v60, %v2227_v6  ;;  %v2391_v2 = vunpack.c.0.s8 %v2390_v39 }
 0x1fc   : > { %v2455_v53 = vadd.f32 %v2454_v49, %v2437_v55  ;;  %v2476_v54 = vadd.f32 %v2475_v19, %v2438_v59  ;;  %v2378_v61 = vadd.f32 %v2377_v20, %v2228_v57 }
 0x1fd   : > { %v2358_v35 = vadd.f32 %v2357_v34, %v2229_v29  ;;  %v2394_v16 = vsub.s32 %v2391_v2, %v2393_v25 }
 0x1fe   : > { %v2456_v36 = vadd.f32 %v2455_v53, %v2439_v9  ;;  %v2477_v21 = vadd.f32 %v2476_v54, %v2440_v33  ;;  %v2379_v22 = vadd.f32 %v2378_v61, %v2230_v30 }
 0x1ff   : > { %v2359_v11 = vrot.slane %v2358_v35, 4 }
 0x200   : > { %v2380_v12 = vrot.slane %v2379_v22, 4  ;;  %v2457_v51 = vadd.f32 %v2456_v36, %v2441_v10  ;;  %v2478_v37 = vadd.f32 %v2477_v21, %v2442_v62 }
 0x201   : > { %v2360_v38 = vadd.f32 %v2359_v11, %v2358_v35 }
 0x202   : > { %v2381_v63 = vadd.f32 %v2380_v12, %v2379_v22  ;;  %v2458_v23 = vrot.slane %v2457_v51, 4  ;;  %v2479_v24 = vrot.slane %v2478_v37, 4 }
 0x203   : > { %v2361_v40 = vrot.slane %v2360_v38, 2 }
 0x204   : > { %v2382_v1 = vrot.slane %v2381_v63, 2  ;;  %v2459_v13 = vadd.f32 %v2458_v23, %v2457_v51  ;;  %v2480_v14 = vadd.f32 %v2479_v24, %v2478_v37 }
 0x205   : > { %v2362_v50 = vadd.f32 %v2361_v40, %v2360_v38 }
 0x206   : > { %v2383_v41 = vadd.f32 %v2382_v1, %v2381_v63  ;;  %v2460_v42 = vrot.slane %v2459_v13, 2  ;;  %v2481_v26 = vrot.slane %v2480_v14, 2 }
 0x207   : > { %v2363_v3 = vrot.slane %v2362_v50, 1 }
 0x208   : > { %v2384_v4 = vrot.slane %v2383_v41, 1  ;;  %v2461_v5 = vadd.f32 %v2460_v42, %v2459_v13  ;;  %v2482_v43 = vadd.f32 %v2481_v26, %v2480_v14 }
 0x209   : > { %v2364_v44 = vadd.f32 %v2363_v3, %v2362_v50 }
 0x20a   : > { %v2385_v15 = vadd.f32 %v2384_v4, %v2383_v41  ;;  %v2462_v27 = vrot.slane %v2461_v5, 1  ;;  %v2483_v28 = vrot.slane %v2482_v43, 1 }
 0x20c   : > { %v2388_v6 = vcombine.low %v2364_v44, %v2385_v15  ;;  %v2463_v57 = vadd.f32 %v2462_v27, %v2461_v5  ;;  %v2484_v45 = vadd.f32 %v2483_v28, %v2482_v43 }
 0x20e   : > { %v2395_v46 = vrot.slane %v2388_v6, %v2394_v16  ;;  %v2487_v58 = vcombine.low %v2463_v57, %v2484_v45 }
 0x210   : > { %v2402_v29 = vrot.slane %v2395_v46, %v2394_v16  ;;  %v2494_v30 = vrot.slane %v2487_v58, %v2394_v16 }
 0x212   : > { %v2404_v17 = vadd.f32 %v2402_v29, %v2343_v7  ;;  %v2501_v18 = vrot.slane %v2494_v30, %v2394_v16 }
 0x214   : > { %2409 = vst.msk [vmem:[#allocation3] sm:$0x3] %vm2407_vm1, %v2404_v17  ;;  %v2503_v47 = vadd.f32 %v2501_v18, %v2410_v8 }
 0x216   : > { %2504 = vst.msk [vmem:[#allocation4] sm:$0x3] %vm2407_vm1, %v2503_v47 }
 0x217 PF: > { %2508 = sbr.rel (!%p2195_p12) target bundleno = 543 (0x21f), region = 67  ;;  %v2510_v55 = vlaneseq (%p2195_p12) }
 0x219   : > { %vm2512_vm2 = vcmp.lt.s32.totalorder (%p2195_p12), %v2510_v55, 256 }
 0x21b   : > { %v2509_v48 = vld [vmem:[#allocation3] sm:$0x3] (%p2195_p12) }
 0x21c   : > { %2514 = vst.msk [vmem:[%s3882_s3] sm:$0x3] %vm2512_vm2, %v2509_v48 }
 0x21d   : > { %v2515_v56 = vld [vmem:[#allocation4] sm:$0x3] }
 0x21e   : > { %2516 = vst.msk [vmem:[%s3883_s4] sm:$0x3] %vm2512_vm2, %v2515_v56 }
 0x21f PF: > { %s15_s19 = sadd.s32 1, %s3202_s19   ;;  %s3918_s15 = smov %s3190_s16 }
 0x220   : > { %p12_p0 = scmp.ge.s32.totalorder %s15_s19, 4   ;;  %s3919_s16 = smov %s3267_s23 }
 0x221   : > { %s3920_s17 = smov %s3198_s18  ;;  %s3921_s18 = smov %s3923_s20 }
 0x222   :  { %14 = sbr.rel (!%p12_p0) target bundleno = 3 (0x3), region = 129 }

// kernel: critic_forward.11
= control target key start
LH: loop header
LB: loop body
LE: loop exit
PB: predicated region body
PF: predicated region fallthrough
CT: control target
= control target key end

     0   :  { %v64_v0 = vlaneseq  ;;  %s608_s0 = inlined_call_operand.vmem [shape: bf16[128,256], index: 0, kind: input, shape index: {}]   ;;  %s609_s1 = inlined_call_operand.vmem [shape: f32[1,256], index: 1, kind: input, shape index: {}]   ;;  %s610_s2 = inlined_call_operand.vmem [shape: f32[1,256], index: 2, kind: input, shape index: {}]   ;;  %s611_s3 = inlined_call_operand.vmem [shape: bf16[128,256], index: 3, kind: output, shape index: {}]  }
   0x1   :  { %v14_v1 = vld [vmem:[%s608_s0] sm:$0xff]  ;;  %v15_v6 = vld [vmem:[%s608_s0 + $0x8] sm:$0xff]  ;;  %v16_v7 = vld [vmem:[%s608_s0 + $0x10] sm:$0xff] }
   0x2   :  { %v62_v2 = vld [vmem:[%s609_s1] sm:$0x3]  ;;  %v30_v3 = vunpack.c.l.bf16 %v14_v1  ;;  %v31_v4 = vunpack.c.h.bf16 %v14_v1  ;;  %v65_v5 = vshrl.u32 %v64_v0, 7  ;;  %v17_v8 = vld [vmem:[%s608_s0 + $0x18] sm:$0xff]  ;;  %v32_v10 = vunpack.c.l.bf16 %v15_v6  ;;  %v440_v15 = vld [vmem:[%s608_s0 + $0x28] sm:$0xff] }
   0x3   :  { %v106_v9 = vld [vmem:[%s610_s2] sm:$0x3]  ;;  %v33_v11 = vunpack.c.h.bf16 %v15_v6  ;;  %v34_v12 = vunpack.c.l.bf16 %v16_v7  ;;  %v35_v13 = vunpack.c.h.bf16 %v16_v7  ;;  %v36_v18 = vunpack.c.l.bf16 %v17_v8  ;;  %v445_v20 = vld [vmem:[%s608_s0 + $0x30] sm:$0xff]  ;;  %v450_v21 = vld [vmem:[%s608_s0 + $0x38] sm:$0xff] }
   0x4   :  { %v435_v14 = vld [vmem:[%s608_s0 + $0x20] sm:$0xff]  ;;  %v66_v16 = vsub.s32 0, %v65_v5  ;;  %v70_v17 = vsub.s32 1, %v65_v5  ;;  %v37_v19 = vunpack.c.h.bf16 %v17_v8  ;;  %v40_v24 = vunpack.c.l.bf16 %v440_v15 }
   0x5   :  { %v38_v22 = vunpack.c.l.bf16 %v435_v14  ;;  %v39_v23 = vunpack.c.h.bf16 %v435_v14  ;;  %v41_v25 = vunpack.c.h.bf16 %v440_v15  ;;  %v42_v30 = vunpack.c.l.bf16 %v445_v20 }
   0x6   :  { %v456_v26 = vrot.slane %v62_v2, %v66_v16  ;;  %v458_v27 = vrot.slane %v62_v2, %v70_v17  ;;  %v460_v28 = vrot.slane %v106_v9, %v66_v16  ;;  %v462_v29 = vrot.slane %v106_v9, %v70_v17 }
   0x7   :  { %v43_v31 = vunpack.c.h.bf16 %v445_v20  ;;  %v44_v32 = vunpack.c.l.bf16 %v450_v21  ;;  %v45_v33 = vunpack.c.h.bf16 %v450_v21 }
   0x8   :  { %v74_v34 = vmul.f32 %v456_v26, %v30_v3  ;;  %v75_v35 = vmul.f32 %v458_v27, %v31_v4  ;;  %v76_v36 = vmul.f32 %v456_v26, %v32_v10  ;;  %v77_v37 = vmul.f32 %v458_v27, %v33_v11 }
   0x9   :  { %v78_v38 = vmul.f32 %v456_v26, %v34_v12  ;;  %v79_v39 = vmul.f32 %v458_v27, %v35_v13  ;;  %v80_v40 = vmul.f32 %v456_v26, %v36_v18  ;;  %v81_v41 = vmul.f32 %v458_v27, %v37_v19 }
   0xa   :  { %v118_v42 = vadd.f32 %v460_v28, %v74_v34  ;;  %v119_v43 = vadd.f32 %v462_v29, %v75_v35  ;;  %v120_v44 = vadd.f32 %v460_v28, %v76_v36  ;;  %v121_v45 = vadd.f32 %v462_v29, %v77_v37  ;;  %v23_v37 = vld [vmem:[%s608_s0 + $0x48] sm:$0xff] }
   0xb   :  { %v122_v46 = vadd.f32 %v460_v28, %v78_v38  ;;  %v123_v47 = vadd.f32 %v462_v29, %v79_v39  ;;  %v124_v48 = vadd.f32 %v460_v28, %v80_v40  ;;  %v125_v49 = vadd.f32 %v462_v29, %v81_v41 }
   0xc   :  { %vm150_vm0 = vcmp.ge.f32.partialorder %v118_v42, 0.0  ;;  %vm151_vm1 = vcmp.ge.f32.partialorder %v119_v43, 0.0  ;;  %v182_v50 = vmul.f32 0.2, %v118_v42  ;;  %v183_v51 = vmul.f32 0.2, %v119_v43 }
   0xd   :  { %vm152_vm2 = vcmp.ge.f32.partialorder %v120_v44, 0.0  ;;  %vm153_vm3 = vcmp.ge.f32.partialorder %v121_v45, 0.0  ;;  %v184_v52 = vmul.f32 0.2, %v120_v44  ;;  %v185_v53 = vmul.f32 0.2, %v121_v45 }
   0xe   :  { %v214_v54 = vsel %vm150_vm0, %v118_v42, %v182_v50  ;;  %v215_v55 = vsel %vm151_vm1, %v119_v43, %v183_v51  ;;  %vm154_vm4 = vcmp.ge.f32.partialorder %v122_v46, 0.0  ;;  %vm155_vm5 = vcmp.ge.f32.partialorder %v123_v47, 0.0 }
   0xf   :  { %v378_v56 = vpack.c.bf16 %v215_v55, %v214_v54  ;;  %v216_v57 = vsel %vm152_vm2, %v120_v44, %v184_v52  ;;  %v217_v58 = vsel %vm153_vm3, %v121_v45, %v185_v53  ;;  %v186_v59 = vmul.f32 0.2, %v122_v46 }
  0x10   :  { %v379_v60 = vpack.c.bf16 %v217_v58, %v216_v57  ;;  %v187_v61 = vmul.f32 0.2, %v123_v47  ;;  %vm156_vm6 = vcmp.ge.f32.partialorder %v124_v48, 0.0  ;;  %vm157_vm7 = vcmp.ge.f32.partialorder %v125_v49, 0.0 }
  0x11   :  { %342 = vst [vmem:[%s611_s3] sm:$0xff] %v378_v56  ;;  %v218_v62 = vsel %vm154_vm4, %v122_v46, %v186_v59  ;;  %v188_v63 = vmul.f32 0.2, %v124_v48  ;;  %v189_v0 = vmul.f32 0.2, %v125_v49  ;;  %v82_v1 = vmul.f32 %v456_v26, %v38_v22  ;;  %v24_v46 = vld [vmem:[%s608_s0 + $0x50] sm:$0xff] }
  0x12   :  { %343 = vst [vmem:[%s611_s3 + $0x8] sm:$0xff] %v379_v60  ;;  %v219_v2 = vsel %vm155_vm5, %v123_v47, %v187_v61  ;;  %v83_v3 = vmul.f32 %v458_v27, %v39_v23  ;;  %v84_v4 = vmul.f32 %v456_v26, %v40_v24  ;;  %v85_v5 = vmul.f32 %v458_v27, %v41_v25 }
  0x13   :  { %v380_v6 = vpack.c.bf16 %v219_v2, %v218_v62  ;;  %v220_v7 = vsel %vm156_vm6, %v124_v48, %v188_v63  ;;  %v221_v8 = vsel %vm157_vm7, %v125_v49, %v189_v0  ;;  %v126_v9 = vadd.f32 %v460_v28, %v82_v1  ;;  %v25_v1 = vld [vmem:[%s608_s0 + $0x58] sm:$0xff] }
  0x14   :  { %v381_v10 = vpack.c.bf16 %v221_v8, %v220_v7  ;;  %v127_v11 = vadd.f32 %v462_v29, %v83_v3  ;;  %v128_v12 = vadd.f32 %v460_v28, %v84_v4  ;;  %v129_v13 = vadd.f32 %v462_v29, %v85_v5 }
  0x15   :  { %344 = vst [vmem:[%s611_s3 + $0x10] sm:$0xff] %v380_v6  ;;  %vm158_vm8 = vcmp.ge.f32.partialorder %v126_v9, 0.0  ;;  %v190_v14 = vmul.f32 0.2, %v126_v9  ;;  %v86_v15 = vmul.f32 %v456_v26, %v42_v30  ;;  %v87_v16 = vmul.f32 %v458_v27, %v43_v31  ;;  %v22_v31 = vld [vmem:[%s608_s0 + $0x40] sm:$0xff] }
  0x16   :  { %345 = vst [vmem:[%s611_s3 + $0x18] sm:$0xff] %v381_v10  ;;  %vm159_vm9 = vcmp.ge.f32.partialorder %v127_v11, 0.0  ;;  %v191_v17 = vmul.f32 0.2, %v127_v11  ;;  %vm160_vm10 = vcmp.ge.f32.partialorder %v128_v12, 0.0  ;;  %vm161_vm11 = vcmp.ge.f32.partialorder %v129_v13, 0.0 }
  0x17   :  { %v222_v18 = vsel %vm158_vm8, %v126_v9, %v190_v14  ;;  %v192_v19 = vmul.f32 0.2, %v128_v12  ;;  %v193_v20 = vmul.f32 0.2, %v129_v13  ;;  %v130_v22 = vadd.f32 %v460_v28, %v86_v15  ;;  %v26_v10 = vld [vmem:[%s608_s0 + $0x60] sm:$0xff]  ;;  %v27_v15 = vld [vmem:[%s608_s0 + $0x68] sm:$0xff] }
  0x18   :  { %v223_v23 = vsel %vm159_vm9, %v127_v11, %v191_v17  ;;  %v131_v24 = vadd.f32 %v462_v29, %v87_v16  ;;  %v88_v25 = vmul.f32 %v456_v26, %v44_v32  ;;  %v89_v30 = vmul.f32 %v458_v27, %v45_v33 }
  0x19   :  { %v382_v34 = vpack.c.bf16 %v223_v23, %v222_v18  ;;  %v224_v35 = vsel %vm160_vm10, %v128_v12, %v192_v19  ;;  %v225_v36 = vsel %vm161_vm11, %v129_v13, %v193_v20  ;;  %vm162_vm12 = vcmp.ge.f32.partialorder %v130_v22, 0.0 }
  0x1a   :  { %v383_v38 = vpack.c.bf16 %v225_v36, %v224_v35  ;;  %vm163_vm13 = vcmp.ge.f32.partialorder %v131_v24, 0.0  ;;  %v194_v39 = vmul.f32 0.2, %v130_v22  ;;  %v195_v32 = vmul.f32 0.2, %v131_v24 }
  0x1b   :  { %346 = vst [vmem:[%s611_s3 + $0x20] sm:$0xff] %v382_v34  ;;  %v132_v21 = vadd.f32 %v460_v28, %v88_v25  ;;  %v133_v33 = vadd.f32 %v462_v29, %v89_v30  ;;  %v46_v40 = vunpack.c.l.bf16 %v22_v31  ;;  %v47_v41 = vunpack.c.h.bf16 %v22_v31 }
  0x1c   :  { %347 = vst [vmem:[%s611_s3 + $0x28] sm:$0xff] %v383_v38  ;;  %v226_v42 = vsel %vm162_vm12, %v130_v22, %v194_v39  ;;  %v227_v43 = vsel %vm163_vm13, %v131_v24, %v195_v32  ;;  %v48_v44 = vunpack.c.l.bf16 %v23_v37  ;;  %v49_v45 = vunpack.c.h.bf16 %v23_v37  ;;  %v28_v37 = vld [vmem:[%s608_s0 + $0x70] sm:$0xff] }
  0x1d   :  { %v384_v47 = vpack.c.bf16 %v227_v43, %v226_v42  ;;  %vm164_vm14 = vcmp.ge.f32.partialorder %v132_v21, 0.0  ;;  %vm165_vm15 = vcmp.ge.f32.partialorder %v133_v33, 0.0  ;;  %v196_v48 = vmul.f32 0.2, %v132_v21 }
  0x1e   :  { %v197_v49 = vmul.f32 0.2, %v133_v33  ;;  %v90_v50 = vmul.f32 %v456_v26, %v46_v40  ;;  %v91_v51 = vmul.f32 %v458_v27, %v47_v41  ;;  %v92_v52 = vmul.f32 %v456_v26, %v48_v44 }
  0x1f   :  { %348 = vst [vmem:[%s611_s3 + $0x30] sm:$0xff] %v384_v47  ;;  %v228_v53 = vsel %vm164_vm14, %v132_v21, %v196_v48  ;;  %v93_v54 = vmul.f32 %v458_v27, %v49_v45  ;;  %v50_v55 = vunpack.c.l.bf16 %v24_v46  ;;  %v51_v56 = vunpack.c.h.bf16 %v24_v46 }
  0x20   :  { %v229_v57 = vsel %vm165_vm15, %v133_v33, %v197_v49  ;;  %v134_v58 = vadd.f32 %v460_v28, %v90_v50  ;;  %v135_v59 = vadd.f32 %v462_v29, %v91_v51  ;;  %v136_v60 = vadd.f32 %v460_v28, %v92_v52 }
  0x21   :  { %v385_v61 = vpack.c.bf16 %v229_v57, %v228_v53  ;;  %v137_v62 = vadd.f32 %v462_v29, %v93_v54  ;;  %v94_v63 = vmul.f32 %v456_v26, %v50_v55  ;;  %v95_v0 = vmul.f32 %v458_v27, %v51_v56  ;;  %v29_v53 = vld [vmem:[%s608_s0 + $0x78] sm:$0xff] }
  0x22   :  { %vm166_vm0 = vcmp.ge.f32.partialorder %v134_v58, 0.0  ;;  %vm167_vm1 = vcmp.ge.f32.partialorder %v135_v59, 0.0  ;;  %v198_v2 = vmul.f32 0.2, %v134_v58  ;;  %v199_v3 = vmul.f32 0.2, %v135_v59 }
  0x23   :  { %349 = vst [vmem:[%s611_s3 + $0x38] sm:$0xff] %v385_v61  ;;  %vm168_vm2 = vcmp.ge.f32.partialorder %v136_v60, 0.0  ;;  %vm169_vm3 = vcmp.ge.f32.partialorder %v137_v62, 0.0  ;;  %v200_v4 = vmul.f32 0.2, %v136_v60  ;;  %v138_v8 = vadd.f32 %v460_v28, %v94_v63 }
  0x24   :  { %v201_v5 = vmul.f32 0.2, %v137_v62  ;;  %v230_v6 = vsel %vm166_vm0, %v134_v58, %v198_v2  ;;  %v231_v7 = vsel %vm167_vm1, %v135_v59, %v199_v3  ;;  %v139_v9 = vadd.f32 %v462_v29, %v95_v0 }
  0x25   :  { %v386_v11 = vpack.c.bf16 %v231_v7, %v230_v6  ;;  %v232_v12 = vsel %vm168_vm2, %v136_v60, %v200_v4  ;;  %v52_v14 = vunpack.c.l.bf16 %v25_v1  ;;  %vm170_vm4 = vcmp.ge.f32.partialorder %v138_v8, 0.0 }
  0x26   :  { %v233_v13 = vsel %vm169_vm3, %v137_v62, %v201_v5  ;;  %vm171_vm5 = vcmp.ge.f32.partialorder %v139_v9, 0.0  ;;  %v202_v17 = vmul.f32 0.2, %v138_v8  ;;  %v203_v18 = vmul.f32 0.2, %v139_v9 }
  0x27   :  { %v387_v16 = vpack.c.bf16 %v233_v13, %v232_v12  ;;  %350 = vst [vmem:[%s611_s3 + $0x40] sm:$0xff] %v386_v11  ;;  %v53_v19 = vunpack.c.h.bf16 %v25_v1  ;;  %v96_v20 = vmul.f32 %v456_v26, %v52_v14  ;;  %v54_v22 = vunpack.c.l.bf16 %v26_v10 }
  0x28   :  { %v234_v23 = vsel %vm170_vm4, %v138_v8, %v202_v17  ;;  %v55_v24 = vunpack.c.h.bf16 %v26_v10  ;;  %v56_v25 = vunpack.c.l.bf16 %v27_v15  ;;  %v57_v30 = vunpack.c.h.bf16 %v27_v15 }
  0x29   :  { %351 = vst [vmem:[%s611_s3 + $0x48] sm:$0xff] %v387_v16  ;;  %v235_v31 = vsel %vm171_vm5, %v139_v9, %v203_v18  ;;  %v97_v34 = vmul.f32 %v458_v27, %v53_v19  ;;  %v140_v35 = vadd.f32 %v460_v28, %v96_v20  ;;  %v98_v36 = vmul.f32 %v456_v26, %v54_v22 }
  0x2a   :  { %v388_v38 = vpack.c.bf16 %v235_v31, %v234_v23  ;;  %v99_v39 = vmul.f32 %v458_v27, %v55_v24  ;;  %v100_v32 = vmul.f32 %v456_v26, %v56_v25  ;;  %v101_v21 = vmul.f32 %v458_v27, %v57_v30 }
  0x2b   :  { %v141_v33 = vadd.f32 %v462_v29, %v97_v34  ;;  %vm172_vm6 = vcmp.ge.f32.partialorder %v140_v35, 0.0  ;;  %v204_v40 = vmul.f32 0.2, %v140_v35  ;;  %v142_v41 = vadd.f32 %v460_v28, %v98_v36 }
  0x2c   :  { %352 = vst [vmem:[%s611_s3 + $0x50] sm:$0xff] %v388_v38  ;;  %v143_v42 = vadd.f32 %v462_v29, %v99_v39  ;;  %v144_v43 = vadd.f32 %v460_v28, %v100_v32  ;;  %v145_v44 = vadd.f32 %v462_v29, %v101_v21  ;;  %v58_v45 = vunpack.c.l.bf16 %v28_v37 }
  0x2d   :  { %vm173_vm7 = vcmp.ge.f32.partialorder %v141_v33, 0.0  ;;  %v205_v46 = vmul.f32 0.2, %v141_v33  ;;  %v236_v47 = vsel %vm172_vm6, %v140_v35, %v204_v40  ;;  %vm174_vm8 = vcmp.ge.f32.partialorder %v142_v41, 0.0 }
  0x2e   :  { %vm175_vm9 = vcmp.ge.f32.partialorder %v143_v42, 0.0  ;;  %v206_v48 = vmul.f32 0.2, %v142_v41  ;;  %v207_v49 = vmul.f32 0.2, %v143_v42  ;;  %vm176_vm10 = vcmp.ge.f32.partialorder %v144_v43, 0.0 }
  0x2f   :  { %v237_v50 = vsel %vm173_vm7, %v141_v33, %v205_v46  ;;  %vm177_vm11 = vcmp.ge.f32.partialorder %v145_v44, 0.0  ;;  %v208_v51 = vmul.f32 0.2, %v144_v43  ;;  %v209_v52 = vmul.f32 0.2, %v145_v44 }
  0x30   :  { %v389_v54 = vpack.c.bf16 %v237_v50, %v236_v47  ;;  %v238_v55 = vsel %vm174_vm8, %v142_v41, %v206_v48  ;;  %v239_v56 = vsel %vm175_vm9, %v143_v42, %v207_v49  ;;  %v59_v57 = vunpack.c.h.bf16 %v28_v37 }
  0x31   :  { %v390_v58 = vpack.c.bf16 %v239_v56, %v238_v55  ;;  %v240_v59 = vsel %vm176_vm10, %v144_v43, %v208_v51  ;;  %v241_v60 = vsel %vm177_vm11, %v145_v44, %v209_v52  ;;  %v102_v61 = vmul.f32 %v456_v26, %v58_v45 }
  0x32   :  { %353 = vst [vmem:[%s611_s3 + $0x58] sm:$0xff] %v389_v54  ;;  %v391_v62 = vpack.c.bf16 %v241_v60, %v240_v59  ;;  %v103_v63 = vmul.f32 %v458_v27, %v59_v57  ;;  %v60_v0 = vunpack.c.l.bf16 %v29_v53  ;;  %v61_v1 = vunpack.c.h.bf16 %v29_v53 }
  0x33   :  { %354 = vst [vmem:[%s611_s3 + $0x60] sm:$0xff] %v390_v58  ;;  %v146_v2 = vadd.f32 %v460_v28, %v102_v61 }
  0x34   :  { %355 = vst [vmem:[%s611_s3 + $0x68] sm:$0xff] %v391_v62  ;;  %v147_v3 = vadd.f32 %v462_v29, %v103_v63  ;;  %v104_v4 = vmul.f32 %v456_v26, %v60_v0  ;;  %v105_v5 = vmul.f32 %v458_v27, %v61_v1 }
  0x35   :  { %vm178_vm12 = vcmp.ge.f32.partialorder %v146_v2, 0.0  ;;  %v210_v6 = vmul.f32 0.2, %v146_v2 }
  0x36   :  { %vm179_vm13 = vcmp.ge.f32.partialorder %v147_v3, 0.0  ;;  %v211_v7 = vmul.f32 0.2, %v147_v3  ;;  %v148_v8 = vadd.f32 %v460_v28, %v104_v4  ;;  %v149_v9 = vadd.f32 %v462_v29, %v105_v5 }
  0x37   :  { %v242_v10 = vsel %vm178_vm12, %v146_v2, %v210_v6 }
  0x38   :  { %v243_v11 = vsel %vm179_vm13, %v147_v3, %v211_v7  ;;  %vm180_vm14 = vcmp.ge.f32.partialorder %v148_v8, 0.0  ;;  %vm181_vm15 = vcmp.ge.f32.partialorder %v149_v9, 0.0  ;;  %v212_v12 = vmul.f32 0.2, %v148_v8 }
  0x39   :  { %v392_v13 = vpack.c.bf16 %v243_v11, %v242_v10  ;;  %v213_v14 = vmul.f32 0.2, %v149_v9 }
  0x3a   :  { %v244_v15 = vsel %vm180_vm14, %v148_v8, %v212_v12 }
  0x3b   :  { %356 = vst [vmem:[%s611_s3 + $0x70] sm:$0xff] %v392_v13  ;;  %v245_v26 = vsel %vm181_vm15, %v149_v9, %v213_v14 }
  0x3c   :  { %v393_v27 = vpack.c.bf16 %v245_v26, %v244_v15 }
  0x3e   :  { %357 = vst [vmem:[%s611_s3 + $0x78] sm:$0xff] %v393_v27 }

// kernel: critic_forward.12
= control target key start
LH: loop header
LB: loop body
LE: loop exit
PB: predicated region body
PF: predicated region fallthrough
CT: control target
= control target key end

     0   :  { %s3565_s0 = inlined_call_operand.vmem [shape: bf16[32,4096], index: 0, kind: input, shape index: {}]   ;;  %s3566_s1 = inlined_call_operand.vmem [shape: bf16[4096,512], index: 1, kind: input, shape index: {}]   ;;  %s3567_s2 = inlined_call_operand.vmem [shape: bf16[32,512], index: 2, kind: output, shape index: {0}]   ;;  %s3568_s3 = inlined_call_operand.vmem [shape: f32[1,512], index: 3, kind: output, shape index: {1}]   ;;  %s3569_s4 = inlined_call_operand.vmem [shape: f32[1,512], index: 4, kind: output, shape index: {2}]  }
   0x1   :  { %3572 = sst [smem:[#allocation10_spill]] %s3565_s0 }
   0x2   :  { %s2926_s15 = smov 0   ;;  %s2928_s16 = smov 0  }
   0x3   :  { %s2930_s17 = smov 0   ;;  %s2932_s18 = smov 0  }
   0x4   :  { %s2934_s19 = smov 0   ;;  %s2936_s20 = smov 0  }
   0x5   :  { %s2938_s21 = smov 0   ;;  %s2940_s22 = smov 0  }
   0x6   :  { %s2942_s23 = smov 0   ;;  %s2944_s24 = smov 0  }
   0x7   :  { %s2946_s25 = smov 0  }
   0x8 LB: > { %s2343_s26 = sadd.s32 4294967295, %s2896_s25   ;;  %s27_s27 = sadd.s32 1, %s2888_s23  ;;  %s2896_s25 = sphi %s2946_s25, %s15_s25   ;;  %s2892_s24 = sphi %s2944_s24, %s3590_s24   ;;  %s2888_s23 = sphi %s2942_s23, %s3589_s23   ;;  %s2884_s22 = sphi %s2940_s22, %s3588_s22   ;;  %s2880_s21 = sphi %s2938_s21, %s3587_s21   ;;  %s2876_s20 = sphi %s2936_s20, %s3586_s20   ;;  %s2872_s19 = sphi %s2934_s19, %s3585_s19   ;;  %s2868_s18 = sphi %s2932_s18, %s3584_s18   ;;  %s2864_s17 = sphi %s2930_s17, %s3583_s17   ;;  %s2860_s16 = sphi %s2928_s16, %s3582_s16   ;;  %s2856_s15 = sphi %s2926_s15, %s3581_s15  }
   0x9   : > { %p28_p0 = scmp.ge.s32.totalorder %s27_s27, 4  ;;  %s34_s28 = sadd.s32 1, %s2892_s24 }
   0xa   : > { %s43_s29 = sadd.s32 1, %s2876_s20  ;;  %p50_p1 = scmp.ne.s32.totalorder %s2876_s20, %s2872_s19 }
   0xb   : > { %s3592_s27 = smov (%p28_p0, %s27_s27), 0  ;;  %s3594_s28 = smov (!%p28_p0, %s34_s28), %s2892_s24 }
   0xc   : > { %3573 = sst [smem:[#allocation8_spill]] %s3592_s27  ;;  %s39_s30 = ssub.s32 %s2888_s23, %s3592_s27 }
   0xd   : > { %p51_p2 = scmp.eq.s32.totalorder %s2896_s25, 0  ;;  %p36_p3 = scmp.ge.s32.totalorder %s3594_s28, 2 }
   0xe   : > { %p41_p4 = scmp.eq.s32.totalorder %s39_s30, 0  ;;  %s71_s6 = sadd.s32 1, %s2868_s18 }
   0xf   : > { %p2993_p5 = por %p51_p2, %p50_p1  ;;  %s3596_s28 = smov (%p36_p3, %s3594_s28), 0 }
  0x10   : > { %3575 = sst [smem:[#allocation9_spill]] %s3596_s28  ;;  %s67_s8 = ssub.s32 %s2892_s24, %s3596_s28 }
  0x11   : > { %s3001_s7 = scalar_select %p41_p4, %s2876_s20, %s43_s29  }
  0x12   : > { %p78_p6 = scmp.ne.s32.totalorder %s2868_s18, %s2864_s17  ;;  %s68_s9 = sor.u32 %s67_s8, %s39_s30 }
  0x13   : > { %p97_p7 = scmp.eq.s32.totalorder %s67_s8, 0  ;;  %p69_p8 = scmp.eq.s32.totalorder %s68_s9, 0 }
  0x14   : > { %p3007_p9 = por %p78_p6, %p51_p2  ;;  %s99_s11 = sadd.s32 1, %s2860_s16 }
  0x15   : > { %p109_p10 = scmp.ne.s32.totalorder %s2860_s16, %s2856_s15  ;;  %p110_p11 = scmp.eq.s32.totalorder %s2343_s26, 7 }
  0x16   : > { %s3015_s12 = scalar_select %p69_p8, %s2868_s18, %s71_s6  }
  0x17   : > { %s3018_s13 = scalar_select %p97_p7, %s2860_s16, %s99_s11  }
  0x18   : > { %p3020_p12 = por %p110_p11, %p109_p10  ;;  %p2346_p13 = scmp.ge.s32.totalorder %s2896_s25, 8 }
  0x1a   : > { %184 = sbr.rel (%p2346_p13) target bundleno = 120 (0x78), region = 16 }
  0x1f   : > { %187 = sbr.rel (!%p2993_p5) target bundleno = 49 (0x31), region = 20  ;;  %s189_s29 = sand.u32 (%p2993_p5), 1, %s2876_s20  }
  0x20   : > { %s2518_s30 = sshll.u32 (%p2993_p5), %s2888_s23, 5  ;;  %s2347_s8 = sshll.u32 (%p2993_p5), %s189_s29, 7 }
  0x21   : > { %s3578_s0 = sld [smem:[#allocation10_spill]] (%p2993_p5)  ;;  %s191_s26 = scalar_lea.vmem (%p2993_p5), [#allocation5], %s2347_s8 }
  0x27   : > { %s3032_s11 = scalar_lea.vmem %s3578_s0, %s2518_s30 }
  0x28   : > { %v210_v0 = vld [vmem:[%s3032_s11] sm:$0xff]  ;;  %v212_v1 = vld [vmem:[%s3032_s11 + $0x8] sm:$0xff]  ;;  %v214_v2 = vld [vmem:[%s3032_s11 + $0x10] sm:$0xff] }
  0x29   : > { %211 = vst [vmem:[%s191_s26] sm:$0xff] %v210_v0  ;;  %213 = vst [vmem:[%s191_s26 + $0x8] sm:$0xff] %v212_v1  ;;  %v216_v3 = vld [vmem:[%s3032_s11 + $0x18] sm:$0xff]  ;;  %v218_v4 = vld [vmem:[%s3032_s11 + $0x80] sm:$0xff] }
  0x2a   : > { %215 = vst [vmem:[%s191_s26 + $0x10] sm:$0xff] %v214_v2  ;;  %v220_v5 = vld [vmem:[%s3032_s11 + $0x88] sm:$0xff]  ;;  %217 = vst [vmem:[%s191_s26 + $0x18] sm:$0xff] %v216_v3  ;;  %v222_v6 = vld [vmem:[%s3032_s11 + $0x90] sm:$0xff] }
  0x2b   : > { %219 = vst [vmem:[%s191_s26 + $0x20] sm:$0xff] %v218_v4  ;;  %221 = vst [vmem:[%s191_s26 + $0x28] sm:$0xff] %v220_v5  ;;  %v224_v7 = vld [vmem:[%s3032_s11 + $0x98] sm:$0xff]  ;;  %v226_v8 = vld [vmem:[%s3032_s11 + $0x100] sm:$0xff] }
  0x2c   : > { %223 = vst [vmem:[%s191_s26 + $0x30] sm:$0xff] %v222_v6  ;;  %225 = vst [vmem:[%s191_s26 + $0x38] sm:$0xff] %v224_v7  ;;  %v228_v9 = vld [vmem:[%s3032_s11 + $0x108] sm:$0xff]  ;;  %v230_v10 = vld [vmem:[%s3032_s11 + $0x110] sm:$0xff] }
  0x2d   : > { %227 = vst [vmem:[%s191_s26 + $0x40] sm:$0xff] %v226_v8  ;;  %v232_v11 = vld [vmem:[%s3032_s11 + $0x118] sm:$0xff]  ;;  %229 = vst [vmem:[%s191_s26 + $0x48] sm:$0xff] %v228_v9  ;;  %v234_v12 = vld [vmem:[%s3032_s11 + $0x180] sm:$0xff] }
  0x2e   : > { %231 = vst [vmem:[%s191_s26 + $0x50] sm:$0xff] %v230_v10  ;;  %233 = vst [vmem:[%s191_s26 + $0x58] sm:$0xff] %v232_v11  ;;  %v236_v13 = vld [vmem:[%s3032_s11 + $0x188] sm:$0xff]  ;;  %v238_v14 = vld [vmem:[%s3032_s11 + $0x190] sm:$0xff] }
  0x2f   : > { %235 = vst [vmem:[%s191_s26 + $0x60] sm:$0xff] %v234_v12  ;;  %237 = vst [vmem:[%s191_s26 + $0x68] sm:$0xff] %v236_v13  ;;  %v240_v15 = vld [vmem:[%s3032_s11 + $0x198] sm:$0xff] }
  0x30   : > { %239 = vst [vmem:[%s191_s26 + $0x70] sm:$0xff] %v238_v14  ;;  %241 = vst [vmem:[%s191_s26 + $0x78] sm:$0xff] %v240_v15 }
  0x31 PF: > { %247 = sbr.rel (!%p3007_p9) target bundleno = 120 (0x78), region = 43  ;;  %s249_s5 = sand.u32 (%p3007_p9), 1, %s2868_s18  }
  0x32   : > { %s2352_s29 = sshll.u32 (%p3007_p9), %s2892_s24, 1  ;;  %s2350_s30 = sshll.u32 (%p3007_p9), %s249_s5, 10 }
  0x33   : > { %s2519_s8 = sshll.u32 (%p3007_p9), %s2888_s23, 9  ;;  %s3063_s10 = scalar_lea.vmem (%p3007_p9), [#allocation6], %s2350_s30 }
  0x34   : > { %s255_s6 = sadd.s32 (%p3007_p9), %s2519_s8, %s2352_s29 }
  0x35   : > { %s2354_s9 = sshll.u32 (%p3007_p9), %s255_s6, 2 }
  0x36   : > { %s3058_s27 = scalar_lea.vmem %s3566_s1, %s2354_s9 }
  0x37   : > { %v540_v16 = vld [vmem:[%s3058_s27] sm:$0xff]  ;;  %v542_v17 = vld [vmem:[%s3058_s27 + $0x10] sm:$0xff] }
  0x38   : > { %v544_v18 = vld [vmem:[%s3058_s27 + $0x20] sm:$0xff]  ;;  %541 = vst [vmem:[%s3063_s10] sm:$0xff] %v540_v16  ;;  %543 = vst [vmem:[%s3063_s10 + $0x8] sm:$0xff] %v542_v17  ;;  %v546_v19 = vld [vmem:[%s3058_s27 + $0x30] sm:$0xff] }
  0x39   : > { %545 = vst [vmem:[%s3063_s10 + $0x10] sm:$0xff] %v544_v18  ;;  %v548_v20 = vld [vmem:[%s3058_s27 + $0x40] sm:$0xff]  ;;  %v550_v21 = vld [vmem:[%s3058_s27 + $0x50] sm:$0xff]  ;;  %547 = vst [vmem:[%s3063_s10 + $0x18] sm:$0xff] %v546_v19 }
  0x3a   : > { %549 = vst [vmem:[%s3063_s10 + $0x20] sm:$0xff] %v548_v20  ;;  %551 = vst [vmem:[%s3063_s10 + $0x28] sm:$0xff] %v550_v21  ;;  %v552_v22 = vld [vmem:[%s3058_s27 + $0x60] sm:$0xff]  ;;  %v554_v23 = vld [vmem:[%s3058_s27 + $0x70] sm:$0xff] }
  0x3b   : > { %v556_v24 = vld [vmem:[%s3058_s27 + $0x80] sm:$0xff]  ;;  %553 = vst [vmem:[%s3063_s10 + $0x30] sm:$0xff] %v552_v22  ;;  %555 = vst [vmem:[%s3063_s10 + $0x38] sm:$0xff] %v554_v23  ;;  %v558_v25 = vld [vmem:[%s3058_s27 + $0x90] sm:$0xff] }
  0x3c   : > { %557 = vst [vmem:[%s3063_s10 + $0x40] sm:$0xff] %v556_v24  ;;  %v560_v26 = vld [vmem:[%s3058_s27 + $0xa0] sm:$0xff]  ;;  %v562_v27 = vld [vmem:[%s3058_s27 + $0xb0] sm:$0xff]  ;;  %559 = vst [vmem:[%s3063_s10 + $0x48] sm:$0xff] %v558_v25 }
  0x3d   : > { %561 = vst [vmem:[%s3063_s10 + $0x50] sm:$0xff] %v560_v26  ;;  %563 = vst [vmem:[%s3063_s10 + $0x58] sm:$0xff] %v562_v27  ;;  %v564_v28 = vld [vmem:[%s3058_s27 + $0xc0] sm:$0xff]  ;;  %v566_v29 = vld [vmem:[%s3058_s27 + $0xd0] sm:$0xff] }
  0x3e   : > { %v568_v30 = vld [vmem:[%s3058_s27 + $0xe0] sm:$0xff]  ;;  %565 = vst [vmem:[%s3063_s10 + $0x60] sm:$0xff] %v564_v28  ;;  %567 = vst [vmem:[%s3063_s10 + $0x68] sm:$0xff] %v566_v29  ;;  %v570_v31 = vld [vmem:[%s3058_s27 + $0xf0] sm:$0xff] }
  0x3f   : > { %569 = vst [vmem:[%s3063_s10 + $0x70] sm:$0xff] %v568_v30  ;;  %v572_v32 = vld [vmem:[%s3058_s27 + $0x100] sm:$0xff]  ;;  %v574_v33 = vld [vmem:[%s3058_s27 + $0x110] sm:$0xff]  ;;  %571 = vst [vmem:[%s3063_s10 + $0x78] sm:$0xff] %v570_v31 }
  0x40   : > { %573 = vst [vmem:[%s3063_s10 + $0x80] sm:$0xff] %v572_v32  ;;  %575 = vst [vmem:[%s3063_s10 + $0x88] sm:$0xff] %v574_v33  ;;  %v576_v34 = vld [vmem:[%s3058_s27 + $0x120] sm:$0xff]  ;;  %v578_v35 = vld [vmem:[%s3058_s27 + $0x130] sm:$0xff] }
  0x41   : > { %v580_v36 = vld [vmem:[%s3058_s27 + $0x140] sm:$0xff]  ;;  %577 = vst [vmem:[%s3063_s10 + $0x90] sm:$0xff] %v576_v34  ;;  %579 = vst [vmem:[%s3063_s10 + $0x98] sm:$0xff] %v578_v35  ;;  %v582_v37 = vld [vmem:[%s3058_s27 + $0x150] sm:$0xff] }
  0x42   : > { %581 = vst [vmem:[%s3063_s10 + $0xa0] sm:$0xff] %v580_v36  ;;  %v584_v38 = vld [vmem:[%s3058_s27 + $0x160] sm:$0xff]  ;;  %v586_v39 = vld [vmem:[%s3058_s27 + $0x170] sm:$0xff]  ;;  %583 = vst [vmem:[%s3063_s10 + $0xa8] sm:$0xff] %v582_v37 }
  0x43   : > { %585 = vst [vmem:[%s3063_s10 + $0xb0] sm:$0xff] %v584_v38  ;;  %587 = vst [vmem:[%s3063_s10 + $0xb8] sm:$0xff] %v586_v39  ;;  %v588_v40 = vld [vmem:[%s3058_s27 + $0x180] sm:$0xff]  ;;  %v590_v41 = vld [vmem:[%s3058_s27 + $0x190] sm:$0xff] }
  0x44   : > { %v592_v42 = vld [vmem:[%s3058_s27 + $0x1a0] sm:$0xff]  ;;  %589 = vst [vmem:[%s3063_s10 + $0xc0] sm:$0xff] %v588_v40  ;;  %591 = vst [vmem:[%s3063_s10 + $0xc8] sm:$0xff] %v590_v41  ;;  %v594_v43 = vld [vmem:[%s3058_s27 + $0x1b0] sm:$0xff] }
  0x45   : > { %593 = vst [vmem:[%s3063_s10 + $0xd0] sm:$0xff] %v592_v42  ;;  %v596_v44 = vld [vmem:[%s3058_s27 + $0x1c0] sm:$0xff]  ;;  %v598_v45 = vld [vmem:[%s3058_s27 + $0x1d0] sm:$0xff]  ;;  %595 = vst [vmem:[%s3063_s10 + $0xd8] sm:$0xff] %v594_v43 }
  0x46   : > { %597 = vst [vmem:[%s3063_s10 + $0xe0] sm:$0xff] %v596_v44  ;;  %599 = vst [vmem:[%s3063_s10 + $0xe8] sm:$0xff] %v598_v45  ;;  %v600_v46 = vld [vmem:[%s3058_s27 + $0x1e0] sm:$0xff]  ;;  %v602_v47 = vld [vmem:[%s3058_s27 + $0x1f0] sm:$0xff] }
  0x47   : > { %v604_v48 = vld [vmem:[%s3058_s27 + $0x200] sm:$0xff]  ;;  %601 = vst [vmem:[%s3063_s10 + $0xf0] sm:$0xff] %v600_v46  ;;  %603 = vst [vmem:[%s3063_s10 + $0xf8] sm:$0xff] %v602_v47  ;;  %v606_v49 = vld [vmem:[%s3058_s27 + $0x210] sm:$0xff] }
  0x48   : > { %605 = vst [vmem:[%s3063_s10 + $0x100] sm:$0xff] %v604_v48  ;;  %v608_v50 = vld [vmem:[%s3058_s27 + $0x220] sm:$0xff]  ;;  %v610_v51 = vld [vmem:[%s3058_s27 + $0x230] sm:$0xff]  ;;  %607 = vst [vmem:[%s3063_s10 + $0x108] sm:$0xff] %v606_v49 }
  0x49   : > { %609 = vst [vmem:[%s3063_s10 + $0x110] sm:$0xff] %v608_v50  ;;  %611 = vst [vmem:[%s3063_s10 + $0x118] sm:$0xff] %v610_v51  ;;  %v612_v52 = vld [vmem:[%s3058_s27 + $0x240] sm:$0xff]  ;;  %v614_v53 = vld [vmem:[%s3058_s27 + $0x250] sm:$0xff] }
  0x4a   : > { %v616_v54 = vld [vmem:[%s3058_s27 + $0x260] sm:$0xff]  ;;  %613 = vst [vmem:[%s3063_s10 + $0x120] sm:$0xff] %v612_v52  ;;  %615 = vst [vmem:[%s3063_s10 + $0x128] sm:$0xff] %v614_v53  ;;  %v618_v55 = vld [vmem:[%s3058_s27 + $0x270] sm:$0xff] }
  0x4b   : > { %617 = vst [vmem:[%s3063_s10 + $0x130] sm:$0xff] %v616_v54  ;;  %v620_v56 = vld [vmem:[%s3058_s27 + $0x280] sm:$0xff]  ;;  %v622_v57 = vld [vmem:[%s3058_s27 + $0x290] sm:$0xff]  ;;  %619 = vst [vmem:[%s3063_s10 + $0x138] sm:$0xff] %v618_v55 }
  0x4c   : > { %621 = vst [vmem:[%s3063_s10 + $0x140] sm:$0xff] %v620_v56  ;;  %623 = vst [vmem:[%s3063_s10 + $0x148] sm:$0xff] %v622_v57  ;;  %v624_v58 = vld [vmem:[%s3058_s27 + $0x2a0] sm:$0xff]  ;;  %v626_v59 = vld [vmem:[%s3058_s27 + $0x2b0] sm:$0xff] }
  0x4d   : > { %v628_v60 = vld [vmem:[%s3058_s27 + $0x2c0] sm:$0xff]  ;;  %625 = vst [vmem:[%s3063_s10 + $0x150] sm:$0xff] %v624_v58  ;;  %627 = vst [vmem:[%s3063_s10 + $0x158] sm:$0xff] %v626_v59  ;;  %v630_v61 = vld [vmem:[%s3058_s27 + $0x2d0] sm:$0xff] }
  0x4e   : > { %629 = vst [vmem:[%s3063_s10 + $0x160] sm:$0xff] %v628_v60  ;;  %v632_v62 = vld [vmem:[%s3058_s27 + $0x2e0] sm:$0xff]  ;;  %v634_v63 = vld [vmem:[%s3058_s27 + $0x2f0] sm:$0xff]  ;;  %631 = vst [vmem:[%s3063_s10 + $0x168] sm:$0xff] %v630_v61 }
  0x4f   : > { %633 = vst [vmem:[%s3063_s10 + $0x170] sm:$0xff] %v632_v62  ;;  %635 = vst [vmem:[%s3063_s10 + $0x178] sm:$0xff] %v634_v63  ;;  %v636_v0 = vld [vmem:[%s3058_s27 + $0x300] sm:$0xff]  ;;  %v638_v1 = vld [vmem:[%s3058_s27 + $0x310] sm:$0xff] }
  0x50   : > { %v640_v2 = vld [vmem:[%s3058_s27 + $0x320] sm:$0xff]  ;;  %637 = vst [vmem:[%s3063_s10 + $0x180] sm:$0xff] %v636_v0  ;;  %639 = vst [vmem:[%s3063_s10 + $0x188] sm:$0xff] %v638_v1  ;;  %v642_v3 = vld [vmem:[%s3058_s27 + $0x330] sm:$0xff] }
  0x51   : > { %641 = vst [vmem:[%s3063_s10 + $0x190] sm:$0xff] %v640_v2  ;;  %v644_v4 = vld [vmem:[%s3058_s27 + $0x340] sm:$0xff]  ;;  %v646_v5 = vld [vmem:[%s3058_s27 + $0x350] sm:$0xff]  ;;  %643 = vst [vmem:[%s3063_s10 + $0x198] sm:$0xff] %v642_v3 }
  0x52   : > { %645 = vst [vmem:[%s3063_s10 + $0x1a0] sm:$0xff] %v644_v4  ;;  %647 = vst [vmem:[%s3063_s10 + $0x1a8] sm:$0xff] %v646_v5  ;;  %v648_v6 = vld [vmem:[%s3058_s27 + $0x360] sm:$0xff]  ;;  %v650_v7 = vld [vmem:[%s3058_s27 + $0x370] sm:$0xff] }
  0x53   : > { %v652_v8 = vld [vmem:[%s3058_s27 + $0x380] sm:$0xff]  ;;  %649 = vst [vmem:[%s3063_s10 + $0x1b0] sm:$0xff] %v648_v6  ;;  %651 = vst [vmem:[%s3063_s10 + $0x1b8] sm:$0xff] %v650_v7  ;;  %v654_v9 = vld [vmem:[%s3058_s27 + $0x390] sm:$0xff] }
  0x54   : > { %653 = vst [vmem:[%s3063_s10 + $0x1c0] sm:$0xff] %v652_v8  ;;  %v656_v10 = vld [vmem:[%s3058_s27 + $0x3a0] sm:$0xff]  ;;  %v658_v11 = vld [vmem:[%s3058_s27 + $0x3b0] sm:$0xff]  ;;  %655 = vst [vmem:[%s3063_s10 + $0x1c8] sm:$0xff] %v654_v9 }
  0x55   : > { %657 = vst [vmem:[%s3063_s10 + $0x1d0] sm:$0xff] %v656_v10  ;;  %659 = vst [vmem:[%s3063_s10 + $0x1d8] sm:$0xff] %v658_v11  ;;  %v660_v12 = vld [vmem:[%s3058_s27 + $0x3c0] sm:$0xff]  ;;  %v662_v13 = vld [vmem:[%s3058_s27 + $0x3d0] sm:$0xff] }
  0x56   : > { %v664_v14 = vld [vmem:[%s3058_s27 + $0x3e0] sm:$0xff]  ;;  %661 = vst [vmem:[%s3063_s10 + $0x1e0] sm:$0xff] %v660_v12  ;;  %663 = vst [vmem:[%s3063_s10 + $0x1e8] sm:$0xff] %v662_v13  ;;  %v666_v15 = vld [vmem:[%s3058_s27 + $0x3f0] sm:$0xff] }
  0x57   : > { %665 = vst [vmem:[%s3063_s10 + $0x1f0] sm:$0xff] %v664_v14  ;;  %v668_v16 = vld [vmem:[%s3058_s27 + $0x400] sm:$0xff]  ;;  %v670_v17 = vld [vmem:[%s3058_s27 + $0x410] sm:$0xff]  ;;  %667 = vst [vmem:[%s3063_s10 + $0x1f8] sm:$0xff] %v666_v15 }
  0x58   : > { %669 = vst [vmem:[%s3063_s10 + $0x200] sm:$0xff] %v668_v16  ;;  %671 = vst [vmem:[%s3063_s10 + $0x208] sm:$0xff] %v670_v17  ;;  %v672_v18 = vld [vmem:[%s3058_s27 + $0x420] sm:$0xff]  ;;  %v674_v19 = vld [vmem:[%s3058_s27 + $0x430] sm:$0xff] }
  0x59   : > { %v676_v20 = vld [vmem:[%s3058_s27 + $0x440] sm:$0xff]  ;;  %673 = vst [vmem:[%s3063_s10 + $0x210] sm:$0xff] %v672_v18  ;;  %675 = vst [vmem:[%s3063_s10 + $0x218] sm:$0xff] %v674_v19  ;;  %v678_v21 = vld [vmem:[%s3058_s27 + $0x450] sm:$0xff] }
  0x5a   : > { %677 = vst [vmem:[%s3063_s10 + $0x220] sm:$0xff] %v676_v20  ;;  %v680_v22 = vld [vmem:[%s3058_s27 + $0x460] sm:$0xff]  ;;  %v682_v23 = vld [vmem:[%s3058_s27 + $0x470] sm:$0xff]  ;;  %679 = vst [vmem:[%s3063_s10 + $0x228] sm:$0xff] %v678_v21 }
  0x5b   : > { %681 = vst [vmem:[%s3063_s10 + $0x230] sm:$0xff] %v680_v22  ;;  %683 = vst [vmem:[%s3063_s10 + $0x238] sm:$0xff] %v682_v23  ;;  %v684_v24 = vld [vmem:[%s3058_s27 + $0x480] sm:$0xff]  ;;  %v686_v25 = vld [vmem:[%s3058_s27 + $0x490] sm:$0xff] }
  0x5c   : > { %v688_v26 = vld [vmem:[%s3058_s27 + $0x4a0] sm:$0xff]  ;;  %685 = vst [vmem:[%s3063_s10 + $0x240] sm:$0xff] %v684_v24  ;;  %687 = vst [vmem:[%s3063_s10 + $0x248] sm:$0xff] %v686_v25  ;;  %v690_v27 = vld [vmem:[%s3058_s27 + $0x4b0] sm:$0xff] }
  0x5d   : > { %689 = vst [vmem:[%s3063_s10 + $0x250] sm:$0xff] %v688_v26  ;;  %v692_v28 = vld [vmem:[%s3058_s27 + $0x4c0] sm:$0xff]  ;;  %v694_v29 = vld [vmem:[%s3058_s27 + $0x4d0] sm:$0xff]  ;;  %691 = vst [vmem:[%s3063_s10 + $0x258] sm:$0xff] %v690_v27 }
  0x5e   : > { %693 = vst [vmem:[%s3063_s10 + $0x260] sm:$0xff] %v692_v28  ;;  %695 = vst [vmem:[%s3063_s10 + $0x268] sm:$0xff] %v694_v29  ;;  %v696_v30 = vld [vmem:[%s3058_s27 + $0x4e0] sm:$0xff]  ;;  %v698_v31 = vld [vmem:[%s3058_s27 + $0x4f0] sm:$0xff] }
  0x5f   : > { %v700_v32 = vld [vmem:[%s3058_s27 + $0x500] sm:$0xff]  ;;  %697 = vst [vmem:[%s3063_s10 + $0x270] sm:$0xff] %v696_v30  ;;  %699 = vst [vmem:[%s3063_s10 + $0x278] sm:$0xff] %v698_v31  ;;  %v702_v33 = vld [vmem:[%s3058_s27 + $0x510] sm:$0xff] }
  0x60   : > { %701 = vst [vmem:[%s3063_s10 + $0x280] sm:$0xff] %v700_v32  ;;  %v704_v34 = vld [vmem:[%s3058_s27 + $0x520] sm:$0xff]  ;;  %v706_v35 = vld [vmem:[%s3058_s27 + $0x530] sm:$0xff]  ;;  %703 = vst [vmem:[%s3063_s10 + $0x288] sm:$0xff] %v702_v33 }
  0x61   : > { %705 = vst [vmem:[%s3063_s10 + $0x290] sm:$0xff] %v704_v34  ;;  %707 = vst [vmem:[%s3063_s10 + $0x298] sm:$0xff] %v706_v35  ;;  %v708_v36 = vld [vmem:[%s3058_s27 + $0x540] sm:$0xff]  ;;  %v710_v37 = vld [vmem:[%s3058_s27 + $0x550] sm:$0xff] }
  0x62   : > { %v712_v38 = vld [vmem:[%s3058_s27 + $0x560] sm:$0xff]  ;;  %709 = vst [vmem:[%s3063_s10 + $0x2a0] sm:$0xff] %v708_v36  ;;  %711 = vst [vmem:[%s3063_s10 + $0x2a8] sm:$0xff] %v710_v37  ;;  %v714_v39 = vld [vmem:[%s3058_s27 + $0x570] sm:$0xff] }
  0x63   : > { %713 = vst [vmem:[%s3063_s10 + $0x2b0] sm:$0xff] %v712_v38  ;;  %v716_v40 = vld [vmem:[%s3058_s27 + $0x580] sm:$0xff]  ;;  %v718_v41 = vld [vmem:[%s3058_s27 + $0x590] sm:$0xff]  ;;  %715 = vst [vmem:[%s3063_s10 + $0x2b8] sm:$0xff] %v714_v39 }
  0x64   : > { %717 = vst [vmem:[%s3063_s10 + $0x2c0] sm:$0xff] %v716_v40  ;;  %719 = vst [vmem:[%s3063_s10 + $0x2c8] sm:$0xff] %v718_v41  ;;  %v720_v42 = vld [vmem:[%s3058_s27 + $0x5a0] sm:$0xff]  ;;  %v722_v43 = vld [vmem:[%s3058_s27 + $0x5b0] sm:$0xff] }
  0x65   : > { %v724_v44 = vld [vmem:[%s3058_s27 + $0x5c0] sm:$0xff]  ;;  %721 = vst [vmem:[%s3063_s10 + $0x2d0] sm:$0xff] %v720_v42  ;;  %723 = vst [vmem:[%s3063_s10 + $0x2d8] sm:$0xff] %v722_v43  ;;  %v726_v45 = vld [vmem:[%s3058_s27 + $0x5d0] sm:$0xff] }
  0x66   : > { %725 = vst [vmem:[%s3063_s10 + $0x2e0] sm:$0xff] %v724_v44  ;;  %v728_v46 = vld [vmem:[%s3058_s27 + $0x5e0] sm:$0xff]  ;;  %v730_v47 = vld [vmem:[%s3058_s27 + $0x5f0] sm:$0xff]  ;;  %727 = vst [vmem:[%s3063_s10 + $0x2e8] sm:$0xff] %v726_v45 }
  0x67   : > { %729 = vst [vmem:[%s3063_s10 + $0x2f0] sm:$0xff] %v728_v46  ;;  %731 = vst [vmem:[%s3063_s10 + $0x2f8] sm:$0xff] %v730_v47  ;;  %v732_v48 = vld [vmem:[%s3058_s27 + $0x600] sm:$0xff]  ;;  %v734_v49 = vld [vmem:[%s3058_s27 + $0x610] sm:$0xff] }
  0x68   : > { %v736_v50 = vld [vmem:[%s3058_s27 + $0x620] sm:$0xff]  ;;  %733 = vst [vmem:[%s3063_s10 + $0x300] sm:$0xff] %v732_v48  ;;  %735 = vst [vmem:[%s3063_s10 + $0x308] sm:$0xff] %v734_v49  ;;  %v738_v51 = vld [vmem:[%s3058_s27 + $0x630] sm:$0xff] }
  0x69   : > { %737 = vst [vmem:[%s3063_s10 + $0x310] sm:$0xff] %v736_v50  ;;  %v740_v52 = vld [vmem:[%s3058_s27 + $0x640] sm:$0xff]  ;;  %v742_v53 = vld [vmem:[%s3058_s27 + $0x650] sm:$0xff]  ;;  %739 = vst [vmem:[%s3063_s10 + $0x318] sm:$0xff] %v738_v51 }
  0x6a   : > { %741 = vst [vmem:[%s3063_s10 + $0x320] sm:$0xff] %v740_v52  ;;  %743 = vst [vmem:[%s3063_s10 + $0x328] sm:$0xff] %v742_v53  ;;  %v744_v54 = vld [vmem:[%s3058_s27 + $0x660] sm:$0xff]  ;;  %v746_v55 = vld [vmem:[%s3058_s27 + $0x670] sm:$0xff] }
  0x6b   : > { %v748_v56 = vld [vmem:[%s3058_s27 + $0x680] sm:$0xff]  ;;  %745 = vst [vmem:[%s3063_s10 + $0x330] sm:$0xff] %v744_v54  ;;  %747 = vst [vmem:[%s3063_s10 + $0x338] sm:$0xff] %v746_v55  ;;  %v750_v57 = vld [vmem:[%s3058_s27 + $0x690] sm:$0xff] }
  0x6c   : > { %749 = vst [vmem:[%s3063_s10 + $0x340] sm:$0xff] %v748_v56  ;;  %v752_v58 = vld [vmem:[%s3058_s27 + $0x6a0] sm:$0xff]  ;;  %v754_v59 = vld [vmem:[%s3058_s27 + $0x6b0] sm:$0xff]  ;;  %751 = vst [vmem:[%s3063_s10 + $0x348] sm:$0xff] %v750_v57 }
  0x6d   : > { %753 = vst [vmem:[%s3063_s10 + $0x350] sm:$0xff] %v752_v58  ;;  %755 = vst [vmem:[%s3063_s10 + $0x358] sm:$0xff] %v754_v59  ;;  %v756_v60 = vld [vmem:[%s3058_s27 + $0x6c0] sm:$0xff]  ;;  %v758_v61 = vld [vmem:[%s3058_s27 + $0x6d0] sm:$0xff] }
  0x6e   : > { %v760_v62 = vld [vmem:[%s3058_s27 + $0x6e0] sm:$0xff]  ;;  %757 = vst [vmem:[%s3063_s10 + $0x360] sm:$0xff] %v756_v60  ;;  %759 = vst [vmem:[%s3063_s10 + $0x368] sm:$0xff] %v758_v61  ;;  %v762_v63 = vld [vmem:[%s3058_s27 + $0x6f0] sm:$0xff] }
  0x6f   : > { %761 = vst [vmem:[%s3063_s10 + $0x370] sm:$0xff] %v760_v62  ;;  %v764_v0 = vld [vmem:[%s3058_s27 + $0x700] sm:$0xff]  ;;  %v766_v1 = vld [vmem:[%s3058_s27 + $0x710] sm:$0xff]  ;;  %763 = vst [vmem:[%s3063_s10 + $0x378] sm:$0xff] %v762_v63 }
  0x70   : > { %765 = vst [vmem:[%s3063_s10 + $0x380] sm:$0xff] %v764_v0  ;;  %767 = vst [vmem:[%s3063_s10 + $0x388] sm:$0xff] %v766_v1  ;;  %v768_v2 = vld [vmem:[%s3058_s27 + $0x720] sm:$0xff]  ;;  %v770_v3 = vld [vmem:[%s3058_s27 + $0x730] sm:$0xff] }
  0x71   : > { %v772_v4 = vld [vmem:[%s3058_s27 + $0x740] sm:$0xff]  ;;  %769 = vst [vmem:[%s3063_s10 + $0x390] sm:$0xff] %v768_v2  ;;  %771 = vst [vmem:[%s3063_s10 + $0x398] sm:$0xff] %v770_v3  ;;  %v774_v5 = vld [vmem:[%s3058_s27 + $0x750] sm:$0xff] }
  0x72   : > { %773 = vst [vmem:[%s3063_s10 + $0x3a0] sm:$0xff] %v772_v4  ;;  %v776_v6 = vld [vmem:[%s3058_s27 + $0x760] sm:$0xff]  ;;  %v778_v7 = vld [vmem:[%s3058_s27 + $0x770] sm:$0xff]  ;;  %775 = vst [vmem:[%s3063_s10 + $0x3a8] sm:$0xff] %v774_v5 }
  0x73   : > { %777 = vst [vmem:[%s3063_s10 + $0x3b0] sm:$0xff] %v776_v6  ;;  %779 = vst [vmem:[%s3063_s10 + $0x3b8] sm:$0xff] %v778_v7  ;;  %v780_v8 = vld [vmem:[%s3058_s27 + $0x780] sm:$0xff]  ;;  %v782_v9 = vld [vmem:[%s3058_s27 + $0x790] sm:$0xff] }
  0x74   : > { %v784_v10 = vld [vmem:[%s3058_s27 + $0x7a0] sm:$0xff]  ;;  %781 = vst [vmem:[%s3063_s10 + $0x3c0] sm:$0xff] %v780_v8  ;;  %783 = vst [vmem:[%s3063_s10 + $0x3c8] sm:$0xff] %v782_v9  ;;  %v786_v11 = vld [vmem:[%s3058_s27 + $0x7b0] sm:$0xff] }
  0x75   : > { %785 = vst [vmem:[%s3063_s10 + $0x3d0] sm:$0xff] %v784_v10  ;;  %v788_v12 = vld [vmem:[%s3058_s27 + $0x7c0] sm:$0xff]  ;;  %v790_v13 = vld [vmem:[%s3058_s27 + $0x7d0] sm:$0xff]  ;;  %787 = vst [vmem:[%s3063_s10 + $0x3d8] sm:$0xff] %v786_v11 }
  0x76   : > { %789 = vst [vmem:[%s3063_s10 + $0x3e0] sm:$0xff] %v788_v12  ;;  %791 = vst [vmem:[%s3063_s10 + $0x3e8] sm:$0xff] %v790_v13  ;;  %v792_v14 = vld [vmem:[%s3058_s27 + $0x7e0] sm:$0xff]  ;;  %v794_v15 = vld [vmem:[%s3058_s27 + $0x7f0] sm:$0xff] }
  0x77   : > { %793 = vst [vmem:[%s3063_s10 + $0x3f0] sm:$0xff] %v792_v14  ;;  %795 = vst [vmem:[%s3063_s10 + $0x3f8] sm:$0xff] %v794_v15 }
  0x78 PF: > { %p2355_p0 = scmp.ge.s32.totalorder %s2896_s25, 1  ;;  %p800_p1 = scmp.lt.s32.totalorder %s2896_s25, 9 }
  0x7a   : > { %p801_p2 = pnand %p2355_p0, %p800_p1 }
  0x7b   : > { %s807_s0 = sand.u32 (!%p801_p2), 1, %s2872_s19   ;;  %s814_s28 = sand.u32 (!%p801_p2), 1, %s2864_s17  }
  0x7c   : > { %804 = sbr.rel (%p801_p2) target bundleno = 536 (0x218), region = 81  ;;  %s2356_s11 = sshll.u32 (!%p801_p2), %s807_s0, 7 }
  0x7d   : > { %s2357_s26 = sshll.u32 (!%p801_p2), %s814_s28, 10  ;;  %s835_s27 = sand.u32 (!%p801_p2), 1, %s2856_s15  }
  0x7e   : > { %s2359_s5 = sshll.u32 (!%p801_p2), %s2884_s22, 1  ;;  %s2358_s29 = sshll.u32 (!%p801_p2), %s835_s27, 5 }
  0x7f   : > { %p857_p3 = scmp.lt.s32.totalorder (!%p801_p2), %s2359_s5, 3  ;;  %p866_p4 = scmp.eq.s32.totalorder (!%p801_p2), %s2880_s21, 0 }
  0x80   : > { %s3335_s17 = scalar_lea.vmem (!%p801_p2), [#allocation5], %s2356_s11  ;;  %s3337_s0 = scalar_lea.vmem (!%p801_p2), [#allocation6], %s2357_s26 }
  0x81   : > { %s3598_s5 = smov (!%p857_p3, %s2359_s5), 3  ;;  %s3339_s15 = scalar_lea.vmem [#allocation7], %s2358_s29 }
  0x82   : > { %s859_s6 = scalar_lea.vmem %s3568_s3, %s3598_s5  ;;  %s864_s19 = scalar_lea.vmem %s3569_s4, %s3598_s5 }
  0x83   : > { %p2361_p5 = scmp.ne.s32.totalorder %s2880_s21, 0 }
  0x85   : > { %869 = sbr.rel (%p2361_p5) target bundleno = 143 (0x8f), region = 93 }
  0x8a   : > { %v2898_v16 = vmov 0.0  }
  0x8b   : > { %870 = vst [vmem:[#allocation2 + $0x30] sm:$0xff] %v2898_v16  ;;  %871 = vst [vmem:[#allocation2] sm:$0xff] %v2898_v16 }
  0x8c   : > { %872 = vst [vmem:[#allocation2 + $0x18] sm:$0xff] %v2898_v16  ;;  %873 = vst [vmem:[#allocation2 + $0x10] sm:$0xff] %v2898_v16 }
  0x8d   : > { %874 = vst [vmem:[#allocation2 + $0x8] sm:$0xff] %v2898_v16  ;;  %875 = vst [vmem:[#allocation2 + $0x20] sm:$0xff] %v2898_v16 }
  0x8e   : > { %876 = vst [vmem:[#allocation2 + $0x28] sm:$0xff] %v2898_v16  ;;  %877 = vst [vmem:[#allocation2 + $0x38] sm:$0xff] %v2898_v16 }
  0x8f PF: > { %882 = sbr.rel (!%p866_p4) target bundleno = 148 (0x94), region = 97  ;;  %v883_v17 = vlaneseq (%p866_p4)  ;;  %v2899_v18 = vmov (%p866_p4), 0.0  }
  0x91   : > { %vm885_vm0 = vcmp.lt.s32.totalorder (%p866_p4), %v883_v17, 256 }
  0x92   : > { %887 = vst.msk [vmem:[#allocation3] sm:$0x3] (%p866_p4), %vm885_vm0, %v2899_v18  ;;  %888 = vst.msk [vmem:[#allocation4] sm:$0x3] (%p866_p4), %vm885_vm0, %v2899_v18 }
  0x94 PF: > { %v2618_v19 = vld [vmem:[%s3337_s0 + $0x74] ss:$8 sps:$4 sm:$0xff]   ;;  %v2622_v21 = vld [vmem:[%s3337_s0 + $0x70] ss:$8 sps:$4 sm:$0xff]   ;;  %v2624_v23 = vld [vmem:[%s3337_s0 + $0x64] ss:$8 sps:$4 sm:$0xff]  }
  0x95   : > { %v2620_v20 = vld [vmem:[%s3337_s0 + $0x174] ss:$8 sps:$4 sm:$0xff]   ;;  %1761 = vmatprep.subr.bf16.mxu0 %v2618_v19  ;;  %v2623_v22 = vld [vmem:[%s3337_s0 + $0x170] ss:$8 sps:$4 sm:$0xff]   ;;  %v2626_v24 = vld [vmem:[%s3337_s0 + $0x164] ss:$8 sps:$4 sm:$0xff]  }
  0x96   : > { %1814 = vmatprep.subr.bf16.mxu1 %v2620_v20  ;;  %1762 = vmatpush1.bf16.msra.mxu0 %v2622_v21  ;;  %v2628_v25 = vld [vmem:[%s3337_s0 + $0x60] ss:$8 sps:$4 sm:$0xff]   ;;  %v2630_v27 = vld [vmem:[%s3337_s0 + $0x54] ss:$8 sps:$4 sm:$0xff]   ;;  %v2634_v29 = vld [vmem:[%s3337_s0 + $0x50] ss:$8 sps:$4 sm:$0xff]  }
  0x97   : > { %1815 = vmatpush1.bf16.msra.mxu1 %v2623_v22  ;;  %1763 = vmatprep.subr.bf16.mxu0 %v2624_v23  ;;  %v2629_v26 = vld [vmem:[%s3337_s0 + $0x160] ss:$8 sps:$4 sm:$0xff]   ;;  %v2632_v28 = vld [vmem:[%s3337_s0 + $0x154] ss:$8 sps:$4 sm:$0xff]   ;;  %v2635_v30 = vld [vmem:[%s3337_s0 + $0x150] ss:$8 sps:$4 sm:$0xff]  }
  0x98   : > { %1816 = vmatprep.subr.bf16.mxu1 %v2626_v24  ;;  %v2636_v31 = vld [vmem:[%s3337_s0 + $0x44] ss:$8 sps:$4 sm:$0xff]   ;;  %v2640_v33 = vld [vmem:[%s3337_s0 + $0x40] ss:$8 sps:$4 sm:$0xff]   ;;  %v2642_v35 = vld [vmem:[%s3337_s0 + $0x34] ss:$8 sps:$4 sm:$0xff]  }
  0x99   : > { %v2638_v32 = vld [vmem:[%s3337_s0 + $0x144] ss:$8 sps:$4 sm:$0xff]   ;;  %v2641_v34 = vld [vmem:[%s3337_s0 + $0x140] ss:$8 sps:$4 sm:$0xff]   ;;  %v2644_v36 = vld [vmem:[%s3337_s0 + $0x134] ss:$8 sps:$4 sm:$0xff]  }
  0x9a   : > { %1764 = vmatpush1.bf16.msra.mxu0 %v2628_v25  ;;  %v2646_v37 = vld [vmem:[%s3337_s0 + $0x30] ss:$8 sps:$4 sm:$0xff]   ;;  %v2648_v39 = vld [vmem:[%s3337_s0 + $0x24] ss:$8 sps:$4 sm:$0xff]   ;;  %v2652_v41 = vld [vmem:[%s3337_s0 + $0x20] ss:$8 sps:$4 sm:$0xff]  }
  0x9b   : > { %1817 = vmatpush1.bf16.msra.mxu1 %v2629_v26  ;;  %1765 = vmatprep.subr.bf16.mxu0 %v2630_v27  ;;  %v2647_v38 = vld [vmem:[%s3337_s0 + $0x130] ss:$8 sps:$4 sm:$0xff]   ;;  %v2650_v40 = vld [vmem:[%s3337_s0 + $0x124] ss:$8 sps:$4 sm:$0xff]   ;;  %v2653_v42 = vld [vmem:[%s3337_s0 + $0x120] ss:$8 sps:$4 sm:$0xff]  }
  0x9c   : > { %1818 = vmatprep.subr.bf16.mxu1 %v2632_v28  ;;  %v2654_v43 = vld [vmem:[%s3337_s0 + $0x14] ss:$8 sps:$4 sm:$0xff]   ;;  %v2658_v45 = vld [vmem:[%s3337_s0 + $0x10] ss:$8 sps:$4 sm:$0xff]   ;;  %v2660_v47 = vld [vmem:[%s3337_s0 + $0x4] ss:$8 sps:$4 sm:$0xff]  }
  0x9d   : > { %v2656_v44 = vld [vmem:[%s3337_s0 + $0x114] ss:$8 sps:$4 sm:$0xff]   ;;  %v2659_v46 = vld [vmem:[%s3337_s0 + $0x110] ss:$8 sps:$4 sm:$0xff]   ;;  %v2662_v48 = vld [vmem:[%s3337_s0 + $0x104] ss:$8 sps:$4 sm:$0xff]  }
  0x9e   : > { %1766 = vmatpush1.bf16.msra.mxu0 %v2634_v29  ;;  %v2664_v49 = vld [vmem:[%s3337_s0] ss:$8 sps:$4 sm:$0xff]   ;;  %v2666_v51 = vld [vmem:[%s3337_s0 + $0xf4] ss:$8 sps:$4 sm:$0xff]   ;;  %v2670_v53 = vld [vmem:[%s3337_s0 + $0xf0] ss:$8 sps:$4 sm:$0xff]  }
  0x9f   : > { %1819 = vmatpush1.bf16.msra.mxu1 %v2635_v30  ;;  %1767 = vmatprep.subr.bf16.mxu0 %v2636_v31  ;;  %v2665_v50 = vld [vmem:[%s3337_s0 + $0x100] ss:$8 sps:$4 sm:$0xff]   ;;  %v2668_v52 = vld [vmem:[%s3337_s0 + $0x1f4] ss:$8 sps:$4 sm:$0xff]   ;;  %v2671_v54 = vld [vmem:[%s3337_s0 + $0x1f0] ss:$8 sps:$4 sm:$0xff]  }
  0xa0   : > { %1820 = vmatprep.subr.bf16.mxu1 %v2638_v32  ;;  %v2672_v55 = vld [vmem:[%s3337_s0 + $0xe4] ss:$8 sps:$4 sm:$0xff]   ;;  %v2676_v57 = vld [vmem:[%s3337_s0 + $0xe0] ss:$8 sps:$4 sm:$0xff]   ;;  %v2678_v59 = vld [vmem:[%s3337_s0 + $0xd4] ss:$8 sps:$4 sm:$0xff]  }
  0xa1   : > { %v2674_v56 = vld [vmem:[%s3337_s0 + $0x1e4] ss:$8 sps:$4 sm:$0xff]   ;;  %v2677_v58 = vld [vmem:[%s3337_s0 + $0x1e0] ss:$8 sps:$4 sm:$0xff]   ;;  %v2680_v60 = vld [vmem:[%s3337_s0 + $0x1d4] ss:$8 sps:$4 sm:$0xff]  }
  0xa2   : > { %1768 = vmatpush1.bf16.msra.mxu0 %v2640_v33  ;;  %v2682_v61 = vld [vmem:[%s3337_s0 + $0xd0] ss:$8 sps:$4 sm:$0xff]   ;;  %v2684_v63 = vld [vmem:[%s3337_s0 + $0xc4] ss:$8 sps:$4 sm:$0xff]   ;;  %v2688_v1 = vld [vmem:[%s3337_s0 + $0xc0] ss:$8 sps:$4 sm:$0xff]  }
  0xa3   : > { %1821 = vmatpush1.bf16.msra.mxu1 %v2641_v34  ;;  %1769 = vmatprep.subr.bf16.mxu0 %v2642_v35  ;;  %v2683_v62 = vld [vmem:[%s3337_s0 + $0x1d0] ss:$8 sps:$4 sm:$0xff]   ;;  %v2686_v0 = vld [vmem:[%s3337_s0 + $0x1c4] ss:$8 sps:$4 sm:$0xff]   ;;  %v2689_v2 = vld [vmem:[%s3337_s0 + $0x1c0] ss:$8 sps:$4 sm:$0xff]  }
  0xa4   : > { %1822 = vmatprep.subr.bf16.mxu1 %v2644_v36  ;;  %v897_v3 = vld [vmem:[%s3335_s17] sm:$0xff]  ;;  %v898_v5 = vld [vmem:[%s3335_s17 + $0x8] sm:$0xff]  ;;  %v2690_v7 = vld [vmem:[%s3337_s0 + $0xb4] ss:$8 sps:$4 sm:$0xff]   ;;  %p1989_p6 = scmp.eq.s32.totalorder %s2880_s21, 3  ;;  %p2507_p7 = scmp.ne.s32.totalorder %s2880_s21, 3 }
  0xa5   : > { %v901_v4 = vld [vmem:[%s3335_s17 + $0x20] sm:$0xff]  ;;  %v902_v6 = vld [vmem:[%s3335_s17 + $0x28] sm:$0xff]  ;;  %v2692_v9 = vld [vmem:[%s3337_s0 + $0x1b4] ss:$8 sps:$4 sm:$0xff]  }
  0xa6   : > { %1770 = vmatpush1.bf16.msra.mxu0 %v2646_v37  ;;  %v2364_v8 = vcombine.high %v897_v3, %v901_v4  ;;  %v2366_v10 = vcombine.high %v898_v5, %v902_v6  ;;  %v2694_v11 = vld [vmem:[%s3337_s0 + $0xb0] ss:$8 sps:$4 sm:$0xff]   ;;  %v2696_v13 = vld [vmem:[%s3337_s0 + $0xa4] ss:$8 sps:$4 sm:$0xff]   ;;  %v2700_v15 = vld [vmem:[%s3337_s0 + $0xa0] ss:$8 sps:$4 sm:$0xff]   ;;  %v2363_v27 = vcombine.low %v897_v3, %v901_v4  ;;  %v2365_v28 = vcombine.low %v898_v5, %v902_v6 }
  0xa7   : > { %1823 = vmatpush1.bf16.msra.mxu1 %v2647_v38  ;;  %1771 = vmatprep.subr.bf16.mxu0 %v2648_v39  ;;  %v2695_v12 = vld [vmem:[%s3337_s0 + $0x1b0] ss:$8 sps:$4 sm:$0xff]   ;;  %v2698_v14 = vld [vmem:[%s3337_s0 + $0x1a4] ss:$8 sps:$4 sm:$0xff]   ;;  %v2701_v16 = vld [vmem:[%s3337_s0 + $0x1a0] ss:$8 sps:$4 sm:$0xff]  }
  0xa8   : > { %1824 = vmatprep.subr.bf16.mxu1 %v2650_v40  ;;  %1793 = vmatprep.mubr.bf16.mxu0 %v2364_v8  ;;  %v2702_v17 = vld [vmem:[%s3337_s0 + $0x94] ss:$8 sps:$4 sm:$0xff]   ;;  %v2706_v19 = vld [vmem:[%s3337_s0 + $0x90] ss:$8 sps:$4 sm:$0xff]   ;;  %v2708_v21 = vld [vmem:[%s3337_s0 + $0x84] ss:$8 sps:$4 sm:$0xff]  }
  0xa9   : > { %1846 = vmatprep.mubr.bf16.mxu1 %v2366_v10  ;;  %v2704_v18 = vld [vmem:[%s3337_s0 + $0x194] ss:$8 sps:$4 sm:$0xff]   ;;  %v2707_v20 = vld [vmem:[%s3337_s0 + $0x190] ss:$8 sps:$4 sm:$0xff]   ;;  %v2710_v22 = vld [vmem:[%s3337_s0 + $0x184] ss:$8 sps:$4 sm:$0xff]  }
  0xaa   : > { %1772 = vmatpush1.bf16.msra.mxu0 %v2652_v41  ;;  %v2712_v23 = vld [vmem:[%s3337_s0 + $0x80] ss:$8 sps:$4 sm:$0xff]   ;;  %v2716_v25 = vld [vmem:[%s3337_s0 + $0x274] ss:$8 sps:$4 sm:$0xff]   ;;  %v2714_v29 = vld [vmem:[%s3337_s0 + $0x270] ss:$8 sps:$4 sm:$0xff]  }
  0xab   : > { %1825 = vmatpush1.bf16.msra.mxu1 %v2653_v42  ;;  %1773 = vmatprep.subr.bf16.mxu0 %v2654_v43  ;;  %v2713_v24 = vld [vmem:[%s3337_s0 + $0x180] ss:$8 sps:$4 sm:$0xff]   ;;  %v2719_v26 = vld [vmem:[%s3337_s0 + $0x374] ss:$8 sps:$4 sm:$0xff]   ;;  %v2717_v30 = vld [vmem:[%s3337_s0 + $0x370] ss:$8 sps:$4 sm:$0xff]  }
  0xac   : > { %1826 = vmatprep.subr.bf16.mxu1 %v2656_v44  ;;  %v2722_v31 = vld [vmem:[%s3337_s0 + $0x264] ss:$8 sps:$4 sm:$0xff]   ;;  %v2720_v33 = vld [vmem:[%s3337_s0 + $0x260] ss:$8 sps:$4 sm:$0xff]   ;;  %v2728_v35 = vld [vmem:[%s3337_s0 + $0x254] ss:$8 sps:$4 sm:$0xff]  }
  0xad   : > { %v2725_v32 = vld [vmem:[%s3337_s0 + $0x364] ss:$8 sps:$4 sm:$0xff]   ;;  %v2723_v34 = vld [vmem:[%s3337_s0 + $0x360] ss:$8 sps:$4 sm:$0xff]   ;;  %v2731_v36 = vld [vmem:[%s3337_s0 + $0x354] ss:$8 sps:$4 sm:$0xff]  }
  0xae   : > { %1774 = vmatpush1.bf16.msra.mxu0 %v2658_v45  ;;  %v2726_v37 = vld [vmem:[%s3337_s0 + $0x250] ss:$8 sps:$4 sm:$0xff]   ;;  %v2734_v39 = vld [vmem:[%s3337_s0 + $0x244] ss:$8 sps:$4 sm:$0xff]   ;;  %v2732_v41 = vld [vmem:[%s3337_s0 + $0x240] ss:$8 sps:$4 sm:$0xff]  }
  0xaf   : > { %1827 = vmatpush1.bf16.msra.mxu1 %v2659_v46  ;;  %1775 = vmatprep.subr.bf16.mxu0 %v2660_v47  ;;  %v2729_v38 = vld [vmem:[%s3337_s0 + $0x350] ss:$8 sps:$4 sm:$0xff]   ;;  %v2737_v40 = vld [vmem:[%s3337_s0 + $0x344] ss:$8 sps:$4 sm:$0xff]   ;;  %v2735_v42 = vld [vmem:[%s3337_s0 + $0x340] ss:$8 sps:$4 sm:$0xff]  }
  0xb0   : > { %1828 = vmatprep.subr.bf16.mxu1 %v2662_v48  ;;  %v2740_v43 = vld [vmem:[%s3337_s0 + $0x234] ss:$8 sps:$4 sm:$0xff]   ;;  %v2738_v45 = vld [vmem:[%s3337_s0 + $0x230] ss:$8 sps:$4 sm:$0xff]   ;;  %v905_v47 = vld [vmem:[%s3335_s17 + $0x40] sm:$0xff] }
  0xb1   : > { %v2743_v44 = vld [vmem:[%s3337_s0 + $0x334] ss:$8 sps:$4 sm:$0xff]   ;;  %v2741_v46 = vld [vmem:[%s3337_s0 + $0x330] ss:$8 sps:$4 sm:$0xff]   ;;  %v909_v48 = vld [vmem:[%s3335_s17 + $0x60] sm:$0xff] }
  0xb2   : > { %1776 = vmatpush1.bf16.msra.mxu0 %v2664_v49  ;;  %v906_v49 = vld [vmem:[%s3335_s17 + $0x48] sm:$0xff]  ;;  %v3458_v5 = vld [vmem:[%s3335_s17 + $0x38] sm:$0xff] }
  0xb3   : > { %1829 = vmatpush1.bf16.msra.mxu1 %v2665_v50  ;;  %1777 = vmatprep.subr.bf16.mxu0 %v2666_v51  ;;  %v910_v50 = vld [vmem:[%s3335_s17 + $0x68] sm:$0xff]  ;;  %v2767_v10 = vld [vmem:[%s3337_s0 + $0x3f4] ss:$8 sps:$4 sm:$0xff]  }
  0xb4   : > { %1830 = vmatprep.subr.bf16.mxu1 %v2668_v52  ;;  %v2746_v51 = vld [vmem:[%s3337_s0 + $0x224] ss:$8 sps:$4 sm:$0xff]   ;;  %v2372_v52 = vcombine.high %v905_v47, %v909_v48  ;;  %v2759_v8 = vld [vmem:[%s3337_s0 + $0x300] ss:$8 sps:$4 sm:$0xff]  }
  0xb5   : > { %v2761_v3 = vld [vmem:[%s3337_s0 + $0x304] ss:$8 sps:$4 sm:$0xff]  }
  0xb6   : > { %1778 = vmatpush2.bf16.msra.mxu0 %v2670_v53  ;;  %v2374_v53 = vcombine.high %v906_v49, %v910_v50 }
  0xb7   : > { %1831 = vmatpush2.bf16.msra.mxu1 %v2671_v54  ;;  %1779 = vmatprep.subr.bf16.mxu0 %v2672_v55  ;;  %v2371_v54 = vcombine.low %v905_v47, %v909_v48  ;;  %v2749_v55 = vld [vmem:[%s3337_s0 + $0x324] ss:$8 sps:$4 sm:$0xff]  }
  0xb8   : > { %1832 = vmatprep.subr.bf16.mxu1 %v2674_v56  ;;  %v2373_v56 = vcombine.low %v906_v49, %v910_v50 }
  0xba   : > { %1780 = vmatpush2.bf16.msra.mxu0 %v2676_v57  ;;  %v2744_v57 = vld [vmem:[%s3337_s0 + $0x220] ss:$8 sps:$4 sm:$0xff]  }
  0xbb   : > { %1833 = vmatpush2.bf16.msra.mxu1 %v2677_v58  ;;  %1781 = vmatprep.subr.bf16.mxu0 %v2678_v59  ;;  %v2747_v58 = vld [vmem:[%s3337_s0 + $0x320] ss:$8 sps:$4 sm:$0xff]   ;;  %v2752_v59 = vld [vmem:[%s3337_s0 + $0x214] ss:$8 sps:$4 sm:$0xff]  }
  0xbc   : > { %1834 = vmatprep.subr.bf16.mxu1 %v2680_v60  ;;  %v2755_v60 = vld [vmem:[%s3337_s0 + $0x314] ss:$8 sps:$4 sm:$0xff]  }
  0xbe   : > { %1782 = vmatpush2.bf16.msra.mxu0 %v2682_v61  ;;  %v2750_v61 = vld [vmem:[%s3337_s0 + $0x210] ss:$8 sps:$4 sm:$0xff]  }
  0xbf   : > { %1835 = vmatpush2.bf16.msra.mxu1 %v2683_v62  ;;  %1783 = vmatprep.subr.bf16.mxu0 %v2684_v63  ;;  %v2753_v62 = vld [vmem:[%s3337_s0 + $0x310] ss:$8 sps:$4 sm:$0xff]  }
  0xc0   : > { %1836 = vmatprep.subr.bf16.mxu1 %v2686_v0  ;;  %v3445_v63 = vld [vmem:[%s3335_s17 + $0x10] sm:$0xff] }
  0xc1   : > { %v3448_v0 = vld [vmem:[%s3335_s17 + $0x30] sm:$0xff] }
  0xc2   : > { %1784 = vmatpush2.bf16.msra.mxu0 %v2688_v1  ;;  %v3451_v1 = vld [vmem:[%s3335_s17 + $0x18] sm:$0xff]  ;;  %v2368_v4 = vcombine.high %v3445_v63, %v3448_v0 }
  0xc3   : > { %1837 = vmatpush2.bf16.msra.mxu1 %v2689_v2  ;;  %1785 = vmatprep.subr.bf16.mxu0 %v2690_v7  ;;  %v2758_v2 = vld [vmem:[%s3337_s0 + $0x204] ss:$8 sps:$4 sm:$0xff]   ;;  %v2370_v6 = vcombine.high %v3451_v1, %v3458_v5  ;;  %v2756_v7 = vld [vmem:[%s3337_s0 + $0x200] ss:$8 sps:$4 sm:$0xff]  }
  0xc4   : > { %1838 = vmatprep.subr.bf16.mxu1 %v2692_v9  ;;  %v2764_v9 = vld [vmem:[%s3337_s0 + $0x2f4] ss:$8 sps:$4 sm:$0xff]  }
  0xc6   : > { %1786 = vmatpush2.bf16.msra.mxu0 %v2694_v11  ;;  %v2762_v11 = vld [vmem:[%s3337_s0 + $0x2f0] ss:$8 sps:$4 sm:$0xff]  }
  0xc7   : > { %1839 = vmatpush2.bf16.msra.mxu1 %v2695_v12  ;;  %1787 = vmatprep.subr.bf16.mxu0 %v2696_v13  ;;  %v2765_v12 = vld [vmem:[%s3337_s0 + $0x3f0] ss:$8 sps:$4 sm:$0xff]   ;;  %v2770_v13 = vld [vmem:[%s3337_s0 + $0x2e4] ss:$8 sps:$4 sm:$0xff]  }
  0xc8   : > { %1840 = vmatprep.subr.bf16.mxu1 %v2698_v14  ;;  %v2773_v14 = vld [vmem:[%s3337_s0 + $0x3e4] ss:$8 sps:$4 sm:$0xff]  }
  0xca   : > { %1788 = vmatpush2.bf16.msra.mxu0 %v2700_v15  ;;  %v2768_v15 = vld [vmem:[%s3337_s0 + $0x2e0] ss:$8 sps:$4 sm:$0xff]  }
  0xcb   : > { %1841 = vmatpush2.bf16.msra.mxu1 %v2701_v16  ;;  %1789 = vmatprep.subr.bf16.mxu0 %v2702_v17  ;;  %v2771_v16 = vld [vmem:[%s3337_s0 + $0x3e0] ss:$8 sps:$4 sm:$0xff]   ;;  %v2776_v17 = vld [vmem:[%s3337_s0 + $0x2d4] ss:$8 sps:$4 sm:$0xff]  }
  0xcc   : > { %1842 = vmatprep.subr.bf16.mxu1 %v2704_v18  ;;  %v2779_v18 = vld [vmem:[%s3337_s0 + $0x3d4] ss:$8 sps:$4 sm:$0xff]  }
  0xce   : > { %1790 = vmatpush2.bf16.msra.mxu0 %v2706_v19  ;;  %v2774_v19 = vld [vmem:[%s3337_s0 + $0x2d0] ss:$8 sps:$4 sm:$0xff]  }
  0xcf   : > { %1843 = vmatpush2.bf16.msra.mxu1 %v2707_v20  ;;  %1791 = vmatprep.subr.bf16.mxu0 %v2708_v21  ;;  %v2777_v20 = vld [vmem:[%s3337_s0 + $0x3d0] ss:$8 sps:$4 sm:$0xff]   ;;  %v2782_v21 = vld [vmem:[%s3337_s0 + $0x2c4] ss:$8 sps:$4 sm:$0xff]  }
  0xd0   : > { %1844 = vmatprep.subr.bf16.mxu1 %v2710_v22  ;;  %v2785_v22 = vld [vmem:[%s3337_s0 + $0x3c4] ss:$8 sps:$4 sm:$0xff]  }
  0xd2   : > { %1792 = vmatpush2.bf16.msra.mxu0 %v2712_v23  ;;  %v2780_v23 = vld [vmem:[%s3337_s0 + $0x2c0] ss:$8 sps:$4 sm:$0xff]  }
  0xd3   : > { %1845 = vmatpush2.bf16.msra.mxu1 %v2713_v24  ;;  %1867 = vmatprep.subr.bf16.mxu0 %v2716_v25  ;;  %v2783_v24 = vld [vmem:[%s3337_s0 + $0x3c0] ss:$8 sps:$4 sm:$0xff]   ;;  %v2788_v25 = vld [vmem:[%s3337_s0 + $0x2b4] ss:$8 sps:$4 sm:$0xff]  }
  0xd4   : > { %1920 = vmatprep.subr.bf16.mxu1 %v2719_v26  ;;  %v2791_v26 = vld [vmem:[%s3337_s0 + $0x3b4] ss:$8 sps:$4 sm:$0xff]  }
  0xd5   : > { %1794 = vmatmul.mubr.bf16.vlgmr.msra.gmra.mxu0 %v2363_v27  ;;  %v2786_v27 = vld [vmem:[%s3337_s0 + $0x2b0] ss:$8 sps:$4 sm:$0xff]  }
  0xd6   : > { %1847 = vmatmul.mubr.bf16.vlgmr.msra.gmra.mxu1 %v2365_v28  ;;  %1868 = vmatpush1.bf16.msra.mxu0 %v2714_v29  ;;  %v2789_v28 = vld [vmem:[%s3337_s0 + $0x3b0] ss:$8 sps:$4 sm:$0xff]   ;;  %v2794_v29 = vld [vmem:[%s3337_s0 + $0x2a4] ss:$8 sps:$4 sm:$0xff]  }
  0xd7   : > { %1921 = vmatpush1.bf16.msra.mxu1 %v2717_v30  ;;  %1869 = vmatprep.subr.bf16.mxu0 %v2722_v31  ;;  %v2797_v30 = vld [vmem:[%s3337_s0 + $0x3a4] ss:$8 sps:$4 sm:$0xff]   ;;  %v2792_v31 = vld [vmem:[%s3337_s0 + $0x2a0] ss:$8 sps:$4 sm:$0xff]  }
  0xd8   : > { %1922 = vmatprep.subr.bf16.mxu1 %v2725_v32  ;;  %1803 = vmatprep.mubr.bf16.mxu0 %v2372_v52  ;;  %v2795_v32 = vld [vmem:[%s3337_s0 + $0x3a0] ss:$8 sps:$4 sm:$0xff]  }
  0xd9   : > { %1856 = vmatprep.mubr.bf16.mxu1 %v2374_v53 }
  0xda   : > { %1870 = vmatpush1.bf16.msra.mxu0 %v2720_v33  ;;  %v2800_v33 = vld [vmem:[%s3337_s0 + $0x294] ss:$8 sps:$4 sm:$0xff]  }
  0xdb   : > { %1923 = vmatpush1.bf16.msra.mxu1 %v2723_v34  ;;  %1871 = vmatprep.subr.bf16.mxu0 %v2728_v35  ;;  %v2803_v34 = vld [vmem:[%s3337_s0 + $0x394] ss:$8 sps:$4 sm:$0xff]   ;;  %v2798_v35 = vld [vmem:[%s3337_s0 + $0x290] ss:$8 sps:$4 sm:$0xff]  }
  0xdc   : > { %1924 = vmatprep.subr.bf16.mxu1 %v2731_v36  ;;  %v2801_v36 = vld [vmem:[%s3337_s0 + $0x390] ss:$8 sps:$4 sm:$0xff]  }
  0xdd   : > { %1804 = vmatmul.mubr.bf16.gmra.mxu0 %v2371_v54 }
  0xde   : > { %1872 = vmatpush1.bf16.msra.mxu0 %v2726_v37  ;;  %1857 = vmatmul.mubr.bf16.gmra.mxu1 %v2373_v56  ;;  %v2806_v37 = vld [vmem:[%s3337_s0 + $0x284] ss:$8 sps:$4 sm:$0xff]  }
  0xdf   : > { %1925 = vmatpush1.bf16.msra.mxu1 %v2729_v38  ;;  %1873 = vmatprep.subr.bf16.mxu0 %v2734_v39  ;;  %v2809_v38 = vld [vmem:[%s3337_s0 + $0x384] ss:$8 sps:$4 sm:$0xff]   ;;  %v2804_v39 = vld [vmem:[%s3337_s0 + $0x280] ss:$8 sps:$4 sm:$0xff]  }
  0xe0   : > { %1926 = vmatprep.subr.bf16.mxu1 %v2737_v40  ;;  %1899 = vmatprep.mubr.bf16.mxu0 %v2368_v4  ;;  %v2807_v40 = vld [vmem:[%s3337_s0 + $0x380] ss:$8 sps:$4 sm:$0xff]  }
  0xe1   : > { %1952 = vmatprep.mubr.bf16.mxu1 %v2370_v6 }
  0xe2   : > { %1874 = vmatpush1.bf16.msra.mxu0 %v2732_v41  ;;  %v907_v41 = vld [vmem:[%s3335_s17 + $0x50] sm:$0xff] }
  0xe3   : > { %1927 = vmatpush1.bf16.msra.mxu1 %v2735_v42  ;;  %1875 = vmatprep.subr.bf16.mxu0 %v2740_v43  ;;  %v911_v42 = vld [vmem:[%s3335_s17 + $0x70] sm:$0xff]  ;;  %v908_v43 = vld [vmem:[%s3335_s17 + $0x58] sm:$0xff] }
  0xe4   : > { %1928 = vmatprep.subr.bf16.mxu1 %v2743_v44  ;;  %v912_v44 = vld [vmem:[%s3335_s17 + $0x78] sm:$0xff]  ;;  %v2376_v47 = vcombine.high %v907_v41, %v911_v42  ;;  %v2375_v49 = vcombine.low %v907_v41, %v911_v42 }
  0xe5   : > { %v2378_v48 = vcombine.high %v908_v43, %v912_v44  ;;  %v2377_v50 = vcombine.low %v908_v43, %v912_v44  ;;  %v894_v42 = vld [vmem:[#allocation2 + $0x20] sm:$0xff] }
  0xe6   : > { %1876 = vmatpush1.bf16.msra.mxu0 %v2738_v45  ;;  %v2367_v45 = vcombine.low %v3445_v63, %v3448_v0 }
  0xe7   : > { %1929 = vmatpush1.bf16.msra.mxu1 %v2741_v46  ;;  %1877 = vmatprep.subr.bf16.mxu0 %v2746_v51  ;;  %v2369_v46 = vcombine.low %v3451_v1, %v3458_v5 }
  0xe8   : > { %1930 = vmatprep.subr.bf16.mxu1 %v2749_v55 }
  0xea   : > { %1878 = vmatpush1.bf16.msra.mxu0 %v2744_v57 }
  0xeb   : > { %1931 = vmatpush1.bf16.msra.mxu1 %v2747_v58  ;;  %1879 = vmatprep.subr.bf16.mxu0 %v2752_v59 }
  0xec   : > { %1932 = vmatprep.subr.bf16.mxu1 %v2755_v60 }
  0xee   : > { %1880 = vmatpush1.bf16.msra.mxu0 %v2750_v61 }
  0xef   : > { %1933 = vmatpush1.bf16.msra.mxu1 %v2753_v62  ;;  %1881 = vmatprep.subr.bf16.mxu0 %v2758_v2 }
  0xf0   : > { %1934 = vmatprep.subr.bf16.mxu1 %v2761_v3 }
  0xf2   : > { %1882 = vmatpush1.bf16.msra.mxu0 %v2756_v7 }
  0xf3   : > { %1935 = vmatpush1.bf16.msra.mxu1 %v2759_v8  ;;  %1883 = vmatprep.subr.bf16.mxu0 %v2764_v9  ;;  %v889_v8 = vld [vmem:[#allocation2 + $0x30] sm:$0xff] }
  0xf4   : > { %1936 = vmatprep.subr.bf16.mxu1 %v2767_v10 }
  0xf6   : > { %1884 = vmatpush2.bf16.msra.mxu0 %v2762_v11 }
  0xf7   : > { %1937 = vmatpush2.bf16.msra.mxu1 %v2765_v12  ;;  %1885 = vmatprep.subr.bf16.mxu0 %v2770_v13 }
  0xf8   : > { %1938 = vmatprep.subr.bf16.mxu1 %v2773_v14  ;;  %v890_v14 = vld [vmem:[#allocation2] sm:$0xff] }
  0xfa   : > { %1886 = vmatpush2.bf16.msra.mxu0 %v2768_v15 }
  0xfb   : > { %1939 = vmatpush2.bf16.msra.mxu1 %v2771_v16  ;;  %1887 = vmatprep.subr.bf16.mxu0 %v2776_v17 }
  0xfc   : > { %1940 = vmatprep.subr.bf16.mxu1 %v2779_v18 }
  0xfe   : > { %1888 = vmatpush2.bf16.msra.mxu0 %v2774_v19 }
  0xff   : > { %1941 = vmatpush2.bf16.msra.mxu1 %v2777_v20  ;;  %1889 = vmatprep.subr.bf16.mxu0 %v2782_v21  ;;  %v891_v21 = vld [vmem:[#allocation2 + $0x18] sm:$0xff] }
 0x100   : > { %1942 = vmatprep.subr.bf16.mxu1 %v2785_v22 }
 0x102   : > { %1890 = vmatpush2.bf16.msra.mxu0 %v2780_v23 }
 0x103   : > { %1943 = vmatpush2.bf16.msra.mxu1 %v2783_v24  ;;  %1891 = vmatprep.subr.bf16.mxu0 %v2788_v25 }
 0x104   : > { %1944 = vmatprep.subr.bf16.mxu1 %v2791_v26 }
 0x106   : > { %1892 = vmatpush2.bf16.msra.mxu0 %v2786_v27 }
 0x107   : > { %1945 = vmatpush2.bf16.msra.mxu1 %v2789_v28  ;;  %1893 = vmatprep.subr.bf16.mxu0 %v2794_v29  ;;  %v892_v28 = vld [vmem:[#allocation2 + $0x10] sm:$0xff] }
 0x108   : > { %1946 = vmatprep.subr.bf16.mxu1 %v2797_v30 }
 0x10a   : > { %1894 = vmatpush2.bf16.msra.mxu0 %v2792_v31 }
 0x10b   : > { %1947 = vmatpush2.bf16.msra.mxu1 %v2795_v32  ;;  %1895 = vmatprep.subr.bf16.mxu0 %v2800_v33 }
 0x10c   : > { %1948 = vmatprep.subr.bf16.mxu1 %v2803_v34 }
 0x10e   : > { %1896 = vmatpush2.bf16.msra.mxu0 %v2798_v35  ;;  %v893_v35 = vld [vmem:[#allocation2 + $0x8] sm:$0xff] }
 0x10f   : > { %1949 = vmatpush2.bf16.msra.mxu1 %v2801_v36  ;;  %1897 = vmatprep.subr.bf16.mxu0 %v2806_v37 }
 0x110   : > { %1950 = vmatprep.subr.bf16.mxu1 %v2809_v38 }
 0x112   : > { %1898 = vmatpush2.bf16.msra.mxu0 %v2804_v39 }
 0x113   : > { %1951 = vmatpush2.bf16.msra.mxu1 %v2807_v40 }
 0x115   : > { %1900 = vmatmul.mubr.bf16.vlgmr.msra.gmra.mxu0 %v2367_v45 }
 0x116   : > { %1953 = vmatmul.mubr.bf16.vlgmr.msra.gmra.mxu1 %v2369_v46  ;;  %1909 = vmatprep.mubr.bf16.mxu0 %v2376_v47 }
 0x117   : > { %1962 = vmatprep.mubr.bf16.mxu1 %v2378_v48 }
 0x11d   : > { %1910 = vmatmul.mubr.bf16.gmra.mxu0 %v2375_v49  ;;  %v895_v49 = vld [vmem:[#allocation2 + $0x28] sm:$0xff] }
 0x11e   : > { %1963 = vmatmul.mubr.bf16.gmra.mxu1 %v2377_v50 }
 0x195   : > { %v1795_v51 = vpop.f32.mrf.mxu0 }
 0x196   : > { %v1848_v52 = vpop.f32.mrf.mxu1 }
 0x197   : > { %v1797_v53 = vpop.f32.mrf.mxu0  ;;  %v1849_v3 = vadd.f32 %v1848_v52, %v1795_v51 }
 0x198   : > { %v1850_v54 = vpop.f32.mrf.mxu1 }
 0x199   : > { %v1799_v55 = vpop.f32.mrf.mxu0  ;;  %v1851_v6 = vadd.f32 %v1850_v54, %v1797_v53  ;;  %v896_v54 = vld [vmem:[#allocation2 + $0x38] sm:$0xff] }
 0x19a   : > { %v1852_v56 = vpop.f32.mrf.mxu1 }
 0x19b   : > { %v1801_v57 = vpop.f32.mrf.mxu0  ;;  %v1853_v11 = vadd.f32 %v1852_v56, %v1799_v55 }
 0x19c   : > { %v1854_v58 = vpop.f32.mrf.mxu1 }
 0x19d   : > { %v1805_v59 = vpop.f32.mrf.mxu0  ;;  %v1855_v17 = vadd.f32 %v1854_v58, %v1801_v57 }
 0x19e   : > { %v1858_v60 = vpop.f32.mrf.mxu1 }
 0x19f   : > { %v1807_v61 = vpop.f32.mrf.mxu0  ;;  %v1859_v24 = vadd.f32 %v1858_v60, %v1805_v59 }
 0x1a0   : > { %v1860_v62 = vpop.f32.mrf.mxu1 }
 0x1a1   : > { %v1809_v63 = vpop.f32.mrf.mxu0  ;;  %v1861_v31 = vadd.f32 %v1860_v62, %v1807_v61 }
 0x1a2   : > { %v1862_v0 = vpop.f32.mrf.mxu1 }
 0x1a3   : > { %v1811_v1 = vpop.f32.mrf.mxu0  ;;  %v1863_v38 = vadd.f32 %v1862_v0, %v1809_v63 }
 0x1a4   : > { %v1864_v2 = vpop.f32.mrf.mxu1 }
 0x1a5   : > { %v1865_v45 = vadd.f32 %v1864_v2, %v1811_v1 }
 0x1d5   : > { %v1901_v4 = vpop.f32.mrf.mxu0 }
 0x1d6   : > { %v1954_v5 = vpop.f32.mrf.mxu1  ;;  %v1902_v7 = vadd.f32 %v1901_v4, %v1849_v3 }
 0x1d7   : > { %v1903_v9 = vpop.f32.mrf.mxu0 }
 0x1d8   : > { %v1956_v10 = vpop.f32.mrf.mxu1  ;;  %v1955_v12 = vadd.f32 %v1954_v5, %v1902_v7  ;;  %v1904_v13 = vadd.f32 %v1903_v9, %v1851_v6 }
 0x1d9   : > { %v1905_v15 = vpop.f32.mrf.mxu0 }
 0x1da   : > { %v1958_v16 = vpop.f32.mrf.mxu1  ;;  %v1973_v18 = vadd.f32 %v1955_v12, %v889_v8  ;;  %v1957_v19 = vadd.f32 %v1956_v10, %v1904_v13  ;;  %v1906_v20 = vadd.f32 %v1905_v15, %v1853_v11 }
 0x1db   : > { %v1907_v22 = vpop.f32.mrf.mxu0 }
 0x1dc   : > { %v1960_v23 = vpop.f32.mrf.mxu1  ;;  %1981 = vst [vmem:[#allocation2 + $0x30] sm:$0xff] %v1973_v18  ;;  %v1974_v25 = vadd.f32 %v1957_v19, %v890_v14  ;;  %v1959_v26 = vadd.f32 %v1958_v16, %v1906_v20  ;;  %v1908_v27 = vadd.f32 %v1907_v22, %v1855_v17 }
 0x1dd   : > { %v1911_v29 = vpop.f32.mrf.mxu0 }
 0x1de   : > { %v1964_v30 = vpop.f32.mrf.mxu1  ;;  %1982 = vst [vmem:[#allocation2] sm:$0xff] %v1974_v25  ;;  %v1975_v32 = vadd.f32 %v1959_v26, %v891_v21  ;;  %v1961_v33 = vadd.f32 %v1960_v23, %v1908_v27  ;;  %v1912_v34 = vadd.f32 %v1911_v29, %v1859_v24 }
 0x1df   : > { %v1913_v36 = vpop.f32.mrf.mxu0 }
 0x1e0   : > { %v1966_v37 = vpop.f32.mrf.mxu1  ;;  %1983 = vst [vmem:[#allocation2 + $0x18] sm:$0xff] %v1975_v32  ;;  %v1976_v39 = vadd.f32 %v1961_v33, %v892_v28  ;;  %v1965_v40 = vadd.f32 %v1964_v30, %v1912_v34  ;;  %v1914_v41 = vadd.f32 %v1913_v36, %v1861_v31 }
 0x1e1   : > { %v1915_v43 = vpop.f32.mrf.mxu0 }
 0x1e2   : > { %v1968_v44 = vpop.f32.mrf.mxu1  ;;  %1984 = vst [vmem:[#allocation2 + $0x10] sm:$0xff] %v1976_v39  ;;  %v1977_v46 = vadd.f32 %v1965_v40, %v893_v35  ;;  %v1967_v47 = vadd.f32 %v1966_v37, %v1914_v41  ;;  %v1916_v48 = vadd.f32 %v1915_v43, %v1863_v38 }
 0x1e3   : > { %v1917_v50 = vpop.f32.mrf.mxu0 }
 0x1e4   : > { %1985 = vst [vmem:[#allocation2 + $0x8] sm:$0xff] %v1977_v46  ;;  %v1978_v51 = vadd.f32 %v1967_v47, %v894_v42  ;;  %v1969_v52 = vadd.f32 %v1968_v44, %v1916_v48  ;;  %v1918_v53 = vadd.f32 %v1917_v50, %v1865_v45  ;;  %v1970_v55 = vpop.f32.mrf.mxu1 }
 0x1e6   : > { %1986 = vst [vmem:[#allocation2 + $0x20] sm:$0xff] %v1978_v51  ;;  %v1979_v56 = vadd.f32 %v1969_v52, %v895_v49  ;;  %v1971_v57 = vadd.f32 %v1970_v55, %v1918_v53  ;;  %1992 = sbr.rel (%p2507_p7) target bundleno = 523 (0x20b), region = 101 }
 0x1e8   : > { %1987 = vst [vmem:[#allocation2 + $0x28] sm:$0xff] %v1979_v56  ;;  %v1980_v58 = vadd.f32 %v1971_v57, %v896_v54 }
 0x1ea   : > { %1988 = vst [vmem:[#allocation2 + $0x38] sm:$0xff] %v1980_v58 }
 0x1eb   : > { %v1993_v59 = vld [vmem:[#allocation2 + $0x30] sm:$0xff]  ;;  %v1994_v60 = vld [vmem:[#allocation2] sm:$0xff]  ;;  %v1995_v61 = vld [vmem:[#allocation2 + $0x18] sm:$0xff]  ;;  %v2054_v30 = vlaneseq  ;;  %v2900_v34 = vmov 1966171168  }
 0x1ec   : > { %v2521_v62 = vpack.c.bf16 %v1994_v60, %v1993_v59  ;;  %v2073_v63 = vmul.f32 %v1993_v59, %v1993_v59  ;;  %v2074_v0 = vmul.f32 %v1994_v60, %v1994_v60  ;;  %v1996_v1 = vld [vmem:[#allocation2 + $0x10] sm:$0xff]  ;;  %v2030_v2 = vadd.f32 %v1995_v61, %v1993_v59  ;;  %v1997_v3 = vld [vmem:[#allocation2 + $0x8] sm:$0xff] }
 0x1ed   : > { %v1998_v4 = vld [vmem:[#allocation2 + $0x20] sm:$0xff]  ;;  %v2522_v5 = vpack.c.bf16 %v1996_v1, %v1995_v61  ;;  %v2039_v6 = vadd.f32 %v1996_v1, %v1994_v60  ;;  %v2075_v7 = vmul.f32 %v1995_v61, %v1995_v61  ;;  %v2076_v8 = vmul.f32 %v1996_v1, %v1996_v1 }
 0x1ee   : > { %2025 = vst [vmem:[%s3339_s15] sm:$0xff] %v2521_v62  ;;  %v2523_v11 = vpack.c.bf16 %v1998_v4, %v1997_v3  ;;  %v2031_v12 = vadd.f32 %v2030_v2, %v1997_v3  ;;  %v2077_v13 = vmul.f32 %v1997_v3, %v1997_v3  ;;  %v2078_v14 = vmul.f32 %v1998_v4, %v1998_v4  ;;  %v2029_v60 = vld [vmem:[#allocation3] sm:$0x3] }
 0x1ef   : > { %v1999_v9 = vld [vmem:[#allocation2 + $0x28] sm:$0xff]  ;;  %2026 = vst [vmem:[%s3339_s15 + $0x8] sm:$0xff] %v2522_v5  ;;  %v2081_v15 = vadd.f32 %v2075_v7, %v2073_v63  ;;  %v2090_v16 = vadd.f32 %v2076_v8, %v2074_v0  ;;  %v2040_v17 = vadd.f32 %v2039_v6, %v1998_v4  ;;  %v2052_v35 = vunpack.c.l.s4 %v2900_v34  ;;  %v2072_v63 = vld [vmem:[#allocation4] sm:$0x3] }
 0x1f0   : > { %2027 = vst [vmem:[%s3339_s15 + $0x10] sm:$0xff] %v2523_v11  ;;  %v2032_v19 = vadd.f32 %v2031_v12, %v1999_v9  ;;  %v2079_v20 = vmul.f32 %v1999_v9, %v1999_v9  ;;  %v2055_v41 = vshrl.u32 %v2054_v30, 7  ;;  %vm2069_vm1 = vcmp.lt.s32.totalorder %v2054_v30, 256 }
 0x1f1   : > { %v2000_v10 = vld [vmem:[#allocation2 + $0x38] sm:$0xff]  ;;  %v2082_v22 = vadd.f32 %v2081_v15, %v2077_v13  ;;  %v2091_v23 = vadd.f32 %v2090_v16, %v2078_v14  ;;  %v2053_v45 = vunpack.c.0.s8 %v2052_v35 }
 0x1f2   : > { %v2524_v18 = vpack.c.bf16 %v2000_v10, %v1999_v9  ;;  %v2080_v21 = vmul.f32 %v2000_v10, %v2000_v10  ;;  %v2041_v24 = vadd.f32 %v2040_v17, %v2000_v10  ;;  %v2033_v25 = vrot.slane %v2032_v19, 4 }
 0x1f3   : > { %v2083_v27 = vadd.f32 %v2082_v22, %v2079_v20  ;;  %v2056_v54 = vsub.s32 %v2053_v45, %v2055_v41 }
 0x1f4   : > { %2028 = vst [vmem:[%s3339_s15 + $0x18] sm:$0xff] %v2524_v18  ;;  %v2042_v26 = vrot.slane %v2041_v24, 4  ;;  %v2092_v28 = vadd.f32 %v2091_v23, %v2080_v21  ;;  %v2034_v29 = vadd.f32 %v2033_v25, %v2032_v19 }
 0x1f5   : > { %v2084_v32 = vrot.slane %v2083_v27, 4 }
 0x1f6   : > { %v2043_v31 = vadd.f32 %v2042_v26, %v2041_v24  ;;  %v2093_v33 = vrot.slane %v2092_v28, 4  ;;  %v2035_v36 = vrot.slane %v2034_v29, 2 }
 0x1f7   : > { %v2085_v38 = vadd.f32 %v2084_v32, %v2083_v27 }
 0x1f8   : > { %v2044_v37 = vrot.slane %v2043_v31, 2  ;;  %v2094_v39 = vadd.f32 %v2093_v33, %v2092_v28  ;;  %v2036_v40 = vadd.f32 %v2035_v36, %v2034_v29 }
 0x1f9   : > { %v2086_v43 = vrot.slane %v2085_v38, 2 }
 0x1fa   : > { %v2045_v42 = vadd.f32 %v2044_v37, %v2043_v31  ;;  %v2095_v44 = vrot.slane %v2094_v39, 2  ;;  %v2037_v46 = vrot.slane %v2036_v40, 1 }
 0x1fb   : > { %v2087_v48 = vadd.f32 %v2086_v43, %v2085_v38 }
 0x1fc   : > { %v2046_v47 = vrot.slane %v2045_v42, 1  ;;  %v2096_v49 = vadd.f32 %v2095_v44, %v2094_v39  ;;  %v2038_v50 = vadd.f32 %v2037_v46, %v2036_v40 }
 0x1fd   : > { %v2088_v52 = vrot.slane %v2087_v48, 1 }
 0x1fe   : > { %v2047_v51 = vadd.f32 %v2046_v47, %v2045_v42  ;;  %v2097_v53 = vrot.slane %v2096_v49, 1 }
 0x1ff   : > { %v2089_v56 = vadd.f32 %v2088_v52, %v2087_v48 }
 0x200   : > { %v2050_v55 = vcombine.low %v2038_v50, %v2047_v51  ;;  %v2098_v57 = vadd.f32 %v2097_v53, %v2096_v49 }
 0x202   : > { %v2057_v58 = vrot.slane %v2050_v55, %v2056_v54  ;;  %v2101_v59 = vcombine.low %v2089_v56, %v2098_v57 }
 0x204   : > { %v2064_v61 = vrot.slane %v2057_v58, %v2056_v54  ;;  %v2108_v62 = vrot.slane %v2101_v59, %v2056_v54 }
 0x206   : > { %v2066_v0 = vadd.f32 %v2064_v61, %v2029_v60  ;;  %v2115_v1 = vrot.slane %v2108_v62, %v2056_v54 }
 0x208   : > { %2071 = vst.msk [vmem:[#allocation3] sm:$0x3] %vm2069_vm1, %v2066_v0  ;;  %v2117_v2 = vadd.f32 %v2115_v1, %v2072_v63 }
 0x20a   : > { %2118 = vst.msk [vmem:[#allocation4] sm:$0x3] %vm2069_vm1, %v2117_v2 }
 0x20b PF: > { %2122 = sbr.rel (!%p1989_p6) target bundleno = 531 (0x213), region = 105  ;;  %v2124_v4 = vlaneseq (%p1989_p6) }
 0x20d   : > { %vm2126_vm2 = vcmp.lt.s32.totalorder (%p1989_p6), %v2124_v4, 256 }
 0x20f   : > { %v2123_v3 = vld [vmem:[#allocation3] sm:$0x3] (%p1989_p6) }
 0x210   : > { %2128 = vst.msk [vmem:[%s859_s6] sm:$0x3] %vm2126_vm2, %v2123_v3 }
 0x211   : > { %v2129_v5 = vld [vmem:[#allocation4] sm:$0x3] }
 0x212   : > { %2130 = vst.msk [vmem:[%s864_s19] sm:$0x3] %vm2126_vm2, %v2129_v5 }
 0x213 PF: > { %2145 = sbr.rel (!%p3020_p12) target bundleno = 536 (0x218), region = 109  ;;  %s2526_s21 = sshll.u32 (%p3020_p12), %s2884_s22, 3  ;;  %v2186_v6 = vld [vmem:[%s3339_s15] sm:$0xff] (%p3020_p12)  ;;  %v2188_v7 = vld [vmem:[%s3339_s15 + $0x8] sm:$0xff] (%p3020_p12)  ;;  %v2190_v8 = vld [vmem:[%s3339_s15 + $0x10] sm:$0xff] (%p3020_p12) }
 0x214   : > { %s2151_s8 = scalar_lea.vmem (%p3020_p12), %s3567_s2, %s2526_s21  ;;  %v2192_v9 = vld [vmem:[%s3339_s15 + $0x18] sm:$0xff] (%p3020_p12) }
 0x215   : > { %2187 = vst [vmem:[%s2151_s8] sm:$0xff] (%p3020_p12), %v2186_v6  ;;  %2189 = vst [vmem:[%s2151_s8 + $0x10] sm:$0xff] (%p3020_p12), %v2188_v7 }
 0x216   : > { %2191 = vst [vmem:[%s2151_s8 + $0x20] sm:$0xff] (%p3020_p12), %v2190_v8  ;;  %2193 = vst [vmem:[%s2151_s8 + $0x30] sm:$0xff] (%p3020_p12), %v2192_v9 }
 0x218 PF: > { %s15_s25 = sadd.s32 1, %s2896_s25   ;;  %s3579_s14 = sld [smem:[#allocation8_spill]] }
 0x219   : > { %p12_p8 = scmp.ge.s32.totalorder %s15_s25, 10   ;;  %s3580_s5 = sld [smem:[#allocation9_spill]] }
 0x21a   : > { %s3581_s15 = smov %s2860_s16  ;;  %s3582_s16 = smov %s3018_s13 }
 0x21b   : > { %s3583_s17 = smov %s2868_s18  ;;  %s3584_s18 = smov %s3015_s12 }
 0x21c   : > { %s3585_s19 = smov %s2876_s20  ;;  %s3586_s20 = smov %s3001_s7 }
 0x21d   : > { %s3587_s21 = smov %s2888_s23  ;;  %s3588_s22 = smov %s2892_s24 }
 0x21e   : > { %s3589_s23 = smov %s3579_s14  ;;  %14 = sbr.rel (!%p12_p8) target bundleno = 8 (0x8), region = 210 }
 0x21f   : > { %s3590_s24 = smov %s3580_s5 }

// kernel: critic_forward.13
= control target key start
LH: loop header
LB: loop body
LE: loop exit
PB: predicated region body
PF: predicated region fallthrough
CT: control target
= control target key end

     0   :  { %v40_v0 = vlaneseq  ;;  %s365_s0 = inlined_call_operand.vmem [shape: bf16[32,512], index: 0, kind: input, shape index: {}]   ;;  %s366_s1 = inlined_call_operand.vmem [shape: f32[1,512], index: 1, kind: input, shape index: {}]   ;;  %s367_s2 = inlined_call_operand.vmem [shape: f32[1,512], index: 2, kind: input, shape index: {}]   ;;  %s368_s3 = inlined_call_operand.vmem [shape: bf16[32,512], index: 3, kind: output, shape index: {}]  }
   0x1   :  { %v14_v1 = vld [vmem:[%s365_s0] sm:$0xff]  ;;  %v15_v5 = vld [vmem:[%s365_s0 + $0x8] sm:$0xff]  ;;  %v16_v6 = vld [vmem:[%s365_s0 + $0x10] sm:$0xff] }
   0x2   :  { %v22_v2 = vunpack.c.l.bf16 %v14_v1  ;;  %v23_v3 = vunpack.c.h.bf16 %v14_v1  ;;  %v41_v4 = vshrl.u32 %v40_v0, 7  ;;  %v17_v7 = vld [vmem:[%s365_s0 + $0x18] sm:$0xff]  ;;  %v38_v8 = vld [vmem:[%s366_s1] sm:$0xf]  ;;  %v24_v10 = vunpack.c.l.bf16 %v15_v5  ;;  %v19_v57 = vld [vmem:[%s365_s0 + $0x28] sm:$0xff] }
   0x3   :  { %v76_v9 = vld [vmem:[%s367_s2] sm:$0xf]  ;;  %v25_v11 = vunpack.c.h.bf16 %v15_v5  ;;  %v26_v12 = vunpack.c.l.bf16 %v16_v6  ;;  %v27_v13 = vunpack.c.h.bf16 %v16_v6  ;;  %v28_v19 = vunpack.c.l.bf16 %v17_v7 }
   0x4   :  { %v279_v14 = vld [vmem:[%s365_s0 + $0x20] sm:$0xff]  ;;  %v42_v15 = vsub.s32 0, %v41_v4  ;;  %v46_v16 = vsub.s32 1, %v41_v4  ;;  %v50_v17 = vsub.s32 2, %v41_v4  ;;  %v54_v18 = vsub.s32 3, %v41_v4  ;;  %v20_v4 = vld [vmem:[%s365_s0 + $0x30] sm:$0xff] }
   0x5   :  { %v29_v20 = vunpack.c.h.bf16 %v17_v7  ;;  %v30_v21 = vunpack.c.l.bf16 %v279_v14  ;;  %v31_v22 = vunpack.c.h.bf16 %v279_v14 }
   0x6   :  { %v283_v23 = vrot.slane %v38_v8, %v42_v15  ;;  %v285_v24 = vrot.slane %v38_v8, %v46_v16  ;;  %v287_v25 = vrot.slane %v76_v9, %v42_v15  ;;  %v289_v26 = vrot.slane %v76_v9, %v46_v16 }
   0x7   :  { %v291_v27 = vrot.slane %v38_v8, %v50_v17  ;;  %v293_v28 = vrot.slane %v38_v8, %v54_v18  ;;  %v295_v29 = vrot.slane %v76_v9, %v50_v17  ;;  %v297_v30 = vrot.slane %v76_v9, %v54_v18 }
   0x8   :  { %v60_v31 = vmul.f32 %v283_v23, %v22_v2  ;;  %v61_v32 = vmul.f32 %v285_v24, %v23_v3  ;;  %v64_v33 = vmul.f32 %v283_v23, %v26_v12  ;;  %v65_v34 = vmul.f32 %v285_v24, %v27_v13  ;;  %v21_v13 = vld [vmem:[%s365_s0 + $0x38] sm:$0xff] }
   0x9   :  { %v62_v35 = vmul.f32 %v291_v27, %v24_v10  ;;  %v63_v36 = vmul.f32 %v293_v28, %v25_v11  ;;  %v66_v37 = vmul.f32 %v291_v27, %v28_v19  ;;  %v67_v38 = vmul.f32 %v293_v28, %v29_v20 }
   0xa   :  { %v98_v39 = vadd.f32 %v287_v25, %v60_v31  ;;  %v99_v40 = vadd.f32 %v289_v26, %v61_v32  ;;  %v102_v41 = vadd.f32 %v287_v25, %v64_v33  ;;  %v103_v42 = vadd.f32 %v289_v26, %v65_v34 }
   0xb   :  { %v100_v43 = vadd.f32 %v295_v29, %v62_v35  ;;  %v101_v44 = vadd.f32 %v297_v30, %v63_v36  ;;  %v104_v45 = vadd.f32 %v295_v29, %v66_v37  ;;  %v105_v46 = vadd.f32 %v297_v30, %v67_v38 }
   0xc   :  { %vm114_vm0 = vcmp.ge.f32.partialorder %v98_v39, 0.0  ;;  %vm115_vm1 = vcmp.ge.f32.partialorder %v99_v40, 0.0  ;;  %v130_v47 = vmul.f32 0.2, %v98_v39  ;;  %v131_v48 = vmul.f32 0.2, %v99_v40 }
   0xd   :  { %vm116_vm2 = vcmp.ge.f32.partialorder %v100_v43, 0.0  ;;  %vm117_vm3 = vcmp.ge.f32.partialorder %v101_v44, 0.0  ;;  %v132_v49 = vmul.f32 0.2, %v100_v43  ;;  %v133_v50 = vmul.f32 0.2, %v101_v44 }
   0xe   :  { %v146_v51 = vsel %vm114_vm0, %v98_v39, %v130_v47  ;;  %v147_v52 = vsel %vm115_vm1, %v99_v40, %v131_v48  ;;  %vm118_vm4 = vcmp.ge.f32.partialorder %v102_v41, 0.0  ;;  %vm119_vm5 = vcmp.ge.f32.partialorder %v103_v42, 0.0 }
   0xf   :  { %v230_v53 = vpack.c.bf16 %v147_v52, %v146_v51  ;;  %v148_v54 = vsel %vm116_vm2, %v100_v43, %v132_v49  ;;  %v149_v55 = vsel %vm117_vm3, %v101_v44, %v133_v50  ;;  %v134_v56 = vmul.f32 0.2, %v102_v41 }
  0x10   :  { %v231_v58 = vpack.c.bf16 %v149_v55, %v148_v54  ;;  %v135_v59 = vmul.f32 0.2, %v103_v42  ;;  %vm120_vm6 = vcmp.ge.f32.partialorder %v104_v45, 0.0  ;;  %vm121_vm7 = vcmp.ge.f32.partialorder %v105_v46, 0.0 }
  0x11   :  { %210 = vst [vmem:[%s368_s3] sm:$0xff] %v230_v53  ;;  %v150_v60 = vsel %vm118_vm4, %v102_v41, %v134_v56  ;;  %v136_v61 = vmul.f32 0.2, %v104_v45  ;;  %v137_v62 = vmul.f32 0.2, %v105_v46  ;;  %v68_v63 = vmul.f32 %v283_v23, %v30_v21 }
  0x12   :  { %211 = vst [vmem:[%s368_s3 + $0x8] sm:$0xff] %v231_v58  ;;  %v151_v0 = vsel %vm119_vm5, %v103_v42, %v135_v59  ;;  %v69_v1 = vmul.f32 %v285_v24, %v31_v22  ;;  %v32_v2 = vunpack.c.l.bf16 %v19_v57  ;;  %v33_v3 = vunpack.c.h.bf16 %v19_v57 }
  0x13   :  { %v232_v5 = vpack.c.bf16 %v151_v0, %v150_v60  ;;  %v152_v6 = vsel %vm120_vm6, %v104_v45, %v136_v61  ;;  %v153_v7 = vsel %vm121_vm7, %v105_v46, %v137_v62  ;;  %v106_v8 = vadd.f32 %v287_v25, %v68_v63 }
  0x14   :  { %v233_v9 = vpack.c.bf16 %v153_v7, %v152_v6  ;;  %v107_v10 = vadd.f32 %v289_v26, %v69_v1  ;;  %v70_v11 = vmul.f32 %v291_v27, %v32_v2  ;;  %v71_v12 = vmul.f32 %v293_v28, %v33_v3 }
  0x15   :  { %212 = vst [vmem:[%s368_s3 + $0x10] sm:$0xff] %v232_v5  ;;  %vm122_vm8 = vcmp.ge.f32.partialorder %v106_v8, 0.0  ;;  %v138_v14 = vmul.f32 0.2, %v106_v8  ;;  %v34_v15 = vunpack.c.l.bf16 %v20_v4  ;;  %v35_v16 = vunpack.c.h.bf16 %v20_v4 }
  0x16   :  { %213 = vst [vmem:[%s368_s3 + $0x18] sm:$0xff] %v233_v9  ;;  %vm123_vm9 = vcmp.ge.f32.partialorder %v107_v10, 0.0  ;;  %v139_v17 = vmul.f32 0.2, %v107_v10  ;;  %v108_v18 = vadd.f32 %v295_v29, %v70_v11  ;;  %v109_v19 = vadd.f32 %v297_v30, %v71_v12 }
  0x17   :  { %v154_v20 = vsel %vm122_vm8, %v106_v8, %v138_v14  ;;  %v72_v21 = vmul.f32 %v283_v23, %v34_v15  ;;  %v73_v22 = vmul.f32 %v285_v24, %v35_v16  ;;  %v36_v31 = vunpack.c.l.bf16 %v21_v13 }
  0x18   :  { %v155_v32 = vsel %vm123_vm9, %v107_v10, %v139_v17  ;;  %vm124_vm10 = vcmp.ge.f32.partialorder %v108_v18, 0.0  ;;  %vm125_vm11 = vcmp.ge.f32.partialorder %v109_v19, 0.0  ;;  %v140_v33 = vmul.f32 0.2, %v108_v18 }
  0x19   :  { %v234_v34 = vpack.c.bf16 %v155_v32, %v154_v20  ;;  %v141_v35 = vmul.f32 0.2, %v109_v19  ;;  %v110_v36 = vadd.f32 %v287_v25, %v72_v21  ;;  %v111_v37 = vadd.f32 %v289_v26, %v73_v22 }
  0x1a   :  { %v156_v38 = vsel %vm124_vm10, %v108_v18, %v140_v33  ;;  %v37_v39 = vunpack.c.h.bf16 %v21_v13  ;;  %v74_v40 = vmul.f32 %v291_v27, %v36_v31 }
  0x1b   :  { %214 = vst [vmem:[%s368_s3 + $0x20] sm:$0xff] %v234_v34  ;;  %v157_v23 = vsel %vm125_vm11, %v109_v19, %v141_v35  ;;  %vm126_vm12 = vcmp.ge.f32.partialorder %v110_v36, 0.0  ;;  %vm127_vm13 = vcmp.ge.f32.partialorder %v111_v37, 0.0  ;;  %v142_v24 = vmul.f32 0.2, %v110_v36 }
  0x1c   :  { %v235_v41 = vpack.c.bf16 %v157_v23, %v156_v38  ;;  %v143_v42 = vmul.f32 0.2, %v111_v37  ;;  %v75_v43 = vmul.f32 %v293_v28, %v37_v39  ;;  %v112_v25 = vadd.f32 %v295_v29, %v74_v40 }
  0x1d   :  { %v158_v44 = vsel %vm126_vm12, %v110_v36, %v142_v24 }
  0x1e   :  { %215 = vst [vmem:[%s368_s3 + $0x28] sm:$0xff] %v235_v41  ;;  %v159_v26 = vsel %vm127_vm13, %v111_v37, %v143_v42  ;;  %v113_v27 = vadd.f32 %v297_v30, %v75_v43  ;;  %vm128_vm14 = vcmp.ge.f32.partialorder %v112_v25, 0.0  ;;  %v144_v45 = vmul.f32 0.2, %v112_v25 }
  0x1f   :  { %v236_v46 = vpack.c.bf16 %v159_v26, %v158_v44 }
  0x20   :  { %vm129_vm15 = vcmp.ge.f32.partialorder %v113_v27, 0.0  ;;  %v145_v47 = vmul.f32 0.2, %v113_v27  ;;  %v160_v48 = vsel %vm128_vm14, %v112_v25, %v144_v45 }
  0x21   :  { %216 = vst [vmem:[%s368_s3 + $0x30] sm:$0xff] %v236_v46 }
  0x22   :  { %v161_v28 = vsel %vm129_vm15, %v113_v27, %v145_v47 }
  0x23   :  { %v237_v29 = vpack.c.bf16 %v161_v28, %v160_v48 }
  0x25   :  { %217 = vst [vmem:[%s368_s3 + $0x38] sm:$0xff] %v237_v29 }

// kernel: critic_forward.14
= control target key start
LH: loop header
LB: loop body
LE: loop exit
PB: predicated region body
PF: predicated region fallthrough
CT: control target
= control target key end

     0   :  { %s2601_s15 = smov 0   ;;  %s2603_s16 = smov 0   ;;  %s3133_s0 = inlined_call_operand.vmem [shape: bf16[8,8192], index: 0, kind: input, shape index: {}]   ;;  %s3134_s1 = inlined_call_operand.vmem [shape: bf16[8192,1024], index: 1, kind: input, shape index: {}]   ;;  %s3135_s2 = inlined_call_operand.vmem [shape: bf16[8,1024], index: 2, kind: output, shape index: {0}]   ;;  %s3136_s3 = inlined_call_operand.vmem [shape: f32[1,1024], index: 3, kind: output, shape index: {1}]   ;;  %s3137_s4 = inlined_call_operand.vmem [shape: f32[1,1024], index: 4, kind: output, shape index: {2}]  }
   0x1   :  { %s2605_s17 = smov 0   ;;  %s2607_s18 = smov 0  }
   0x2   :  { %s2609_s19 = smov 0   ;;  %s2611_s20 = smov 0  }
   0x3   :  { %s2613_s21 = smov 0  }
   0x4 LB: > { %s27_s22 = sadd.s32 1, %s2563_s19  ;;  %s34_s23 = sadd.s32 1, %s2567_s20  ;;  %s2571_s21 = sphi %s2613_s21, %s15_s21   ;;  %s2567_s20 = sphi %s2611_s20, %s3143_s20   ;;  %s2563_s19 = sphi %s2609_s19, %s3142_s19   ;;  %s2559_s18 = sphi %s2607_s18, %s3141_s18   ;;  %s2555_s17 = sphi %s2605_s17, %s3140_s17   ;;  %s2551_s16 = sphi %s2603_s16, %s3139_s16   ;;  %s2547_s15 = sphi %s2601_s15, %s3138_s15  }
   0x5   : > { %p28_p0 = scmp.ge.s32.totalorder %s27_s22, 8  ;;  %p78_p1 = scmp.ne.s32.totalorder %s2551_s16, %s2547_s15 }
   0x6   : > { %p79_p2 = scmp.eq.s32.totalorder %s2571_s21, 0  ;;  %s71_s27 = sadd.s32 1, %s2551_s16 }
   0x7   : > { %s3145_s22 = smov (%p28_p0, %s27_s22), 0  ;;  %s3147_s23 = smov (!%p28_p0, %s34_s23), %s2567_s20 }
   0x8   : > { %p80_p3 = por %p79_p2, %p78_p1  ;;  %p36_p4 = scmp.ge.s32.totalorder %s3147_s23, 4 }
   0x9   : > { %s66_s24 = ssub.s32 %s2563_s19, %s3145_s22  ;;  %p2097_p6 = scmp.ge.s32.totalorder %s2571_s21, 32 }
   0xa   : > { %s3149_s23 = smov (%p36_p4, %s3147_s23), 0 }
   0xb   : > { %s67_s25 = ssub.s32 %s2567_s20, %s3149_s23  ;;  %184 = sbr.rel (%p2097_p6) target bundleno = 151 (0x97), region = 16 }
   0xc   : > { %s68_s26 = sor.u32 %s67_s25, %s66_s24 }
   0xd   : > { %p69_p5 = scmp.eq.s32.totalorder %s68_s26, 0 }
   0xf   : > { %s2652_s28 = scalar_select %p69_p5, %s2551_s16, %s71_s27  }
  0x10   : > { %200 = sbr.rel (!%p80_p3) target bundleno = 151 (0x97), region = 24  ;;  %s202_s29 = sand.u32 (%p80_p3), 1, %s2551_s16  }
  0x11   : > { %s2100_s30 = sshll.u32 (%p80_p3), %s2567_s20, 1  ;;  %s2098_s5 = sshll.u32 (%p80_p3), %s202_s29, 10 }
  0x12   : > { %s2254_s6 = sshll.u32 (%p80_p3), %s2563_s19, 10  ;;  %s2666_s12 = scalar_lea.vmem (%p80_p3), [#allocation5], %s2098_s5 }
  0x13   : > { %s208_s7 = sadd.s32 (%p80_p3), %s2254_s6, %s2100_s30 }
  0x14   : > { %s2102_s8 = sshll.u32 (%p80_p3), %s208_s7, 2 }
  0x15   : > { %s2661_s11 = scalar_lea.vmem %s3134_s1, %s2102_s8 }
  0x16   : > { %v493_v0 = vld [vmem:[%s2661_s11] sm:$0xff] }
  0x17   : > { %v495_v1 = vld [vmem:[%s2661_s11 + $0x20] sm:$0xff]  ;;  %494 = vst [vmem:[%s2666_s12] sm:$0xff] %v493_v0 }
  0x18   : > { %v497_v2 = vld [vmem:[%s2661_s11 + $0x40] sm:$0xff]  ;;  %496 = vst [vmem:[%s2666_s12 + $0x8] sm:$0xff] %v495_v1 }
  0x19   : > { %498 = vst [vmem:[%s2666_s12 + $0x10] sm:$0xff] %v497_v2  ;;  %v499_v3 = vld [vmem:[%s2661_s11 + $0x60] sm:$0xff] }
  0x1a   : > { %v501_v4 = vld [vmem:[%s2661_s11 + $0x80] sm:$0xff]  ;;  %500 = vst [vmem:[%s2666_s12 + $0x18] sm:$0xff] %v499_v3 }
  0x1b   : > { %v503_v5 = vld [vmem:[%s2661_s11 + $0xa0] sm:$0xff]  ;;  %502 = vst [vmem:[%s2666_s12 + $0x20] sm:$0xff] %v501_v4 }
  0x1c   : > { %504 = vst [vmem:[%s2666_s12 + $0x28] sm:$0xff] %v503_v5  ;;  %v505_v6 = vld [vmem:[%s2661_s11 + $0xc0] sm:$0xff] }
  0x1d   : > { %v507_v7 = vld [vmem:[%s2661_s11 + $0xe0] sm:$0xff]  ;;  %506 = vst [vmem:[%s2666_s12 + $0x30] sm:$0xff] %v505_v6 }
  0x1e   : > { %v509_v8 = vld [vmem:[%s2661_s11 + $0x100] sm:$0xff]  ;;  %508 = vst [vmem:[%s2666_s12 + $0x38] sm:$0xff] %v507_v7 }
  0x1f   : > { %510 = vst [vmem:[%s2666_s12 + $0x40] sm:$0xff] %v509_v8  ;;  %v511_v9 = vld [vmem:[%s2661_s11 + $0x120] sm:$0xff] }
  0x20   : > { %v513_v10 = vld [vmem:[%s2661_s11 + $0x140] sm:$0xff]  ;;  %512 = vst [vmem:[%s2666_s12 + $0x48] sm:$0xff] %v511_v9 }
  0x21   : > { %v515_v11 = vld [vmem:[%s2661_s11 + $0x160] sm:$0xff]  ;;  %514 = vst [vmem:[%s2666_s12 + $0x50] sm:$0xff] %v513_v10 }
  0x22   : > { %516 = vst [vmem:[%s2666_s12 + $0x58] sm:$0xff] %v515_v11  ;;  %v517_v12 = vld [vmem:[%s2661_s11 + $0x180] sm:$0xff] }
  0x23   : > { %v519_v13 = vld [vmem:[%s2661_s11 + $0x1a0] sm:$0xff]  ;;  %518 = vst [vmem:[%s2666_s12 + $0x60] sm:$0xff] %v517_v12 }
  0x24   : > { %v521_v14 = vld [vmem:[%s2661_s11 + $0x1c0] sm:$0xff]  ;;  %520 = vst [vmem:[%s2666_s12 + $0x68] sm:$0xff] %v519_v13 }
  0x25   : > { %522 = vst [vmem:[%s2666_s12 + $0x70] sm:$0xff] %v521_v14  ;;  %v523_v15 = vld [vmem:[%s2661_s11 + $0x1e0] sm:$0xff] }
  0x26   : > { %v525_v16 = vld [vmem:[%s2661_s11 + $0x200] sm:$0xff]  ;;  %524 = vst [vmem:[%s2666_s12 + $0x78] sm:$0xff] %v523_v15 }
  0x27   : > { %v527_v17 = vld [vmem:[%s2661_s11 + $0x220] sm:$0xff]  ;;  %526 = vst [vmem:[%s2666_s12 + $0x80] sm:$0xff] %v525_v16 }
  0x28   : > { %528 = vst [vmem:[%s2666_s12 + $0x88] sm:$0xff] %v527_v17  ;;  %v529_v18 = vld [vmem:[%s2661_s11 + $0x240] sm:$0xff] }
  0x29   : > { %v531_v19 = vld [vmem:[%s2661_s11 + $0x260] sm:$0xff]  ;;  %530 = vst [vmem:[%s2666_s12 + $0x90] sm:$0xff] %v529_v18 }
  0x2a   : > { %v533_v20 = vld [vmem:[%s2661_s11 + $0x280] sm:$0xff]  ;;  %532 = vst [vmem:[%s2666_s12 + $0x98] sm:$0xff] %v531_v19 }
  0x2b   : > { %534 = vst [vmem:[%s2666_s12 + $0xa0] sm:$0xff] %v533_v20  ;;  %v535_v21 = vld [vmem:[%s2661_s11 + $0x2a0] sm:$0xff] }
  0x2c   : > { %v537_v22 = vld [vmem:[%s2661_s11 + $0x2c0] sm:$0xff]  ;;  %536 = vst [vmem:[%s2666_s12 + $0xa8] sm:$0xff] %v535_v21 }
  0x2d   : > { %v539_v23 = vld [vmem:[%s2661_s11 + $0x2e0] sm:$0xff]  ;;  %538 = vst [vmem:[%s2666_s12 + $0xb0] sm:$0xff] %v537_v22 }
  0x2e   : > { %540 = vst [vmem:[%s2666_s12 + $0xb8] sm:$0xff] %v539_v23  ;;  %v541_v24 = vld [vmem:[%s2661_s11 + $0x300] sm:$0xff] }
  0x2f   : > { %v543_v25 = vld [vmem:[%s2661_s11 + $0x320] sm:$0xff]  ;;  %542 = vst [vmem:[%s2666_s12 + $0xc0] sm:$0xff] %v541_v24 }
  0x30   : > { %v545_v26 = vld [vmem:[%s2661_s11 + $0x340] sm:$0xff]  ;;  %544 = vst [vmem:[%s2666_s12 + $0xc8] sm:$0xff] %v543_v25 }
  0x31   : > { %546 = vst [vmem:[%s2666_s12 + $0xd0] sm:$0xff] %v545_v26  ;;  %v547_v27 = vld [vmem:[%s2661_s11 + $0x360] sm:$0xff] }
  0x32   : > { %v549_v28 = vld [vmem:[%s2661_s11 + $0x380] sm:$0xff]  ;;  %548 = vst [vmem:[%s2666_s12 + $0xd8] sm:$0xff] %v547_v27 }
  0x33   : > { %v551_v29 = vld [vmem:[%s2661_s11 + $0x3a0] sm:$0xff]  ;;  %550 = vst [vmem:[%s2666_s12 + $0xe0] sm:$0xff] %v549_v28 }
  0x34   : > { %552 = vst [vmem:[%s2666_s12 + $0xe8] sm:$0xff] %v551_v29  ;;  %v553_v30 = vld [vmem:[%s2661_s11 + $0x3c0] sm:$0xff] }
  0x35   : > { %v555_v31 = vld [vmem:[%s2661_s11 + $0x3e0] sm:$0xff]  ;;  %554 = vst [vmem:[%s2666_s12 + $0xf0] sm:$0xff] %v553_v30 }
  0x36   : > { %v557_v32 = vld [vmem:[%s2661_s11 + $0x400] sm:$0xff]  ;;  %556 = vst [vmem:[%s2666_s12 + $0xf8] sm:$0xff] %v555_v31 }
  0x37   : > { %558 = vst [vmem:[%s2666_s12 + $0x100] sm:$0xff] %v557_v32  ;;  %v559_v33 = vld [vmem:[%s2661_s11 + $0x420] sm:$0xff] }
  0x38   : > { %v561_v34 = vld [vmem:[%s2661_s11 + $0x440] sm:$0xff]  ;;  %560 = vst [vmem:[%s2666_s12 + $0x108] sm:$0xff] %v559_v33 }
  0x39   : > { %v563_v35 = vld [vmem:[%s2661_s11 + $0x460] sm:$0xff]  ;;  %562 = vst [vmem:[%s2666_s12 + $0x110] sm:$0xff] %v561_v34 }
  0x3a   : > { %564 = vst [vmem:[%s2666_s12 + $0x118] sm:$0xff] %v563_v35  ;;  %v565_v36 = vld [vmem:[%s2661_s11 + $0x480] sm:$0xff] }
  0x3b   : > { %v567_v37 = vld [vmem:[%s2661_s11 + $0x4a0] sm:$0xff]  ;;  %566 = vst [vmem:[%s2666_s12 + $0x120] sm:$0xff] %v565_v36 }
  0x3c   : > { %v569_v38 = vld [vmem:[%s2661_s11 + $0x4c0] sm:$0xff]  ;;  %568 = vst [vmem:[%s2666_s12 + $0x128] sm:$0xff] %v567_v37 }
  0x3d   : > { %570 = vst [vmem:[%s2666_s12 + $0x130] sm:$0xff] %v569_v38  ;;  %v571_v39 = vld [vmem:[%s2661_s11 + $0x4e0] sm:$0xff] }
  0x3e   : > { %v573_v40 = vld [vmem:[%s2661_s11 + $0x500] sm:$0xff]  ;;  %572 = vst [vmem:[%s2666_s12 + $0x138] sm:$0xff] %v571_v39 }
  0x3f   : > { %v575_v41 = vld [vmem:[%s2661_s11 + $0x520] sm:$0xff]  ;;  %574 = vst [vmem:[%s2666_s12 + $0x140] sm:$0xff] %v573_v40 }
  0x40   : > { %576 = vst [vmem:[%s2666_s12 + $0x148] sm:$0xff] %v575_v41  ;;  %v577_v42 = vld [vmem:[%s2661_s11 + $0x540] sm:$0xff] }
  0x41   : > { %v579_v43 = vld [vmem:[%s2661_s11 + $0x560] sm:$0xff]  ;;  %578 = vst [vmem:[%s2666_s12 + $0x150] sm:$0xff] %v577_v42 }
  0x42   : > { %v581_v44 = vld [vmem:[%s2661_s11 + $0x580] sm:$0xff]  ;;  %580 = vst [vmem:[%s2666_s12 + $0x158] sm:$0xff] %v579_v43 }
  0x43   : > { %582 = vst [vmem:[%s2666_s12 + $0x160] sm:$0xff] %v581_v44  ;;  %v583_v45 = vld [vmem:[%s2661_s11 + $0x5a0] sm:$0xff] }
  0x44   : > { %v585_v46 = vld [vmem:[%s2661_s11 + $0x5c0] sm:$0xff]  ;;  %584 = vst [vmem:[%s2666_s12 + $0x168] sm:$0xff] %v583_v45 }
  0x45   : > { %v587_v47 = vld [vmem:[%s2661_s11 + $0x5e0] sm:$0xff]  ;;  %586 = vst [vmem:[%s2666_s12 + $0x170] sm:$0xff] %v585_v46 }
  0x46   : > { %588 = vst [vmem:[%s2666_s12 + $0x178] sm:$0xff] %v587_v47  ;;  %v589_v48 = vld [vmem:[%s2661_s11 + $0x600] sm:$0xff] }
  0x47   : > { %v591_v49 = vld [vmem:[%s2661_s11 + $0x620] sm:$0xff]  ;;  %590 = vst [vmem:[%s2666_s12 + $0x180] sm:$0xff] %v589_v48 }
  0x48   : > { %v593_v50 = vld [vmem:[%s2661_s11 + $0x640] sm:$0xff]  ;;  %592 = vst [vmem:[%s2666_s12 + $0x188] sm:$0xff] %v591_v49 }
  0x49   : > { %594 = vst [vmem:[%s2666_s12 + $0x190] sm:$0xff] %v593_v50  ;;  %v595_v51 = vld [vmem:[%s2661_s11 + $0x660] sm:$0xff] }
  0x4a   : > { %v597_v52 = vld [vmem:[%s2661_s11 + $0x680] sm:$0xff]  ;;  %596 = vst [vmem:[%s2666_s12 + $0x198] sm:$0xff] %v595_v51 }
  0x4b   : > { %v599_v53 = vld [vmem:[%s2661_s11 + $0x6a0] sm:$0xff]  ;;  %598 = vst [vmem:[%s2666_s12 + $0x1a0] sm:$0xff] %v597_v52 }
  0x4c   : > { %600 = vst [vmem:[%s2666_s12 + $0x1a8] sm:$0xff] %v599_v53  ;;  %v601_v54 = vld [vmem:[%s2661_s11 + $0x6c0] sm:$0xff] }
  0x4d   : > { %v603_v55 = vld [vmem:[%s2661_s11 + $0x6e0] sm:$0xff]  ;;  %602 = vst [vmem:[%s2666_s12 + $0x1b0] sm:$0xff] %v601_v54 }
  0x4e   : > { %v605_v56 = vld [vmem:[%s2661_s11 + $0x700] sm:$0xff]  ;;  %604 = vst [vmem:[%s2666_s12 + $0x1b8] sm:$0xff] %v603_v55 }
  0x4f   : > { %606 = vst [vmem:[%s2666_s12 + $0x1c0] sm:$0xff] %v605_v56  ;;  %v607_v57 = vld [vmem:[%s2661_s11 + $0x720] sm:$0xff] }
  0x50   : > { %v609_v58 = vld [vmem:[%s2661_s11 + $0x740] sm:$0xff]  ;;  %608 = vst [vmem:[%s2666_s12 + $0x1c8] sm:$0xff] %v607_v57 }
  0x51   : > { %v611_v59 = vld [vmem:[%s2661_s11 + $0x760] sm:$0xff]  ;;  %610 = vst [vmem:[%s2666_s12 + $0x1d0] sm:$0xff] %v609_v58 }
  0x52   : > { %612 = vst [vmem:[%s2666_s12 + $0x1d8] sm:$0xff] %v611_v59  ;;  %v613_v60 = vld [vmem:[%s2661_s11 + $0x780] sm:$0xff] }
  0x53   : > { %v615_v61 = vld [vmem:[%s2661_s11 + $0x7a0] sm:$0xff]  ;;  %614 = vst [vmem:[%s2666_s12 + $0x1e0] sm:$0xff] %v613_v60 }
  0x54   : > { %v617_v62 = vld [vmem:[%s2661_s11 + $0x7c0] sm:$0xff]  ;;  %616 = vst [vmem:[%s2666_s12 + $0x1e8] sm:$0xff] %v615_v61 }
  0x55   : > { %618 = vst [vmem:[%s2666_s12 + $0x1f0] sm:$0xff] %v617_v62  ;;  %v619_v63 = vld [vmem:[%s2661_s11 + $0x7e0] sm:$0xff] }
  0x56   : > { %v621_v0 = vld [vmem:[%s2661_s11 + $0x800] sm:$0xff]  ;;  %620 = vst [vmem:[%s2666_s12 + $0x1f8] sm:$0xff] %v619_v63 }
  0x57   : > { %v623_v1 = vld [vmem:[%s2661_s11 + $0x820] sm:$0xff]  ;;  %622 = vst [vmem:[%s2666_s12 + $0x200] sm:$0xff] %v621_v0 }
  0x58   : > { %624 = vst [vmem:[%s2666_s12 + $0x208] sm:$0xff] %v623_v1  ;;  %v625_v2 = vld [vmem:[%s2661_s11 + $0x840] sm:$0xff] }
  0x59   : > { %v627_v3 = vld [vmem:[%s2661_s11 + $0x860] sm:$0xff]  ;;  %626 = vst [vmem:[%s2666_s12 + $0x210] sm:$0xff] %v625_v2 }
  0x5a   : > { %v629_v4 = vld [vmem:[%s2661_s11 + $0x880] sm:$0xff]  ;;  %628 = vst [vmem:[%s2666_s12 + $0x218] sm:$0xff] %v627_v3 }
  0x5b   : > { %630 = vst [vmem:[%s2666_s12 + $0x220] sm:$0xff] %v629_v4  ;;  %v631_v5 = vld [vmem:[%s2661_s11 + $0x8a0] sm:$0xff] }
  0x5c   : > { %v633_v6 = vld [vmem:[%s2661_s11 + $0x8c0] sm:$0xff]  ;;  %632 = vst [vmem:[%s2666_s12 + $0x228] sm:$0xff] %v631_v5 }
  0x5d   : > { %v635_v7 = vld [vmem:[%s2661_s11 + $0x8e0] sm:$0xff]  ;;  %634 = vst [vmem:[%s2666_s12 + $0x230] sm:$0xff] %v633_v6 }
  0x5e   : > { %636 = vst [vmem:[%s2666_s12 + $0x238] sm:$0xff] %v635_v7  ;;  %v637_v8 = vld [vmem:[%s2661_s11 + $0x900] sm:$0xff] }
  0x5f   : > { %v639_v9 = vld [vmem:[%s2661_s11 + $0x920] sm:$0xff]  ;;  %638 = vst [vmem:[%s2666_s12 + $0x240] sm:$0xff] %v637_v8 }
  0x60   : > { %v641_v10 = vld [vmem:[%s2661_s11 + $0x940] sm:$0xff]  ;;  %640 = vst [vmem:[%s2666_s12 + $0x248] sm:$0xff] %v639_v9 }
  0x61   : > { %642 = vst [vmem:[%s2666_s12 + $0x250] sm:$0xff] %v641_v10  ;;  %v643_v11 = vld [vmem:[%s2661_s11 + $0x960] sm:$0xff] }
  0x62   : > { %v645_v12 = vld [vmem:[%s2661_s11 + $0x980] sm:$0xff]  ;;  %644 = vst [vmem:[%s2666_s12 + $0x258] sm:$0xff] %v643_v11 }
  0x63   : > { %v647_v13 = vld [vmem:[%s2661_s11 + $0x9a0] sm:$0xff]  ;;  %646 = vst [vmem:[%s2666_s12 + $0x260] sm:$0xff] %v645_v12 }
  0x64   : > { %648 = vst [vmem:[%s2666_s12 + $0x268] sm:$0xff] %v647_v13  ;;  %v649_v14 = vld [vmem:[%s2661_s11 + $0x9c0] sm:$0xff] }
  0x65   : > { %v651_v15 = vld [vmem:[%s2661_s11 + $0x9e0] sm:$0xff]  ;;  %650 = vst [vmem:[%s2666_s12 + $0x270] sm:$0xff] %v649_v14 }
  0x66   : > { %v653_v16 = vld [vmem:[%s2661_s11 + $0xa00] sm:$0xff]  ;;  %652 = vst [vmem:[%s2666_s12 + $0x278] sm:$0xff] %v651_v15 }
  0x67   : > { %654 = vst [vmem:[%s2666_s12 + $0x280] sm:$0xff] %v653_v16  ;;  %v655_v17 = vld [vmem:[%s2661_s11 + $0xa20] sm:$0xff] }
  0x68   : > { %v657_v18 = vld [vmem:[%s2661_s11 + $0xa40] sm:$0xff]  ;;  %656 = vst [vmem:[%s2666_s12 + $0x288] sm:$0xff] %v655_v17 }
  0x69   : > { %v659_v19 = vld [vmem:[%s2661_s11 + $0xa60] sm:$0xff]  ;;  %658 = vst [vmem:[%s2666_s12 + $0x290] sm:$0xff] %v657_v18 }
  0x6a   : > { %660 = vst [vmem:[%s2666_s12 + $0x298] sm:$0xff] %v659_v19  ;;  %v661_v20 = vld [vmem:[%s2661_s11 + $0xa80] sm:$0xff] }
  0x6b   : > { %v663_v21 = vld [vmem:[%s2661_s11 + $0xaa0] sm:$0xff]  ;;  %662 = vst [vmem:[%s2666_s12 + $0x2a0] sm:$0xff] %v661_v20 }
  0x6c   : > { %v665_v22 = vld [vmem:[%s2661_s11 + $0xac0] sm:$0xff]  ;;  %664 = vst [vmem:[%s2666_s12 + $0x2a8] sm:$0xff] %v663_v21 }
  0x6d   : > { %666 = vst [vmem:[%s2666_s12 + $0x2b0] sm:$0xff] %v665_v22  ;;  %v667_v23 = vld [vmem:[%s2661_s11 + $0xae0] sm:$0xff] }
  0x6e   : > { %v669_v24 = vld [vmem:[%s2661_s11 + $0xb00] sm:$0xff]  ;;  %668 = vst [vmem:[%s2666_s12 + $0x2b8] sm:$0xff] %v667_v23 }
  0x6f   : > { %v671_v25 = vld [vmem:[%s2661_s11 + $0xb20] sm:$0xff]  ;;  %670 = vst [vmem:[%s2666_s12 + $0x2c0] sm:$0xff] %v669_v24 }
  0x70   : > { %672 = vst [vmem:[%s2666_s12 + $0x2c8] sm:$0xff] %v671_v25  ;;  %v673_v26 = vld [vmem:[%s2661_s11 + $0xb40] sm:$0xff] }
  0x71   : > { %v675_v27 = vld [vmem:[%s2661_s11 + $0xb60] sm:$0xff]  ;;  %674 = vst [vmem:[%s2666_s12 + $0x2d0] sm:$0xff] %v673_v26 }
  0x72   : > { %v677_v28 = vld [vmem:[%s2661_s11 + $0xb80] sm:$0xff]  ;;  %676 = vst [vmem:[%s2666_s12 + $0x2d8] sm:$0xff] %v675_v27 }
  0x73   : > { %678 = vst [vmem:[%s2666_s12 + $0x2e0] sm:$0xff] %v677_v28  ;;  %v679_v29 = vld [vmem:[%s2661_s11 + $0xba0] sm:$0xff] }
  0x74   : > { %v681_v30 = vld [vmem:[%s2661_s11 + $0xbc0] sm:$0xff]  ;;  %680 = vst [vmem:[%s2666_s12 + $0x2e8] sm:$0xff] %v679_v29 }
  0x75   : > { %v683_v31 = vld [vmem:[%s2661_s11 + $0xbe0] sm:$0xff]  ;;  %682 = vst [vmem:[%s2666_s12 + $0x2f0] sm:$0xff] %v681_v30 }
  0x76   : > { %684 = vst [vmem:[%s2666_s12 + $0x2f8] sm:$0xff] %v683_v31  ;;  %v685_v32 = vld [vmem:[%s2661_s11 + $0xc00] sm:$0xff] }
  0x77   : > { %v687_v33 = vld [vmem:[%s2661_s11 + $0xc20] sm:$0xff]  ;;  %686 = vst [vmem:[%s2666_s12 + $0x300] sm:$0xff] %v685_v32 }
  0x78   : > { %v689_v34 = vld [vmem:[%s2661_s11 + $0xc40] sm:$0xff]  ;;  %688 = vst [vmem:[%s2666_s12 + $0x308] sm:$0xff] %v687_v33 }
  0x79   : > { %690 = vst [vmem:[%s2666_s12 + $0x310] sm:$0xff] %v689_v34  ;;  %v691_v35 = vld [vmem:[%s2661_s11 + $0xc60] sm:$0xff] }
  0x7a   : > { %v693_v36 = vld [vmem:[%s2661_s11 + $0xc80] sm:$0xff]  ;;  %692 = vst [vmem:[%s2666_s12 + $0x318] sm:$0xff] %v691_v35 }
  0x7b   : > { %v695_v37 = vld [vmem:[%s2661_s11 + $0xca0] sm:$0xff]  ;;  %694 = vst [vmem:[%s2666_s12 + $0x320] sm:$0xff] %v693_v36 }
  0x7c   : > { %696 = vst [vmem:[%s2666_s12 + $0x328] sm:$0xff] %v695_v37  ;;  %v697_v38 = vld [vmem:[%s2661_s11 + $0xcc0] sm:$0xff] }
  0x7d   : > { %v699_v39 = vld [vmem:[%s2661_s11 + $0xce0] sm:$0xff]  ;;  %698 = vst [vmem:[%s2666_s12 + $0x330] sm:$0xff] %v697_v38 }
  0x7e   : > { %v701_v40 = vld [vmem:[%s2661_s11 + $0xd00] sm:$0xff]  ;;  %700 = vst [vmem:[%s2666_s12 + $0x338] sm:$0xff] %v699_v39 }
  0x7f   : > { %702 = vst [vmem:[%s2666_s12 + $0x340] sm:$0xff] %v701_v40  ;;  %v703_v41 = vld [vmem:[%s2661_s11 + $0xd20] sm:$0xff] }
  0x80   : > { %v705_v42 = vld [vmem:[%s2661_s11 + $0xd40] sm:$0xff]  ;;  %704 = vst [vmem:[%s2666_s12 + $0x348] sm:$0xff] %v703_v41 }
  0x81   : > { %v707_v43 = vld [vmem:[%s2661_s11 + $0xd60] sm:$0xff]  ;;  %706 = vst [vmem:[%s2666_s12 + $0x350] sm:$0xff] %v705_v42 }
  0x82   : > { %708 = vst [vmem:[%s2666_s12 + $0x358] sm:$0xff] %v707_v43  ;;  %v709_v44 = vld [vmem:[%s2661_s11 + $0xd80] sm:$0xff] }
  0x83   : > { %v711_v45 = vld [vmem:[%s2661_s11 + $0xda0] sm:$0xff]  ;;  %710 = vst [vmem:[%s2666_s12 + $0x360] sm:$0xff] %v709_v44 }
  0x84   : > { %v713_v46 = vld [vmem:[%s2661_s11 + $0xdc0] sm:$0xff]  ;;  %712 = vst [vmem:[%s2666_s12 + $0x368] sm:$0xff] %v711_v45 }
  0x85   : > { %714 = vst [vmem:[%s2666_s12 + $0x370] sm:$0xff] %v713_v46  ;;  %v715_v47 = vld [vmem:[%s2661_s11 + $0xde0] sm:$0xff] }
  0x86   : > { %v717_v48 = vld [vmem:[%s2661_s11 + $0xe00] sm:$0xff]  ;;  %716 = vst [vmem:[%s2666_s12 + $0x378] sm:$0xff] %v715_v47 }
  0x87   : > { %v719_v49 = vld [vmem:[%s2661_s11 + $0xe20] sm:$0xff]  ;;  %718 = vst [vmem:[%s2666_s12 + $0x380] sm:$0xff] %v717_v48 }
  0x88   : > { %720 = vst [vmem:[%s2666_s12 + $0x388] sm:$0xff] %v719_v49  ;;  %v721_v50 = vld [vmem:[%s2661_s11 + $0xe40] sm:$0xff] }
  0x89   : > { %v723_v51 = vld [vmem:[%s2661_s11 + $0xe60] sm:$0xff]  ;;  %722 = vst [vmem:[%s2666_s12 + $0x390] sm:$0xff] %v721_v50 }
  0x8a   : > { %v725_v52 = vld [vmem:[%s2661_s11 + $0xe80] sm:$0xff]  ;;  %724 = vst [vmem:[%s2666_s12 + $0x398] sm:$0xff] %v723_v51 }
  0x8b   : > { %726 = vst [vmem:[%s2666_s12 + $0x3a0] sm:$0xff] %v725_v52  ;;  %v727_v53 = vld [vmem:[%s2661_s11 + $0xea0] sm:$0xff] }
  0x8c   : > { %v729_v54 = vld [vmem:[%s2661_s11 + $0xec0] sm:$0xff]  ;;  %728 = vst [vmem:[%s2666_s12 + $0x3a8] sm:$0xff] %v727_v53 }
  0x8d   : > { %v731_v55 = vld [vmem:[%s2661_s11 + $0xee0] sm:$0xff]  ;;  %730 = vst [vmem:[%s2666_s12 + $0x3b0] sm:$0xff] %v729_v54 }
  0x8e   : > { %732 = vst [vmem:[%s2666_s12 + $0x3b8] sm:$0xff] %v731_v55  ;;  %v733_v56 = vld [vmem:[%s2661_s11 + $0xf00] sm:$0xff] }
  0x8f   : > { %v735_v57 = vld [vmem:[%s2661_s11 + $0xf20] sm:$0xff]  ;;  %734 = vst [vmem:[%s2666_s12 + $0x3c0] sm:$0xff] %v733_v56 }
  0x90   : > { %v737_v58 = vld [vmem:[%s2661_s11 + $0xf40] sm:$0xff]  ;;  %736 = vst [vmem:[%s2666_s12 + $0x3c8] sm:$0xff] %v735_v57 }
  0x91   : > { %738 = vst [vmem:[%s2666_s12 + $0x3d0] sm:$0xff] %v737_v58  ;;  %v739_v59 = vld [vmem:[%s2661_s11 + $0xf60] sm:$0xff] }
  0x92   : > { %v741_v60 = vld [vmem:[%s2661_s11 + $0xf80] sm:$0xff]  ;;  %740 = vst [vmem:[%s2666_s12 + $0x3d8] sm:$0xff] %v739_v59 }
  0x93   : > { %v743_v61 = vld [vmem:[%s2661_s11 + $0xfa0] sm:$0xff]  ;;  %742 = vst [vmem:[%s2666_s12 + $0x3e0] sm:$0xff] %v741_v60 }
  0x94   : > { %744 = vst [vmem:[%s2666_s12 + $0x3e8] sm:$0xff] %v743_v61  ;;  %v745_v62 = vld [vmem:[%s2661_s11 + $0xfc0] sm:$0xff] }
  0x95   : > { %v747_v63 = vld [vmem:[%s2661_s11 + $0xfe0] sm:$0xff]  ;;  %746 = vst [vmem:[%s2666_s12 + $0x3f0] sm:$0xff] %v745_v62 }
  0x96   : > { %748 = vst [vmem:[%s2666_s12 + $0x3f8] sm:$0xff] %v747_v63 }
  0x97 PF: > { %p2103_p7 = scmp.ge.s32.totalorder %s2571_s21, 1  ;;  %p753_p8 = scmp.lt.s32.totalorder %s2571_s21, 33 }
  0x99   : > { %p754_p9 = pnand %p2103_p7, %p753_p8 }
  0x9a   : > { %s760_s13 = sand.u32 (!%p754_p9), 1, %s2547_s15   ;;  %s2105_s14 = sshll.u32 (!%p754_p9), %s2555_s17, 3 }
  0x9b   : > { %757 = sbr.rel (%p754_p9) target bundleno = 545 (0x221), region = 62  ;;  %s2104_s24 = sshll.u32 (!%p754_p9), %s760_s13, 10 }
  0x9c   : > { %p809_p10 = scmp.lt.s32.totalorder (!%p754_p9), %s2105_s14, 63  ;;  %s2107_s25 = sshll.u32 (!%p754_p9), %s2559_s18, 1 }
  0x9d   : > { %p821_p11 = scmp.lt.s32.totalorder (!%p754_p9), %s2107_s25, 7  ;;  %p838_p12 = scmp.eq.s32.totalorder (!%p754_p9), %s2555_s17, 0 }
  0x9e   : > { %s2948_s13 = scalar_lea.vmem (!%p754_p9), [#allocation5], %s2104_s24  ;;  %p2111_p13 = scmp.ne.s32.totalorder (!%p754_p9), %s2555_s17, 0 }
  0xa0   : > { %s3151_s14 = smov (!%p809_p10, %s2105_s14), 63  ;;  %s3153_s25 = smov (!%p821_p11, %s2107_s25), 7 }
  0xa1   : > { %s2106_s26 = sshll.u32 %s3151_s14, 2  ;;  %s2108_s5 = sshll.u32 %s3153_s25, 2 }
  0xa2   : > { %s2930_s30 = scalar_lea.vmem %s3133_s0, %s2106_s26  ;;  %s831_s7 = scalar_lea.vmem %s3136_s3, %s3153_s25 }
  0xa3   : > { %s2942_s9 = scalar_lea.vmem %s3135_s2, %s2108_s5  ;;  %s836_s12 = scalar_lea.vmem %s3137_s4, %s3153_s25 }
  0xa4   : > { %841 = sbr.rel (%p2111_p13) target bundleno = 171 (0xab), region = 70 }
  0xa9   : > { %v2573_v0 = vmov 0.0  }
  0xaa   : > { %842 = vst [vmem:[#allocation2] sm:$0xff] %v2573_v0  ;;  %843 = vst [vmem:[#allocation2 + $0x8] sm:$0xff] %v2573_v0 }
  0xab PF: > { %848 = sbr.rel (!%p838_p12) target bundleno = 176 (0xb0), region = 74  ;;  %v849_v1 = vlaneseq (%p838_p12)  ;;  %v2574_v2 = vmov (%p838_p12), 0.0  }
  0xad   : > { %vm851_vm0 = vcmp.lt.s32.totalorder (%p838_p12), %v849_v1, 256 }
  0xae   : > { %853 = vst.msk [vmem:[#allocation3] sm:$0x3] (%p838_p12), %vm851_vm0, %v2574_v2  ;;  %854 = vst.msk [vmem:[#allocation4] sm:$0x3] (%p838_p12), %vm851_vm0, %v2574_v2 }
  0xb0 PF: > { %v2317_v3 = vld [vmem:[%s2948_s13 + $0x74] ss:$8 sps:$4 sm:$0xff]   ;;  %v2321_v5 = vld [vmem:[%s2948_s13 + $0x70] ss:$8 sps:$4 sm:$0xff]   ;;  %v2323_v7 = vld [vmem:[%s2948_s13 + $0x64] ss:$8 sps:$4 sm:$0xff]  }
  0xb1   : > { %v2319_v4 = vld [vmem:[%s2948_s13 + $0x174] ss:$8 sps:$4 sm:$0xff]   ;;  %1657 = vmatprep.subr.bf16.mxu0 %v2317_v3  ;;  %v2322_v6 = vld [vmem:[%s2948_s13 + $0x170] ss:$8 sps:$4 sm:$0xff]   ;;  %v2325_v8 = vld [vmem:[%s2948_s13 + $0x164] ss:$8 sps:$4 sm:$0xff]  }
  0xb2   : > { %1698 = vmatprep.subr.bf16.mxu1 %v2319_v4  ;;  %1658 = vmatpush1.bf16.msra.mxu0 %v2321_v5  ;;  %v2327_v9 = vld [vmem:[%s2948_s13 + $0x60] ss:$8 sps:$4 sm:$0xff]   ;;  %v2329_v11 = vld [vmem:[%s2948_s13 + $0x54] ss:$8 sps:$4 sm:$0xff]   ;;  %v2333_v13 = vld [vmem:[%s2948_s13 + $0x50] ss:$8 sps:$4 sm:$0xff]  }
  0xb3   : > { %1699 = vmatpush1.bf16.msra.mxu1 %v2322_v6  ;;  %1659 = vmatprep.subr.bf16.mxu0 %v2323_v7  ;;  %v2328_v10 = vld [vmem:[%s2948_s13 + $0x160] ss:$8 sps:$4 sm:$0xff]   ;;  %v2331_v12 = vld [vmem:[%s2948_s13 + $0x154] ss:$8 sps:$4 sm:$0xff]   ;;  %v2334_v14 = vld [vmem:[%s2948_s13 + $0x150] ss:$8 sps:$4 sm:$0xff]  }
  0xb4   : > { %1700 = vmatprep.subr.bf16.mxu1 %v2325_v8  ;;  %v2335_v15 = vld [vmem:[%s2948_s13 + $0x44] ss:$8 sps:$4 sm:$0xff]   ;;  %v2339_v17 = vld [vmem:[%s2948_s13 + $0x40] ss:$8 sps:$4 sm:$0xff]   ;;  %v2341_v19 = vld [vmem:[%s2948_s13 + $0x34] ss:$8 sps:$4 sm:$0xff]  }
  0xb5   : > { %v2337_v16 = vld [vmem:[%s2948_s13 + $0x144] ss:$8 sps:$4 sm:$0xff]   ;;  %v2340_v18 = vld [vmem:[%s2948_s13 + $0x140] ss:$8 sps:$4 sm:$0xff]   ;;  %v2343_v20 = vld [vmem:[%s2948_s13 + $0x134] ss:$8 sps:$4 sm:$0xff]  }
  0xb6   : > { %1660 = vmatpush1.bf16.msra.mxu0 %v2327_v9  ;;  %v2345_v21 = vld [vmem:[%s2948_s13 + $0x30] ss:$8 sps:$4 sm:$0xff]   ;;  %v2347_v23 = vld [vmem:[%s2948_s13 + $0x24] ss:$8 sps:$4 sm:$0xff]   ;;  %v2351_v25 = vld [vmem:[%s2948_s13 + $0x20] ss:$8 sps:$4 sm:$0xff]  }
  0xb7   : > { %1701 = vmatpush1.bf16.msra.mxu1 %v2328_v10  ;;  %1661 = vmatprep.subr.bf16.mxu0 %v2329_v11  ;;  %v2346_v22 = vld [vmem:[%s2948_s13 + $0x130] ss:$8 sps:$4 sm:$0xff]   ;;  %v2349_v24 = vld [vmem:[%s2948_s13 + $0x124] ss:$8 sps:$4 sm:$0xff]   ;;  %v2352_v26 = vld [vmem:[%s2948_s13 + $0x120] ss:$8 sps:$4 sm:$0xff]  }
  0xb8   : > { %1702 = vmatprep.subr.bf16.mxu1 %v2331_v12  ;;  %v2353_v27 = vld [vmem:[%s2948_s13 + $0x14] ss:$8 sps:$4 sm:$0xff]   ;;  %v2357_v29 = vld [vmem:[%s2948_s13 + $0x10] ss:$8 sps:$4 sm:$0xff]   ;;  %v2359_v31 = vld [vmem:[%s2948_s13 + $0x4] ss:$8 sps:$4 sm:$0xff]  }
  0xb9   : > { %v2355_v28 = vld [vmem:[%s2948_s13 + $0x114] ss:$8 sps:$4 sm:$0xff]   ;;  %v2358_v30 = vld [vmem:[%s2948_s13 + $0x110] ss:$8 sps:$4 sm:$0xff]   ;;  %v2361_v32 = vld [vmem:[%s2948_s13 + $0x104] ss:$8 sps:$4 sm:$0xff]  }
  0xba   : > { %1662 = vmatpush1.bf16.msra.mxu0 %v2333_v13  ;;  %v2363_v33 = vld [vmem:[%s2948_s13] ss:$8 sps:$4 sm:$0xff]   ;;  %v2365_v35 = vld [vmem:[%s2948_s13 + $0xf4] ss:$8 sps:$4 sm:$0xff]   ;;  %v2369_v37 = vld [vmem:[%s2948_s13 + $0xf0] ss:$8 sps:$4 sm:$0xff]  }
  0xbb   : > { %1703 = vmatpush1.bf16.msra.mxu1 %v2334_v14  ;;  %1663 = vmatprep.subr.bf16.mxu0 %v2335_v15  ;;  %v2364_v34 = vld [vmem:[%s2948_s13 + $0x100] ss:$8 sps:$4 sm:$0xff]   ;;  %v2367_v36 = vld [vmem:[%s2948_s13 + $0x1f4] ss:$8 sps:$4 sm:$0xff]   ;;  %v2370_v38 = vld [vmem:[%s2948_s13 + $0x1f0] ss:$8 sps:$4 sm:$0xff]  }
  0xbc   : > { %1704 = vmatprep.subr.bf16.mxu1 %v2337_v16  ;;  %v2371_v39 = vld [vmem:[%s2948_s13 + $0xe4] ss:$8 sps:$4 sm:$0xff]   ;;  %v2375_v41 = vld [vmem:[%s2948_s13 + $0xe0] ss:$8 sps:$4 sm:$0xff]   ;;  %v2377_v43 = vld [vmem:[%s2948_s13 + $0xd4] ss:$8 sps:$4 sm:$0xff]  }
  0xbd   : > { %v2373_v40 = vld [vmem:[%s2948_s13 + $0x1e4] ss:$8 sps:$4 sm:$0xff]   ;;  %v2376_v42 = vld [vmem:[%s2948_s13 + $0x1e0] ss:$8 sps:$4 sm:$0xff]   ;;  %v2379_v44 = vld [vmem:[%s2948_s13 + $0x1d4] ss:$8 sps:$4 sm:$0xff]  }
  0xbe   : > { %1664 = vmatpush1.bf16.msra.mxu0 %v2339_v17  ;;  %v2381_v45 = vld [vmem:[%s2948_s13 + $0xd0] ss:$8 sps:$4 sm:$0xff]   ;;  %v2383_v47 = vld [vmem:[%s2948_s13 + $0xc4] ss:$8 sps:$4 sm:$0xff]   ;;  %v2387_v52 = vld [vmem:[%s2948_s13 + $0xc0] ss:$8 sps:$4 sm:$0xff]  }
  0xbf   : > { %1705 = vmatpush1.bf16.msra.mxu1 %v2340_v18  ;;  %1665 = vmatprep.subr.bf16.mxu0 %v2341_v19  ;;  %v2382_v46 = vld [vmem:[%s2948_s13 + $0x1d0] ss:$8 sps:$4 sm:$0xff]   ;;  %v2385_v48 = vld [vmem:[%s2948_s13 + $0x1c4] ss:$8 sps:$4 sm:$0xff]   ;;  %v2388_v53 = vld [vmem:[%s2948_s13 + $0x1c0] ss:$8 sps:$4 sm:$0xff]  }
  0xc0   : > { %1706 = vmatprep.subr.bf16.mxu1 %v2343_v20  ;;  %v857_v49 = vld [vmem:[%s2930_s30] sm:$0xff]  ;;  %v858_v51 = vld [vmem:[%s2930_s30 + $0x8] sm:$0xff]  ;;  %v2399_v61 = vld [vmem:[%s2948_s13 + $0xa0] ss:$8 sps:$4 sm:$0xff]   ;;  %p1825_p0 = scmp.eq.s32.totalorder %s2555_s17, 7  ;;  %p2249_p1 = scmp.ne.s32.totalorder %s2555_s17, 7 }
  0xc1   : > { %v2114_v50 = vcombine.high %v857_v49, %v857_v49  ;;  %v2116_v54 = vcombine.high %v858_v51, %v858_v51  ;;  %v2389_v55 = vld [vmem:[%s2948_s13 + $0xb4] ss:$8 sps:$4 sm:$0xff]   ;;  %v2393_v57 = vld [vmem:[%s2948_s13 + $0xb0] ss:$8 sps:$4 sm:$0xff]   ;;  %v2395_v59 = vld [vmem:[%s2948_s13 + $0xa4] ss:$8 sps:$4 sm:$0xff]   ;;  %v2113_v9 = vcombine.low %v857_v49, %v857_v49  ;;  %v2115_v10 = vcombine.low %v858_v51, %v858_v51 }
  0xc2   : > { %1666 = vmatpush1.bf16.msra.mxu0 %v2345_v21  ;;  %v2391_v56 = vld [vmem:[%s2948_s13 + $0x1b4] ss:$8 sps:$4 sm:$0xff]   ;;  %v2394_v58 = vld [vmem:[%s2948_s13 + $0x1b0] ss:$8 sps:$4 sm:$0xff]   ;;  %v2397_v60 = vld [vmem:[%s2948_s13 + $0x1a4] ss:$8 sps:$4 sm:$0xff]  }
  0xc3   : > { %1707 = vmatpush1.bf16.msra.mxu1 %v2346_v22  ;;  %1667 = vmatprep.subr.bf16.mxu0 %v2347_v23  ;;  %v2400_v62 = vld [vmem:[%s2948_s13 + $0x1a0] ss:$8 sps:$4 sm:$0xff]   ;;  %v2401_v63 = vld [vmem:[%s2948_s13 + $0x94] ss:$8 sps:$4 sm:$0xff]   ;;  %v2405_v1 = vld [vmem:[%s2948_s13 + $0x90] ss:$8 sps:$4 sm:$0xff]  }
  0xc4   : > { %1708 = vmatprep.subr.bf16.mxu1 %v2349_v24  ;;  %1689 = vmatprep.mubr.bf16.mxu0 %v2114_v50  ;;  %v2403_v0 = vld [vmem:[%s2948_s13 + $0x194] ss:$8 sps:$4 sm:$0xff]   ;;  %v2406_v2 = vld [vmem:[%s2948_s13 + $0x190] ss:$8 sps:$4 sm:$0xff]   ;;  %v2407_v3 = vld [vmem:[%s2948_s13 + $0x84] ss:$8 sps:$4 sm:$0xff]  }
  0xc5   : > { %1730 = vmatprep.mubr.bf16.mxu1 %v2116_v54  ;;  %v2409_v4 = vld [vmem:[%s2948_s13 + $0x184] ss:$8 sps:$4 sm:$0xff]   ;;  %v2411_v5 = vld [vmem:[%s2948_s13 + $0x80] ss:$8 sps:$4 sm:$0xff]   ;;  %v2419_v7 = vld [vmem:[%s2948_s13 + $0x274] ss:$8 sps:$4 sm:$0xff]  }
  0xc6   : > { %1668 = vmatpush1.bf16.msra.mxu0 %v2351_v25  ;;  %v2412_v6 = vld [vmem:[%s2948_s13 + $0x180] ss:$8 sps:$4 sm:$0xff]   ;;  %v2422_v8 = vld [vmem:[%s2948_s13 + $0x374] ss:$8 sps:$4 sm:$0xff]   ;;  %v2417_v11 = vld [vmem:[%s2948_s13 + $0x270] ss:$8 sps:$4 sm:$0xff]  }
  0xc7   : > { %1709 = vmatpush1.bf16.msra.mxu1 %v2352_v26  ;;  %1669 = vmatprep.subr.bf16.mxu0 %v2353_v27  ;;  %v2420_v12 = vld [vmem:[%s2948_s13 + $0x370] ss:$8 sps:$4 sm:$0xff]   ;;  %v2425_v13 = vld [vmem:[%s2948_s13 + $0x264] ss:$8 sps:$4 sm:$0xff]   ;;  %v2423_v15 = vld [vmem:[%s2948_s13 + $0x260] ss:$8 sps:$4 sm:$0xff]  }
  0xc8   : > { %1710 = vmatprep.subr.bf16.mxu1 %v2355_v28  ;;  %v2428_v14 = vld [vmem:[%s2948_s13 + $0x364] ss:$8 sps:$4 sm:$0xff]   ;;  %v2426_v16 = vld [vmem:[%s2948_s13 + $0x360] ss:$8 sps:$4 sm:$0xff]   ;;  %v2431_v17 = vld [vmem:[%s2948_s13 + $0x254] ss:$8 sps:$4 sm:$0xff]  }
  0xc9   : > { %v2434_v18 = vld [vmem:[%s2948_s13 + $0x354] ss:$8 sps:$4 sm:$0xff]   ;;  %v2429_v19 = vld [vmem:[%s2948_s13 + $0x250] ss:$8 sps:$4 sm:$0xff]   ;;  %v2437_v21 = vld [vmem:[%s2948_s13 + $0x244] ss:$8 sps:$4 sm:$0xff]  }
  0xca   : > { %1670 = vmatpush1.bf16.msra.mxu0 %v2357_v29  ;;  %v2432_v20 = vld [vmem:[%s2948_s13 + $0x350] ss:$8 sps:$4 sm:$0xff]   ;;  %v2440_v22 = vld [vmem:[%s2948_s13 + $0x344] ss:$8 sps:$4 sm:$0xff]   ;;  %v2435_v23 = vld [vmem:[%s2948_s13 + $0x240] ss:$8 sps:$4 sm:$0xff]  }
  0xcb   : > { %1711 = vmatpush1.bf16.msra.mxu1 %v2358_v30  ;;  %1671 = vmatprep.subr.bf16.mxu0 %v2359_v31  ;;  %v2438_v24 = vld [vmem:[%s2948_s13 + $0x340] ss:$8 sps:$4 sm:$0xff]   ;;  %v2443_v25 = vld [vmem:[%s2948_s13 + $0x234] ss:$8 sps:$4 sm:$0xff]   ;;  %v2441_v27 = vld [vmem:[%s2948_s13 + $0x230] ss:$8 sps:$4 sm:$0xff]  }
  0xcc   : > { %1712 = vmatprep.subr.bf16.mxu1 %v2361_v32  ;;  %v2446_v26 = vld [vmem:[%s2948_s13 + $0x334] ss:$8 sps:$4 sm:$0xff]   ;;  %v2444_v28 = vld [vmem:[%s2948_s13 + $0x330] ss:$8 sps:$4 sm:$0xff]   ;;  %v2449_v29 = vld [vmem:[%s2948_s13 + $0x224] ss:$8 sps:$4 sm:$0xff]  }
  0xcd   : > { %v2452_v30 = vld [vmem:[%s2948_s13 + $0x324] ss:$8 sps:$4 sm:$0xff]   ;;  %v2447_v31 = vld [vmem:[%s2948_s13 + $0x220] ss:$8 sps:$4 sm:$0xff]   ;;  %v2482_v54 = vld [vmem:[%s2948_s13 + $0x3d4] ss:$8 sps:$4 sm:$0xff]  }
  0xce   : > { %1672 = vmatpush1.bf16.msra.mxu0 %v2363_v33  ;;  %v2450_v32 = vld [vmem:[%s2948_s13 + $0x320] ss:$8 sps:$4 sm:$0xff]   ;;  %v2455_v33 = vld [vmem:[%s2948_s13 + $0x214] ss:$8 sps:$4 sm:$0xff]   ;;  %v2473_v49 = vld [vmem:[%s2948_s13 + $0x2e4] ss:$8 sps:$4 sm:$0xff]  }
  0xcf   : > { %1713 = vmatpush1.bf16.msra.mxu1 %v2364_v34  ;;  %1673 = vmatprep.subr.bf16.mxu0 %v2365_v35  ;;  %v2458_v34 = vld [vmem:[%s2948_s13 + $0x314] ss:$8 sps:$4 sm:$0xff]   ;;  %v2476_v50 = vld [vmem:[%s2948_s13 + $0x3e4] ss:$8 sps:$4 sm:$0xff]   ;;  %v2471_v51 = vld [vmem:[%s2948_s13 + $0x2e0] ss:$8 sps:$4 sm:$0xff]  }
  0xd0   : > { %1714 = vmatprep.subr.bf16.mxu1 %v2367_v36  ;;  %v3046_v35 = vld [vmem:[%s2930_s30 + $0x10] sm:$0xff]  ;;  %v3049_v36 = vld [vmem:[%s2930_s30 + $0x18] sm:$0xff] }
  0xd2   : > { %1674 = vmatpush2.bf16.msra.mxu0 %v2369_v37  ;;  %v2118_v37 = vcombine.high %v3046_v35, %v3046_v35 }
  0xd3   : > { %1715 = vmatpush2.bf16.msra.mxu1 %v2370_v38  ;;  %1675 = vmatprep.subr.bf16.mxu0 %v2371_v39  ;;  %v2120_v38 = vcombine.high %v3049_v36, %v3049_v36  ;;  %v2453_v39 = vld [vmem:[%s2948_s13 + $0x210] ss:$8 sps:$4 sm:$0xff]  }
  0xd4   : > { %1716 = vmatprep.subr.bf16.mxu1 %v2373_v40  ;;  %v2456_v40 = vld [vmem:[%s2948_s13 + $0x310] ss:$8 sps:$4 sm:$0xff]  }
  0xd6   : > { %1676 = vmatpush2.bf16.msra.mxu0 %v2375_v41  ;;  %v2461_v41 = vld [vmem:[%s2948_s13 + $0x204] ss:$8 sps:$4 sm:$0xff]  }
  0xd7   : > { %1717 = vmatpush2.bf16.msra.mxu1 %v2376_v42  ;;  %1677 = vmatprep.subr.bf16.mxu0 %v2377_v43  ;;  %v2464_v42 = vld [vmem:[%s2948_s13 + $0x304] ss:$8 sps:$4 sm:$0xff]   ;;  %v2459_v43 = vld [vmem:[%s2948_s13 + $0x200] ss:$8 sps:$4 sm:$0xff]  }
  0xd8   : > { %1718 = vmatprep.subr.bf16.mxu1 %v2379_v44  ;;  %v2462_v44 = vld [vmem:[%s2948_s13 + $0x300] ss:$8 sps:$4 sm:$0xff]  }
  0xda   : > { %1678 = vmatpush2.bf16.msra.mxu0 %v2381_v45  ;;  %v2467_v45 = vld [vmem:[%s2948_s13 + $0x2f4] ss:$8 sps:$4 sm:$0xff]  }
  0xdb   : > { %1719 = vmatpush2.bf16.msra.mxu1 %v2382_v46  ;;  %1679 = vmatprep.subr.bf16.mxu0 %v2383_v47  ;;  %v2470_v46 = vld [vmem:[%s2948_s13 + $0x3f4] ss:$8 sps:$4 sm:$0xff]   ;;  %v2465_v47 = vld [vmem:[%s2948_s13 + $0x2f0] ss:$8 sps:$4 sm:$0xff]  }
  0xdc   : > { %1720 = vmatprep.subr.bf16.mxu1 %v2385_v48  ;;  %v2468_v48 = vld [vmem:[%s2948_s13 + $0x3f0] ss:$8 sps:$4 sm:$0xff]  }
  0xde   : > { %1680 = vmatpush2.bf16.msra.mxu0 %v2387_v52  ;;  %v2474_v52 = vld [vmem:[%s2948_s13 + $0x3e0] ss:$8 sps:$4 sm:$0xff]  }
  0xdf   : > { %1721 = vmatpush2.bf16.msra.mxu1 %v2388_v53  ;;  %1681 = vmatprep.subr.bf16.mxu0 %v2389_v55  ;;  %v2479_v53 = vld [vmem:[%s2948_s13 + $0x2d4] ss:$8 sps:$4 sm:$0xff]   ;;  %v2477_v55 = vld [vmem:[%s2948_s13 + $0x2d0] ss:$8 sps:$4 sm:$0xff]  }
  0xe0   : > { %1722 = vmatprep.subr.bf16.mxu1 %v2391_v56  ;;  %v2480_v56 = vld [vmem:[%s2948_s13 + $0x3d0] ss:$8 sps:$4 sm:$0xff]  }
  0xe2   : > { %1682 = vmatpush2.bf16.msra.mxu0 %v2393_v57  ;;  %v2485_v57 = vld [vmem:[%s2948_s13 + $0x2c4] ss:$8 sps:$4 sm:$0xff]  }
  0xe3   : > { %1723 = vmatpush2.bf16.msra.mxu1 %v2394_v58  ;;  %1683 = vmatprep.subr.bf16.mxu0 %v2395_v59  ;;  %v2488_v58 = vld [vmem:[%s2948_s13 + $0x3c4] ss:$8 sps:$4 sm:$0xff]   ;;  %v2483_v59 = vld [vmem:[%s2948_s13 + $0x2c0] ss:$8 sps:$4 sm:$0xff]  }
  0xe4   : > { %1724 = vmatprep.subr.bf16.mxu1 %v2397_v60  ;;  %v2486_v60 = vld [vmem:[%s2948_s13 + $0x3c0] ss:$8 sps:$4 sm:$0xff]  }
  0xe6   : > { %1684 = vmatpush2.bf16.msra.mxu0 %v2399_v61  ;;  %v2491_v61 = vld [vmem:[%s2948_s13 + $0x2b4] ss:$8 sps:$4 sm:$0xff]  }
  0xe7   : > { %1725 = vmatpush2.bf16.msra.mxu1 %v2400_v62  ;;  %1685 = vmatprep.subr.bf16.mxu0 %v2401_v63  ;;  %v2494_v62 = vld [vmem:[%s2948_s13 + $0x3b4] ss:$8 sps:$4 sm:$0xff]   ;;  %v2489_v63 = vld [vmem:[%s2948_s13 + $0x2b0] ss:$8 sps:$4 sm:$0xff]  }
  0xe8   : > { %1726 = vmatprep.subr.bf16.mxu1 %v2403_v0  ;;  %v2492_v0 = vld [vmem:[%s2948_s13 + $0x3b0] ss:$8 sps:$4 sm:$0xff]  }
  0xea   : > { %1686 = vmatpush2.bf16.msra.mxu0 %v2405_v1  ;;  %v2497_v1 = vld [vmem:[%s2948_s13 + $0x2a4] ss:$8 sps:$4 sm:$0xff]  }
  0xeb   : > { %1727 = vmatpush2.bf16.msra.mxu1 %v2406_v2  ;;  %1687 = vmatprep.subr.bf16.mxu0 %v2407_v3  ;;  %v2500_v2 = vld [vmem:[%s2948_s13 + $0x3a4] ss:$8 sps:$4 sm:$0xff]   ;;  %v2495_v3 = vld [vmem:[%s2948_s13 + $0x2a0] ss:$8 sps:$4 sm:$0xff]  }
  0xec   : > { %1728 = vmatprep.subr.bf16.mxu1 %v2409_v4  ;;  %v2498_v4 = vld [vmem:[%s2948_s13 + $0x3a0] ss:$8 sps:$4 sm:$0xff]  }
  0xee   : > { %1688 = vmatpush2.bf16.msra.mxu0 %v2411_v5  ;;  %v2503_v5 = vld [vmem:[%s2948_s13 + $0x294] ss:$8 sps:$4 sm:$0xff]  }
  0xef   : > { %1729 = vmatpush2.bf16.msra.mxu1 %v2412_v6  ;;  %1739 = vmatprep.subr.bf16.mxu0 %v2419_v7  ;;  %v2506_v6 = vld [vmem:[%s2948_s13 + $0x394] ss:$8 sps:$4 sm:$0xff]   ;;  %v2501_v7 = vld [vmem:[%s2948_s13 + $0x290] ss:$8 sps:$4 sm:$0xff]  }
  0xf0   : > { %1780 = vmatprep.subr.bf16.mxu1 %v2422_v8  ;;  %v2504_v8 = vld [vmem:[%s2948_s13 + $0x390] ss:$8 sps:$4 sm:$0xff]  }
  0xf1   : > { %1690 = vmatmul.mubr.bf16.vlgmr.msra.gmra.mxu0 %v2113_v9  ;;  %v2509_v9 = vld [vmem:[%s2948_s13 + $0x284] ss:$8 sps:$4 sm:$0xff]  }
  0xf2   : > { %1731 = vmatmul.mubr.bf16.vlgmr.msra.gmra.mxu1 %v2115_v10  ;;  %1740 = vmatpush1.bf16.msra.mxu0 %v2417_v11  ;;  %v2512_v10 = vld [vmem:[%s2948_s13 + $0x384] ss:$8 sps:$4 sm:$0xff]   ;;  %v2507_v11 = vld [vmem:[%s2948_s13 + $0x280] ss:$8 sps:$4 sm:$0xff]  }
  0xf3   : > { %1781 = vmatpush1.bf16.msra.mxu1 %v2420_v12  ;;  %1741 = vmatprep.subr.bf16.mxu0 %v2425_v13  ;;  %v2510_v12 = vld [vmem:[%s2948_s13 + $0x380] ss:$8 sps:$4 sm:$0xff]   ;;  %v2117_v13 = vcombine.low %v3046_v35, %v3046_v35 }
  0xf4   : > { %1782 = vmatprep.subr.bf16.mxu1 %v2428_v14  ;;  %1771 = vmatprep.mubr.bf16.mxu0 %v2118_v37  ;;  %v2119_v14 = vcombine.low %v3049_v36, %v3049_v36 }
  0xf5   : > { %1812 = vmatprep.mubr.bf16.mxu1 %v2120_v38 }
  0xf6   : > { %1742 = vmatpush1.bf16.msra.mxu0 %v2423_v15 }
  0xf7   : > { %1783 = vmatpush1.bf16.msra.mxu1 %v2426_v16  ;;  %1743 = vmatprep.subr.bf16.mxu0 %v2431_v17 }
  0xf8   : > { %1784 = vmatprep.subr.bf16.mxu1 %v2434_v18 }
  0xfa   : > { %1744 = vmatpush1.bf16.msra.mxu0 %v2429_v19 }
  0xfb   : > { %1785 = vmatpush1.bf16.msra.mxu1 %v2432_v20  ;;  %1745 = vmatprep.subr.bf16.mxu0 %v2437_v21 }
  0xfc   : > { %1786 = vmatprep.subr.bf16.mxu1 %v2440_v22 }
  0xfe   : > { %1746 = vmatpush1.bf16.msra.mxu0 %v2435_v23 }
  0xff   : > { %1787 = vmatpush1.bf16.msra.mxu1 %v2438_v24  ;;  %1747 = vmatprep.subr.bf16.mxu0 %v2443_v25 }
 0x100   : > { %1788 = vmatprep.subr.bf16.mxu1 %v2446_v26 }
 0x102   : > { %1748 = vmatpush1.bf16.msra.mxu0 %v2441_v27 }
 0x103   : > { %1789 = vmatpush1.bf16.msra.mxu1 %v2444_v28  ;;  %1749 = vmatprep.subr.bf16.mxu0 %v2449_v29  ;;  %v855_v28 = vld [vmem:[#allocation2] sm:$0xff] }
 0x104   : > { %1790 = vmatprep.subr.bf16.mxu1 %v2452_v30 }
 0x106   : > { %1750 = vmatpush1.bf16.msra.mxu0 %v2447_v31 }
 0x107   : > { %1791 = vmatpush1.bf16.msra.mxu1 %v2450_v32  ;;  %1751 = vmatprep.subr.bf16.mxu0 %v2455_v33  ;;  %v856_v33 = vld [vmem:[#allocation2 + $0x8] sm:$0xff] }
 0x108   : > { %1792 = vmatprep.subr.bf16.mxu1 %v2458_v34 }
 0x10a   : > { %1752 = vmatpush1.bf16.msra.mxu0 %v2453_v39 }
 0x10b   : > { %1793 = vmatpush1.bf16.msra.mxu1 %v2456_v40  ;;  %1753 = vmatprep.subr.bf16.mxu0 %v2461_v41 }
 0x10c   : > { %1794 = vmatprep.subr.bf16.mxu1 %v2464_v42 }
 0x10e   : > { %1754 = vmatpush1.bf16.msra.mxu0 %v2459_v43 }
 0x10f   : > { %1795 = vmatpush1.bf16.msra.mxu1 %v2462_v44  ;;  %1755 = vmatprep.subr.bf16.mxu0 %v2467_v45 }
 0x110   : > { %1796 = vmatprep.subr.bf16.mxu1 %v2470_v46 }
 0x112   : > { %1756 = vmatpush2.bf16.msra.mxu0 %v2465_v47 }
 0x113   : > { %1797 = vmatpush2.bf16.msra.mxu1 %v2468_v48  ;;  %1757 = vmatprep.subr.bf16.mxu0 %v2473_v49 }
 0x114   : > { %1798 = vmatprep.subr.bf16.mxu1 %v2476_v50 }
 0x116   : > { %1758 = vmatpush2.bf16.msra.mxu0 %v2471_v51 }
 0x117   : > { %1799 = vmatpush2.bf16.msra.mxu1 %v2474_v52  ;;  %1759 = vmatprep.subr.bf16.mxu0 %v2479_v53 }
 0x118   : > { %1800 = vmatprep.subr.bf16.mxu1 %v2482_v54 }
 0x11a   : > { %1760 = vmatpush2.bf16.msra.mxu0 %v2477_v55 }
 0x11b   : > { %1801 = vmatpush2.bf16.msra.mxu1 %v2480_v56  ;;  %1761 = vmatprep.subr.bf16.mxu0 %v2485_v57 }
 0x11c   : > { %1802 = vmatprep.subr.bf16.mxu1 %v2488_v58 }
 0x11e   : > { %1762 = vmatpush2.bf16.msra.mxu0 %v2483_v59 }
 0x11f   : > { %1803 = vmatpush2.bf16.msra.mxu1 %v2486_v60  ;;  %1763 = vmatprep.subr.bf16.mxu0 %v2491_v61 }
 0x120   : > { %1804 = vmatprep.subr.bf16.mxu1 %v2494_v62 }
 0x122   : > { %1764 = vmatpush2.bf16.msra.mxu0 %v2489_v63 }
 0x123   : > { %1805 = vmatpush2.bf16.msra.mxu1 %v2492_v0  ;;  %1765 = vmatprep.subr.bf16.mxu0 %v2497_v1 }
 0x124   : > { %1806 = vmatprep.subr.bf16.mxu1 %v2500_v2 }
 0x126   : > { %1766 = vmatpush2.bf16.msra.mxu0 %v2495_v3 }
 0x127   : > { %1807 = vmatpush2.bf16.msra.mxu1 %v2498_v4  ;;  %1767 = vmatprep.subr.bf16.mxu0 %v2503_v5 }
 0x128   : > { %1808 = vmatprep.subr.bf16.mxu1 %v2506_v6 }
 0x12a   : > { %1768 = vmatpush2.bf16.msra.mxu0 %v2501_v7 }
 0x12b   : > { %1809 = vmatpush2.bf16.msra.mxu1 %v2504_v8  ;;  %1769 = vmatprep.subr.bf16.mxu0 %v2509_v9 }
 0x12c   : > { %1810 = vmatprep.subr.bf16.mxu1 %v2512_v10 }
 0x12e   : > { %1770 = vmatpush2.bf16.msra.mxu0 %v2507_v11 }
 0x12f   : > { %1811 = vmatpush2.bf16.msra.mxu1 %v2510_v12 }
 0x131   : > { %1772 = vmatmul.mubr.bf16.vlgmr.msra.gmra.mxu0 %v2117_v13 }
 0x132   : > { %1813 = vmatmul.mubr.bf16.vlgmr.msra.gmra.mxu1 %v2119_v14 }
 0x1b1   : > { %v1691_v15 = vpop.f32.mrf.mxu0 }
 0x1b2   : > { %v1732_v16 = vpop.f32.mrf.mxu1 }
 0x1b3   : > { %v1693_v17 = vpop.f32.mrf.mxu0  ;;  %v1733_v23 = vadd.f32 %v1732_v16, %v1691_v15 }
 0x1b4   : > { %v1734_v18 = vpop.f32.mrf.mxu1 }
 0x1b5   : > { %v1695_v19 = vpop.f32.mrf.mxu0  ;;  %v1735_v26 = vadd.f32 %v1734_v18, %v1693_v17 }
 0x1b6   : > { %v1736_v20 = vpop.f32.mrf.mxu1 }
 0x1b7   : > { %v1696_v21 = vpop.f32.mrf.mxu0 }
 0x1b8   : > { %v1737_v22 = vpop.f32.mrf.mxu1 }
 0x1f1   : > { %v1773_v24 = vpop.f32.mrf.mxu0 }
 0x1f2   : > { %v1814_v25 = vpop.f32.mrf.mxu1  ;;  %v1774_v27 = vadd.f32 %v1773_v24, %v1733_v23 }
 0x1f3   : > { %v1775_v29 = vpop.f32.mrf.mxu0 }
 0x1f4   : > { %v1816_v30 = vpop.f32.mrf.mxu1  ;;  %v1815_v31 = vadd.f32 %v1814_v25, %v1774_v27  ;;  %v1776_v32 = vadd.f32 %v1775_v29, %v1735_v26 }
 0x1f5   : > { %v1777_v34 = vpop.f32.mrf.mxu0 }
 0x1f6   : > { %v1818_v35 = vpop.f32.mrf.mxu1  ;;  %v1821_v36 = vadd.f32 %v1815_v31, %v855_v28  ;;  %v1817_v37 = vadd.f32 %v1816_v30, %v1776_v32  ;;  %1828 = sbr.rel (%p2249_p1) target bundleno = 537 (0x219), region = 78 }
 0x1f7   : > { %v1778_v38 = vpop.f32.mrf.mxu0 }
 0x1f8   : > { %v1819_v39 = vpop.f32.mrf.mxu1  ;;  %1823 = vst [vmem:[#allocation2] sm:$0xff] %v1821_v36  ;;  %v1822_v40 = vadd.f32 %v1817_v37, %v856_v33 }
 0x1fa   : > { %1824 = vst [vmem:[#allocation2 + $0x8] sm:$0xff] %v1822_v40 }
 0x1fb   : > { %v1859_v48 = vlaneseq  ;;  %v2575_v52 = vmov 1966171168   ;;  %v1840_v14 = vld [vmem:[#allocation3] sm:$0x3]  ;;  %v1877_v19 = vld [vmem:[#allocation4] sm:$0x3] }
 0x1fc   : > { %v1857_v53 = vunpack.c.l.s4 %v2575_v52 }
 0x1fd   : > { %v1860_v59 = vshrl.u32 %v1859_v48, 7  ;;  %vm1874_vm1 = vcmp.lt.s32.totalorder %v1859_v48, 256 }
 0x1fe   : > { %v1858_v63 = vunpack.c.0.s8 %v1857_v53 }
 0x1ff   : > { %v1829_v41 = vld [vmem:[#allocation2] sm:$0xff] }
 0x200   : > { %v1841_v44 = vrot.slane %v1829_v41, 4  ;;  %v1878_v46 = vmul.f32 %v1829_v41, %v1829_v41  ;;  %v1861_v7 = vsub.s32 %v1858_v63, %v1860_v59 }
 0x201   : > { %v1830_v42 = vld [vmem:[#allocation2 + $0x8] sm:$0xff] }
 0x202   : > { %v2256_v43 = vpack.c.bf16 %v1830_v42, %v1829_v41  ;;  %v1847_v45 = vrot.slane %v1830_v42, 4  ;;  %v1879_v47 = vmul.f32 %v1830_v42, %v1830_v42  ;;  %v1842_v49 = vadd.f32 %v1841_v44, %v1829_v41 }
 0x203   : > { %v1880_v51 = vrot.slane %v1878_v46, 4 }
 0x204   : > { %1839 = vst [vmem:[%s2942_s9] sm:$0xff] %v2256_v43  ;;  %v1848_v50 = vadd.f32 %v1847_v45, %v1830_v42  ;;  %v1886_v54 = vrot.slane %v1879_v47, 4  ;;  %v1843_v55 = vrot.slane %v1842_v49, 2 }
 0x205   : > { %v1881_v57 = vadd.f32 %v1880_v51, %v1878_v46 }
 0x206   : > { %v1849_v56 = vrot.slane %v1848_v50, 2  ;;  %v1887_v58 = vadd.f32 %v1886_v54, %v1879_v47  ;;  %v1844_v60 = vadd.f32 %v1843_v55, %v1842_v49 }
 0x207   : > { %v1882_v62 = vrot.slane %v1881_v57, 2 }
 0x208   : > { %v1850_v61 = vadd.f32 %v1849_v56, %v1848_v50  ;;  %v1888_v0 = vrot.slane %v1887_v58, 2  ;;  %v1845_v1 = vrot.slane %v1844_v60, 1 }
 0x209   : > { %v1883_v3 = vadd.f32 %v1882_v62, %v1881_v57 }
 0x20a   : > { %v1851_v2 = vrot.slane %v1850_v61, 1  ;;  %v1889_v4 = vadd.f32 %v1888_v0, %v1887_v58  ;;  %v1846_v5 = vadd.f32 %v1845_v1, %v1844_v60 }
 0x20b   : > { %v1884_v8 = vrot.slane %v1883_v3, 1 }
 0x20c   : > { %v1852_v6 = vadd.f32 %v1851_v2, %v1850_v61  ;;  %v1890_v9 = vrot.slane %v1889_v4, 1 }
 0x20d   : > { %v1885_v11 = vadd.f32 %v1884_v8, %v1883_v3 }
 0x20e   : > { %v1855_v10 = vcombine.low %v1846_v5, %v1852_v6  ;;  %v1891_v12 = vadd.f32 %v1890_v9, %v1889_v4 }
 0x210   : > { %v1862_v13 = vrot.slane %v1855_v10, %v1861_v7  ;;  %v1894_v15 = vcombine.low %v1885_v11, %v1891_v12 }
 0x212   : > { %v1869_v16 = vrot.slane %v1862_v13, %v1861_v7  ;;  %v1901_v17 = vrot.slane %v1894_v15, %v1861_v7 }
 0x214   : > { %v1871_v18 = vadd.f32 %v1869_v16, %v1840_v14  ;;  %v1908_v20 = vrot.slane %v1901_v17, %v1861_v7 }
 0x216   : > { %1876 = vst.msk [vmem:[#allocation3] sm:$0x3] %vm1874_vm1, %v1871_v18  ;;  %v1910_v21 = vadd.f32 %v1908_v20, %v1877_v19 }
 0x218   : > { %1911 = vst.msk [vmem:[#allocation4] sm:$0x3] %vm1874_vm1, %v1910_v21 }
 0x219 PF: > { %1915 = sbr.rel (!%p1825_p0) target bundleno = 545 (0x221), region = 82  ;;  %v1917_v23 = vlaneseq (%p1825_p0) }
 0x21b   : > { %vm1919_vm2 = vcmp.lt.s32.totalorder (%p1825_p0), %v1917_v23, 256 }
 0x21d   : > { %v1916_v22 = vld [vmem:[#allocation3] sm:$0x3] (%p1825_p0) }
 0x21e   : > { %1921 = vst.msk [vmem:[%s831_s7] sm:$0x3] %vm1919_vm2, %v1916_v22 }
 0x21f   : > { %v1922_v24 = vld [vmem:[#allocation4] sm:$0x3] }
 0x220   : > { %1923 = vst.msk [vmem:[%s836_s12] sm:$0x3] %vm1919_vm2, %v1922_v24 }
 0x221 PF: > { %s15_s21 = sadd.s32 1, %s2571_s21   ;;  %s3138_s15 = smov %s2551_s16 }
 0x222   : > { %p12_p2 = scmp.ge.s32.totalorder %s15_s21, 34   ;;  %s3139_s16 = smov %s2652_s28 }
 0x223   : > { %s3140_s17 = smov %s2563_s19  ;;  %s3141_s18 = smov %s2567_s20 }
 0x224   : > { %s3142_s19 = smov %s3145_s22  ;;  %s3143_s20 = smov %s3149_s23 }
 0x225   :  { %14 = sbr.rel (!%p12_p2) target bundleno = 4 (0x4), region = 144 }

// kernel: critic_forward.15
= control target key start
LH: loop header
LB: loop body
LE: loop exit
PB: predicated region body
PF: predicated region fallthrough
CT: control target
= control target key end

     0   :  { %v28_v0 = vlaneseq  ;;  %s272_s0 = inlined_call_operand.vmem [shape: bf16[8,1024], index: 0, kind: input, shape index: {}]   ;;  %s273_s1 = inlined_call_operand.vmem [shape: f32[1,1024], index: 1, kind: input, shape index: {}]   ;;  %s274_s2 = inlined_call_operand.vmem [shape: f32[1,1024], index: 2, kind: input, shape index: {}]   ;;  %s275_s3 = inlined_call_operand.vmem [shape: bf16[8,1024], index: 3, kind: output, shape index: {}]  }
   0x1   :  { %v14_v1 = vld [vmem:[%s272_s0] sm:$0xff]  ;;  %v15_v5 = vld [vmem:[%s272_s0 + $0x8] sm:$0xff]  ;;  %v16_v6 = vld [vmem:[%s272_s0 + $0x10] sm:$0xff] }
   0x2   :  { %v18_v2 = vunpack.c.l.bf16 %v14_v1  ;;  %v19_v3 = vunpack.c.h.bf16 %v14_v1  ;;  %v221_v4 = vshrl.u32 %v28_v0, 7  ;;  %v232_v7 = vld [vmem:[%s272_s0 + $0x18] sm:$0xff]  ;;  %v26_v8 = vld [vmem:[%s273_s1] sm:$0xff]  ;;  %v20_v10 = vunpack.c.l.bf16 %v15_v5 }
   0x3   :  { %v240_v9 = vld [vmem:[%s274_s2] sm:$0xff]  ;;  %v21_v11 = vunpack.c.h.bf16 %v15_v5  ;;  %v22_v12 = vunpack.c.l.bf16 %v16_v6  ;;  %v23_v13 = vunpack.c.h.bf16 %v16_v6  ;;  %v24_v20 = vunpack.c.l.bf16 %v232_v7 }
   0x4   :  { %v30_v14 = vsub.s32 0, %v221_v4  ;;  %v34_v15 = vsub.s32 1, %v221_v4  ;;  %v38_v16 = vsub.s32 2, %v221_v4  ;;  %v42_v17 = vsub.s32 3, %v221_v4 }
   0x5   :  { %v46_v18 = vsub.s32 4, %v221_v4  ;;  %v50_v19 = vsub.s32 5, %v221_v4  ;;  %v25_v21 = vunpack.c.h.bf16 %v232_v7  ;;  %v54_v44 = vsub.s32 6, %v221_v4 }
   0x6   :  { %v31_v22 = vrot.slane %v26_v8, %v30_v14  ;;  %v35_v23 = vrot.slane %v26_v8, %v34_v15  ;;  %v81_v24 = vrot.slane %v240_v9, %v30_v14  ;;  %v85_v25 = vrot.slane %v240_v9, %v34_v15 }
   0x7   :  { %v39_v26 = vrot.slane %v26_v8, %v38_v16  ;;  %v43_v27 = vrot.slane %v26_v8, %v42_v17  ;;  %v89_v28 = vrot.slane %v240_v9, %v38_v16  ;;  %v93_v29 = vrot.slane %v240_v9, %v42_v17 }
   0x8   :  { %v68_v30 = vmul.f32 %v31_v22, %v18_v2  ;;  %v69_v31 = vmul.f32 %v35_v23, %v19_v3  ;;  %v47_v32 = vrot.slane %v26_v8, %v46_v18  ;;  %v51_v33 = vrot.slane %v26_v8, %v50_v19 }
   0x9   :  { %v70_v34 = vmul.f32 %v39_v26, %v20_v10  ;;  %v71_v35 = vmul.f32 %v43_v27, %v21_v11  ;;  %v97_v36 = vrot.slane %v240_v9, %v46_v18  ;;  %v101_v37 = vrot.slane %v240_v9, %v50_v19 }
   0xa   :  { %v118_v38 = vadd.f32 %v81_v24, %v68_v30  ;;  %v119_v39 = vadd.f32 %v85_v25, %v69_v31  ;;  %v72_v40 = vmul.f32 %v47_v32, %v22_v12  ;;  %v73_v41 = vmul.f32 %v51_v33, %v23_v13 }
   0xb   :  { %v120_v42 = vadd.f32 %v89_v28, %v70_v34  ;;  %v121_v43 = vadd.f32 %v93_v29, %v71_v35  ;;  %v58_v45 = vsub.s32 7, %v221_v4  ;;  %v55_v57 = vrot.slane %v26_v8, %v54_v44 }
   0xc   :  { %vm126_vm0 = vcmp.ge.f32.partialorder %v118_v38, 0.0  ;;  %vm127_vm1 = vcmp.ge.f32.partialorder %v119_v39, 0.0  ;;  %v134_v46 = vmul.f32 0.2, %v118_v38  ;;  %v135_v47 = vmul.f32 0.2, %v119_v39 }
   0xd   :  { %vm128_vm2 = vcmp.ge.f32.partialorder %v120_v42, 0.0  ;;  %vm129_vm3 = vcmp.ge.f32.partialorder %v121_v43, 0.0  ;;  %v136_v48 = vmul.f32 0.2, %v120_v42  ;;  %v137_v49 = vmul.f32 0.2, %v121_v43 }
   0xe   :  { %v142_v50 = vsel %vm126_vm0, %v118_v38, %v134_v46  ;;  %v143_v51 = vsel %vm127_vm1, %v119_v39, %v135_v47  ;;  %v122_v52 = vadd.f32 %v97_v36, %v72_v40  ;;  %v123_v53 = vadd.f32 %v101_v37, %v73_v41 }
   0xf   :  { %v194_v54 = vpack.c.bf16 %v143_v51, %v142_v50  ;;  %v144_v55 = vsel %vm128_vm2, %v120_v42, %v136_v48  ;;  %v145_v56 = vsel %vm129_vm3, %v121_v43, %v137_v49  ;;  %v59_v61 = vrot.slane %v26_v8, %v58_v45 }
  0x10   :  { %v195_v58 = vpack.c.bf16 %v145_v56, %v144_v55  ;;  %vm130_vm4 = vcmp.ge.f32.partialorder %v122_v52, 0.0  ;;  %vm131_vm5 = vcmp.ge.f32.partialorder %v123_v53, 0.0  ;;  %v138_v59 = vmul.f32 0.2, %v122_v52 }
  0x11   :  { %182 = vst [vmem:[%s275_s3] sm:$0xff] %v194_v54  ;;  %v139_v60 = vmul.f32 0.2, %v123_v53  ;;  %v74_v62 = vmul.f32 %v55_v57, %v24_v20  ;;  %v105_v63 = vrot.slane %v240_v9, %v54_v44  ;;  %v109_v1 = vrot.slane %v240_v9, %v58_v45 }
  0x12   :  { %183 = vst [vmem:[%s275_s3 + $0x8] sm:$0xff] %v195_v58  ;;  %v146_v0 = vsel %vm130_vm4, %v122_v52, %v138_v59  ;;  %v75_v3 = vmul.f32 %v59_v61, %v25_v21 }
  0x13   :  { %v147_v2 = vsel %vm131_vm5, %v123_v53, %v139_v60  ;;  %v124_v4 = vadd.f32 %v105_v63, %v74_v62 }
  0x14   :  { %v196_v5 = vpack.c.bf16 %v147_v2, %v146_v0  ;;  %v125_v6 = vadd.f32 %v109_v1, %v75_v3 }
  0x15   :  { %vm132_vm6 = vcmp.ge.f32.partialorder %v124_v4, 0.0  ;;  %v140_v7 = vmul.f32 0.2, %v124_v4 }
  0x16   :  { %184 = vst [vmem:[%s275_s3 + $0x10] sm:$0xff] %v196_v5  ;;  %vm133_vm7 = vcmp.ge.f32.partialorder %v125_v6, 0.0  ;;  %v141_v8 = vmul.f32 0.2, %v125_v6 }
  0x17   :  { %v148_v10 = vsel %vm132_vm6, %v124_v4, %v140_v7 }
  0x18   :  { %v149_v11 = vsel %vm133_vm7, %v125_v6, %v141_v8 }
  0x19   :  { %v197_v12 = vpack.c.bf16 %v149_v11, %v148_v10 }
  0x1b   :  { %185 = vst [vmem:[%s275_s3 + $0x18] sm:$0xff] %v197_v12 }

</bundles_post_ra>
